<compile_context>
chip_gen: v5e
topology: v5e:2x2
jax: 0.10.0
libtpu: 0.0.40
codegen_flags: <defaults>
</compile_context>

<pallas_src>
import functools

import jax
import jax.numpy as jnp
from jax import lax
from jax.experimental import pallas as pl
from jax.experimental.pallas import tpu as pltpu


_COMPUTE_DT = jnp.bfloat16     # MXU operand dtype (f32 accumulation)
_MAX_BAND_M = 128              # max live rows of the (H*W, Cout) accumulator


def _band_rows(ho, wo, max_m=_MAX_BAND_M):
    """Largest divisor of `ho` such that band_rows * wo <= max_m (>= 1)."""
    th = max(1, min(ho, max_m // max(wo, 1)))
    while ho % th != 0:
        th -= 1
    return th


# ----------------------------------------------------------------------------
# Fused BasicBlock kernel (one grid step per batch element)
# ----------------------------------------------------------------------------
def _basic_block_kernel(x_ref, w1_ref, w2_ref, s1_ref, b1_ref, s2_ref, b2_ref,
                        *rest, stride, has_res_input):
    if has_res_input:
        res_ref, out_ref, xpad, p1, midpad, p2 = rest
    else:
        out_ref, xpad, p1, midpad, p2 = rest

    _, H, W, Cin = x_ref.shape
    _, Ho, Wo, Co = out_ref.shape

    # ---- conv1 input: zero-pad (pad=1) into a VMEM scratch -------------------
    xpad[...] = jnp.zeros_like(xpad)
    xpad[1:H + 1, 1:W + 1, :] = x_ref[0].astype(_COMPUTE_DT)

    # ---- im2col: pack the 9 shifted windows along K = 9*Cin ------------------
    for kh in range(3):
        for kw in range(3):
            if stride == 1:
                win = xpad[kh:kh + Ho, kw:kw + Wo, :]
            else:
                # TODO(synk): strided taps (downsampling conv1) are not exercised
                # by the demo; an even/odd pre-split would avoid strided reads.
                win = xpad[pl.ds(kh, Ho, stride), pl.ds(kw, Wo, stride), :]
            c0 = (kh * 3 + kw) * Cin
            p1[:, c0:c0 + Cin] = win.reshape(Ho * Wo, Cin)

    # ---- conv1 + BN1 + ReLU, banded; result written into padded VMEM scratch -
    midpad[...] = jnp.zeros_like(midpad)
    th = _band_rows(Ho, Wo)
    for r0 in range(0, Ho, th):
        a = p1[r0 * Wo:(r0 + th) * Wo, :]
        acc = jnp.dot(a, w1_ref[...], preferred_element_type=jnp.float32)
        y = jnp.maximum(acc * s1_ref[...] + b1_ref[...], 0.0)
        midpad[1 + r0:1 + r0 + th, 1:Wo + 1, :] = (
            y.astype(_COMPUTE_DT).reshape(th, Wo, Co))

    # ---- conv2 im2col (always stride 1) --------------------------------------
    for kh in range(3):
        for kw in range(3):
            win = midpad[kh:kh + Ho, kw:kw + Wo, :]
            c0 = (kh * 3 + kw) * Co
            p2[:, c0:c0 + Co] = win.reshape(Ho * Wo, Co)

    # ---- conv2 + BN2 + shortcut add + ReLU, banded ---------------------------
    for r0 in range(0, Ho, th):
        a = p2[r0 * Wo:(r0 + th) * Wo, :]
        acc = jnp.dot(a, w2_ref[...], preferred_element_type=jnp.float32)
        y = acc * s2_ref[...] + b2_ref[...]
        if has_res_input:
            res = res_ref[:, r0:r0 + th, :, :]
        else:
            res = x_ref[:, r0:r0 + th, :, :]          # identity shortcut
        y = y + res.astype(jnp.float32).reshape(th * Wo, Co)
        y = jnp.maximum(y, 0.0)
        out_ref[:, r0:r0 + th, :, :] = (
            y.astype(out_ref.dtype).reshape(1, th, Wo, Co))


# ----------------------------------------------------------------------------
# BasicBlock forward (wrapper glue in plain JAX)
# ----------------------------------------------------------------------------
def _fold_bn(gamma, beta, mean, var, eps=1e-5):
    scale = gamma / jnp.sqrt(var + eps)
    bias = beta - mean * scale
    return scale, bias


def basic_block_forward(x_nchw, params, *, stride=1, option='A'):
    """Matches BasicBlock.forward (eval-mode BN). Input/output are NCHW."""
    x = jnp.transpose(x_nchw, (0, 2, 3, 1))               # NCHW -> NHWC
    N, H, W, Cin = x.shape
    Cout = params['w1'].shape[-1]
    Ho = (H + 2 - 3) // stride + 1
    Wo = (W + 2 - 3) // stride + 1

    s1, b1 = _fold_bn(params['bn1_gamma'], params['bn1_beta'],
                      params['bn1_mean'], params['bn1_var'])
    s2, b2 = _fold_bn(params['bn2_gamma'], params['bn2_beta'],
                      params['bn2_mean'], params['bn2_var'])
    s1 = s1.reshape(1, Cout).astype(jnp.float32)
    b1 = b1.reshape(1, Cout).astype(jnp.float32)
    s2 = s2.reshape(1, Cout).astype(jnp.float32)
    b2 = b2.reshape(1, Cout).astype(jnp.float32)

    # bf16 MXU operands, pre-cast once in the wrapper.
    xb = x.astype(_COMPUTE_DT)
    w1 = params['w1'].reshape(9 * Cin, Cout).astype(_COMPUTE_DT)   # (kh,kw,cin)
    w2 = params['w2'].reshape(9 * Cout, Cout).astype(_COMPUTE_DT)

    identity = (stride == 1 and Cin == Cout)
    args = [xb, w1, w2, s1, b1, s2, b2]
    in_specs = [
        pl.BlockSpec((1, H, W, Cin), lambda n: (n, 0, 0, 0)),
        pl.BlockSpec((9 * Cin, Cout), lambda n: (0, 0)),
        pl.BlockSpec((9 * Cout, Cout), lambda n: (0, 0)),
        pl.BlockSpec((1, Cout), lambda n: (0, 0)),
        pl.BlockSpec((1, Cout), lambda n: (0, 0)),
        pl.BlockSpec((1, Cout), lambda n: (0, 0)),
        pl.BlockSpec((1, Cout), lambda n: (0, 0)),
    ]
    if not identity:
        if option == 'A':
            sc = x[:, ::2, ::2, :]                         # spatial subsample
            pad = Cout // 4
            sc = jnp.pad(sc, ((0, 0), (0, 0), (0, 0), (pad, pad)))
            sc = sc.astype(_COMPUTE_DT)
        else:
            # TODO(synk): option 'B' (1x1 conv + BN shortcut) not implemented.
            raise NotImplementedError("option B shortcut")
        args.append(sc)
        in_specs.append(pl.BlockSpec((1, Ho, Wo, Cout), lambda n: (n, 0, 0, 0)))

    flops = int(2 * N * Ho * Wo * 9 * (Cin * Cout + Cout * Cout))
    bytes_accessed = int(sum(int(a.size) * a.dtype.itemsize for a in args)
                         + N * Ho * Wo * Cout * x_nchw.dtype.itemsize)

    kernel = functools.partial(_basic_block_kernel, stride=stride,
                               has_res_input=not identity)

    out = pl.pallas_call(
        kernel,
        out_shape=jax.ShapeDtypeStruct((N, Ho, Wo, Cout), x_nchw.dtype),
        grid=(N,),
        in_specs=in_specs,
        out_specs=pl.BlockSpec((1, Ho, Wo, Cout), lambda n: (n, 0, 0, 0)),
        scratch_shapes=[
            pltpu.VMEM((H + 2, W + 2, Cin), _COMPUTE_DT),      # padded conv1 in
            pltpu.VMEM((Ho * Wo, 9 * Cin), _COMPUTE_DT),       # conv1 patches
            pltpu.VMEM((Ho + 2, Wo + 2, Cout), _COMPUTE_DT),   # padded conv1 out
            pltpu.VMEM((Ho * Wo, 9 * Cout), _COMPUTE_DT),      # conv2 patches
        ],
        compiler_params=pltpu.CompilerParams(
            dimension_semantics=("parallel",)),
        cost_estimate=pl.CostEstimate(
            flops=flops, transcendentals=0, bytes_accessed=bytes_accessed),
    )(*args)
    return jnp.transpose(out, (0, 3, 1, 2))                # NHWC -> NCHW


# ----------------------------------------------------------------------------
# Pure-JAX f32 reference for correctness checking
# ----------------------------------------------------------------------------
def _reference(x_nchw, params, *, stride=1):
    x = jnp.transpose(x_nchw, (0, 2, 3, 1)).astype(jnp.float32)
    in_planes = x.shape[-1]
    planes = params['w1'].shape[-1]

    def conv(v, w, s):
        return lax.conv_general_dilated(
            v, w, window_strides=(s, s), padding=((1, 1), (1, 1)),
            dimension_numbers=('NHWC', 'HWIO', 'NHWC'))

    def bn(v, g, b, m, var, eps=1e-5):
        return (v - m) / jnp.sqrt(var + eps) * g + b

    out = jax.nn.relu(bn(conv(x, params['w1'], stride),
                         params['bn1_gamma'], params['bn1_beta'],
                         params['bn1_mean'], params['bn1_var']))
    out = bn(conv(out, params['w2'], 1),
             params['bn2_gamma'], params['bn2_beta'],
             params['bn2_mean'], params['bn2_var'])
    if stride != 1 or in_planes != planes:
        sc = x[:, ::2, ::2, :]
        pad = planes // 4
        sc = jnp.pad(sc, ((0, 0), (0, 0), (0, 0), (pad, pad)))
    else:
        sc = x
    out = jax.nn.relu(out + sc)
    return jnp.transpose(out, (0, 3, 1, 2))


# ----------------------------------------------------------------------------
# Deterministic parameter init + demo run
# ----------------------------------------------------------------------------
def make_params(key, in_planes, planes):
    ks = jax.random.split(key, 8)
    return {
        'w1': 0.1 * jax.random.normal(ks[0], (3, 3, in_planes, planes),
                                      jnp.float32),
        'w2': 0.1 * jax.random.normal(ks[1], (3, 3, planes, planes),
                                      jnp.float32),
        'bn1_gamma': 1.0 + 0.1 * jax.random.normal(ks[2], (planes,), jnp.float32),
        'bn1_beta': 0.1 * jax.random.normal(ks[3], (planes,), jnp.float32),
        'bn1_mean': 0.1 * jax.random.normal(ks[4], (planes,), jnp.float32),
        'bn1_var': jnp.abs(1.0 + 0.1 * jax.random.normal(ks[5], (planes,),
                                                         jnp.float32)),
        'bn2_gamma': 1.0 + 0.1 * jax.random.normal(ks[6], (planes,), jnp.float32),
        'bn2_beta': 0.1 * jax.random.normal(ks[7], (planes,), jnp.float32),
        'bn2_mean': jnp.zeros((planes,), jnp.float32),
        'bn2_var': jnp.ones((planes,), jnp.float32),
    }


if __name__ == "__main__":
    key = jax.random.PRNGKey(0)
    kx, kp = jax.random.split(key)

    N, C, H, W = 2, 16, 16, 16        # small NCHW input, in_planes == planes
    stride = 1
    x = jax.random.normal(kx, (N, C, H, W), jnp.float32)
    params = make_params(kp, in_planes=C, planes=C)

    out = basic_block_forward(x, params, stride=stride, option='A')
    out = jax.block_until_ready(out)

    ref = jax.block_until_ready(_reference(x, params, stride=stride))
    assert out.shape == ref.shape, (out.shape, ref.shape)
    # bf16 MXU operands (f32 accumulation) -> loosened tolerance vs f32 reference.
    max_err = float(jnp.max(jnp.abs(out - ref)))
    assert jnp.allclose(out, ref, rtol=5e-2, atol=5e-2), max_err

    print("KERNEL_OK")
</pallas_src>

<mosaic_0001>
module attributes {stable_mosaic.version = 11 : i64} {
  func.func @_basic_block_kernel(%arg0: i32, %arg1: memref<1x16x16x16xbf16, #tpu.memory_space<vmem>>, %arg2: memref<144x16xbf16, #tpu.memory_space<vmem>>, %arg3: memref<144x16xbf16, #tpu.memory_space<vmem>>, %arg4: memref<1x16xf32, #tpu.memory_space<vmem>>, %arg5: memref<1x16xf32, #tpu.memory_space<vmem>>, %arg6: memref<1x16xf32, #tpu.memory_space<vmem>>, %arg7: memref<1x16xf32, #tpu.memory_space<vmem>>, %arg8: memref<1x16x16x16xf32, #tpu.memory_space<vmem>>, %arg9: memref<18x18x16xbf16, #tpu.memory_space<vmem>>, %arg10: memref<256x144xbf16, #tpu.memory_space<vmem>>, %arg11: memref<18x18x16xbf16, #tpu.memory_space<vmem>>, %arg12: memref<256x144xbf16, #tpu.memory_space<vmem>>) attributes {dimension_semantics = [#tpu.dimension_semantics<parallel>], iteration_bounds = array<i64: 2>, scalar_prefetch = 0 : i64, scratch_operands = 4 : i64, tpu.core_type = #tpu.core_type<tc>, window_params = [{transform_indices = @transform_0, window_bounds = array<i64: 1, 16, 16, 16>}, {pipeline_mode = #tpu.pipeline_mode<synchronous>, transform_indices = @transform_1, window_bounds = array<i64: 144, 16>}, {pipeline_mode = #tpu.pipeline_mode<synchronous>, transform_indices = @transform_2, window_bounds = array<i64: 144, 16>}, {pipeline_mode = #tpu.pipeline_mode<synchronous>, transform_indices = @transform_3, window_bounds = array<i64: 1, 16>}, {pipeline_mode = #tpu.pipeline_mode<synchronous>, transform_indices = @transform_4, window_bounds = array<i64: 1, 16>}, {pipeline_mode = #tpu.pipeline_mode<synchronous>, transform_indices = @transform_5, window_bounds = array<i64: 1, 16>}, {pipeline_mode = #tpu.pipeline_mode<synchronous>, transform_indices = @transform_6, window_bounds = array<i64: 1, 16>}, {transform_indices = @transform_7, window_bounds = array<i64: 1, 16, 16, 16>}]} {
    %cst = arith.constant 0.000000e+00 : bf16
    %0 = vector.broadcast %cst : bf16 to vector<18x18x16xbf16>
    %c0 = arith.constant 0 : index
    %c0_0 = arith.constant 0 : index
    %c0_1 = arith.constant 0 : index
    %1 = vector.load %arg9[%c0, %c0_0, %c0_1] : memref<18x18x16xbf16, #tpu.memory_space<vmem>>, vector<18x18x16xbf16>
    tpu.vector_store %arg9[%c0, %c0_0, %c0_1], %0 {strides = array<i32>} : memref<18x18x16xbf16, #tpu.memory_space<vmem>>, vector<18x18x16xbf16>,
    %c0_2 = arith.constant 0 : index
    %c0_3 = arith.constant 0 : index
    %c0_4 = arith.constant 0 : index
    %c0_5 = arith.constant 0 : index
    %2 = vector.load %arg1[%c0_2, %c0_3, %c0_4, %c0_5] : memref<1x16x16x16xbf16, #tpu.memory_space<vmem>>, vector<1x16x16x16xbf16>
    %3 = vector.shape_cast %2 : vector<1x16x16x16xbf16> to vector<16x16x16xbf16>
    %c1 = arith.constant 1 : index
    %c1_6 = arith.constant 1 : index
    %c0_7 = arith.constant 0 : index
    %4 = vector.load %arg9[%c1, %c1_6, %c0_7] : memref<18x18x16xbf16, #tpu.memory_space<vmem>>, vector<16x16x16xbf16>
    tpu.vector_store %arg9[%c1, %c1_6, %c0_7], %3 {strides = array<i32>} : memref<18x18x16xbf16, #tpu.memory_space<vmem>>, vector<16x16x16xbf16>,
    %c0_8 = arith.constant 0 : index
    %c0_9 = arith.constant 0 : index
    %c0_10 = arith.constant 0 : index
    %5 = vector.load %arg9[%c0_8, %c0_9, %c0_10] : memref<18x18x16xbf16, #tpu.memory_space<vmem>>, vector<16x16x16xbf16>
    %6 = vector.shape_cast %5 : vector<16x16x16xbf16> to vector<256x16xbf16>
    %c0_11 = arith.constant 0 : index
    %c0_12 = arith.constant 0 : index
    %7 = vector.load %arg10[%c0_11, %c0_12] : memref<256x144xbf16, #tpu.memory_space<vmem>>, vector<256x16xbf16>
    tpu.vector_store %arg10[%c0_11, %c0_12], %6 {strides = array<i32>} : memref<256x144xbf16, #tpu.memory_space<vmem>>, vector<256x16xbf16>,
    %c0_13 = arith.constant 0 : index
    %c1_14 = arith.constant 1 : index
    %c0_15 = arith.constant 0 : index
    %8 = vector.load %arg9[%c0_13, %c1_14, %c0_15] : memref<18x18x16xbf16, #tpu.memory_space<vmem>>, vector<16x16x16xbf16>
    %9 = vector.shape_cast %8 : vector<16x16x16xbf16> to vector<256x16xbf16>
    %c0_16 = arith.constant 0 : index
    %c16 = arith.constant 16 : index
    %10 = vector.load %arg10[%c0_16, %c16] : memref<256x144xbf16, #tpu.memory_space<vmem>>, vector<256x16xbf16>
    tpu.vector_store %arg10[%c0_16, %c16], %9 {strides = array<i32>} : memref<256x144xbf16, #tpu.memory_space<vmem>>, vector<256x16xbf16>,
    %c0_17 = arith.constant 0 : index
    %c2 = arith.constant 2 : index
    %c0_18 = arith.constant 0 : index
    %11 = vector.load %arg9[%c0_17, %c2, %c0_18] : memref<18x18x16xbf16, #tpu.memory_space<vmem>>, vector<16x16x16xbf16>
    %12 = vector.shape_cast %11 : vector<16x16x16xbf16> to vector<256x16xbf16>
    %c0_19 = arith.constant 0 : index
    %c32 = arith.constant 32 : index
    %13 = vector.load %arg10[%c0_19, %c32] : memref<256x144xbf16, #tpu.memory_space<vmem>>, vector<256x16xbf16>
    tpu.vector_store %arg10[%c0_19, %c32], %12 {strides = array<i32>} : memref<256x144xbf16, #tpu.memory_space<vmem>>, vector<256x16xbf16>,
    %c1_20 = arith.constant 1 : index
    %c0_21 = arith.constant 0 : index
    %c0_22 = arith.constant 0 : index
    %14 = vector.load %arg9[%c1_20, %c0_21, %c0_22] : memref<18x18x16xbf16, #tpu.memory_space<vmem>>, vector<16x16x16xbf16>
    %15 = vector.shape_cast %14 : vector<16x16x16xbf16> to vector<256x16xbf16>
    %c0_23 = arith.constant 0 : index
    %c48 = arith.constant 48 : index
    %16 = vector.load %arg10[%c0_23, %c48] : memref<256x144xbf16, #tpu.memory_space<vmem>>, vector<256x16xbf16>
    tpu.vector_store %arg10[%c0_23, %c48], %15 {strides = array<i32>} : memref<256x144xbf16, #tpu.memory_space<vmem>>, vector<256x16xbf16>,
    %c1_24 = arith.constant 1 : index
    %c1_25 = arith.constant 1 : index
    %c0_26 = arith.constant 0 : index
    %17 = vector.load %arg9[%c1_24, %c1_25, %c0_26] : memref<18x18x16xbf16, #tpu.memory_space<vmem>>, vector<16x16x16xbf16>
    %18 = vector.shape_cast %17 : vector<16x16x16xbf16> to vector<256x16xbf16>
    %c0_27 = arith.constant 0 : index
    %c64 = arith.constant 64 : index
    %19 = vector.load %arg10[%c0_27, %c64] : memref<256x144xbf16, #tpu.memory_space<vmem>>, vector<256x16xbf16>
    tpu.vector_store %arg10[%c0_27, %c64], %18 {strides = array<i32>} : memref<256x144xbf16, #tpu.memory_space<vmem>>, vector<256x16xbf16>,
    %c1_28 = arith.constant 1 : index
    %c2_29 = arith.constant 2 : index
    %c0_30 = arith.constant 0 : index
    %20 = vector.load %arg9[%c1_28, %c2_29, %c0_30] : memref<18x18x16xbf16, #tpu.memory_space<vmem>>, vector<16x16x16xbf16>
    %21 = vector.shape_cast %20 : vector<16x16x16xbf16> to vector<256x16xbf16>
    %c0_31 = arith.constant 0 : index
    %c80 = arith.constant 80 : index
    %22 = vector.load %arg10[%c0_31, %c80] : memref<256x144xbf16, #tpu.memory_space<vmem>>, vector<256x16xbf16>
    tpu.vector_store %arg10[%c0_31, %c80], %21 {strides = array<i32>} : memref<256x144xbf16, #tpu.memory_space<vmem>>, vector<256x16xbf16>,
    %c2_32 = arith.constant 2 : index
    %c0_33 = arith.constant 0 : index
    %c0_34 = arith.constant 0 : index
    %23 = vector.load %arg9[%c2_32, %c0_33, %c0_34] : memref<18x18x16xbf16, #tpu.memory_space<vmem>>, vector<16x16x16xbf16>
    %24 = vector.shape_cast %23 : vector<16x16x16xbf16> to vector<256x16xbf16>
    %c0_35 = arith.constant 0 : index
    %c96 = arith.constant 96 : index
    %25 = vector.load %arg10[%c0_35, %c96] : memref<256x144xbf16, #tpu.memory_space<vmem>>, vector<256x16xbf16>
    tpu.vector_store %arg10[%c0_35, %c96], %24 {strides = array<i32>} : memref<256x144xbf16, #tpu.memory_space<vmem>>, vector<256x16xbf16>,
    %c2_36 = arith.constant 2 : index
    %c1_37 = arith.constant 1 : index
    %c0_38 = arith.constant 0 : index
    %26 = vector.load %arg9[%c2_36, %c1_37, %c0_38] : memref<18x18x16xbf16, #tpu.memory_space<vmem>>, vector<16x16x16xbf16>
    %27 = vector.shape_cast %26 : vector<16x16x16xbf16> to vector<256x16xbf16>
    %c0_39 = arith.constant 0 : index
    %c112 = arith.constant 112 : index
    %28 = vector.load %arg10[%c0_39, %c112] : memref<256x144xbf16, #tpu.memory_space<vmem>>, vector<256x16xbf16>
    tpu.vector_store %arg10[%c0_39, %c112], %27 {strides = array<i32>} : memref<256x144xbf16, #tpu.memory_space<vmem>>, vector<256x16xbf16>,
    %c2_40 = arith.constant 2 : index
    %c2_41 = arith.constant 2 : index
    %c0_42 = arith.constant 0 : index
    %29 = vector.load %arg9[%c2_40, %c2_41, %c0_42] : memref<18x18x16xbf16, #tpu.memory_space<vmem>>, vector<16x16x16xbf16>
    %30 = vector.shape_cast %29 : vector<16x16x16xbf16> to vector<256x16xbf16>
    %c0_43 = arith.constant 0 : index
    %c128 = arith.constant 128 : index
    %31 = vector.load %arg10[%c0_43, %c128] : memref<256x144xbf16, #tpu.memory_space<vmem>>, vector<256x16xbf16>
    tpu.vector_store %arg10[%c0_43, %c128], %30 {strides = array<i32>} : memref<256x144xbf16, #tpu.memory_space<vmem>>, vector<256x16xbf16>,
    %cst_44 = arith.constant 0.000000e+00 : bf16
    %32 = vector.broadcast %cst_44 : bf16 to vector<18x18x16xbf16>
    %c0_45 = arith.constant 0 : index
    %c0_46 = arith.constant 0 : index
    %c0_47 = arith.constant 0 : index
    %33 = vector.load %arg11[%c0_45, %c0_46, %c0_47] : memref<18x18x16xbf16, #tpu.memory_space<vmem>>, vector<18x18x16xbf16>
    tpu.vector_store %arg11[%c0_45, %c0_46, %c0_47], %32 {strides = array<i32>} : memref<18x18x16xbf16, #tpu.memory_space<vmem>>, vector<18x18x16xbf16>,
    %c0_48 = arith.constant 0 : index
    %c0_49 = arith.constant 0 : index
    %34 = vector.load %arg10[%c0_48, %c0_49] : memref<256x144xbf16, #tpu.memory_space<vmem>>, vector<128x144xbf16>
    %c0_50 = arith.constant 0 : index
    %c0_51 = arith.constant 0 : index
    %35 = vector.load %arg2[%c0_50, %c0_51] : memref<144x16xbf16, #tpu.memory_space<vmem>>, vector<144x16xbf16>
    %cst_52 = arith.constant dense<0.000000e+00> : vector<128x16xf32>
    %36 = tpu.matmul %34, %35, %cst_52 {dimension_numbers = #tpu.dot_dimension_numbers<[1], [0], [0], [1], [0, 0, 1, 1], [], []>} : vector<128x144xbf16>, vector<144x16xbf16>, vector<128x16xf32> -> vector<128x16xf32>
    %c0_53 = arith.constant 0 : index
    %c0_54 = arith.constant 0 : index
    %37 = vector.load %arg4[%c0_53, %c0_54] : memref<1x16xf32, #tpu.memory_space<vmem>>, vector<1x16xf32>
    %38 = vector.broadcast %37 : vector<1x16xf32> to vector<128x16xf32>
    %39 = arith.mulf %36, %38 : vector<128x16xf32>
    %c0_55 = arith.constant 0 : index
    %c0_56 = arith.constant 0 : index
    %40 = vector.load %arg5[%c0_55, %c0_56] : memref<1x16xf32, #tpu.memory_space<vmem>>, vector<1x16xf32>
    %41 = vector.broadcast %40 : vector<1x16xf32> to vector<128x16xf32>
    %42 = arith.addf %39, %41 : vector<128x16xf32>
    %cst_57 = arith.constant 0.000000e+00 : f32
    %43 = vector.broadcast %cst_57 : f32 to vector<128x16xf32>
    %44 = arith.maximumf %42, %43 : vector<128x16xf32>
    %45 = arith.truncf %44 : vector<128x16xf32> to vector<128x16xbf16>
    %46 = vector.shape_cast %45 : vector<128x16xbf16> to vector<8x16x16xbf16>
    %c1_58 = arith.constant 1 : index
    %c1_59 = arith.constant 1 : index
    %c0_60 = arith.constant 0 : index
    %47 = vector.load %arg11[%c1_58, %c1_59, %c0_60] : memref<18x18x16xbf16, #tpu.memory_space<vmem>>, vector<8x16x16xbf16>
    tpu.vector_store %arg11[%c1_58, %c1_59, %c0_60], %46 {strides = array<i32>} : memref<18x18x16xbf16, #tpu.memory_space<vmem>>, vector<8x16x16xbf16>,
    %c128_61 = arith.constant 128 : index
    %c0_62 = arith.constant 0 : index
    %48 = vector.load %arg10[%c128_61, %c0_62] : memref<256x144xbf16, #tpu.memory_space<vmem>>, vector<128x144xbf16>
    %c0_63 = arith.constant 0 : index
    %c0_64 = arith.constant 0 : index
    %49 = vector.load %arg2[%c0_63, %c0_64] : memref<144x16xbf16, #tpu.memory_space<vmem>>, vector<144x16xbf16>
    %cst_65 = arith.constant dense<0.000000e+00> : vector<128x16xf32>
    %50 = tpu.matmul %48, %49, %cst_65 {dimension_numbers = #tpu.dot_dimension_numbers<[1], [0], [0], [1], [0, 0, 1, 1], [], []>} : vector<128x144xbf16>, vector<144x16xbf16>, vector<128x16xf32> -> vector<128x16xf32>
    %c0_66 = arith.constant 0 : index
    %c0_67 = arith.constant 0 : index
    %51 = vector.load %arg4[%c0_66, %c0_67] : memref<1x16xf32, #tpu.memory_space<vmem>>, vector<1x16xf32>
    %52 = vector.broadcast %51 : vector<1x16xf32> to vector<128x16xf32>
    %53 = arith.mulf %50, %52 : vector<128x16xf32>
    %c0_68 = arith.constant 0 : index
    %c0_69 = arith.constant 0 : index
    %54 = vector.load %arg5[%c0_68, %c0_69] : memref<1x16xf32, #tpu.memory_space<vmem>>, vector<1x16xf32>
    %55 = vector.broadcast %54 : vector<1x16xf32> to vector<128x16xf32>
    %56 = arith.addf %53, %55 : vector<128x16xf32>
    %cst_70 = arith.constant 0.000000e+00 : f32
    %57 = vector.broadcast %cst_70 : f32 to vector<128x16xf32>
    %58 = arith.maximumf %56, %57 : vector<128x16xf32>
    %59 = arith.truncf %58 : vector<128x16xf32> to vector<128x16xbf16>
    %60 = vector.shape_cast %59 : vector<128x16xbf16> to vector<8x16x16xbf16>
    %c9 = arith.constant 9 : index
    %c1_71 = arith.constant 1 : index
    %c0_72 = arith.constant 0 : index
    %61 = vector.load %arg11[%c9, %c1_71, %c0_72] : memref<18x18x16xbf16, #tpu.memory_space<vmem>>, vector<8x16x16xbf16>
    tpu.vector_store %arg11[%c9, %c1_71, %c0_72], %60 {strides = array<i32>} : memref<18x18x16xbf16, #tpu.memory_space<vmem>>, vector<8x16x16xbf16>,
    %c0_73 = arith.constant 0 : index
    %c0_74 = arith.constant 0 : index
    %c0_75 = arith.constant 0 : index
    %62 = vector.load %arg11[%c0_73, %c0_74, %c0_75] : memref<18x18x16xbf16, #tpu.memory_space<vmem>>, vector<16x16x16xbf16>
    %63 = vector.shape_cast %62 : vector<16x16x16xbf16> to vector<256x16xbf16>
    %c0_76 = arith.constant 0 : index
    %c0_77 = arith.constant 0 : index
    %64 = vector.load %arg12[%c0_76, %c0_77] : memref<256x144xbf16, #tpu.memory_space<vmem>>, vector<256x16xbf16>
    tpu.vector_store %arg12[%c0_76, %c0_77], %63 {strides = array<i32>} : memref<256x144xbf16, #tpu.memory_space<vmem>>, vector<256x16xbf16>,
    %c0_78 = arith.constant 0 : index
    %c1_79 = arith.constant 1 : index
    %c0_80 = arith.constant 0 : index
    %65 = vector.load %arg11[%c0_78, %c1_79, %c0_80] : memref<18x18x16xbf16, #tpu.memory_space<vmem>>, vector<16x16x16xbf16>
    %66 = vector.shape_cast %65 : vector<16x16x16xbf16> to vector<256x16xbf16>
    %c0_81 = arith.constant 0 : index
    %c16_82 = arith.constant 16 : index
    %67 = vector.load %arg12[%c0_81, %c16_82] : memref<256x144xbf16, #tpu.memory_space<vmem>>, vector<256x16xbf16>
    tpu.vector_store %arg12[%c0_81, %c16_82], %66 {strides = array<i32>} : memref<256x144xbf16, #tpu.memory_space<vmem>>, vector<256x16xbf16>,
    %c0_83 = arith.constant 0 : index
    %c2_84 = arith.constant 2 : index
    %c0_85 = arith.constant 0 : index
    %68 = vector.load %arg11[%c0_83, %c2_84, %c0_85] : memref<18x18x16xbf16, #tpu.memory_space<vmem>>, vector<16x16x16xbf16>
    %69 = vector.shape_cast %68 : vector<16x16x16xbf16> to vector<256x16xbf16>
    %c0_86 = arith.constant 0 : index
    %c32_87 = arith.constant 32 : index
    %70 = vector.load %arg12[%c0_86, %c32_87] : memref<256x144xbf16, #tpu.memory_space<vmem>>, vector<256x16xbf16>
    tpu.vector_store %arg12[%c0_86, %c32_87], %69 {strides = array<i32>} : memref<256x144xbf16, #tpu.memory_space<vmem>>, vector<256x16xbf16>,
    %c1_88 = arith.constant 1 : index
    %c0_89 = arith.constant 0 : index
    %c0_90 = arith.constant 0 : index
    %71 = vector.load %arg11[%c1_88, %c0_89, %c0_90] : memref<18x18x16xbf16, #tpu.memory_space<vmem>>, vector<16x16x16xbf16>
    %72 = vector.shape_cast %71 : vector<16x16x16xbf16> to vector<256x16xbf16>
    %c0_91 = arith.constant 0 : index
    %c48_92 = arith.constant 48 : index
    %73 = vector.load %arg12[%c0_91, %c48_92] : memref<256x144xbf16, #tpu.memory_space<vmem>>, vector<256x16xbf16>
    tpu.vector_store %arg12[%c0_91, %c48_92], %72 {strides = array<i32>} : memref<256x144xbf16, #tpu.memory_space<vmem>>, vector<256x16xbf16>,
    %c1_93 = arith.constant 1 : index
    %c1_94 = arith.constant 1 : index
    %c0_95 = arith.constant 0 : index
    %74 = vector.load %arg11[%c1_93, %c1_94, %c0_95] : memref<18x18x16xbf16, #tpu.memory_space<vmem>>, vector<16x16x16xbf16>
    %75 = vector.shape_cast %74 : vector<16x16x16xbf16> to vector<256x16xbf16>
    %c0_96 = arith.constant 0 : index
    %c64_97 = arith.constant 64 : index
    %76 = vector.load %arg12[%c0_96, %c64_97] : memref<256x144xbf16, #tpu.memory_space<vmem>>, vector<256x16xbf16>
    tpu.vector_store %arg12[%c0_96, %c64_97], %75 {strides = array<i32>} : memref<256x144xbf16, #tpu.memory_space<vmem>>, vector<256x16xbf16>,
    %c1_98 = arith.constant 1 : index
    %c2_99 = arith.constant 2 : index
    %c0_100 = arith.constant 0 : index
    %77 = vector.load %arg11[%c1_98, %c2_99, %c0_100] : memref<18x18x16xbf16, #tpu.memory_space<vmem>>, vector<16x16x16xbf16>
    %78 = vector.shape_cast %77 : vector<16x16x16xbf16> to vector<256x16xbf16>
    %c0_101 = arith.constant 0 : index
    %c80_102 = arith.constant 80 : index
    %79 = vector.load %arg12[%c0_101, %c80_102] : memref<256x144xbf16, #tpu.memory_space<vmem>>, vector<256x16xbf16>
    tpu.vector_store %arg12[%c0_101, %c80_102], %78 {strides = array<i32>} : memref<256x144xbf16, #tpu.memory_space<vmem>>, vector<256x16xbf16>,
    %c2_103 = arith.constant 2 : index
    %c0_104 = arith.constant 0 : index
    %c0_105 = arith.constant 0 : index
    %80 = vector.load %arg11[%c2_103, %c0_104, %c0_105] : memref<18x18x16xbf16, #tpu.memory_space<vmem>>, vector<16x16x16xbf16>
    %81 = vector.shape_cast %80 : vector<16x16x16xbf16> to vector<256x16xbf16>
    %c0_106 = arith.constant 0 : index
    %c96_107 = arith.constant 96 : index
    %82 = vector.load %arg12[%c0_106, %c96_107] : memref<256x144xbf16, #tpu.memory_space<vmem>>, vector<256x16xbf16>
    tpu.vector_store %arg12[%c0_106, %c96_107], %81 {strides = array<i32>} : memref<256x144xbf16, #tpu.memory_space<vmem>>, vector<256x16xbf16>,
    %c2_108 = arith.constant 2 : index
    %c1_109 = arith.constant 1 : index
    %c0_110 = arith.constant 0 : index
    %83 = vector.load %arg11[%c2_108, %c1_109, %c0_110] : memref<18x18x16xbf16, #tpu.memory_space<vmem>>, vector<16x16x16xbf16>
    %84 = vector.shape_cast %83 : vector<16x16x16xbf16> to vector<256x16xbf16>
    %c0_111 = arith.constant 0 : index
    %c112_112 = arith.constant 112 : index
    %85 = vector.load %arg12[%c0_111, %c112_112] : memref<256x144xbf16, #tpu.memory_space<vmem>>, vector<256x16xbf16>
    tpu.vector_store %arg12[%c0_111, %c112_112], %84 {strides = array<i32>} : memref<256x144xbf16, #tpu.memory_space<vmem>>, vector<256x16xbf16>,
    %c2_113 = arith.constant 2 : index
    %c2_114 = arith.constant 2 : index
    %c0_115 = arith.constant 0 : index
    %86 = vector.load %arg11[%c2_113, %c2_114, %c0_115] : memref<18x18x16xbf16, #tpu.memory_space<vmem>>, vector<16x16x16xbf16>
    %87 = vector.shape_cast %86 : vector<16x16x16xbf16> to vector<256x16xbf16>
    %c0_116 = arith.constant 0 : index
    %c128_117 = arith.constant 128 : index
    %88 = vector.load %arg12[%c0_116, %c128_117] : memref<256x144xbf16, #tpu.memory_space<vmem>>, vector<256x16xbf16>
    tpu.vector_store %arg12[%c0_116, %c128_117], %87 {strides = array<i32>} : memref<256x144xbf16, #tpu.memory_space<vmem>>, vector<256x16xbf16>,
    %c0_118 = arith.constant 0 : index
    %c0_119 = arith.constant 0 : index
    %89 = vector.load %arg12[%c0_118, %c0_119] : memref<256x144xbf16, #tpu.memory_space<vmem>>, vector<128x144xbf16>
    %c0_120 = arith.constant 0 : index
    %c0_121 = arith.constant 0 : index
    %90 = vector.load %arg3[%c0_120, %c0_121] : memref<144x16xbf16, #tpu.memory_space<vmem>>, vector<144x16xbf16>
    %cst_122 = arith.constant dense<0.000000e+00> : vector<128x16xf32>
    %91 = tpu.matmul %89, %90, %cst_122 {dimension_numbers = #tpu.dot_dimension_numbers<[1], [0], [0], [1], [0, 0, 1, 1], [], []>} : vector<128x144xbf16>, vector<144x16xbf16>, vector<128x16xf32> -> vector<128x16xf32>
    %c0_123 = arith.constant 0 : index
    %c0_124 = arith.constant 0 : index
    %92 = vector.load %arg6[%c0_123, %c0_124] : memref<1x16xf32, #tpu.memory_space<vmem>>, vector<1x16xf32>
    %93 = vector.broadcast %92 : vector<1x16xf32> to vector<128x16xf32>
    %94 = arith.mulf %91, %93 : vector<128x16xf32>
    %c0_125 = arith.constant 0 : index
    %c0_126 = arith.constant 0 : index
    %95 = vector.load %arg7[%c0_125, %c0_126] : memref<1x16xf32, #tpu.memory_space<vmem>>, vector<1x16xf32>
    %96 = vector.broadcast %95 : vector<1x16xf32> to vector<128x16xf32>
    %97 = arith.addf %94, %96 : vector<128x16xf32>
    %c0_127 = arith.constant 0 : index
    %c0_128 = arith.constant 0 : index
    %c0_129 = arith.constant 0 : index
    %c0_130 = arith.constant 0 : index
    %98 = vector.load %arg1[%c0_127, %c0_128, %c0_129, %c0_130] : memref<1x16x16x16xbf16, #tpu.memory_space<vmem>>, vector<1x8x16x16xbf16>
    %99 = arith.extf %98 : vector<1x8x16x16xbf16> to vector<1x8x16x16xf32>
    %100 = vector.shape_cast %99 : vector<1x8x16x16xf32> to vector<128x16xf32>
    %101 = arith.addf %97, %100 : vector<128x16xf32>
    %cst_131 = arith.constant 0.000000e+00 : f32
    %102 = vector.broadcast %cst_131 : f32 to vector<128x16xf32>
    %103 = arith.maximumf %101, %102 : vector<128x16xf32>
    %104 = vector.shape_cast %103 : vector<128x16xf32> to vector<1x8x16x16xf32>
    %c0_132 = arith.constant 0 : index
    %c0_133 = arith.constant 0 : index
    %c0_134 = arith.constant 0 : index
    %c0_135 = arith.constant 0 : index
    %105 = vector.load %arg8[%c0_132, %c0_133, %c0_134, %c0_135] : memref<1x16x16x16xf32, #tpu.memory_space<vmem>>, vector<1x8x16x16xf32>
    tpu.vector_store %arg8[%c0_132, %c0_133, %c0_134, %c0_135], %104 {strides = array<i32>} : memref<1x16x16x16xf32, #tpu.memory_space<vmem>>, vector<1x8x16x16xf32>,
    %c128_136 = arith.constant 128 : index
    %c0_137 = arith.constant 0 : index
    %106 = vector.load %arg12[%c128_136, %c0_137] : memref<256x144xbf16, #tpu.memory_space<vmem>>, vector<128x144xbf16>
    %c0_138 = arith.constant 0 : index
    %c0_139 = arith.constant 0 : index
    %107 = vector.load %arg3[%c0_138, %c0_139] : memref<144x16xbf16, #tpu.memory_space<vmem>>, vector<144x16xbf16>
    %cst_140 = arith.constant dense<0.000000e+00> : vector<128x16xf32>
    %108 = tpu.matmul %106, %107, %cst_140 {dimension_numbers = #tpu.dot_dimension_numbers<[1], [0], [0], [1], [0, 0, 1, 1], [], []>} : vector<128x144xbf16>, vector<144x16xbf16>, vector<128x16xf32> -> vector<128x16xf32>
    %c0_141 = arith.constant 0 : index
    %c0_142 = arith.constant 0 : index
    %109 = vector.load %arg6[%c0_141, %c0_142] : memref<1x16xf32, #tpu.memory_space<vmem>>, vector<1x16xf32>
    %110 = vector.broadcast %109 : vector<1x16xf32> to vector<128x16xf32>
    %111 = arith.mulf %108, %110 : vector<128x16xf32>
    %c0_143 = arith.constant 0 : index
    %c0_144 = arith.constant 0 : index
    %112 = vector.load %arg7[%c0_143, %c0_144] : memref<1x16xf32, #tpu.memory_space<vmem>>, vector<1x16xf32>
    %113 = vector.broadcast %112 : vector<1x16xf32> to vector<128x16xf32>
    %114 = arith.addf %111, %113 : vector<128x16xf32>
    %c0_145 = arith.constant 0 : index
    %c8 = arith.constant 8 : index
    %c0_146 = arith.constant 0 : index
    %c0_147 = arith.constant 0 : index
    %115 = vector.load %arg1[%c0_145, %c8, %c0_146, %c0_147] : memref<1x16x16x16xbf16, #tpu.memory_space<vmem>>, vector<1x8x16x16xbf16>
    %116 = arith.extf %115 : vector<1x8x16x16xbf16> to vector<1x8x16x16xf32>
    %117 = vector.shape_cast %116 : vector<1x8x16x16xf32> to vector<128x16xf32>
    %118 = arith.addf %114, %117 : vector<128x16xf32>
    %cst_148 = arith.constant 0.000000e+00 : f32
    %119 = vector.broadcast %cst_148 : f32 to vector<128x16xf32>
    %120 = arith.maximumf %118, %119 : vector<128x16xf32>
    %121 = vector.shape_cast %120 : vector<128x16xf32> to vector<1x8x16x16xf32>
    %c0_149 = arith.constant 0 : index
    %c8_150 = arith.constant 8 : index
    %c0_151 = arith.constant 0 : index
    %c0_152 = arith.constant 0 : index
    %122 = vector.load %arg8[%c0_149, %c8_150, %c0_151, %c0_152] : memref<1x16x16x16xf32, #tpu.memory_space<vmem>>, vector<1x8x16x16xf32>
    tpu.vector_store %arg8[%c0_149, %c8_150, %c0_151, %c0_152], %121 {strides = array<i32>} : memref<1x16x16x16xf32, #tpu.memory_space<vmem>>, vector<1x8x16x16xf32>,
    return
  }
  func.func @transform_0(%arg0: i32) -> (i32, i32, i32, i32) {
    %c0_i32 = arith.constant 0 : i32
    %c0_i32_0 = arith.constant 0 : i32
    %c0_i32_1 = arith.constant 0 : i32
    %c0_i32_2 = arith.constant 0 : i32
    return %arg0, %c0_i32, %c0_i32_0, %c0_i32_1 : i32, i32, i32, i32
  }
  func.func @transform_1(%arg0: i32) -> (i32, i32) {
    %c0_i32 = arith.constant 0 : i32
    %c0_i32_0 = arith.constant 0 : i32
    %c0_i32_1 = arith.constant 0 : i32
    return %c0_i32, %c0_i32_0 : i32, i32
  }
  func.func @transform_2(%arg0: i32) -> (i32, i32) {
    %c0_i32 = arith.constant 0 : i32
    %c0_i32_0 = arith.constant 0 : i32
    %c0_i32_1 = arith.constant 0 : i32
    return %c0_i32, %c0_i32_0 : i32, i32
  }
  func.func @transform_3(%arg0: i32) -> (i32, i32) {
    %c0_i32 = arith.constant 0 : i32
    %c0_i32_0 = arith.constant 0 : i32
    %c0_i32_1 = arith.constant 0 : i32
    return %c0_i32, %c0_i32_0 : i32, i32
  }
  func.func @transform_4(%arg0: i32) -> (i32, i32) {
    %c0_i32 = arith.constant 0 : i32
    %c0_i32_0 = arith.constant 0 : i32
    %c0_i32_1 = arith.constant 0 : i32
    return %c0_i32, %c0_i32_0 : i32, i32
  }
  func.func @transform_5(%arg0: i32) -> (i32, i32) {
    %c0_i32 = arith.constant 0 : i32
    %c0_i32_0 = arith.constant 0 : i32
    %c0_i32_1 = arith.constant 0 : i32
    return %c0_i32, %c0_i32_0 : i32, i32
  }
  func.func @transform_6(%arg0: i32) -> (i32, i32) {
    %c0_i32 = arith.constant 0 : i32
    %c0_i32_0 = arith.constant 0 : i32
    %c0_i32_1 = arith.constant 0 : i32
    return %c0_i32, %c0_i32_0 : i32, i32
  }
  func.func @transform_7(%arg0: i32) -> (i32, i32, i32, i32) {
    %c0_i32 = arith.constant 0 : i32
    %c0_i32_0 = arith.constant 0 : i32
    %c0_i32_1 = arith.constant 0 : i32
    %c0_i32_2 = arith.constant 0 : i32
    return %arg0, %c0_i32, %c0_i32_0, %c0_i32_1 : i32, i32, i32, i32
  }
}

</mosaic_0001>

<bundles_post_ra>
// kernel: tpu_custom_call.1
= control target key start
LH: loop header
LB: loop body
LE: loop exit
PB: predicated region body
PF: predicated region fallthrough
CT: control target
= control target key end

     0   :  { %12 = vsyncpa [#allocation7], 0  ;;  %s13672_s0 = inlined_call_operand.hbm [shape: bf16[2,16,16,16], index: 0, kind: input, shape index: {}]   ;;  %s13673_s1 = inlined_call_operand.vmem [shape: bf16[144,16], index: 1, kind: input, shape index: {}]   ;;  %s13674_s2 = inlined_call_operand.vmem [shape: bf16[144,16], index: 2, kind: input, shape index: {}]   ;;  %s13675_s3 = inlined_call_operand.vmem [shape: f32[1,16], index: 3, kind: input, shape index: {}]   ;;  %s13676_s4 = inlined_call_operand.vmem [shape: f32[1,16], index: 4, kind: input, shape index: {}]   ;;  %s13677_s5 = inlined_call_operand.vmem [shape: f32[1,16], index: 5, kind: input, shape index: {}]   ;;  %s13678_s6 = inlined_call_operand.vmem [shape: f32[1,16], index: 6, kind: input, shape index: {}]   ;;  %s13679_s7 = inlined_call_operand.hbm [shape: f32[2,16,16,16], index: 7, kind: output, shape index: {}]  }
   0x1   :  { %14 = vsyncpa [#allocation7 + $0x1], 0 }
   0x2   :  { %15 = vsyncpa [#allocation8], 0 }
   0x3   :  { %17 = vsyncpa [#allocation8 + $0x1], 0  ;;  %s10056_s24 = smov 0   ;;  %s10058_s25 = smov 0  }
   0x4   :  { %s10060_s26 = smov 0   ;;  %s10062_s27 = smov 0  }
   0x5 LB: > { %s10077_s28 = sadd.s32 4294967295, %s10002_s27   ;;  %s9080_s29 = sadd.s32 4294967294, %s10002_s27   ;;  %s10002_s27 = sphi %s10062_s27, %s13701_s27   ;;  %s9998_s26 = sphi %s10060_s26, %s13700_s26   ;;  %s9994_s25 = sphi %s10058_s25, %s13699_s25   ;;  %s9990_s24 = sphi %s10056_s24, %s13698_s24  }
   0x6   : > { %s10081_s30 = sadd.s32 1, %s10002_s27   ;;  %s30_s8 = sadd.s32 1, %s9998_s26 }
   0x7   : > { %s27_s9 = ssub.s32 %s10002_s27, %s10081_s30  ;;  %p37_p0 = scmp.ne.s32.totalorder %s9998_s26, %s9994_s25 }
   0x8   : > { %p28_p1 = scmp.eq.s32.totalorder %s27_s9, 0  ;;  %p38_p2 = scmp.eq.s32.totalorder %s10002_s27, 0 }
   0x9   : > { %p43_p3 = scmp.ne.s32.totalorder %s9994_s25, %s9990_s24  ;;  %p44_p4 = scmp.eq.s32.totalorder %s10077_s28, 0 }
   0xa   : > { %s10093_s10 = scalar_select %p28_p1, %s9998_s26, %s30_s8  }
   0xb   : > { %p10095_p5 = por %p38_p2, %p37_p0  ;;  %p10099_p6 = por %p44_p4, %p43_p3 }
   0xc   : > { %13680 = sst [smem:[#allocation12_spill]] %s10093_s10  ;;  %p193_p7 = scmp.eq.s32.totalorder %s10077_s28, 1 }
   0xd   : > { %p199_p8 = scmp.eq.s32.totalorder %s9080_s29, 1  ;;  %p9847_p10 = scmp.lt.s32.totalorder %s10002_s27, 2 }
   0xe   : > { %p10106_p11 = por %p193_p7, %p37_p0  ;;  %s237_s15 = sand.u32 1, %s9998_s26  }
   0xf   : > { %p10110_p12 = por %p199_p8, %p43_p3  ;;  %s9654_s16 = sshll.u32 %s10002_s27, 7 }
  0x10   : > { %s9083_s17 = sshll.u32 %s237_s15, 7  ;;  %s246_s20 = scalar_lea.hbm %s13672_s0, %s9654_s16 }
  0x11   : > { %s247_s21 = sshll.u32 %s246_s20, 4  ;;  %s241_s22 = scalar_lea.vmem [#allocation6], %s9083_s17  ;;  %s248_s21 = int_to_ptr.hbm [resolvable:$true] %s247_s21 }
  0x12   : > { %s249_s23 = sshll.u32 %s241_s22, 4  ;;  %p10121_p13 = pnand %p9847_p10, %p10095_p5  ;;  %s250_s23 = int_to_ptr.vmem [resolvable:$true] %s249_s23 }
  0x13   : > { %p9086_p0 = scmp.ge.s32.totalorder %s10002_s27, 1  ;;  %p257_p1 = scmp.lt.s32.totalorder %s10002_s27, 3 }
  0x14   : > { %s238_s8 = scalar_lea.sflag [#allocation7], %s237_s15  ;;  %s9906_s9 = sshra.s32 %s248_s21, 4  ;;  %s9907_s9 = int_to_ptr.hbm [resolvable:$true] %s9906_s9 }
  0x15   : > { %s9908_s10 = scalar_lea.hbm %s9907_s9, 128  ;;  %p9910_p3 = pneg %p10121_p13 }
  0x16   : > { %p9909_p2 = scmp.ne.s32.totalorder %s9907_s9, %s9908_s10  ;;  %s9913_s11 = scalar_lea.hbm %s13672_s0, 256 }
  0x17   : > { %p9914_p5 = scmp.lt.s32.totalorder %s9907_s9, %s13672_s0  ;;  %p9915_p8 = scmp.lt.s32.totalorder %s9913_s11, %s9908_s10 }
  0x18   : > { %p9911_p4 = pnand %p9910_p3, %p9909_p2 }
  0x19   : > { %p9916_p10 = por %p9915_p8, %p9914_p5 }
  0x1a   : > { %p9912_p7 = pneg %p9911_p4 }
  0x1c   : > { %p9917_p9 = pnand %p9916_p10, %p9912_p7 }
  0x1e   : > { %9920 = shalt.err (!%p9917_p9)
}
  0x1f   : > { %s10004_s15 = smov 64   ;;  %s10005_s20 = smov 4  }
  0x20   : > { %9842 = dma.hbm_to_vmem [thread:$0]  (!%p10121_p13), %s248_s21, 2048, %s250_s23, %s238_s8, %s10004_s15, %s10004_s15, %s10005_s20  }
  0x21   : > { %p258_p2 = pnand %p9086_p0, %p257_p1 }
  0x22   : > { %s10142_s22 = sand.u32 (!%p258_p2), 1, %s9994_s25  }
  0x23   : > { %261 = sbr.rel (%p258_p2) target bundleno = 1924 (0x784), region = 48  ;;  %s9087_s10 = sshll.u32 (!%p258_p2), %s10142_s22, 7 }
  0x24   : > { %s264_s9 = scalar_lea.sflag (!%p258_p2), [#allocation7], %s10142_s22  ;;  %s10146_s16 = scalar_lea.vmem (!%p258_p2), [#allocation6], %s9087_s10 }
  0x28   : > { %9981 = dma.done.wait (%p10099_p6), %s264_s9, 2048  }
  0x29   : > { %9983 = vsyncadd (%p10099_p6), %s264_s9, 4294965248  ;;  %vm300_vm0 = vcmask 125952   ;;  %v10006_v0 = vmov 0   ;;  %vm941_vm1 = vsmask.f32 3328  ;;  %s10007_s12 = smov 16  }
  0x2a   : > { %301 = vst.msk [vmem:[#allocation2] sm:$0xf] %vm300_vm0, %v10006_v0  ;;  %vm942_vm2 = vsmask.f32 7440  ;;  %v356_v15 = vld [vmem:[%s10146_s16] sm:$0xf] }
  0x2b   : > { %302 = vst.msk [vmem:[#allocation2 + $0x4] sm:$0xf] %vm300_vm0, %v10006_v0  ;;  %vm10180_vm3 = vmor %vm941_vm1, %vm942_vm2  ;;  %v357_v16 = vld [vmem:[%s10146_s16 + $0x4] sm:$0xf]  ;;  %v392_v17 = vshrl.u32 %v356_v15, 16  ;;  %v395_v21 = vshll.u32 %v356_v15, 16 }
  0x2c   : > { %305 = vst.msk [vmem:[#allocation2 + $0xc] sm:$0xf] %vm300_vm0, %v10006_v0  ;;  %v400_v19 = vshrl.u32 %v357_v16, 16  ;;  %v403_v23 = vshll.u32 %v357_v16, 16  ;;  %vm713_vm4 = vsmask.f32 7938 }
  0x2d   : > { %306 = vst.msk [vmem:[#allocation2 + $0x10] sm:$0xf] %vm300_vm0, %v10006_v0  ;;  %v394_v20 = vrot.slane %v392_v17, 7  ;;  %vm388_vm5 = vsmask.f32 256  ;;  %vm10303_vm7 = vmand %vm300_vm0, %vm713_vm4  ;;  %vm303_vm9 = vcmask 122880  }
  0x2e   : > { %308 = vst.msk [vmem:[#allocation2 + $0x18] sm:$0xf] %vm300_vm0, %v10006_v0  ;;  %v10291_v22 = vrot.slane %v400_v19, 7  ;;  %vm389_vm6 = vsmask.f32 4368  ;;  %vm10409_vm10 = vmand %vm303_vm9, %vm388_vm5  ;;  %vm1553_vm11 = vcmask 1042432  }
  0x2f   : > { %309 = vst.msk [vmem:[#allocation2 + $0x1c] sm:$0xf] %vm300_vm0, %v10006_v0  ;;  %v397_v24 = vor.u32 %v395_v21, %v394_v20  ;;  %v398_v25 = vrot.slane %v394_v20, 4  ;;  %vm10310_vm8 = vmor %vm388_vm5, %vm389_vm6  ;;  %v360_v45 = vld [vmem:[%s10146_s16 + $0x10] sm:$0xf]  ;;  %vm1554_vm12 = vcmask 1046532  }
  0x30   : > { %311 = vst.msk [vmem:[#allocation2 + $0x24] sm:$0xf] %vm300_vm0, %v10006_v0  ;;  %v405_v26 = vor.u32 %v403_v23, %v10291_v22  ;;  %v361_v48 = vld [vmem:[%s10146_s16 + $0x14] sm:$0xf]  ;;  %v426_v49 = vshrl.u32 %v360_v45, 16  ;;  %v429_v58 = vshll.u32 %v360_v45, 16  ;;  %vm10873_vm13 = vmor %vm1553_vm11, %vm1554_vm12 }
  0x31   : > { %v893_v1 = vld [vmem:[#allocation2] sm:$0xf]  ;;  %312 = vst.msk [vmem:[#allocation2 + $0x28] sm:$0xf] %vm300_vm0, %v10006_v0  ;;  %v10363_v50 = vld [vmem:[%s10146_s16 + $0x18] sm:$0xf] }
  0x32   : > { %v894_v2 = vld [vmem:[#allocation2 + $0x4] sm:$0xf]  ;;  %v945_v3 = vshrl.u32 %v893_v1, 16  ;;  %v948_v4 = vshll.u32 %v893_v1, 16  ;;  %314 = vst.msk [vmem:[#allocation2 + $0x30] sm:$0xf] %vm300_vm0, %v10006_v0  ;;  %v406_v31 = vsel %vm10310_vm8, %v398_v25, %v405_v26 }
  0x33   : > { %v954_v5 = vshll.u32 %v894_v2, 16  ;;  %315 = vst.msk [vmem:[#allocation2 + $0x34] sm:$0xf] %vm300_vm0, %v10006_v0  ;;  %v958_v13 = vshrl.u32 %v894_v2, 16  ;;  %v715_v28 = vld [vmem:[#allocation2 + $0xc] sm:$0xf] }
  0x34   : > { %v947_v6 = vrot.slane %v945_v3, 4  ;;  %v950_v7 = vrot.slane %v948_v4, 5  ;;  %317 = vst.msk [vmem:[#allocation2 + $0x3c] sm:$0xf] %vm300_vm0, %v10006_v0  ;;  %v716_v30 = vsel %vm10303_vm7, %v397_v24, %v715_v28  ;;  %v434_v52 = vshrl.u32 %v361_v48, 16  ;;  %s10008_s21 = smov 32  }
  0x35   : > { %318 = vst.msk [vmem:[#allocation2 + $0x40] sm:$0xf] %vm300_vm0, %v10006_v0  ;;  %v10176_v9 = vrot.slane %v954_v5, 5  ;;  %v960_v14 = vrot.slane %v958_v13, 4  ;;  %v363_v53 = vld [vmem:[%s10146_s16 + $0x1c] sm:$0xf] }
  0x36   : > { %v951_v8 = vor.u32 %v950_v7, %v947_v6  ;;  %320 = vst.msk [vmem:[#allocation2 + $0x48] sm:$0xf] %vm300_vm0, %v10006_v0  ;;  %v443_v54 = vshrl.u32 %v10363_v50, 16  ;;  %v358_v55 = vld [vmem:[%s10146_s16 + $0x8] sm:$0xf]  ;;  %v428_v57 = vrot.slane %v426_v49, 7 }
  0x37   : > { %321 = vst.msk [vmem:[#allocation2 + $0x4c] sm:$0xf] %vm300_vm0, %v10006_v0  ;;  %v961_v18 = vor.u32 %v960_v14, %v10176_v9  ;;  %v451_v59 = vshrl.u32 %v363_v53, 16  ;;  %v359_v60 = vld [vmem:[%s10146_s16 + $0xc] sm:$0xf]  ;;  %v436_v61 = vrot.slane %v434_v52, 7 }
  0x38   : > { %v952_v11 = vrot.slane %v951_v8, 4  ;;  %323 = vst.msk [vmem:[#allocation2 + $0x54] sm:$0xf] %vm300_vm0, %v10006_v0  ;;  %v409_v62 = vshrl.u32 %v358_v55, 16  ;;  %v437_v63 = vshll.u32 %v361_v48, 16  ;;  %v10387_v1 = vrot.slane %v443_v54, 7 }
  0x39   : > { %324 = vst.msk [vmem:[#allocation2 + $0x58] sm:$0xf] %vm300_vm0, %v10006_v0  ;;  %v962_v40 = vrot.slane %v961_v18, 4  ;;  %v364_v2 = vld [vmem:[%s10146_s16 + $0x20] sm:$0xf]  ;;  %v407_v4 = vrot.slane %v10291_v22, 4  ;;  %v10395_v7 = vor.u32 %v429_v58, %v428_v57 }
  0x3a   : > { %v957_v12 = vsel %vm10180_vm3, %v952_v11, %v10176_v9  ;;  %326 = vst.msk [vmem:[#allocation2 + $0x60] sm:$0xf] %vm300_vm0, %v10006_v0  ;;  %v432_v5 = vrot.slane %v428_v57, 4  ;;  %v417_v6 = vshrl.u32 %v359_v60, 16  ;;  %v10397_v8 = vld [vmem:[#allocation2 + $0x24] sm:$0xf]  ;;  %v439_v18 = vor.u32 %v437_v63, %v436_v61 }
  0x3b   : > { %1328 = vrot.lane.b32.xlu0 %v957_v12, %s10007_s12  ;;  %327 = vst.msk [vmem:[#allocation2 + $0x64] sm:$0xf] %vm300_vm0, %v10006_v0  ;;  %v453_v9 = vrot.slane %v451_v59, 7  ;;  %v454_v11 = vshll.u32 %v363_v53, 16  ;;  %v365_v12 = vld [vmem:[%s10146_s16 + $0x24] sm:$0xf] }
  0x3c   : > { %329 = vst.msk [vmem:[#allocation2 + $0x6c] sm:$0xf] %vm300_vm0, %v10006_v0  ;;  %v441_v14 = vrot.slane %v436_v61, 4  ;;  %v411_v15 = vrot.slane %v409_v62, 7  ;;  %v412_v16 = vshll.u32 %v358_v55, 16  ;;  %v460_v17 = vshrl.u32 %v364_v2, 16 }
  0x3d   : > { %330 = vst.msk [vmem:[#allocation2 + $0x70] sm:$0xf] %vm300_vm0, %v10006_v0  ;;  %v449_v20 = vrot.slane %v10387_v1, 4  ;;  %v420_v21 = vshll.u32 %v359_v60, 16  ;;  %v10413_v24 = vrot.slane %v417_v6, 7  ;;  %v468_v25 = vshrl.u32 %v365_v12, 16 }
  0x3e   : > { %332 = vst.msk [vmem:[#allocation2 + $0x78] sm:$0xf] %vm300_vm0, %v10006_v0  ;;  %v10416_v26 = vld [vmem:[%s10146_s16 + $0x28] sm:$0xf]  ;;  %v369_v48 = vld [vmem:[%s10146_s16 + $0x34] sm:$0xf] }
  0x3f   : > { %333 = vst.msk [vmem:[#allocation2 + $0x7c] sm:$0xf] %vm300_vm0, %v10006_v0  ;;  %v422_v45 = vor.u32 %v420_v21, %v10413_v24  ;;  %v10472_v57 = vld [vmem:[#allocation2 + $0x3c] sm:$0xf]  ;;  %v502_v58 = vshrl.u32 %v369_v48, 16  ;;  %v480_v61 = vshll.u32 %v10416_v26, 16 }
  0x40   : > { %335 = vst.msk [vmem:[#allocation2 + $0x84] sm:$0xf] %vm300_vm0, %v10006_v0  ;;  %v370_v59 = vld [vmem:[%s10146_s16 + $0x38] sm:$0xf]  ;;  %v371_v6 = vld [vmem:[%s10146_s16 + $0x3c] sm:$0xf] }
  0x41   : > { %336 = vst.msk [vmem:[#allocation2 + $0x88] sm:$0xf] %vm300_vm0, %v10006_v0  ;;  %v511_v63 = vshrl.u32 %v370_v59, 16  ;;  %v372_v21 = vld [vmem:[%s10146_s16 + $0x40] sm:$0xf]  ;;  %vm1424_vm14 = vcmask 257152  }
  0x42   : > { %338 = vst.msk [vmem:[#allocation2 + $0x90] sm:$0xf] %vm300_vm0, %v10006_v0  ;;  %s10009_s23 = smov 48   ;;  %vm1764_vm15 = vcmask 388352   ;;  %s10010_s29 = smov 64   ;;  %vm1957_vm1 = vcmask 519552  }
  0x43   : > { %339 = vst.msk [vmem:[#allocation2 + $0x94] sm:$0xf] %vm300_vm0, %v10006_v0  ;;  %s10011_s8 = smov 80   ;;  %vm2518_vm2 = vcmask 650752   ;;  %s10012_s17 = smov 96   ;;  %vm2855_vm4 = vcmask 781952  }
  0x44   : > { %341 = vst.msk [vmem:[#allocation2 + $0x9c] sm:$0xf] %vm300_vm0, %v10006_v0  ;;  %s10013_s11 = smov 112   ;;  %vm3049_vm5 = vcmask 913152   ;;  %vm4129_vm6 = vcmask 130048   ;;  %v9757_v10 = vld [vmem:[%s10146_s16] sm:$0xff]  }
  0x45   : > { %342 = vst.msk [vmem:[#allocation2 + $0xa0] sm:$0xf] %vm300_vm0, %v10006_v0  ;;  %s9755_s20 = sshll.u32 %s10077_s28, 8 }
  0x46   : > { %344 = vst.msk [vmem:[#allocation2 + $0xa8] sm:$0xf] %vm300_vm0, %v10006_v0  ;;  %s9003_s9 = scalar_lea.hbm %s13679_s7, %s9755_s20 }
  0x47   : > { %345 = vst.msk [vmem:[#allocation2 + $0xac] sm:$0xf] %vm300_vm0, %v10006_v0 }
  0x48   : > { %347 = vst.msk [vmem:[#allocation2 + $0xb4] sm:$0xf] %vm300_vm0, %v10006_v0 }
  0x49   : > { %348 = vst.msk [vmem:[#allocation2 + $0xb8] sm:$0xf] %vm300_vm0, %v10006_v0 }
  0x4a   : > { %350 = vst.msk [vmem:[#allocation2 + $0xc0] sm:$0xf] %vm300_vm0, %v10006_v0 }
  0x4b   : > { %351 = vst.msk [vmem:[#allocation2 + $0xc4] sm:$0xf] %vm300_vm0, %v10006_v0 }
  0x4c   : > { %353 = vst.msk [vmem:[#allocation2 + $0xcc] sm:$0xf] %vm300_vm0, %v10006_v0 }
  0x4d   : > { %354 = vst.msk [vmem:[#allocation2 + $0xd0] sm:$0xf] %vm300_vm0, %v10006_v0 }
  0x4e   : > { %3915 = vst.msk [vmem:[#allocation4] sm:$0xf] %vm300_vm0, %v10006_v0 }
  0x4f   : > { %3916 = vst.msk [vmem:[#allocation4 + $0x4] sm:$0xf] %vm300_vm0, %v10006_v0 }
  0x50   : > { %3918 = vst.msk [vmem:[#allocation4 + $0xc] sm:$0xf] %vm300_vm0, %v10006_v0 }
  0x51   : > { %3919 = vst.msk [vmem:[#allocation4 + $0x10] sm:$0xf] %vm300_vm0, %v10006_v0 }
  0x52   : > { %3921 = vst.msk [vmem:[#allocation4 + $0x18] sm:$0xf] %vm300_vm0, %v10006_v0 }
  0x53   : > { %3922 = vst.msk [vmem:[#allocation4 + $0x1c] sm:$0xf] %vm300_vm0, %v10006_v0 }
  0x54   : > { %3924 = vst.msk [vmem:[#allocation4 + $0x24] sm:$0xf] %vm300_vm0, %v10006_v0 }
  0x55   : > { %3925 = vst.msk [vmem:[#allocation4 + $0x28] sm:$0xf] %vm300_vm0, %v10006_v0 }
  0x56   : > { %3927 = vst.msk [vmem:[#allocation4 + $0x30] sm:$0xf] %vm300_vm0, %v10006_v0 }
  0x57   : > { %3928 = vst.msk [vmem:[#allocation4 + $0x34] sm:$0xf] %vm300_vm0, %v10006_v0 }
  0x58   : > { %3930 = vst.msk [vmem:[#allocation4 + $0x3c] sm:$0xf] %vm300_vm0, %v10006_v0 }
  0x59   : > { %3931 = vst.msk [vmem:[#allocation4 + $0x40] sm:$0xf] %vm300_vm0, %v10006_v0 }
  0x5a   : > { %3933 = vst.msk [vmem:[#allocation4 + $0x48] sm:$0xf] %vm300_vm0, %v10006_v0 }
  0x5b   : > { %3934 = vst.msk [vmem:[#allocation4 + $0x4c] sm:$0xf] %vm300_vm0, %v10006_v0 }
  0x5c   : > { %3936 = vst.msk [vmem:[#allocation4 + $0x54] sm:$0xf] %vm300_vm0, %v10006_v0 }
  0x5d   : > { %3937 = vst.msk [vmem:[#allocation4 + $0x58] sm:$0xf] %vm300_vm0, %v10006_v0 }
  0x5e   : > { %3939 = vst.msk [vmem:[#allocation4 + $0x60] sm:$0xf] %vm300_vm0, %v10006_v0 }
  0x5f   : > { %3940 = vst.msk [vmem:[#allocation4 + $0x64] sm:$0xf] %vm300_vm0, %v10006_v0 }
  0x60   : > { %3942 = vst.msk [vmem:[#allocation4 + $0x6c] sm:$0xf] %vm300_vm0, %v10006_v0 }
  0x61   : > { %3943 = vst.msk [vmem:[#allocation4 + $0x70] sm:$0xf] %vm300_vm0, %v10006_v0 }
  0x62   : > { %3945 = vst.msk [vmem:[#allocation4 + $0x78] sm:$0xf] %vm300_vm0, %v10006_v0 }
  0x63   : > { %3946 = vst.msk [vmem:[#allocation4 + $0x7c] sm:$0xf] %vm300_vm0, %v10006_v0 }
  0x64   : > { %3948 = vst.msk [vmem:[#allocation4 + $0x84] sm:$0xf] %vm300_vm0, %v10006_v0 }
  0x65   : > { %3949 = vst.msk [vmem:[#allocation4 + $0x88] sm:$0xf] %vm300_vm0, %v10006_v0 }
  0x66   : > { %3951 = vst.msk [vmem:[#allocation4 + $0x90] sm:$0xf] %vm300_vm0, %v10006_v0 }
  0x67   : > { %3952 = vst.msk [vmem:[#allocation4 + $0x94] sm:$0xf] %vm300_vm0, %v10006_v0 }
  0x68   : > { %3954 = vst.msk [vmem:[#allocation4 + $0x9c] sm:$0xf] %vm300_vm0, %v10006_v0 }
  0x69   : > { %3955 = vst.msk [vmem:[#allocation4 + $0xa0] sm:$0xf] %vm300_vm0, %v10006_v0 }
  0x6a   : > { %3957 = vst.msk [vmem:[#allocation4 + $0xa8] sm:$0xf] %vm300_vm0, %v10006_v0 }
  0x6b   : > { %3958 = vst.msk [vmem:[#allocation4 + $0xac] sm:$0xf] %vm300_vm0, %v10006_v0 }
  0x6c   : > { %3960 = vst.msk [vmem:[#allocation4 + $0xb4] sm:$0xf] %vm300_vm0, %v10006_v0 }
  0x6d   : > { %3961 = vst.msk [vmem:[#allocation4 + $0xb8] sm:$0xf] %vm300_vm0, %v10006_v0 }
  0x6e   : > { %3963 = vst.msk [vmem:[#allocation4 + $0xc0] sm:$0xf] %vm300_vm0, %v10006_v0 }
  0x6f   : > { %3964 = vst.msk [vmem:[#allocation4 + $0xc4] sm:$0xf] %vm300_vm0, %v10006_v0 }
  0x70   : > { %3966 = vst.msk [vmem:[#allocation4 + $0xcc] sm:$0xf] %vm300_vm0, %v10006_v0 }
  0x71   : > { %3967 = vst.msk [vmem:[#allocation4 + $0xd0] sm:$0xf] %vm300_vm0, %v10006_v0 }
  0x72   : > { %717 = vst [vmem:[#allocation2 + $0xc] sm:$0xf] %v716_v30  ;;  %v456_v30 = vor.u32 %v454_v11, %v453_v9  ;;  %v446_v11 = vshll.u32 %v10363_v50, 16  ;;  %v513_v50 = vrot.slane %v511_v63, 7 }
  0x73   : > { %718 = vst.msk [vmem:[#allocation2 + $0x10] sm:$0xf] %vm300_vm0, %v406_v31  ;;  %v458_v31 = vrot.slane %v453_v9, 4 }
  0x74   : > { %304 = vst.msk [vmem:[#allocation2 + $0x8] sm:$0x1] %vm303_vm9, %v10006_v0 }
  0x75   : > { %307 = vst.msk [vmem:[#allocation2 + $0x14] sm:$0x1] %vm303_vm9, %v10006_v0 }
  0x76   : > { %310 = vst.msk [vmem:[#allocation2 + $0x20] sm:$0x1] %vm303_vm9, %v10006_v0 }
  0x77   : > { %313 = vst.msk [vmem:[#allocation2 + $0x2c] sm:$0x1] %vm303_vm9, %v10006_v0 }
  0x78   : > { %316 = vst.msk [vmem:[#allocation2 + $0x38] sm:$0x1] %vm303_vm9, %v10006_v0 }
  0x79   : > { %v896_v32 = vld [vmem:[#allocation2 + $0xc] sm:$0xf]  ;;  %319 = vst.msk [vmem:[#allocation2 + $0x44] sm:$0x1] %vm303_vm9, %v10006_v0 }
  0x7a   : > { %v897_v33 = vld [vmem:[#allocation2 + $0x10] sm:$0xf]  ;;  %v969_v34 = vshrl.u32 %v896_v32, 16  ;;  %v972_v35 = vshll.u32 %v896_v32, 16  ;;  %322 = vst.msk [vmem:[#allocation2 + $0x50] sm:$0x1] %vm303_vm9, %v10006_v0 }
  0x7b   : > { %v978_v36 = vshll.u32 %v897_v33, 16  ;;  %v895_v37 = vld [vmem:[#allocation2 + $0x8] sm:$0x1]  ;;  %325 = vst.msk [vmem:[#allocation2 + $0x5c] sm:$0x1] %vm303_vm9, %v10006_v0  ;;  %v982_v56 = vshrl.u32 %v897_v33, 16 }
  0x7c   : > { %v971_v38 = vrot.slane %v969_v34, 4  ;;  %v974_v39 = vrot.slane %v972_v35, 5  ;;  %v964_v41 = vshll.u32 %v895_v37, 16  ;;  %328 = vst.msk [vmem:[#allocation2 + $0x68] sm:$0x1] %vm303_vm9, %v10006_v0  ;;  %v415_v32 = vrot.slane %v411_v15, 4 }
  0x7d   : > { %331 = vst.msk [vmem:[#allocation2 + $0x74] sm:$0x1] %vm303_vm9, %v10006_v0  ;;  %v10347_v43 = vrot.slane %v978_v36, 5  ;;  %v984_v3 = vrot.slane %v982_v56, 4  ;;  %v721_v13 = vld [vmem:[#allocation2 + $0x14] sm:$0x1]  ;;  %v732_v34 = vsel %vm10303_vm7, %v10395_v7, %v10397_v8  ;;  %v10430_v35 = vor.u32 %v412_v16, %v411_v15 }
  0x7e   : > { %v975_v42 = vor.u32 %v974_v39, %v971_v38  ;;  %v966_v44 = vrot.slane %v964_v41, 5  ;;  %334 = vst.msk [vmem:[#allocation2 + $0x80] sm:$0x1] %vm303_vm9, %v10006_v0  ;;  %v735_v19 = vld [vmem:[#allocation2 + $0x2c] sm:$0x1]  ;;  %v462_v37 = vrot.slane %v460_v17, 7  ;;  %v722_v39 = vsel %vm10409_vm10, %v407_v4, %v721_v13 }
  0x7f   : > { %337 = vst.msk [vmem:[#allocation2 + $0x8c] sm:$0x1] %vm303_vm9, %v10006_v0  ;;  %v742_v23 = vld [vmem:[#allocation2 + $0x38] sm:$0x1]  ;;  %v985_v28 = vor.u32 %v984_v3, %v10347_v43  ;;  %v10422_v33 = vld [vmem:[%s10146_s16 + $0x2c] sm:$0xf] }
  0x80   : > { %v976_v46 = vrot.slane %v975_v42, 4  ;;  %v967_v47 = vsel %vm10180_vm3, %v962_v40, %v966_v44  ;;  %340 = vst.msk [vmem:[#allocation2 + $0x98] sm:$0x1] %vm303_vm9, %v10006_v0  ;;  %v10432_v36 = vld [vmem:[#allocation2 + $0x18] sm:$0xf]  ;;  %v463_v38 = vshll.u32 %v364_v2, 16  ;;  %v440_v40 = vsel %vm10310_vm8, %v432_v5, %v439_v18 }
  0x81   : > { %1330 = vrot.lane.b32.xlu0 %v967_v47, %s10007_s12  ;;  %343 = vst.msk [vmem:[#allocation2 + $0xa4] sm:$0x1] %vm303_vm9, %v10006_v0  ;;  %v471_v41 = vshll.u32 %v365_v12, 16  ;;  %v477_v42 = vshrl.u32 %v10416_v26, 16  ;;  %v736_v44 = vsel %vm10409_vm10, %v441_v14, %v735_v19  ;;  %v485_v47 = vshrl.u32 %v10422_v33, 16 }
  0x82   : > { %v981_v51 = vsel %vm10180_vm3, %v976_v46, %v10347_v43  ;;  %346 = vst.msk [vmem:[#allocation2 + $0xb0] sm:$0x1] %vm303_vm9, %v10006_v0  ;;  %v10442_v43 = vld [vmem:[%s10146_s16 + $0x30] sm:$0xf]  ;;  %v10449_v46 = vrot.slane %v468_v25, 7  ;;  %v10455_v49 = vrot.slane %v985_v28, 4  ;;  %v10461_v52 = vsel %vm10409_vm10, %v458_v31, %v742_v23 }
  0x83   : > { %1332 = vrot.lane.b32.xlu1 %v981_v51, %s10007_s12  ;;  %349 = vst.msk [vmem:[#allocation2 + $0xbc] sm:$0x1] %vm303_vm9, %v10006_v0  ;;  %v457_v51 = vsel %vm10310_vm8, %v449_v20, %v456_v30  ;;  %v494_v53 = vshrl.u32 %v10442_v43, 16  ;;  %v725_v54 = vsel %vm10303_vm7, %v10430_v35, %v10432_v36  ;;  %v10470_v55 = vor.u32 %v463_v38, %v462_v37  ;;  %v728_v8 = vld [vmem:[#allocation2 + $0x20] sm:$0x1] }
  0x84   : > { %352 = vst.msk [vmem:[#allocation2 + $0xc8] sm:$0x1] %vm303_vm9, %v10006_v0  ;;  %v466_v56 = vrot.slane %v462_v37, 4  ;;  %v479_v60 = vrot.slane %v477_v42, 7  ;;  %v488_v62 = vshll.u32 %v10422_v33, 16  ;;  %v423_v2 = vsel %vm10310_vm8, %v415_v32, %v422_v45 }
  0x85   : > { %355 = vst.msk [vmem:[#allocation2 + $0xd4] sm:$0x1] %vm303_vm9, %v10006_v0  ;;  %v473_v3 = vor.u32 %v471_v41, %v10449_v46  ;;  %v487_v4 = vrot.slane %v485_v47, 7  ;;  %v424_v5 = vrot.slane %v10413_v24, 4  ;;  %v10488_v9 = vrot.slane %v494_v53, 7 }
  0x86   : > { %3917 = vst.msk [vmem:[#allocation4 + $0x8] sm:$0x1] %vm303_vm9, %v10006_v0  ;;  %v483_v7 = vrot.slane %v479_v60, 4  ;;  %v519_v12 = vshrl.u32 %v371_v6, 16  ;;  %v10493_v13 = vld [vmem:[#allocation2 + $0x48] sm:$0xf]  ;;  %v746_v18 = vsel %vm10303_vm7, %v10470_v55, %v10472_v57  ;;  %v10499_v19 = vor.u32 %v480_v61, %v479_v60 }
  0x87   : > { %3920 = vst.msk [vmem:[#allocation4 + $0x14] sm:$0x1] %vm303_vm9, %v10006_v0  ;;  %v492_v14 = vrot.slane %v487_v4, 4  ;;  %v504_v15 = vrot.slane %v502_v58, 7  ;;  %v505_v16 = vshll.u32 %v369_v48, 16  ;;  %v514_v17 = vshll.u32 %v370_v59, 16 }
  0x88   : > { %3923 = vst.msk [vmem:[#allocation4 + $0x20] sm:$0x1] %vm303_vm9, %v10006_v0  ;;  %v522_v20 = vshll.u32 %v371_v6, 16  ;;  %v490_v23 = vor.u32 %v488_v62, %v487_v4  ;;  %v756_v24 = vld [vmem:[#allocation2 + $0x50] sm:$0x1]  ;;  %v10506_v26 = vrot.slane %v519_v12, 7  ;;  %v10512_v33 = vor.u32 %v446_v11, %v10387_v1 }
  0x89   : > { %3926 = vst.msk [vmem:[#allocation4 + $0x2c] sm:$0x1] %vm303_vm9, %v10006_v0  ;;  %v10504_v25 = vld [vmem:[#allocation2 + $0x30] sm:$0xf]  ;;  %v373_v28 = vld [vmem:[%s10146_s16 + $0x44] sm:$0xf]  ;;  %v10516_v38 = vsel %vm10409_vm10, %v424_v5, %v728_v8  ;;  %v753_v1 = vsel %vm10303_vm7, %v10499_v19, %v10493_v13 }
  0x8a   : > { %3929 = vst.msk [vmem:[#allocation4 + $0x38] sm:$0x1] %vm303_vm9, %v10006_v0  ;;  %v528_v30 = vshrl.u32 %v372_v21, 16  ;;  %v500_v31 = vrot.slane %v10488_v9, 4  ;;  %v763_v32 = vld [vmem:[#allocation2 + $0x5c] sm:$0x1]  ;;  %v524_v47 = vor.u32 %v522_v20, %v10506_v26  ;;  %v10536_v53 = vsel %vm10310_vm8, %v483_v7, %v490_v23 }
  0x8b   : > { %3932 = vst.msk [vmem:[#allocation4 + $0x44] sm:$0x1] %vm303_vm9, %v10006_v0  ;;  %v536_v37 = vshrl.u32 %v373_v28, 16  ;;  %v509_v41 = vrot.slane %v504_v15, 4  ;;  %v10518_v42 = vld [vmem:[#allocation2 + $0x60] sm:$0xf]  ;;  %v739_v58 = vsel %vm10303_vm7, %v10512_v33, %v10504_v25 }
  0x8c   : > { %3935 = vst.msk [vmem:[#allocation4 + $0x50] sm:$0x1] %vm303_vm9, %v10006_v0  ;;  %v10520_v45 = vrot.slane %v528_v30, 7  ;;  %v10531_v48 = vld [vmem:[%s10146_s16 + $0x48] sm:$0xf] }
  0x8d   : > { %3938 = vst.msk [vmem:[#allocation4 + $0x5c] sm:$0x1] %vm303_vm9, %v10006_v0  ;;  %v10541_v55 = vrot.slane %v536_v37, 7  ;;  %v10543_v57 = vld [vmem:[#allocation2 + $0x6c] sm:$0xf]  ;;  %v545_v61 = vshrl.u32 %v10531_v48, 16  ;;  %v10570_v36 = vsel %vm10409_vm10, %v509_v41, %v763_v32 }
  0x8e   : > { %3941 = vst.msk [vmem:[#allocation4 + $0x68] sm:$0x1] %vm303_vm9, %v10006_v0  ;;  %v534_v59 = vrot.slane %v10520_v45, 4  ;;  %v10560_v60 = vld [vmem:[%s10146_s16 + $0x4c] sm:$0xf] }
  0x8f   : > { %3944 = vst.msk [vmem:[#allocation4 + $0x74] sm:$0x1] %vm303_vm9, %v10006_v0  ;;  %v543_v63 = vrot.slane %v10541_v55, 4  ;;  %v10582_v6 = vrot.slane %v545_v61, 7 }
  0x90   : > { %3947 = vst.msk [vmem:[#allocation4 + $0x80] sm:$0x1] %vm303_vm9, %v10006_v0 }
  0x91   : > { %3950 = vst.msk [vmem:[#allocation4 + $0x8c] sm:$0x1] %vm303_vm9, %v10006_v0 }
  0x92   : > { %3953 = vst.msk [vmem:[#allocation4 + $0x98] sm:$0x1] %vm303_vm9, %v10006_v0 }
  0x93   : > { %3956 = vst.msk [vmem:[#allocation4 + $0xa4] sm:$0x1] %vm303_vm9, %v10006_v0 }
  0x94   : > { %3959 = vst.msk [vmem:[#allocation4 + $0xb0] sm:$0x1] %vm303_vm9, %v10006_v0 }
  0x95   : > { %3962 = vst.msk [vmem:[#allocation4 + $0xbc] sm:$0x1] %vm303_vm9, %v10006_v0 }
  0x96   : > { %3965 = vst.msk [vmem:[#allocation4 + $0xc8] sm:$0x1] %vm303_vm9, %v10006_v0 }
  0x97   : > { %3968 = vst.msk [vmem:[#allocation4 + $0xd4] sm:$0x1] %vm303_vm9, %v10006_v0  ;;  %v474_v0 = vsel %vm10310_vm8, %v466_v56, %v473_v3  ;;  %v539_v56 = vshll.u32 %v373_v28, 16  ;;  %vm3610_vm9 = vcmask 1044352  }
  0x98   : > { %723 = vst [vmem:[#allocation2 + $0x14] sm:$0x1] %v722_v39  ;;  %v507_v39 = vor.u32 %v505_v16, %v504_v15 }
  0x99   : > { %733 = vst [vmem:[#allocation2 + $0x24] sm:$0xf] %v732_v34  ;;  %v531_v34 = vshll.u32 %v372_v21, 16  ;;  %v10586_v12 = vor.u32 %v539_v56, %v10541_v55 }
  0x9a   : > { %734 = vst.msk [vmem:[#allocation2 + $0x28] sm:$0xf] %vm300_vm0, %v440_v40  ;;  %v10527_v40 = vor.u32 %v514_v17, %v513_v50  ;;  %v10566_v35 = vsel %vm10310_vm8, %v500_v31, %v507_v39 }
  0x9b   : > { %737 = vst [vmem:[#allocation2 + $0x2c] sm:$0x1] %v736_v44  ;;  %v517_v44 = vrot.slane %v513_v50, 4  ;;  %v551_v50 = vrot.slane %v10582_v6, 4  ;;  %v542_v25 = vsel %vm10310_vm8, %v534_v59, %v10586_v12 }
  0x9c   : > { %741 = vst.msk [vmem:[#allocation2 + $0x34] sm:$0xf] %vm300_vm0, %v457_v51  ;;  %v10539_v51 = vor.u32 %v531_v34, %v10520_v45 }
  0x9d   : > { %744 = vst [vmem:[#allocation2 + $0x38] sm:$0x1] %v10461_v52  ;;  %v10552_v52 = vsel %vm10409_vm10, %v492_v14, %v756_v24  ;;  %v10576_v5 = vsel %vm10310_vm8, %v517_v44, %v524_v47 }
  0x9e   : > { %726 = vst [vmem:[#allocation2 + $0x18] sm:$0xf] %v725_v54  ;;  %v475_v54 = vrot.slane %v10449_v46, 4  ;;  %v774_v14 = vsel %vm10303_vm7, %v10539_v51, %v10543_v57 }
  0x9f   : > { %v898_v62 = vld [vmem:[#allocation2 + $0x14] sm:$0x1]  ;;  %727 = vst.msk [vmem:[#allocation2 + $0x1c] sm:$0xf] %vm300_vm0, %v423_v2  ;;  %v767_v2 = vsel %vm10303_vm7, %v10527_v40, %v10518_v42 }
  0xa0   : > { %v988_v3 = vshll.u32 %v898_v62, 16  ;;  %v902_v4 = vld [vmem:[#allocation2 + $0x24] sm:$0xf]  ;;  %747 = vst [vmem:[#allocation2 + $0x3c] sm:$0xf] %v746_v18 }
  0xa1   : > { %v903_v7 = vld [vmem:[#allocation2 + $0x28] sm:$0xf]  ;;  %v1017_v8 = vshrl.u32 %v902_v4, 16  ;;  %v1020_v11 = vshll.u32 %v902_v4, 16  ;;  %748 = vst.msk [vmem:[#allocation2 + $0x40] sm:$0xf] %vm300_vm0, %v474_v0 }
  0xa2   : > { %v990_v15 = vrot.slane %v988_v3, 5  ;;  %v1026_v16 = vshll.u32 %v903_v7, 16  ;;  %v1030_v17 = vshrl.u32 %v903_v7, 16  ;;  %v904_v18 = vld [vmem:[#allocation2 + $0x2c] sm:$0x1]  ;;  %v553_v0 = vshrl.u32 %v10560_v60, 16 }
  0xa3   : > { %v1019_v20 = vrot.slane %v1017_v8, 4  ;;  %v1022_v21 = vrot.slane %v1020_v11, 5  ;;  %v1036_v23 = vshll.u32 %v904_v18, 16  ;;  %v906_v24 = vld [vmem:[#allocation2 + $0x34] sm:$0xf] }
  0xa4   : > { %v991_v28 = vsel %vm10180_vm3, %v10455_v49, %v990_v15  ;;  %v1028_v30 = vrot.slane %v1026_v16, 5  ;;  %v1032_v31 = vrot.slane %v1030_v17, 4  ;;  %v907_v32 = vld [vmem:[#allocation2 + $0x38] sm:$0x1]  ;;  %v1050_v34 = vshll.u32 %v906_v24, 16 }
  0xa5   : > { %1334 = vrot.lane.b32.xlu1 %v991_v28, %s10007_s12  ;;  %v1023_v37 = vor.u32 %v1022_v21, %v1019_v20  ;;  %v1038_v39 = vrot.slane %v1036_v23, 5  ;;  %v1054_v41 = vshrl.u32 %v906_v24, 16  ;;  %v1060_v44 = vshll.u32 %v907_v32, 16  ;;  %v899_v47 = vld [vmem:[#allocation2 + $0x18] sm:$0xf] }
  0xa6   : > { %v1033_v56 = vor.u32 %v1032_v31, %v1028_v30  ;;  %v10598_v61 = vrot.slane %v1050_v34, 5  ;;  %v900_v62 = vld [vmem:[#allocation2 + $0x1c] sm:$0xf]  ;;  %v993_v3 = vshrl.u32 %v899_v47, 16  ;;  %v996_v4 = vshll.u32 %v899_v47, 16 }
  0xa7   : > { %v1024_v7 = vrot.slane %v1023_v37, 4  ;;  %v1056_v8 = vrot.slane %v1054_v41, 4  ;;  %v10600_v49 = vrot.slane %v1060_v44, 5  ;;  %v1002_v11 = vshll.u32 %v900_v62, 16  ;;  %v908_v15 = vld [vmem:[#allocation2 + $0x3c] sm:$0xf] }
  0xa8   : > { %v1034_v16 = vrot.slane %v1033_v56, 4  ;;  %v995_v17 = vrot.slane %v993_v3, 4  ;;  %v998_v18 = vrot.slane %v996_v4, 5  ;;  %v1006_v20 = vshrl.u32 %v900_v62, 16  ;;  %v909_v21 = vld [vmem:[#allocation2 + $0x40] sm:$0xf] }
  0xa9   : > { %v1029_v23 = vsel %vm10180_vm3, %v1024_v7, %v1028_v30  ;;  %v1057_v24 = vor.u32 %v1056_v8, %v10598_v61  ;;  %v1004_v28 = vrot.slane %v1002_v11, 5  ;;  %v1065_v31 = vshrl.u32 %v908_v15, 16  ;;  %754 = vst [vmem:[#allocation2 + $0x48] sm:$0xf] %v753_v1  ;;  %v749_v30 = vld [vmem:[#allocation2 + $0x44] sm:$0x1] }
  0xaa   : > { %1340 = vrot.lane.b32.xlu0 %v1029_v23, %s10007_s12  ;;  %v1039_v32 = vsel %vm10180_vm3, %v1034_v16, %v1038_v39  ;;  %v999_v34 = vor.u32 %v998_v18, %v995_v17  ;;  %v1008_v37 = vrot.slane %v1006_v20, 4  ;;  %v1068_v41 = vshll.u32 %v908_v15, 16  ;;  %755 = vst.msk [vmem:[#allocation2 + $0x4c] sm:$0xf] %vm300_vm0, %v10536_v53  ;;  %v777_v39 = vld [vmem:[#allocation2 + $0x74] sm:$0x1] }
  0xab   : > { %v1058_v44 = vrot.slane %v1057_v24, 4  ;;  %v1067_v47 = vrot.slane %v1065_v31, 4  ;;  %v1074_v56 = vshll.u32 %v909_v21, 16  ;;  %v1078_v62 = vshrl.u32 %v909_v21, 16  ;;  %730 = vst [vmem:[#allocation2 + $0x20] sm:$0x1] %v10516_v38 }
  0xac   : > { %v1000_v13 = vrot.slane %v999_v34, 4  ;;  %v1070_v19 = vrot.slane %v1068_v41, 5  ;;  %v1009_v1 = vor.u32 %v1008_v37, %v1004_v28  ;;  %758 = vst [vmem:[#allocation2 + $0x50] sm:$0x1] %v10552_v52  ;;  %v555_v3 = vrot.slane %v553_v0, 7 }
  0xad   : > { %1342 = vrot.lane.b32.xlu1 %v1039_v32, %s10007_s12  ;;  %v1063_v53 = vsel %vm10180_vm3, %v1058_v44, %v10600_v49  ;;  %762 = vst.msk [vmem:[#allocation2 + $0x58] sm:$0xf] %vm300_vm0, %v10566_v35  ;;  %v10627_v38 = vsel %vm10409_vm10, %v475_v54, %v749_v30  ;;  %v1080_v4 = vrot.slane %v1078_v62, 4  ;;  %v556_v52 = vshll.u32 %v10560_v60, 16  ;;  %v784_v7 = vld [vmem:[#allocation2 + $0x80] sm:$0x1] }
  0xae   : > { %v1005_v0 = vsel %vm10180_vm3, %v1000_v13, %v1004_v28  ;;  %v1071_v8 = vor.u32 %v1070_v19, %v1067_v47  ;;  %v1076_v11 = vrot.slane %v1074_v56, 5  ;;  %765 = vst [vmem:[#allocation2 + $0x5c] sm:$0x1] %v10570_v36  ;;  %v560_v49 = vrot.slane %v555_v3, 4  ;;  %v10634_v15 = vld [vmem:[%s10146_s16 + $0x50] sm:$0xf] }
  0xaf   : > { %1336 = vrot.lane.b32.xlu2 %v1005_v0, %s10007_s12  ;;  %v1010_v46 = vrot.slane %v1009_v1, 4  ;;  %740 = vst [vmem:[#allocation2 + $0x30] sm:$0xf] %v739_v58  ;;  %v558_v60 = vor.u32 %v556_v52, %v555_v3  ;;  %v497_v35 = vshll.u32 %v10442_v43, 16  ;;  %v562_v54 = vshrl.u32 %v10634_v15, 16 }
  0xb0   : > { %v1072_v16 = vrot.slane %v1071_v8, 4  ;;  %v911_v17 = vld [vmem:[#allocation2 + $0x48] sm:$0xf]  ;;  %768 = vst [vmem:[#allocation2 + $0x60] sm:$0xf] %v767_v2  ;;  %v1081_v33 = vor.u32 %v1080_v4, %v1076_v11  ;;  %v565_v58 = vshll.u32 %v10634_v15, 16  ;;  %v778_v42 = vsel %vm10409_vm10, %v543_v63, %v777_v39 }
  0xb1   : > { %v912_v43 = vld [vmem:[#allocation2 + $0x4c] sm:$0xf]  ;;  %v1089_v36 = vshrl.u32 %v911_v17, 16  ;;  %v1092_v18 = vshll.u32 %v911_v17, 16  ;;  %769 = vst.msk [vmem:[#allocation2 + $0x64] sm:$0xf] %vm300_vm0, %v10576_v5  ;;  %v10663_v45 = vsel %vm10409_vm10, %v560_v49, %v784_v7  ;;  %v499_v55 = vor.u32 %v497_v35, %v10488_v9 }
  0xb2   : > { %v10665_v40 = vld [vmem:[#allocation2 + $0x54] sm:$0xf]  ;;  %1346 = vrot.lane.b32.xlu0 %v1063_v53, %s10007_s12  ;;  %v1077_v59 = vsel %vm10180_vm3, %v1072_v16, %v1076_v11  ;;  %v1098_v2 = vshll.u32 %v912_v43, 16  ;;  %v1102_v12 = vshrl.u32 %v912_v43, 16  ;;  %v901_v20 = vld [vmem:[#allocation2 + $0x20] sm:$0x1]  ;;  %v559_v24 = vsel %vm10310_vm8, %v551_v50, %v558_v60 }
  0xb3   : > { %775 = vst [vmem:[#allocation2 + $0x6c] sm:$0xf] %v774_v14  ;;  %v1091_v63 = vrot.slane %v1089_v36, 4  ;;  %v1094_v5 = vrot.slane %v1092_v18, 5  ;;  %v1012_v21 = vshll.u32 %v901_v20, 16  ;;  %v10680_v37 = vrot.slane %v1081_v33, 4 }
  0xb4   : > { %v913_v23 = vld [vmem:[#allocation2 + $0x50] sm:$0x1]  ;;  %v1100_v28 = vrot.slane %v1098_v2, 5  ;;  %v1104_v31 = vrot.slane %v1102_v12, 4  ;;  %v915_v34 = vld [vmem:[#allocation2 + $0x58] sm:$0xf]  ;;  %v760_v50 = vsel %vm10303_vm7, %v499_v55, %v10665_v40 }
  0xb5   : > { %v1108_v32 = vshll.u32 %v913_v23, 16  ;;  %1348 = vrot.lane.b32.xlu1 %v1077_v59, %s10007_s12  ;;  %v1095_v51 = vor.u32 %v1094_v5, %v1091_v63  ;;  %v1014_v57 = vrot.slane %v1012_v21, 5  ;;  %v916_v9 = vld [vmem:[#allocation2 + $0x5c] sm:$0x1]  ;;  %v1122_v14 = vshll.u32 %v915_v34, 16 }
  0xb6   : > { %v1126_v41 = vshrl.u32 %v915_v34, 16  ;;  %v1105_v30 = vor.u32 %v1104_v31, %v1100_v28  ;;  %v1132_v47 = vshll.u32 %v916_v9, 16  ;;  %v905_v56 = vld [vmem:[#allocation2 + $0x30] sm:$0xf]  ;;  %776 = vst.msk [vmem:[#allocation2 + $0x70] sm:$0xf] %vm300_vm0, %v542_v25 }
  0xb7   : > { %v1110_v44 = vrot.slane %v1108_v32, 5  ;;  %v1096_v62 = vrot.slane %v1095_v51, 4  ;;  %v1015_v13 = vsel %vm10180_vm3, %v1010_v46, %v1014_v57  ;;  %v10689_v19 = vrot.slane %v1122_v14, 5  ;;  %v917_v39 = vld [vmem:[#allocation2 + $0x60] sm:$0xf] }
  0xb8   : > { %v1128_v1 = vrot.slane %v1126_v41, 4  ;;  %1338 = vrot.lane.b32.xlu2 %v1015_v13, %s10007_s12  ;;  %v1106_v3 = vrot.slane %v1105_v30, 4  ;;  %v1134_v53 = vrot.slane %v1132_v47, 5  ;;  %v1041_v4 = vshrl.u32 %v905_v56, 16  ;;  %v10692_v7 = vld [vmem:[#allocation2 + $0x64] sm:$0xf] }
  0xb9   : > { %v1044_v52 = vshll.u32 %v905_v56, 16  ;;  %v10695_v0 = vld [vmem:[%s10146_s16 + $0x54] sm:$0xf]  ;;  %v1101_v8 = vsel %vm10180_vm3, %v1096_v62, %v1100_v28  ;;  %v1137_v49 = vshrl.u32 %v917_v39, 16  ;;  %v1140_v46 = vshll.u32 %v917_v39, 16 }
  0xba   : > { %v1129_v11 = vor.u32 %v1128_v1, %v10689_v19  ;;  %v920_v60 = vld [vmem:[#allocation2 + $0x6c] sm:$0xf]  ;;  %751 = vst [vmem:[#allocation2 + $0x44] sm:$0x1] %v10627_v38  ;;  %1352 = vrot.lane.b32.xlu0 %v1101_v8, %s10007_s12  ;;  %v1111_v35 = vsel %vm10180_vm3, %v1106_v3, %v1110_v44  ;;  %v1043_v16 = vrot.slane %v1041_v4, 4  ;;  %v1146_v25 = vshll.u32 %v10692_v7, 16 }
  0xbb   : > { %v1046_v17 = vrot.slane %v1044_v52, 5  ;;  %779 = vst [vmem:[#allocation2 + $0x74] sm:$0x1] %v778_v42  ;;  %v1139_v43 = vrot.slane %v1137_v49, 4  ;;  %v1142_v36 = vrot.slane %v1140_v46, 5  ;;  %v1150_v18 = vshrl.u32 %v10692_v7, 16 }
  0xbc   : > { %v1130_v33 = vrot.slane %v1129_v11, 4  ;;  %783 = vst.msk [vmem:[#allocation2 + $0x7c] sm:$0xf] %vm300_vm0, %v559_v24  ;;  %v10707_v59 = vrot.slane %v1146_v25, 5  ;;  %v1161_v38 = vshrl.u32 %v920_v60, 16  ;;  %v1164_v2 = vshll.u32 %v920_v60, 16 }
  0xbd   : > { %v1047_v40 = vor.u32 %v1046_v17, %v1043_v16  ;;  %786 = vst [vmem:[#allocation2 + $0x80] sm:$0x1] %v10663_v45  ;;  %1354 = vrot.lane.b32.xlu1 %v1111_v35, %s10007_s12  ;;  %v1143_v12 = vor.u32 %v1142_v36, %v1139_v43  ;;  %v921_v20 = vld [vmem:[#allocation2 + $0x70] sm:$0xf]  ;;  %v564_v55 = vrot.slane %v562_v54, 7  ;;  %v570_v63 = vshrl.u32 %v10695_v0, 16 }
  0xbe   : > { %v1135_v42 = vsel %vm10180_vm3, %v1130_v33, %v1134_v53  ;;  %761 = vst [vmem:[#allocation2 + $0x54] sm:$0xf] %v760_v50  ;;  %v1163_v21 = vrot.slane %v1161_v38, 4  ;;  %v1166_v23 = vrot.slane %v1164_v2, 5  ;;  %v1170_v24 = vshll.u32 %v921_v20, 16 }
  0xbf   : > { %v1048_v5 = vrot.slane %v1047_v40, 4  ;;  %v787_v28 = vld [vmem:[#allocation2 + $0x84] sm:$0xf]  ;;  %v1144_v45 = vrot.slane %v1143_v12, 4  ;;  %v1174_v31 = vshrl.u32 %v921_v20, 16  ;;  %v567_v32 = vor.u32 %v565_v58, %v564_v55 }
  0xc0   : > { %v568_v34 = vrot.slane %v564_v55, 4  ;;  %v378_v51 = vld [vmem:[%s10146_s16 + $0x58] sm:$0xf]  ;;  %v1167_v9 = vor.u32 %v1166_v23, %v1163_v21  ;;  %v1172_v54 = vrot.slane %v1170_v24, 5  ;;  %v10722_v41 = vrot.slane %v570_v63, 7 }
  0xc1   : > { %v1053_v57 = vsel %vm10180_vm3, %v1048_v5, %v10598_v61  ;;  %v910_v14 = vld [vmem:[#allocation2 + $0x44] sm:$0x1]  ;;  %v1149_v30 = vsel %vm10180_vm3, %v1144_v45, %v10707_v59  ;;  %v1176_v58 = vrot.slane %v1174_v31, 4  ;;  %v573_v47 = vshll.u32 %v10695_v0, 16  ;;  %v379_v16 = vld [vmem:[%s10146_s16 + $0x5c] sm:$0xf] }
  0xc2   : > { %1344 = vrot.lane.b32.xlu2 %v1053_v57, %s10007_s12  ;;  %v1084_v44 = vshll.u32 %v910_v14, 16  ;;  %v922_v15 = vld [vmem:[#allocation2 + $0x74] sm:$0x1]  ;;  %1358 = vrot.lane.b32.xlu0 %v1135_v42, %s10007_s12  ;;  %v1168_v56 = vrot.slane %v1167_v9, 4  ;;  %v788_v62 = vsel %vm10303_vm7, %v567_v32, %v787_v28  ;;  %v579_v13 = vshrl.u32 %v378_v51, 16 }
  0xc3   : > { %v1180_v61 = vshll.u32 %v922_v15, 16  ;;  %v924_v50 = vld [vmem:[#allocation2 + $0x7c] sm:$0xf]  ;;  %v1177_v39 = vor.u32 %v1176_v58, %v1172_v54  ;;  %v575_v0 = vor.u32 %v573_v47, %v10722_v41  ;;  %789 = vst [vmem:[#allocation2 + $0x84] sm:$0xf] %v788_v62  ;;  %v582_v2 = vshll.u32 %v378_v51, 16 }
  0xc4   : > { %v1086_v1 = vrot.slane %v1084_v44, 5  ;;  %v925_v3 = vld [vmem:[#allocation2 + $0x80] sm:$0x1]  ;;  %v1194_v53 = vshll.u32 %v924_v50, 16  ;;  %v1198_v4 = vshrl.u32 %v924_v50, 16  ;;  %v1173_v40 = vsel %vm10180_vm3, %v1168_v56, %v1172_v54 }
  0xc5   : > { %v1182_v52 = vrot.slane %v1180_v61, 5  ;;  %v1204_v8 = vshll.u32 %v925_v3, 16  ;;  %v914_v11 = vld [vmem:[#allocation2 + $0x54] sm:$0xf]  ;;  %1360 = vrot.lane.b32.xlu1 %v1149_v30, %s10007_s12  ;;  %v1178_v46 = vrot.slane %v1177_v39, 4  ;;  %v576_v43 = vsel %vm10310_vm8, %v568_v34, %v575_v0 }
  0xc6   : > { %v1087_v49 = vsel %vm10180_vm3, %v10680_v37, %v1086_v1  ;;  %v10737_v60 = vrot.slane %v1194_v53, 5  ;;  %v1200_v35 = vrot.slane %v1198_v4, 4  ;;  %v1113_v25 = vshrl.u32 %v914_v11, 16  ;;  %v794_v36 = vld [vmem:[#allocation2 + $0x90] sm:$0xf] }
  0xc7   : > { %v10740_v17 = vrot.slane %v1204_v8, 5  ;;  %v1116_v33 = vshll.u32 %v914_v11, 16  ;;  %790 = vst.msk [vmem:[#allocation2 + $0x88] sm:$0xf] %vm300_vm0, %v576_v43  ;;  %v581_v38 = vrot.slane %v579_v13, 7  ;;  %v587_v55 = vshrl.u32 %v379_v16, 16 }
  0xc8   : > { %v1201_v37 = vor.u32 %v1200_v35, %v10737_v60  ;;  %v770_v42 = vld [vmem:[#allocation2 + $0x68] sm:$0x1]  ;;  %v1115_v12 = vrot.slane %v1113_v25, 4  ;;  %v590_v63 = vshll.u32 %v379_v16, 16  ;;  %v10749_v5 = vld [vmem:[%s10146_s16 + $0x60] sm:$0xf]  ;;  %v1183_v21 = vsel %vm10180_vm3, %v1178_v46, %v1182_v52 }
  0xc9   : > { %v1118_v20 = vrot.slane %v1116_v33, 5  ;;  %v584_v23 = vor.u32 %v582_v2, %v581_v38  ;;  %v585_v24 = vrot.slane %v581_v38, 4  ;;  %v526_v28 = vrot.slane %v10506_v26, 4  ;;  %v381_v45 = vld [vmem:[%s10146_s16 + $0x64] sm:$0xf] }
  0xca   : > { %1350 = vrot.lane.b32.xlu2 %v1087_v49, %s10007_s12  ;;  %1364 = vrot.lane.b32.xlu0 %v1173_v40, %s10007_s12  ;;  %v589_v32 = vrot.slane %v587_v55, 7  ;;  %v1152_v34 = vrot.slane %v1150_v18, 4  ;;  %v596_v51 = vshrl.u32 %v10749_v5, 16  ;;  %v1202_v57 = vrot.slane %v1201_v37, 4  ;;  %v926_v9 = vld [vmem:[#allocation2 + $0x84] sm:$0xf] }
  0xcb   : > { %v1119_v31 = vor.u32 %v1118_v20, %v1115_v12  ;;  %v795_v54 = vsel %vm10303_vm7, %v584_v23, %v794_v36  ;;  %v771_v14 = vsel %vm10409_vm10, %v526_v28, %v770_v42  ;;  %v798_v30 = vld [vmem:[#allocation2 + $0x98] sm:$0x1]  ;;  %v604_v26 = vshrl.u32 %v381_v45, 16  ;;  %v805_v52 = vld [vmem:[#allocation2 + $0xa4] sm:$0x1] }
  0xcc   : > { %v1209_v15 = vshrl.u32 %v926_v9, 16  ;;  %v1212_v58 = vshll.u32 %v926_v9, 16  ;;  %v592_v47 = vor.u32 %v590_v63, %v589_v32  ;;  %796 = vst [vmem:[#allocation2 + $0x90] sm:$0xf] %v795_v54  ;;  %v1153_v7 = vor.u32 %v1152_v34, %v10707_v59  ;;  %v382_v3 = vld [vmem:[%s10146_s16 + $0x68] sm:$0xf] }
  0xcd   : > { %v1120_v44 = vrot.slane %v1119_v31, 4  ;;  %1366 = vrot.lane.b32.xlu1 %v1183_v21, %s10007_s12  ;;  %772 = vst [vmem:[#allocation2 + $0x68] sm:$0x1] %v771_v14  ;;  %v594_v18 = vrot.slane %v589_v32, 4  ;;  %v10766_v56 = vrot.slane %v596_v51, 7  ;;  %v606_v61 = vrot.slane %v604_v26, 7 }
  0xce   : > { %v10771_v62 = vld [vmem:[#allocation2 + $0x88] sm:$0xf]  ;;  %v1211_v13 = vrot.slane %v1209_v15, 4  ;;  %v1214_v1 = vrot.slane %v1212_v58, 5  ;;  %v593_v39 = vsel %vm10310_vm8, %v585_v24, %v592_v47  ;;  %v1207_v59 = vsel %vm10180_vm3, %v1202_v57, %v10740_v17  ;;  %v383_v16 = vld [vmem:[%s10146_s16 + $0x6c] sm:$0xf] }
  0xcf   : > { %v1125_v50 = vsel %vm10180_vm3, %v1120_v44, %v10689_v19  ;;  %v1218_v53 = vshll.u32 %v10771_v62, 16  ;;  %797 = vst.msk [vmem:[#allocation2 + $0x94] sm:$0xf] %vm300_vm0, %v593_v39  ;;  %v1154_v4 = vrot.slane %v1153_v7, 4  ;;  %v799_v19 = vsel %vm10409_vm10, %v594_v18, %v798_v30  ;;  %v780_v40 = vld [vmem:[#allocation2 + $0x78] sm:$0xf] }
  0xd0   : > { %v1215_v8 = vor.u32 %v1214_v1, %v1211_v13  ;;  %800 = vst [vmem:[#allocation2 + $0x98] sm:$0x1] %v799_v19  ;;  %v602_v11 = vrot.slane %v10766_v56, 4  ;;  %v607_v0 = vshll.u32 %v381_v45, 16  ;;  %v611_v49 = vrot.slane %v606_v61, 4 }
  0xd1   : > { %v10785_v46 = vrot.slane %v1218_v53, 5  ;;  %v548_v35 = vshll.u32 %v10531_v48, 16  ;;  %v613_v17 = vshrl.u32 %v382_v3, 16  ;;  %v616_v25 = vshll.u32 %v382_v3, 16  ;;  %v808_v23 = vld [vmem:[#allocation2 + $0xa8] sm:$0xf] }
  0xd2   : > { %1356 = vrot.lane.b32.xlu2 %v1125_v50, %s10007_s12  ;;  %1370 = vrot.lane.b32.xlu0 %v1207_v59, %s10007_s12  ;;  %v1216_v33 = vrot.slane %v1215_v8, 4  ;;  %v609_v43 = vor.u32 %v607_v0, %v606_v61  ;;  %v806_v36 = vsel %vm10409_vm10, %v611_v49, %v805_v52  ;;  %v621_v37 = vshrl.u32 %v383_v16, 16  ;;  %v384_v31 = vld [vmem:[%s10146_s16 + $0x70] sm:$0xf]  ;;  %v385_v58 = vld [vmem:[%s10146_s16 + $0x74] sm:$0xf] }
  0xd3   : > { %v929_v38 = vld [vmem:[#allocation2 + $0x90] sm:$0xf]  ;;  %807 = vst [vmem:[#allocation2 + $0xa4] sm:$0x1] %v806_v36  ;;  %v550_v2 = vor.u32 %v548_v35, %v10582_v6  ;;  %v615_v42 = vrot.slane %v613_v17, 7  ;;  %v624_v12 = vshll.u32 %v383_v16, 16 }
  0xd4   : > { %v1221_v48 = vsel %vm10180_vm3, %v1216_v33, %v10785_v46  ;;  %v1233_v20 = vshrl.u32 %v929_v38, 16  ;;  %v1236_v55 = vshll.u32 %v929_v38, 16  ;;  %v919_v63 = vld [vmem:[#allocation2 + $0x68] sm:$0x1]  ;;  %v610_v21 = vsel %vm10310_vm8, %v602_v11, %v609_v43  ;;  %v815_v11 = vld [vmem:[#allocation2 + $0xb4] sm:$0xf] }
  0xd5   : > { %1372 = vrot.lane.b32.xlu1 %v1221_v48, %s10007_s12  ;;  %v1156_v24 = vshll.u32 %v919_v63, 16  ;;  %804 = vst.msk [vmem:[#allocation2 + $0xa0] sm:$0xf] %vm300_vm0, %v610_v21  ;;  %v781_v6 = vsel %vm10303_vm7, %v550_v2, %v780_v40  ;;  %v618_v28 = vor.u32 %v616_v25, %v615_v42  ;;  %v619_v45 = vrot.slane %v615_v42, 4  ;;  %v791_v2 = vld [vmem:[#allocation2 + $0x8c] sm:$0x1] }
  0xd6   : > { %v930_v32 = vld [vmem:[#allocation2 + $0x94] sm:$0xf]  ;;  %v1235_v34 = vrot.slane %v1233_v20, 4  ;;  %v1238_v51 = vrot.slane %v1236_v55, 5  ;;  %782 = vst [vmem:[#allocation2 + $0x78] sm:$0xf] %v781_v6 }
  0xd7   : > { %v1242_v57 = vshll.u32 %v930_v32, 16  ;;  %v1246_v9 = vshrl.u32 %v930_v32, 16  ;;  %v1158_v54 = vrot.slane %v1156_v24, 5  ;;  %v931_v14 = vld [vmem:[#allocation2 + $0x98] sm:$0x1]  ;;  %v10803_v30 = vrot.slane %v621_v37, 7 }
  0xd8   : > { %v1239_v26 = vor.u32 %v1238_v51, %v1235_v34  ;;  %v1252_v44 = vshll.u32 %v931_v14, 16  ;;  %v809_v15 = vsel %vm10303_vm7, %v618_v28, %v808_v23  ;;  %v630_v47 = vshrl.u32 %v384_v31, 16 }
  0xd9   : > { %v1244_v7 = vrot.slane %v1242_v57, 5  ;;  %v1159_v18 = vsel %vm10180_vm3, %v1154_v4, %v1158_v54  ;;  %v1248_v61 = vrot.slane %v1246_v9, 4  ;;  %v626_v50 = vor.u32 %v624_v12, %v10803_v30  ;;  %810 = vst [vmem:[#allocation2 + $0xa8] sm:$0xf] %v809_v15  ;;  %v819_v57 = vld [vmem:[#allocation2 + $0xbc] sm:$0x1] }
  0xda   : > { %v1222_v13 = vshrl.u32 %v10771_v62, 16  ;;  %v1240_v1 = vrot.slane %v1239_v26, 4  ;;  %1362 = vrot.lane.b32.xlu2 %v1159_v18, %s10007_s12  ;;  %v934_v39 = vld [vmem:[#allocation2 + $0xa4] sm:$0x1]  ;;  %v632_v3 = vrot.slane %v630_v47, 7  ;;  %v633_v59 = vshll.u32 %v384_v31, 16 }
  0xdb   : > { %v1249_v53 = vor.u32 %v1248_v61, %v1244_v7  ;;  %v1254_v19 = vrot.slane %v1252_v44, 5  ;;  %v627_v52 = vsel %vm10310_vm8, %v619_v45, %v626_v50  ;;  %v638_v8 = vshrl.u32 %v385_v58, 16 }
  0xdc   : > { %v1245_v4 = vsel %vm10180_vm3, %v1240_v1, %v1244_v7  ;;  %v933_v0 = vld [vmem:[#allocation2 + $0xa0] sm:$0xf]  ;;  %v1276_v49 = vshll.u32 %v934_v39, 16  ;;  %811 = vst.msk [vmem:[#allocation2 + $0xac] sm:$0xf] %vm300_vm0, %v627_v52  ;;  %v635_v62 = vor.u32 %v633_v59, %v632_v3  ;;  %v641_v35 = vshll.u32 %v385_v58, 16 }
  0xdd   : > { %1376 = vrot.lane.b32.xlu0 %v1245_v4, %s10007_s12  ;;  %v1250_v16 = vrot.slane %v1249_v53, 4  ;;  %v1266_v17 = vshll.u32 %v933_v0, 16  ;;  %v1270_v25 = vshrl.u32 %v933_v0, 16  ;;  %v923_v33 = vld [vmem:[#allocation2 + $0x78] sm:$0xf]  ;;  %v636_v43 = vrot.slane %v632_v3, 4 }
  0xde   : > { %v1185_v36 = vshrl.u32 %v923_v33, 16  ;;  %v1188_v40 = vshll.u32 %v923_v33, 16  ;;  %v640_v37 = vrot.slane %v638_v8, 7  ;;  %v816_v38 = vsel %vm10303_vm7, %v635_v62, %v815_v11  ;;  %v801_v8 = vld [vmem:[#allocation2 + $0x9c] sm:$0xf] }
  0xdf   : > { %v1255_v42 = vsel %vm10180_vm3, %v1250_v16, %v1254_v19  ;;  %v10823_v12 = vrot.slane %v1266_v17, 5  ;;  %v1272_v48 = vrot.slane %v1270_v25, 4  ;;  %817 = vst [vmem:[#allocation2 + $0xb4] sm:$0xf] %v816_v38  ;;  %v577_v20 = vrot.slane %v10722_v41, 4 }
  0xe0   : > { %1378 = vrot.lane.b32.xlu1 %v1255_v42, %s10007_s12  ;;  %v1278_v55 = vrot.slane %v1276_v49, 5  ;;  %v1187_v63 = vrot.slane %v1185_v36, 4  ;;  %v1190_v21 = vrot.slane %v1188_v40, 5  ;;  %v935_v23 = vld [vmem:[#allocation2 + $0xa8] sm:$0xf]  ;;  %v643_v24 = vor.u32 %v641_v35, %v640_v37 }
  0xe1   : > { %v1273_v6 = vor.u32 %v1272_v48, %v10823_v12  ;;  %v1281_v28 = vshrl.u32 %v935_v23, 16  ;;  %v1284_v45 = vshll.u32 %v935_v23, 16  ;;  %v792_v31 = vsel %vm10409_vm10, %v577_v20, %v791_v2  ;;  %v10853_v4 = vld [vmem:[#allocation2 + $0x4] sm:$0xf]  ;;  %v812_v49 = vld [vmem:[#allocation2 + $0xb0] sm:$0x1] }
  0xe2   : > { %v1191_v32 = vor.u32 %v1190_v21, %v1187_v63  ;;  %v644_v34 = vsel %vm10310_vm8, %v636_v43, %v643_v24  ;;  %793 = vst [vmem:[#allocation2 + $0x8c] sm:$0x1] %v792_v31  ;;  %v1224_v41 = vrot.slane %v1222_v13, 4  ;;  %v645_v51 = vrot.slane %v640_v37, 4  ;;  %v1459_v42 = vld [vmem:[#allocation2 + $0x8] sm:$0x1] }
  0xe3   : > { %v1274_v9 = vrot.slane %v1273_v6, 4  ;;  %v10832_v54 = vld [vmem:[#allocation2 + $0xac] sm:$0xf]  ;;  %v1283_v14 = vrot.slane %v1281_v28, 4  ;;  %v1286_v26 = vrot.slane %v1284_v45, 5  ;;  %v599_v59 = vshll.u32 %v10749_v5, 16 }
  0xe4   : > { %v1192_v44 = vrot.slane %v1191_v32, 4  ;;  %v1290_v15 = vshll.u32 %v10832_v54, 16  ;;  %818 = vst.msk [vmem:[#allocation2 + $0xb8] sm:$0xf] %vm300_vm0, %v644_v34  ;;  %v820_v7 = vsel %vm10409_vm10, %v645_v51, %v819_v57  ;;  %v1225_v13 = vor.u32 %v1224_v41, %v10785_v46  ;;  %v1460_v63 = vld [vmem:[#allocation2 + $0xc] sm:$0xe] }
  0xe5   : > { %v1279_v58 = vsel %vm10180_vm3, %v1274_v9, %v1278_v55  ;;  %v1287_v47 = vor.u32 %v1286_v26, %v1283_v14  ;;  %821 = vst [vmem:[#allocation2 + $0xbc] sm:$0x1] %v820_v7  ;;  %v601_v0 = vor.u32 %v599_v59, %v10766_v56  ;;  %v628_v5 = vrot.slane %v10803_v30, 4  ;;  %v10871_v28 = vld [vmem:[#allocation2 + $0x10] sm:$0xf] }
  0xe6   : > { %1382 = vrot.lane.b32.xlu0 %v1279_v58, %s10007_s12  ;;  %v1197_v18 = vsel %vm10180_vm3, %v1192_v44, %v10737_v60  ;;  %v10844_v61 = vrot.slane %v1290_v15, 5  ;;  %v938_v50 = vld [vmem:[#allocation2 + $0xb4] sm:$0xf]  ;;  %v1226_v11 = vrot.slane %v1225_v13, 4  ;;  %v1558_v40 = vrot.slane %v10853_v4, 5  ;;  %v1329_v44 = vpop.permute.xlu0 %1328 }
  0xe7   : > { %1368 = vrot.lane.b32.xlu2 %v1197_v18, %s10007_s12  ;;  %v1288_v1 = vrot.slane %v1287_v47, 4  ;;  %v1305_v39 = vshrl.u32 %v938_v50, 16  ;;  %v1308_v3 = vshll.u32 %v938_v50, 16  ;;  %v802_v33 = vsel %vm10303_vm7, %v601_v0, %v801_v8  ;;  %v1463_v9 = vld [vmem:[#allocation2 + $0x18] sm:$0xe] }
  0xe8   : > { %803 = vst [vmem:[#allocation2 + $0x9c] sm:$0xf] %v802_v33  ;;  %v813_v37 = vsel %vm10409_vm10, %v628_v5, %v812_v49  ;;  %v1294_v21 = vshrl.u32 %v10832_v54, 16  ;;  %v1560_v24 = vrot.slane %v1558_v40, 4  ;;  %v1561_v6 = vrot.slane %v1459_v42, 5 }
  0xe9   : > { %v1293_v53 = vsel %vm10180_vm3, %v1288_v1, %v10844_v61  ;;  %v1307_v19 = vrot.slane %v1305_v39, 4  ;;  %v1310_v52 = vrot.slane %v1308_v3, 5  ;;  %v928_v60 = vld [vmem:[#allocation2 + $0x8c] sm:$0x1]  ;;  %814 = vst [vmem:[#allocation2 + $0xb0] sm:$0x1] %v813_v37 }
  0xea   : > { %1384 = vrot.lane.b32.xlu1 %v1293_v53, %s10007_s12  ;;  %v1228_v46 = vshll.u32 %v928_v60, 16  ;;  %v9090_v51 = vrot.slane %v1460_v63, 9  ;;  %v1565_v57 = vrot.slane %v10871_v28, 5  ;;  %v1464_v54 = vld [vmem:[#allocation2 + $0x1c] sm:$0xf]  ;;  %v1562_v14 = vsel %vm10873_vm13, %v1560_v24, %v1561_v6 }
  0xeb   : > { %v939_v62 = vld [vmem:[#allocation2 + $0xb8] sm:$0xf]  ;;  %v1311_v35 = vor.u32 %v1310_v52, %v1307_v19  ;;  %v1296_v26 = vrot.slane %v1294_v21, 4  ;;  %v829_v15 = vld [vmem:[#allocation2] sm:$0xf]  ;;  %v1572_v39 = vrot.slane %v1464_v54, 5 }
  0xec   : > { %v1314_v16 = vshll.u32 %v939_v62, 16  ;;  %v1318_v17 = vshrl.u32 %v939_v62, 16  ;;  %v1230_v25 = vrot.slane %v1228_v46, 5  ;;  %v940_v36 = vld [vmem:[#allocation2 + $0xbc] sm:$0x1]  ;;  %v1566_v3 = vsel %vm10873_vm13, %v9090_v51, %v1565_v57 }
  0xed   : > { %v1312_v43 = vrot.slane %v1311_v35, 4  ;;  %v1324_v30 = vshll.u32 %v940_v36, 16  ;;  %v833_v58 = vld [vmem:[#allocation2 + $0x18] sm:$0xf]  ;;  %861 = vst.msk [vmem:[#allocation3] sm:$0xf] %vm300_vm0, %v829_v15  ;;  %v1297_v52 = vor.u32 %v1296_v26, %v10844_v61 }
  0xee   : > { %v1316_v56 = vrot.slane %v1314_v16, 5  ;;  %v1231_v38 = vsel %vm10180_vm3, %v1226_v11, %v1230_v25  ;;  %v1320_v2 = vrot.slane %v1318_v17, 4  ;;  %v831_v18 = vld [vmem:[#allocation2 + $0xc] sm:$0xf]  ;;  %1425 = vst.msk [vmem:[#allocation3] sm:$0xf] %vm1424_vm14, %v1329_v44 }
  0xef   : > { %1374 = vrot.lane.b32.xlu2 %v1231_v38, %s10007_s12  ;;  %v1326_v55 = vrot.slane %v1324_v30, 5  ;;  %v932_v32 = vld [vmem:[#allocation2 + $0x9c] sm:$0xf]  ;;  %865 = vst.msk [vmem:[#allocation3 + $0x20] sm:$0xf] %vm300_vm0, %v833_v58  ;;  %v9091_v59 = vrot.slane %v1463_v9, 9 }
  0xf0   : > { %v1317_v48 = vsel %vm10180_vm3, %v1312_v43, %v1316_v56  ;;  %v1321_v20 = vor.u32 %v1320_v2, %v1316_v56  ;;  %v1257_v34 = vshrl.u32 %v932_v32, 16  ;;  %v1260_v41 = vshll.u32 %v932_v32, 16  ;;  %v937_v50 = vld [vmem:[#allocation2 + $0xb0] sm:$0x1]  ;;  %v1465_v53 = vld [vmem:[#allocation2 + $0x20] sm:$0x1] }
  0xf1   : > { %1388 = vrot.lane.b32.xlu0 %v1317_v48, %s10007_s12  ;;  %863 = vst.msk [vmem:[#allocation3 + $0x10] sm:$0xf] %vm300_vm0, %v831_v18  ;;  %v1300_v60 = vshll.u32 %v937_v50, 16  ;;  %v10893_v8 = vld [vmem:[#allocation2 + $0x28] sm:$0xf]  ;;  %v1574_v46 = vrot.slane %v1572_v39, 4  ;;  %v1573_v49 = vsel %vm10873_vm13, %v9091_v59, %v1572_v39 }
  0xf2   : > { %v1322_v23 = vrot.slane %v1321_v20, 4  ;;  %v1259_v47 = vrot.slane %v1257_v34, 4  ;;  %v1262_v7 = vrot.slane %v1260_v41, 5  ;;  %v1468_v0 = vld [vmem:[#allocation2 + $0x2c] sm:$0x1]  ;;  %v1575_v62 = vrot.slane %v1465_v53, 5 }
  0xf3   : > { %v1579_v61 = vrot.slane %v10893_v8, 5  ;;  %v830_v35 = vld [vmem:[#allocation2 + $0x4] sm:$0xf]  ;;  %v834_v5 = vld [vmem:[#allocation2 + $0x1c] sm:$0xf]  ;;  %v1298_v16 = vrot.slane %v1297_v52, 4  ;;  %v1331_v25 = vpop.permute.xlu0 %1330 }
  0xf4   : > { %v1327_v31 = vsel %vm10180_vm3, %v1322_v23, %v1326_v55  ;;  %v1263_v1 = vor.u32 %v1262_v7, %v1259_v47  ;;  %v1302_v17 = vrot.slane %v1300_v60, 5  ;;  %862 = vst.msk [vmem:[#allocation3 + $0x8] sm:$0xf] %vm300_vm0, %v830_v35  ;;  %v1469_v33 = vld [vmem:[#allocation2 + $0x30] sm:$0xe]  ;;  %v1576_v43 = vsel %vm10873_vm13, %v1574_v46, %v1575_v62 }
  0xf5   : > { %1390 = vrot.lane.b32.xlu1 %v1327_v31, %s10007_s12  ;;  %v1333_v13 = vpop.permute.xlu1 %1332  ;;  %1426 = vst.msk [vmem:[#allocation3 + $0x8] sm:$0xf] %vm1424_vm14, %v1331_v25  ;;  %v1581_v36 = vrot.slane %v1579_v61, 4  ;;  %v1582_v37 = vrot.slane %v1468_v0, 5  ;;  %v10912_v56 = vld [vmem:[#allocation2 + $0x34] sm:$0xf] }
  0xf6   : > { %v1264_v19 = vrot.slane %v1263_v1, 4  ;;  %1427 = vst.msk [vmem:[#allocation3 + $0x10] sm:$0xf] %vm1424_vm14, %v1333_v13  ;;  %v1303_v38 = vsel %vm10180_vm3, %v1298_v16, %v1302_v17  ;;  %v1457_v2 = vld [vmem:[#allocation2] sm:$0xe]  ;;  %v9093_v30 = vrot.slane %v1469_v33, 9 }
  0xf7   : > { %866 = vst.msk [vmem:[#allocation3 + $0x28] sm:$0xf] %vm300_vm0, %v834_v5  ;;  %v1586_v42 = vrot.slane %v10912_v56, 5  ;;  %v1473_v48 = vld [vmem:[#allocation2 + $0x40] sm:$0xf]  ;;  %v1583_v20 = vsel %vm10873_vm13, %v1581_v36, %v1582_v37  ;;  %v9089_v23 = vrot.slane %v1457_v2, 9 }
  0xf8   : > { %v1269_v11 = vsel %vm10180_vm3, %v1264_v19, %v10823_v12  ;;  %v832_v12 = vld [vmem:[#allocation2 + $0x10] sm:$0xf]  ;;  %v835_v55 = vld [vmem:[#allocation2 + $0x24] sm:$0xf]  ;;  %v836_v21 = vld [vmem:[#allocation2 + $0x28] sm:$0xf] }
  0xf9   : > { %1670 = vrot.lane.b32.xlu0 %v1562_v14, %s10008_s21  ;;  %1380 = vrot.lane.b32.xlu2 %v1269_v11, %s10007_s12  ;;  %864 = vst.msk [vmem:[#allocation3 + $0x18] sm:$0xf] %vm300_vm0, %v832_v12  ;;  %v837_v63 = vld [vmem:[#allocation2 + $0x30] sm:$0xf]  ;;  %v1472_v24 = vld [vmem:[#allocation2 + $0x3c] sm:$0xe]  ;;  %v1587_v34 = vsel %vm10873_vm13, %v9093_v30, %v1586_v42  ;;  %v1559_v9 = vsel %vm10873_vm13, %v9089_v23, %v1558_v40 }
  0xfa   : > { %867 = vst.msk [vmem:[#allocation3 + $0x30] sm:$0xf] %vm300_vm0, %v835_v55  ;;  %v1593_v6 = vrot.slane %v1473_v48, 5  ;;  %v1474_v31 = vld [vmem:[#allocation2 + $0x44] sm:$0x1]  ;;  %v9094_v41 = vrot.slane %v1472_v24, 9 }
  0xfb   : > { %869 = vst.msk [vmem:[#allocation3 + $0x40] sm:$0xf] %vm300_vm0, %v837_v63  ;;  %v10931_v51 = vld [vmem:[#allocation2 + $0x4c] sm:$0xf]  ;;  %v1462_v54 = vld [vmem:[#allocation2 + $0x14] sm:$0x1] }
  0xfc   : > { %868 = vst.msk [vmem:[#allocation3 + $0x38] sm:$0xf] %vm300_vm0, %v836_v21  ;;  %v1595_v14 = vrot.slane %v1593_v6, 4  ;;  %v1596_v26 = vrot.slane %v1474_v31, 5  ;;  %v1600_v44 = vrot.slane %v10931_v51, 5  ;;  %v1594_v15 = vsel %vm10873_vm13, %v9094_v41, %v1593_v6 }
  0xfd   : > { %1672 = vrot.lane.b32.xlu1 %v1566_v3, %s10008_s21  ;;  %v838_v58 = vld [vmem:[#allocation2 + $0x34] sm:$0xf]  ;;  %v840_v47 = vld [vmem:[#allocation2 + $0x40] sm:$0xf]  ;;  %v839_v7 = vld [vmem:[#allocation2 + $0x3c] sm:$0xf] }
  0xfe   : > { %v1567_v4 = vrot.slane %v1565_v57, 4  ;;  %v1568_v18 = vrot.slane %v1462_v54, 5  ;;  %v1477_v40 = vld [vmem:[#allocation2 + $0x50] sm:$0x1]  ;;  %870 = vst.msk [vmem:[#allocation3 + $0x48] sm:$0xf] %vm300_vm0, %v838_v58  ;;  %v1597_v13 = vsel %vm10873_vm13, %v1595_v14, %v1596_v26 }
  0xff   : > { %872 = vst.msk [vmem:[#allocation3 + $0x58] sm:$0xf] %vm300_vm0, %v840_v47  ;;  %v1478_v50 = vld [vmem:[#allocation2 + $0x54] sm:$0xe]  ;;  %v1602_v1 = vrot.slane %v1600_v44, 4  ;;  %v1603_v39 = vrot.slane %v1477_v40, 5 }
 0x100   : > { %871 = vst.msk [vmem:[#allocation3 + $0x50] sm:$0xf] %vm300_vm0, %v839_v7  ;;  %v10952_v28 = vld [vmem:[#allocation2 + $0x58] sm:$0xf]  ;;  %v1466_v57 = vld [vmem:[#allocation2 + $0x24] sm:$0xe]  ;;  %v1569_v59 = vsel %vm10873_vm13, %v1567_v4, %v1568_v18 }
 0x101   : > { %1676 = vrot.lane.b32.xlu0 %v1573_v49, %s10008_s21  ;;  %1386 = vrot.lane.b32.xlu2 %v1303_v38, %s10007_s12  ;;  %v9096_v53 = vrot.slane %v1478_v50, 9  ;;  %v1607_v19 = vrot.slane %v10952_v28, 5  ;;  %v9092_v52 = vrot.slane %v1466_v57, 9  ;;  %v1604_v60 = vsel %vm10873_vm13, %v1602_v1, %v1603_v39  ;;  %v1482_v11 = vld [vmem:[#allocation2 + $0x64] sm:$0xf] }
 0x102   : > { %v841_v46 = vld [vmem:[#allocation2 + $0x48] sm:$0xf]  ;;  %v843_v0 = vld [vmem:[#allocation2 + $0x54] sm:$0xf]  ;;  %v1481_v62 = vld [vmem:[#allocation2 + $0x60] sm:$0xe] }
 0x103   : > { %873 = vst.msk [vmem:[#allocation3 + $0x60] sm:$0xf] %vm300_vm0, %v841_v46  ;;  %v842_v35 = vld [vmem:[#allocation2 + $0x4c] sm:$0xf]  ;;  %v1614_v5 = vrot.slane %v1482_v11, 5  ;;  %v1608_v16 = vsel %vm10873_vm13, %v9096_v53, %v1607_v19  ;;  %v9097_v17 = vrot.slane %v1481_v62, 9  ;;  %v1580_v12 = vsel %vm10873_vm13, %v9092_v52, %v1579_v61 }
 0x104   : > { %875 = vst.msk [vmem:[#allocation3 + $0x70] sm:$0xf] %vm300_vm0, %v843_v0  ;;  %v1483_v25 = vld [vmem:[#allocation2 + $0x68] sm:$0x1]  ;;  %v1471_v33 = vld [vmem:[#allocation2 + $0x38] sm:$0x1] }
 0x105   : > { %1678 = vrot.lane.b32.xlu1 %v1576_v43, %s10008_s21  ;;  %874 = vst.msk [vmem:[#allocation3 + $0x68] sm:$0xf] %vm300_vm0, %v842_v35  ;;  %v10975_v36 = vld [vmem:[#allocation2 + $0x70] sm:$0xf]  ;;  %v1616_v38 = vrot.slane %v1614_v5, 4  ;;  %v1617_v2 = vrot.slane %v1483_v25, 5  ;;  %v1615_v8 = vsel %vm10873_vm13, %v9097_v17, %v1614_v5 }
 0x106   : > { %v1588_v30 = vrot.slane %v1586_v42, 4  ;;  %v1589_v61 = vrot.slane %v1471_v33, 5  ;;  %v1621_v48 = vrot.slane %v10975_v36, 5  ;;  %v846_v55 = vld [vmem:[#allocation2 + $0x64] sm:$0xf]  ;;  %v1609_v46 = vrot.slane %v1607_v19, 4 }
 0x107   : > { %v1486_v21 = vld [vmem:[#allocation2 + $0x74] sm:$0x1]  ;;  %v845_v23 = vld [vmem:[#allocation2 + $0x60] sm:$0xf]  ;;  %v1487_v56 = vld [vmem:[#allocation2 + $0x78] sm:$0xe]  ;;  %v1618_v24 = vsel %vm10873_vm13, %v1616_v38, %v1617_v2 }
 0x108   : > { %v10989_v42 = vld [vmem:[#allocation2 + $0x7c] sm:$0xf]  ;;  %878 = vst.msk [vmem:[#allocation3 + $0x88] sm:$0xf] %vm300_vm0, %v846_v55  ;;  %v1623_v6 = vrot.slane %v1621_v48, 4  ;;  %v1624_v31 = vrot.slane %v1486_v21, 5 }
 0x109   : > { %1682 = vrot.lane.b32.xlu0 %v1583_v20, %s10008_s21  ;;  %v1337_v32 = vpop.permute.xlu2 %1336  ;;  %1668 = vrot.lane.b32.xlu2 %v1559_v9, %s10008_s21  ;;  %v844_v20 = vld [vmem:[#allocation2 + $0x58] sm:$0xf]  ;;  %877 = vst.msk [vmem:[#allocation3 + $0x80] sm:$0xf] %vm300_vm0, %v845_v23  ;;  %v9099_v54 = vrot.slane %v1487_v56, 9  ;;  %v1628_v14 = vrot.slane %v10989_v42, 5 }
 0x10a   : > { %1429 = vst.msk [vmem:[#allocation3 + $0x20] sm:$0xf] %vm1424_vm14, %v1337_v32  ;;  %v1475_v32 = vld [vmem:[#allocation2 + $0x48] sm:$0xe]  ;;  %v847_v47 = vld [vmem:[#allocation2 + $0x6c] sm:$0xf] }
 0x10b   : > { %876 = vst.msk [vmem:[#allocation3 + $0x78] sm:$0xf] %vm300_vm0, %v844_v20  ;;  %v9095_v26 = vrot.slane %v1475_v32, 9  ;;  %v1491_v58 = vld [vmem:[#allocation2 + $0x88] sm:$0xf] }
 0x10c   : > { %v849_v7 = vld [vmem:[#allocation2 + $0x78] sm:$0xf]  ;;  %v1490_v18 = vld [vmem:[#allocation2 + $0x84] sm:$0xe]  ;;  %879 = vst.msk [vmem:[#allocation3 + $0x90] sm:$0xf] %vm300_vm0, %v847_v47 }
 0x10d   : > { %1684 = vrot.lane.b32.xlu1 %v1587_v34, %s10008_s21  ;;  %v1590_v34 = vsel %vm10873_vm13, %v1588_v30, %v1589_v61  ;;  %v848_v40 = vld [vmem:[#allocation2 + $0x70] sm:$0xf]  ;;  %v1635_v50 = vrot.slane %v1491_v58, 5  ;;  %881 = vst.msk [vmem:[#allocation3 + $0xa0] sm:$0xf] %vm300_vm0, %v849_v7  ;;  %v9100_v1 = vrot.slane %v1490_v18, 9  ;;  %v1601_v57 = vsel %vm10873_vm13, %v9095_v26, %v1600_v44 }
 0x10e   : > { %v1492_v39 = vld [vmem:[#allocation2 + $0x8c] sm:$0x1]  ;;  %880 = vst.msk [vmem:[#allocation3 + $0x98] sm:$0xf] %vm300_vm0, %v848_v40  ;;  %v11019_v53 = vld [vmem:[#allocation2 + $0x94] sm:$0xf] }
 0x10f   : > { %v1638_v11 = vrot.slane %v1492_v39, 5  ;;  %v1636_v51 = vsel %vm10873_vm13, %v9100_v1, %v1635_v50  ;;  %v1642_v0 = vrot.slane %v11019_v53, 5  ;;  %v852_v62 = vld [vmem:[#allocation2 + $0x88] sm:$0xf]  ;;  %v1495_v5 = vld [vmem:[#allocation2 + $0x98] sm:$0x1] }
 0x110   : > { %v1496_v28 = vld [vmem:[#allocation2 + $0x9c] sm:$0xe]  ;;  %v11033_v19 = vld [vmem:[#allocation2 + $0xa0] sm:$0xf]  ;;  %884 = vst.msk [vmem:[#allocation3 + $0xb8] sm:$0xf] %vm300_vm0, %v852_v62 }
 0x111   : > { %1688 = vrot.lane.b32.xlu0 %v1594_v15, %s10008_s21  ;;  %1674 = vrot.lane.b32.xlu2 %v1569_v59, %s10008_s21  ;;  %v1625_v15 = vsel %vm10873_vm13, %v1623_v6, %v1624_v31  ;;  %v1644_v25 = vrot.slane %v1642_v0, 4  ;;  %v1484_v33 = vld [vmem:[#allocation2 + $0x6c] sm:$0xe]  ;;  %v1649_v2 = vrot.slane %v11033_v19, 5  ;;  %v853_v55 = vld [vmem:[#allocation2 + $0x90] sm:$0xf] }
 0x112   : > { %v1339_v3 = vpop.permute.xlu2 %1338  ;;  %v9098_v30 = vrot.slane %v1484_v33, 9  ;;  %v1500_v61 = vld [vmem:[#allocation2 + $0xac] sm:$0xf]  ;;  %v1499_v23 = vld [vmem:[#allocation2 + $0xa8] sm:$0xe]  ;;  %v1630_v7 = vrot.slane %v1628_v14, 4 }
 0x113   : > { %1430 = vst.msk [vmem:[#allocation3 + $0x28] sm:$0xf] %vm1424_vm14, %v1339_v3  ;;  %v1480_v3 = vld [vmem:[#allocation2 + $0x5c] sm:$0x1]  ;;  %v854_v56 = vld [vmem:[#allocation2 + $0x94] sm:$0xf] }
 0x114   : > { %v1610_v44 = vrot.slane %v1480_v3, 5  ;;  %885 = vst.msk [vmem:[#allocation3 + $0xc0] sm:$0xf] %vm300_vm0, %v853_v55  ;;  %v9103_v31 = vrot.slane %v1499_v23, 9  ;;  %v1622_v32 = vsel %vm10873_vm13, %v9098_v30, %v1621_v48  ;;  %v856_v47 = vld [vmem:[#allocation2 + $0xa0] sm:$0xf] }
 0x115   : > { %1690 = vrot.lane.b32.xlu1 %v1597_v13, %s10008_s21  ;;  %v1629_v13 = vsel %vm10873_vm13, %v9099_v54, %v1628_v14  ;;  %886 = vst.msk [vmem:[#allocation3 + $0xc8] sm:$0xf] %vm300_vm0, %v854_v56  ;;  %v858_v48 = vld [vmem:[#allocation2 + $0xac] sm:$0xf]  ;;  %v1504_v40 = vld [vmem:[#allocation2 + $0xbc] sm:$0x1] }
 0x116   : > { %888 = vst.msk [vmem:[#allocation3 + $0xd8] sm:$0xf] %vm300_vm0, %v856_v47  ;;  %v1666_v14 = vrot.slane %v1504_v40, 5  ;;  %v1498_v62 = vld [vmem:[#allocation2 + $0xa4] sm:$0x1] }
 0x117   : > { %v1335_v49 = vpop.permute.xlu1 %1334  ;;  %890 = vst.msk [vmem:[#allocation3 + $0xe8] sm:$0xf] %vm300_vm0, %v858_v48  ;;  %v1800_v53 = vld [vmem:[#allocation2 + $0x1c] sm:$0xf]  ;;  %v1802_v19 = vld [vmem:[#allocation2 + $0x28] sm:$0xf] }
 0x118   : > { %1428 = vst.msk [vmem:[#allocation3 + $0x18] sm:$0xf] %vm1424_vm14, %v1335_v49  ;;  %v850_v49 = vld [vmem:[#allocation2 + $0x7c] sm:$0xf]  ;;  %v1809_v56 = vld [vmem:[#allocation2 + $0x54] sm:$0xf] }
 0x119   : > { %1694 = vrot.lane.b32.xlu0 %v1604_v60, %s10008_s21  ;;  %1680 = vrot.lane.b32.xlu2 %v1580_v12, %s10008_s21  ;;  %v1637_v60 = vrot.slane %v1635_v50, 4  ;;  %882 = vst.msk [vmem:[#allocation3 + $0xa8] sm:$0xf] %vm300_vm0, %v850_v49  ;;  %v1645_v12 = vrot.slane %v1495_v5, 5  ;;  %v857_v50 = vld [vmem:[#allocation2 + $0xa8] sm:$0xf] }
 0x11a   : > { %889 = vst.msk [vmem:[#allocation3 + $0xe0] sm:$0xf] %vm300_vm0, %v857_v50  ;;  %v1651_v5 = vrot.slane %v1649_v2, 4  ;;  %v1805_v30 = vld [vmem:[#allocation2 + $0x3c] sm:$0xf] }
 0x11b   : > { %v1639_v17 = vsel %vm10873_vm13, %v1637_v60, %v1638_v11  ;;  %v1646_v20 = vsel %vm10873_vm13, %v1644_v25, %v1645_v12  ;;  %v860_v60 = vld [vmem:[#allocation2 + $0xb8] sm:$0xf]  ;;  %v1502_v25 = vld [vmem:[#allocation2 + $0xb4] sm:$0xe]  ;;  %v822_v48 = vld [vmem:[#allocation2 + $0xc0] sm:$0xf] }
 0x11c   : > { %v1345_v43 = vpop.permute.xlu2 %1344  ;;  %v1341_v37 = vpop.permute.xlu0 %1340  ;;  %892 = vst.msk [vmem:[#allocation3 + $0xf8] sm:$0xf] %vm300_vm0, %v860_v60  ;;  %v9104_v12 = vrot.slane %v1502_v25, 9  ;;  %v1815_v50 = vld [vmem:[#allocation2 + $0x78] sm:$0xf] }
 0x11d   : > { %1433 = vst.msk [vmem:[#allocation3 + $0x40] sm:$0xf] %vm1424_vm14, %v1345_v43  ;;  %1696 = vrot.lane.b32.xlu1 %v1608_v16, %s10008_s21  ;;  %v851_v16 = vld [vmem:[#allocation2 + $0x84] sm:$0xf]  ;;  %v1611_v43 = vsel %vm10873_vm13, %v1609_v46, %v1610_v44  ;;  %v1797_v44 = vld [vmem:[#allocation2 + $0xc] sm:$0xf] }
 0x11e   : > { %1431 = vst.msk [vmem:[#allocation3 + $0x30] sm:$0xf] %vm1424_vm14, %v1341_v37  ;;  %v9102_v37 = vrot.slane %v1496_v28, 9  ;;  %v387_v60 = vld [vmem:[%s10146_s16 + $0x7c] sm:$0xf] }
 0x11f   : > { %v1343_v63 = vpop.permute.xlu1 %1342  ;;  %883 = vst.msk [vmem:[#allocation3 + $0xb0] sm:$0xf] %vm300_vm0, %v851_v16  ;;  %v1652_v16 = vrot.slane %v1498_v62, 5  ;;  %v658_v62 = vshll.u32 %v387_v60, 16 }
 0x120   : > { %1432 = vst.msk [vmem:[#allocation3 + $0x38] sm:$0xf] %vm1424_vm14, %v1343_v63  ;;  %v855_v63 = vld [vmem:[#allocation2 + $0x9c] sm:$0xf]  ;;  %v1650_v6 = vsel %vm10873_vm13, %v9102_v37, %v1649_v2  ;;  %v1803_v37 = vld [vmem:[#allocation2 + $0x30] sm:$0xf] }
 0x121   : > { %1700 = vrot.lane.b32.xlu0 %v1615_v8, %s10008_s21  ;;  %1686 = vrot.lane.b32.xlu2 %v1590_v34, %s10008_s21  ;;  %887 = vst.msk [vmem:[#allocation3 + $0xd0] sm:$0xf] %vm300_vm0, %v855_v63  ;;  %v1501_v34 = vld [vmem:[#allocation2 + $0xb0] sm:$0x1]  ;;  %v1808_v63 = vld [vmem:[#allocation2 + $0x4c] sm:$0xf] }
 0x122   : > { %v1659_v58 = vrot.slane %v1501_v34, 5 }
 0x124   : > { %v1351_v41 = vpop.permute.xlu2 %1350  ;;  %v1347_v9 = vpop.permute.xlu0 %1346 }
 0x125   : > { %1436 = vst.msk [vmem:[#allocation3 + $0x58] sm:$0xf] %vm1424_vm14, %v1351_v41  ;;  %1702 = vrot.lane.b32.xlu1 %v1618_v24, %s10008_s21  ;;  %v1656_v24 = vrot.slane %v1500_v61, 5  ;;  %v11063_v41 = vld [vmem:[#allocation2 + $0xb8] sm:$0xf] }
 0x126   : > { %1434 = vst.msk [vmem:[#allocation3 + $0x48] sm:$0xf] %vm1424_vm14, %v1347_v9  ;;  %v1489_v9 = vld [vmem:[#allocation2 + $0x80] sm:$0x1]  ;;  %v1663_v36 = vrot.slane %v11063_v41, 5 }
 0x127   : > { %v1349_v4 = vpop.permute.xlu1 %1348  ;;  %v1658_v26 = vrot.slane %v1656_v24, 4  ;;  %v1806_v61 = vld [vmem:[#allocation2 + $0x40] sm:$0xf] }
 0x128   : > { %1435 = vst.msk [vmem:[#allocation3 + $0x50] sm:$0xf] %vm1424_vm14, %v1349_v4  ;;  %v1631_v4 = vrot.slane %v1489_v9, 5  ;;  %v1665_v42 = vrot.slane %v1663_v36, 4 }
 0x129   : > { %1706 = vrot.lane.b32.xlu0 %v1625_v15, %s10008_s21  ;;  %1692 = vrot.lane.b32.xlu2 %v1601_v57, %s10008_s21  ;;  %v1657_v15 = vsel %vm10873_vm13, %v9103_v31, %v1656_v24  ;;  %v1660_v1 = vsel %vm10873_vm13, %v1658_v26, %v1659_v58  ;;  %v1493_v57 = vld [vmem:[#allocation2 + $0x90] sm:$0xe]  ;;  %v1801_v24 = vld [vmem:[#allocation2 + $0x24] sm:$0xf]  ;;  %v1811_v31 = vld [vmem:[#allocation2 + $0x60] sm:$0xf] }
 0x12a   : > { %v1632_v39 = vsel %vm10873_vm13, %v1630_v7, %v1631_v4  ;;  %v9101_v11 = vrot.slane %v1493_v57, 9  ;;  %v1804_v58 = vld [vmem:[#allocation2 + $0x34] sm:$0xf]  ;;  %v1814_v7 = vld [vmem:[#allocation2 + $0x70] sm:$0xf] }
 0x12b   : > { %v1818_v57 = vld [vmem:[#allocation2 + $0x88] sm:$0xf] }
 0x12c   : > { %v1357_v59 = vpop.permute.xlu2 %1356  ;;  %v1353_v52 = vpop.permute.xlu0 %1352  ;;  %v1643_v49 = vsel %vm10873_vm13, %v9101_v11, %v1642_v0  ;;  %v1653_v0 = vsel %vm10873_vm13, %v1651_v5, %v1652_v16  ;;  %v1990_v16 = vld [vmem:[#allocation2 + $0xc] sm:$0xf] }
 0x12d   : > { %1439 = vst.msk [vmem:[#allocation3 + $0x70] sm:$0xf] %vm1424_vm14, %v1357_v59  ;;  %1708 = vrot.lane.b32.xlu1 %v1629_v13, %s10008_s21  ;;  %v1667_v59 = vsel %vm10873_vm13, %v1665_v42, %v1666_v14  ;;  %v1817_v42 = vld [vmem:[#allocation2 + $0x84] sm:$0xf]  ;;  %v2042_v25 = vshll.u32 %v1990_v16, 16 }
 0x12e   : > { %1437 = vst.msk [vmem:[#allocation3 + $0x60] sm:$0xf] %vm1424_vm14, %v1353_v52  ;;  %v859_v52 = vld [vmem:[#allocation2 + $0xb4] sm:$0xf] }
 0x12f   : > { %v1355_v35 = vpop.permute.xlu1 %1354  ;;  %891 = vst.msk [vmem:[#allocation3 + $0xf0] sm:$0xf] %vm300_vm0, %v859_v52  ;;  %v1820_v52 = vld [vmem:[#allocation2 + $0x94] sm:$0xf] }
 0x130   : > { %1438 = vst.msk [vmem:[#allocation3 + $0x68] sm:$0xf] %vm1424_vm14, %v1355_v35  ;;  %v1799_v35 = vld [vmem:[#allocation2 + $0x18] sm:$0xf] }
 0x131   : > { %1712 = vrot.lane.b32.xlu0 %v1636_v51, %s10008_s21  ;;  %1698 = vrot.lane.b32.xlu2 %v1611_v43, %s10008_s21 }
 0x134   : > { %v1359_v38 = vpop.permute.xlu0 %1358  ;;  %v1363_v8 = vpop.permute.xlu2 %1362 }
 0x135   : > { %1714 = vrot.lane.b32.xlu1 %v1639_v17, %s10008_s21  ;;  %1440 = vst.msk [vmem:[#allocation3 + $0x78] sm:$0xf] %vm1424_vm14, %v1359_v38  ;;  %v1664_v38 = vsel %vm10873_vm13, %v9104_v12, %v1663_v36 }
 0x136   : > { %1442 = vst.msk [vmem:[#allocation3 + $0x88] sm:$0xf] %vm1424_vm14, %v1363_v8 }
 0x137   : > { %v1361_v21 = vpop.permute.xlu1 %1360 }
 0x138   : > { %1441 = vst.msk [vmem:[#allocation3 + $0x80] sm:$0xf] %vm1424_vm14, %v1361_v21 }
 0x139   : > { %1718 = vrot.lane.b32.xlu0 %v1646_v20, %s10008_s21  ;;  %1704 = vrot.lane.b32.xlu2 %v1622_v32, %s10008_s21  ;;  %v1798_v20 = vld [vmem:[#allocation2 + $0x10] sm:$0xf]  ;;  %v386_v32 = vld [vmem:[%s10146_s16 + $0x78] sm:$0xf] }
 0x13a   : > { %v647_v41 = vshrl.u32 %v386_v32, 16 }
 0x13c   : > { %v1365_v54 = vpop.permute.xlu0 %1364  ;;  %v649_v26 = vrot.slane %v647_v41, 7 }
 0x13d   : > { %1720 = vrot.lane.b32.xlu1 %v1650_v6, %s10008_s21  ;;  %1443 = vst.msk [vmem:[#allocation3 + $0x90] sm:$0xf] %vm1424_vm14, %v1365_v54  ;;  %v1812_v54 = vld [vmem:[#allocation2 + $0x64] sm:$0xf] }
 0x13f   : > { %v1367_v18 = vpop.permute.xlu1 %1366 }
 0x140   : > { %1444 = vst.msk [vmem:[#allocation3 + $0x98] sm:$0xf] %vm1424_vm14, %v1367_v18 }
 0x141   : > { %1724 = vrot.lane.b32.xlu0 %v1657_v15, %s10008_s21  ;;  %v1369_v13 = vpop.permute.xlu2 %1368  ;;  %1710 = vrot.lane.b32.xlu2 %v1632_v39, %s10008_s21  ;;  %v650_v15 = vshll.u32 %v386_v32, 16 }
 0x142   : > { %1445 = vst.msk [vmem:[#allocation3 + $0xa0] sm:$0xf] %vm1424_vm14, %v1369_v13  ;;  %v1807_v13 = vld [vmem:[#allocation2 + $0x48] sm:$0xf] }
 0x143   : > { %v652_v47 = vor.u32 %v650_v15, %v649_v26 }
 0x144   : > { %v1371_v3 = vpop.permute.xlu0 %1370 }
 0x145   : > { %1726 = vrot.lane.b32.xlu1 %v1660_v1, %s10008_s21  ;;  %1446 = vst.msk [vmem:[#allocation3 + $0xa8] sm:$0xf] %vm1424_vm14, %v1371_v3  ;;  %v823_v4 = vsel %vm10303_vm7, %v652_v47, %v822_v48  ;;  %v1810_v3 = vld [vmem:[#allocation2 + $0x58] sm:$0xf] }
 0x146   : > { %824 = vst [vmem:[#allocation2 + $0xc0] sm:$0xf] %v823_v4  ;;  %v1999_v4 = vld [vmem:[#allocation2 + $0x30] sm:$0xf] }
 0x147   : > { %v1373_v46 = vpop.permute.xlu1 %1372 }
 0x148   : > { %1447 = vst.msk [vmem:[#allocation3 + $0xb0] sm:$0xf] %vm1424_vm14, %v1373_v46  ;;  %v655_v46 = vshrl.u32 %v387_v60, 16 }
 0x149   : > { %1730 = vrot.lane.b32.xlu0 %v1667_v59, %s10008_s21  ;;  %v1375_v51 = vpop.permute.xlu2 %1374  ;;  %1716 = vrot.lane.b32.xlu2 %v1643_v49, %s10008_s21 }
 0x14a   : > { %1448 = vst.msk [vmem:[#allocation3 + $0xb8] sm:$0xf] %vm1424_vm14, %v1375_v51  ;;  %v11156_v49 = vrot.slane %v655_v46, 7 }
 0x14d   : > { %1861 = vrot.lane.b32.xlu1 %v1797_v44, %s10009_s23  ;;  %v1821_v44 = vld [vmem:[#allocation2 + $0x9c] sm:$0xf] }
 0x14f   : > { %v1377_v28 = vpop.permute.xlu0 %1376 }
 0x150   : > { %1449 = vst.msk [vmem:[#allocation3 + $0xc0] sm:$0xf] %vm1424_vm14, %v1377_v28  ;;  %v653_v28 = vrot.slane %v649_v26, 4  ;;  %v1995_v26 = vld [vmem:[#allocation2 + $0x20] sm:$0x1] }
 0x151   : > { %1865 = vrot.lane.b32.xlu0 %v1799_v35, %s10009_s23  ;;  %1722 = vrot.lane.b32.xlu2 %v1653_v0, %s10008_s21  ;;  %v1813_v35 = vld [vmem:[#allocation2 + $0x6c] sm:$0xf]  ;;  %v2039_v0 = vshrl.u32 %v1990_v16, 16 }
 0x152   : > { %v1379_v17 = vpop.permute.xlu1 %1378 }
 0x153   : > { %1450 = vst.msk [vmem:[#allocation3 + $0xc8] sm:$0xf] %vm1424_vm14, %v1379_v17  ;;  %v1381_v33 = vpop.permute.xlu2 %1380  ;;  %v1823_v17 = vld [vmem:[#allocation2 + $0xa8] sm:$0xf] }
 0x154   : > { %1451 = vst.msk [vmem:[#allocation3 + $0xd0] sm:$0xf] %vm1424_vm14, %v1381_v33  ;;  %v1991_v33 = vld [vmem:[#allocation2 + $0x10] sm:$0xf] }
 0x155   : > { %1867 = vrot.lane.b32.xlu1 %v1800_v53, %s10009_s23  ;;  %v660_v53 = vor.u32 %v658_v62, %v11156_v49 }
 0x158   : > { %v1383_v43 = vpop.permute.xlu0 %1382 }
 0x159   : > { %1871 = vrot.lane.b32.xlu0 %v1802_v19, %s10009_s23  ;;  %1452 = vst.msk [vmem:[#allocation3 + $0xd8] sm:$0xf] %vm1424_vm14, %v1383_v43  ;;  %1728 = vrot.lane.b32.xlu2 %v1664_v38, %s10008_s21  ;;  %v661_v19 = vsel %vm10310_vm8, %v653_v28, %v660_v53  ;;  %v2041_v38 = vrot.slane %v2039_v0, 4  ;;  %v1822_v0 = vld [vmem:[#allocation2 + $0xa0] sm:$0xf] }
 0x15a   : > { %825 = vst.msk [vmem:[#allocation2 + $0xc4] sm:$0xf] %vm300_vm0, %v661_v19  ;;  %v2003_v19 = vld [vmem:[#allocation2 + $0x40] sm:$0xf] }
 0x15b   : > { %v1387_v8 = vpop.permute.xlu2 %1386 }
 0x15c   : > { %v1385_v2 = vpop.permute.xlu1 %1384  ;;  %1454 = vst.msk [vmem:[#allocation3 + $0xe8] sm:$0xf] %vm1424_vm14, %v1387_v8  ;;  %v2052_v8 = vshrl.u32 %v1991_v33, 16 }
 0x15d   : > { %1873 = vrot.lane.b32.xlu1 %v1803_v37, %s10009_s23  ;;  %1453 = vst.msk [vmem:[#allocation3 + $0xe0] sm:$0xf] %vm1424_vm14, %v1385_v2  ;;  %v1824_v37 = vld [vmem:[#allocation2 + $0xac] sm:$0xf]  ;;  %v2044_v2 = vrot.slane %v2042_v25, 5 }
 0x161   : > { %1877 = vrot.lane.b32.xlu0 %v1805_v30, %s10009_s23  ;;  %1863 = vrot.lane.b32.xlu2 %v1798_v20, %s10009_s23  ;;  %v2048_v30 = vshll.u32 %v1991_v33, 16  ;;  %v1816_v20 = vld [vmem:[#allocation2 + $0x7c] sm:$0xf] }
 0x163   : > { %v1389_v55 = vpop.permute.xlu0 %1388  ;;  %v1669_v23 = vpop.permute.xlu2 %1668 }
 0x164   : > { %1455 = vst.msk [vmem:[#allocation3 + $0xf0] sm:$0xf] %vm1424_vm14, %v1389_v55 }
 0x165   : > { %1879 = vrot.lane.b32.xlu1 %v1806_v61, %s10009_s23  ;;  %1765 = vst.msk [vmem:[#allocation3] sm:$0xf] %vm1764_vm15, %v1669_v23  ;;  %v1994_v61 = vld [vmem:[#allocation2 + $0x1c] sm:$0xf]  ;;  %v1996_v23 = vld [vmem:[#allocation2 + $0x24] sm:$0xf] }
 0x167   : > { %v1391_v21 = vpop.permute.xlu1 %1390 }
 0x168   : > { %1456 = vst.msk [vmem:[#allocation3 + $0xf8] sm:$0xf] %vm1424_vm14, %v1391_v21  ;;  %v2076_v21 = vshrl.u32 %v1994_v61, 16 }
 0x169   : > { %1883 = vrot.lane.b32.xlu0 %v1808_v63, %s10009_s23  ;;  %1869 = vrot.lane.b32.xlu2 %v1801_v24, %s10009_s23  ;;  %v2072_v63 = vshll.u32 %v1994_v61, 16  ;;  %v2045_v24 = vor.u32 %v2044_v2, %v2041_v38  ;;  %v2005_v38 = vld [vmem:[#allocation2 + $0x48] sm:$0xf]  ;;  %v2148_v61 = vshrl.u32 %v2003_v19, 16 }
 0x16b   : > { %v1671_v6 = vpop.permute.xlu0 %1670  ;;  %v1675_v9 = vpop.permute.xlu2 %1674  ;;  %v11174_v15 = vrot.slane %v2072_v63, 5  ;;  %v2046_v47 = vrot.slane %v2045_v24, 4 }
 0x16c   : > { %1766 = vst.msk [vmem:[#allocation3 + $0x8] sm:$0xf] %vm1764_vm15, %v1671_v6  ;;  %v2050_v6 = vrot.slane %v2048_v30, 5 }
 0x16d   : > { %1885 = vrot.lane.b32.xlu1 %v1809_v56, %s10009_s23  ;;  %1768 = vst.msk [vmem:[#allocation3 + $0x18] sm:$0xf] %vm1764_vm15, %v1675_v9  ;;  %v1826_v56 = vld [vmem:[#allocation2 + $0xb8] sm:$0xf]  ;;  %v2087_v9 = vshrl.u32 %v1996_v23, 16 }
 0x16f   : > { %v1673_v34 = vpop.permute.xlu1 %1672 }
 0x170   : > { %1767 = vst.msk [vmem:[#allocation3 + $0x10] sm:$0xf] %vm1764_vm15, %v1673_v34  ;;  %v1992_v34 = vld [vmem:[#allocation2 + $0x14] sm:$0x1] }
 0x171   : > { %1889 = vrot.lane.b32.xlu0 %v1811_v31, %s10009_s23  ;;  %1875 = vrot.lane.b32.xlu2 %v1804_v58, %s10009_s23  ;;  %v2054_v31 = vrot.slane %v2052_v8, 4  ;;  %v2078_v58 = vrot.slane %v2076_v21, 4  ;;  %v2144_v8 = vshll.u32 %v2003_v19, 16  ;;  %v2159_v21 = vshrl.u32 %v2005_v38, 16 }
 0x173   : > { %v1677_v36 = vpop.permute.xlu0 %1676  ;;  %v1681_v40 = vpop.permute.xlu2 %1680  ;;  %v2055_v48 = vor.u32 %v2054_v31, %v2050_v6  ;;  %v2008_v31 = vld [vmem:[#allocation2 + $0x54] sm:$0xf] }
 0x174   : > { %1769 = vst.msk [vmem:[#allocation3 + $0x20] sm:$0xf] %vm1764_vm15, %v1677_v36  ;;  %v1827_v36 = vld [vmem:[#allocation2 + $0xc0] sm:$0xf] }
 0x175   : > { %1891 = vrot.lane.b32.xlu1 %v1812_v54, %s10009_s23  ;;  %1771 = vst.msk [vmem:[#allocation3 + $0x30] sm:$0xf] %vm1764_vm15, %v1681_v40  ;;  %v2090_v54 = vshll.u32 %v1996_v23, 16  ;;  %v2162_v23 = vshll.u32 %v2005_v38, 16 }
 0x177   : > { %v1679_v18 = vpop.permute.xlu1 %1678 }
 0x178   : > { %1770 = vst.msk [vmem:[#allocation3 + $0x28] sm:$0xf] %vm1764_vm15, %v1679_v18  ;;  %v1819_v18 = vld [vmem:[#allocation2 + $0x90] sm:$0xf] }
 0x179   : > { %1895 = vrot.lane.b32.xlu0 %v1814_v7, %s10009_s23  ;;  %1881 = vrot.lane.b32.xlu2 %v1807_v13, %s10009_s23  ;;  %v2058_v7 = vshll.u32 %v1992_v34, 16  ;;  %v2089_v13 = vrot.slane %v2087_v9, 4  ;;  %v2150_v9 = vrot.slane %v2148_v61, 4 }
 0x17b   : > { %v1683_v1 = vpop.permute.xlu0 %1682  ;;  %v1687_v39 = vpop.permute.xlu2 %1686 }
 0x17c   : > { %1772 = vst.msk [vmem:[#allocation3 + $0x38] sm:$0xf] %vm1764_vm15, %v1683_v1  ;;  %v2092_v1 = vrot.slane %v2090_v54, 5  ;;  %v1825_v54 = vld [vmem:[#allocation2 + $0xb4] sm:$0xf] }
 0x17d   : > { %1897 = vrot.lane.b32.xlu1 %v1815_v50, %s10009_s23  ;;  %1774 = vst.msk [vmem:[#allocation3 + $0x48] sm:$0xf] %vm1764_vm15, %v1687_v39  ;;  %v2082_v50 = vshll.u32 %v1995_v26, 16  ;;  %v2114_v39 = vshll.u32 %v1999_v4, 16 }
 0x17f   : > { %v1685_v14 = vpop.permute.xlu1 %1684  ;;  %v2116_v16 = vrot.slane %v2114_v39, 5  ;;  %v2009_v39 = vld [vmem:[#allocation2 + $0x58] sm:$0xf] }
 0x180   : > { %1773 = vst.msk [vmem:[#allocation3 + $0x40] sm:$0xf] %vm1764_vm15, %v1685_v14  ;;  %v2111_v14 = vshrl.u32 %v1999_v4, 16  ;;  %v2183_v4 = vshrl.u32 %v2008_v31, 16 }
 0x181   : > { %1901 = vrot.lane.b32.xlu0 %v1817_v42, %s10009_s23  ;;  %1887 = vrot.lane.b32.xlu2 %v1810_v3, %s10009_s23  ;;  %v2079_v42 = vor.u32 %v2078_v58, %v11174_v15  ;;  %v2056_v3 = vrot.slane %v2055_v48, 4  ;;  %v2004_v58 = vld [vmem:[#allocation2 + $0x44] sm:$0x1]  ;;  %v2161_v48 = vrot.slane %v2159_v21, 4  ;;  %v2014_v21 = vld [vmem:[#allocation2 + $0x6c] sm:$0xf] }
 0x183   : > { %v1689_v59 = vpop.permute.xlu0 %1688  ;;  %v1693_v51 = vpop.permute.xlu2 %1692  ;;  %v2080_v62 = vrot.slane %v2079_v42, 4 }
 0x184   : > { %1775 = vst.msk [vmem:[#allocation3 + $0x50] sm:$0xf] %vm1764_vm15, %v1689_v59  ;;  %v2060_v59 = vrot.slane %v2058_v7, 5  ;;  %v2164_v7 = vrot.slane %v2162_v23, 5  ;;  %v2002_v23 = vld [vmem:[#allocation2 + $0x3c] sm:$0xf] }
 0x185   : > { %1903 = vrot.lane.b32.xlu1 %v1818_v57, %s10009_s23  ;;  %1777 = vst.msk [vmem:[#allocation3 + $0x60] sm:$0xf] %vm1764_vm15, %v1693_v51  ;;  %v2051_v57 = vsel %vm10180_vm3, %v2046_v47, %v2050_v6  ;;  %v2084_v51 = vrot.slane %v2082_v50, 5  ;;  %v11209_v50 = vld [vmem:[#allocation2 + $0x4c] sm:$0xf] }
 0x186   : > { %v2061_v28 = vsel %vm10180_vm3, %v2056_v3, %v2060_v59 }
 0x187   : > { %v1691_v11 = vpop.permute.xlu1 %1690 }
 0x188   : > { %1776 = vst.msk [vmem:[#allocation3 + $0x58] sm:$0xf] %vm1764_vm15, %v1691_v11  ;;  %v2000_v11 = vld [vmem:[#allocation2 + $0x34] sm:$0xf] }
 0x189   : > { %1907 = vrot.lane.b32.xlu0 %v1820_v52, %s10009_s23  ;;  %1893 = vrot.lane.b32.xlu2 %v1813_v35, %s10009_s23  ;;  %v11182_v52 = vld [vmem:[#allocation2 + $0x28] sm:$0xf]  ;;  %v2120_v53 = vshll.u32 %v2000_v11, 16 }
 0x18a   : > { %v2096_v35 = vshll.u32 %v11182_v52, 16 }
 0x18b   : > { %v1695_v5 = vpop.permute.xlu0 %1694  ;;  %v1699_v43 = vpop.permute.xlu2 %1698  ;;  %v2122_v2 = vrot.slane %v2120_v53, 5  ;;  %v2012_v53 = vld [vmem:[#allocation2 + $0x64] sm:$0xf] }
 0x18c   : > { %1778 = vst.msk [vmem:[#allocation3 + $0x68] sm:$0xf] %vm1764_vm15, %v1695_v5  ;;  %v2113_v5 = vrot.slane %v2111_v14, 4  ;;  %v2154_v14 = vshll.u32 %v2004_v58, 16  ;;  %v2220_v61 = vshrl.u32 %v2012_v53, 16 }
 0x18d   : > { %1909 = vrot.lane.b32.xlu1 %v1821_v44, %s10009_s23  ;;  %1780 = vst.msk [vmem:[#allocation3 + $0x78] sm:$0xf] %vm1764_vm15, %v1699_v43  ;;  %v2093_v44 = vor.u32 %v2092_v1, %v2089_v13  ;;  %v11194_v43 = vrot.slane %v2096_v35, 5  ;;  %v2196_v35 = vshrl.u32 %v2009_v39, 16  ;;  %v2013_v58 = vld [vmem:[#allocation2 + $0x68] sm:$0x1] }
 0x18f   : > { %v1697_v12 = vpop.permute.xlu1 %1696  ;;  %v2094_v33 = vrot.slane %v2093_v44, 4 }
 0x190   : > { %1779 = vst.msk [vmem:[#allocation3 + $0x70] sm:$0xf] %vm1764_vm15, %v1697_v12  ;;  %v2085_v12 = vsel %vm10180_vm3, %v2080_v62, %v2084_v51  ;;  %v2185_v51 = vrot.slane %v2183_v4, 4  ;;  %v2192_v62 = vshll.u32 %v2009_v39, 16 }
 0x191   : > { %1913 = vrot.lane.b32.xlu0 %v1823_v17, %s10009_s23  ;;  %1899 = vrot.lane.b32.xlu2 %v1816_v20, %s10009_s23  ;;  %v2124_v17 = vshrl.u32 %v2000_v11, 16  ;;  %v2099_v24 = vsel %vm10180_vm3, %v2094_v33, %v11194_v43  ;;  %v2165_v11 = vor.u32 %v2164_v7, %v2161_v48  ;;  %v2135_v48 = vshrl.u32 %v2002_v23, 16 }
 0x192   : > { %v2194_v38 = vrot.slane %v2192_v62, 5  ;;  %v2138_v7 = vshll.u32 %v2002_v23, 16 }
 0x193   : > { %v1701_v55 = vpop.permute.xlu0 %1700  ;;  %v1705_v41 = vpop.permute.xlu2 %1704  ;;  %v2126_v30 = vrot.slane %v2124_v17, 4  ;;  %v2100_v17 = vshrl.u32 %v11182_v52, 16 }
 0x194   : > { %1781 = vst.msk [vmem:[#allocation3 + $0x80] sm:$0xf] %vm1764_vm15, %v1701_v55  ;;  %v2001_v55 = vld [vmem:[#allocation2 + $0x38] sm:$0x1] }
 0x195   : > { %1915 = vrot.lane.b32.xlu1 %v1824_v37, %s10009_s23  ;;  %1783 = vst.msk [vmem:[#allocation3 + $0x90] sm:$0xf] %vm1764_vm15, %v1705_v41  ;;  %v2117_v37 = vor.u32 %v2116_v16, %v2113_v5  ;;  %v2130_v34 = vshll.u32 %v2001_v55, 16  ;;  %v11203_v41 = vrot.slane %v2144_v8, 5  ;;  %v2216_v8 = vshll.u32 %v2012_v53, 16 }
 0x197   : > { %v1703_v32 = vpop.permute.xlu1 %1702  ;;  %v2118_v6 = vrot.slane %v2117_v37, 4  ;;  %v2132_v1 = vrot.slane %v2130_v34, 5  ;;  %v2151_v42 = vor.u32 %v2150_v9, %v11203_v41  ;;  %v11233_v9 = vrot.slane %v2216_v8, 5 }
 0x198   : > { %1782 = vst.msk [vmem:[#allocation3 + $0x88] sm:$0xf] %vm1764_vm15, %v1703_v32  ;;  %v2127_v32 = vor.u32 %v2126_v30, %v2122_v2  ;;  %v2198_v30 = vrot.slane %v2196_v35, 4 }
 0x199   : > { %1919 = vrot.lane.b32.xlu0 %v1826_v56, %s10009_s23  ;;  %1905 = vrot.lane.b32.xlu2 %v1819_v18, %s10009_s23  ;;  %v1993_v56 = vld [vmem:[#allocation2 + $0x18] sm:$0xf]  ;;  %v2186_v18 = vshll.u32 %v2008_v31, 16  ;;  %v2152_v16 = vrot.slane %v2151_v42, 4  ;;  %v1998_v31 = vld [vmem:[#allocation2 + $0x2c] sm:$0x1] }
 0x19a   : > { %v2066_v47 = vshll.u32 %v1993_v56, 16  ;;  %v2128_v13 = vrot.slane %v2127_v32, 4  ;;  %v2199_v34 = vor.u32 %v2198_v30, %v2194_v38  ;;  %v2021_v30 = vld [vmem:[#allocation2 + $0x88] sm:$0xf] }
 0x19b   : > { %v1707_v40 = vpop.permute.xlu0 %1706  ;;  %v1711_v46 = vpop.permute.xlu2 %1710  ;;  %v2188_v44 = vrot.slane %v2186_v18, 5  ;;  %v2292_v23 = vshrl.u32 %v2021_v30, 16 }
 0x19c   : > { %1784 = vst.msk [vmem:[#allocation3 + $0x98] sm:$0xf] %vm1764_vm15, %v1707_v40  ;;  %v2123_v40 = vsel %vm10180_vm3, %v2118_v6, %v2122_v2  ;;  %v2068_v59 = vrot.slane %v2066_v47, 5  ;;  %v2133_v5 = vsel %vm10180_vm3, %v2128_v13, %v2132_v1  ;;  %v2010_v2 = vld [vmem:[#allocation2 + $0x5c] sm:$0x1]  ;;  %v2234_v47 = vshll.u32 %v2014_v21, 16 }
 0x19d   : > { %1921 = vrot.lane.b32.xlu1 %v1827_v36, %s10009_s23  ;;  %1786 = vst.msk [vmem:[#allocation3 + $0xa8] sm:$0xf] %vm1764_vm15, %v1711_v46  ;;  %v2063_v36 = vshrl.u32 %v1993_v56, 16  ;;  %v2168_v46 = vshll.u32 %v11209_v50, 16  ;;  %v2189_v37 = vor.u32 %v2188_v44, %v2185_v51  ;;  %v2202_v6 = vshll.u32 %v2010_v2, 16 }
 0x19e   : > { %v2106_v13 = vshll.u32 %v1998_v31, 16  ;;  %v2200_v39 = vrot.slane %v2199_v34, 4  ;;  %v2018_v51 = vld [vmem:[#allocation2 + $0x7c] sm:$0xf]  ;;  %v2019_v31 = vld [vmem:[#allocation2 + $0x80] sm:$0x1] }
 0x19f   : > { %v1709_v60 = vpop.permute.xlu1 %1708  ;;  %v2065_v3 = vrot.slane %v2063_v36, 4  ;;  %v11221_v33 = vrot.slane %v2168_v46, 5  ;;  %v2231_v36 = vshrl.u32 %v2014_v21, 16  ;;  %v2140_v46 = vrot.slane %v2138_v7, 5  ;;  %v2007_v34 = vld [vmem:[#allocation2 + $0x50] sm:$0x1] }
 0x1a0   : > { %1785 = vst.msk [vmem:[#allocation3 + $0xa0] sm:$0xf] %vm1764_vm15, %v1709_v60  ;;  %v2108_v35 = vrot.slane %v2106_v13, 5  ;;  %v2288_v21 = vshll.u32 %v2021_v30, 16 }
 0x1a1   : > { %2422 = vrot.lane.b32.xlu0 %v2051_v57, %s10010_s29  ;;  %1911 = vrot.lane.b32.xlu2 %v1822_v0, %s10009_s23  ;;  %v1828_v0 = vld [vmem:[#allocation2 + $0xc4] sm:$0xf]  ;;  %v2069_v19 = vor.u32 %v2068_v59, %v2065_v3  ;;  %v2226_v59 = vshll.u32 %v2013_v58, 16 }
 0x1a3   : > { %v1713_v25 = vpop.permute.xlu0 %1712  ;;  %v1717_v63 = vpop.permute.xlu2 %1716  ;;  %v2070_v55 = vrot.slane %v2069_v19, 4  ;;  %v2268_v19 = vshrl.u32 %v2018_v51, 16 }
 0x1a4   : > { %1787 = vst.msk [vmem:[#allocation3 + $0xb0] sm:$0xf] %vm1764_vm15, %v1713_v25 }
 0x1a5   : > { %2424 = vrot.lane.b32.xlu1 %v2061_v28, %s10010_s29  ;;  %1789 = vst.msk [vmem:[#allocation3 + $0xc0] sm:$0xf] %vm1764_vm15, %v1717_v63  ;;  %v2156_v28 = vrot.slane %v2154_v14, 5  ;;  %v2102_v63 = vrot.slane %v2100_v17, 4  ;;  %v2075_v4 = vsel %vm10180_vm3, %v2070_v55, %v11174_v15  ;;  %v11244_v15 = vld [vmem:[#allocation2 + $0x70] sm:$0xf] }
 0x1a6   : > { %v2172_v17 = vshrl.u32 %v11209_v50, 16  ;;  %v662_v50 = vrot.slane %v11156_v49, 4 }
 0x1a7   : > { %v1715_v20 = vpop.permute.xlu1 %1714  ;;  %v2157_v52 = vsel %vm10180_vm3, %v2152_v16, %v2156_v28  ;;  %v2240_v16 = vshll.u32 %v11244_v15, 16 }
 0x1a8   : > { %1788 = vst.msk [vmem:[#allocation3 + $0xb8] sm:$0xf] %vm1764_vm15, %v1715_v20  ;;  %v2174_v49 = vrot.slane %v2172_v17, 4 }
 0x1a9   : > { %2428 = vrot.lane.b32.xlu0 %v2085_v12, %s10010_s29  ;;  %1917 = vrot.lane.b32.xlu2 %v1825_v54, %s10009_s23  ;;  %v2166_v12 = vrot.slane %v2165_v11, 4  ;;  %v2222_v54 = vrot.slane %v2220_v61, 4  ;;  %v2137_v11 = vrot.slane %v2135_v48, 4 }
 0x1ab   : > { %v1719_v26 = vpop.permute.xlu0 %1718  ;;  %v1723_v60 = vpop.permute.xlu2 %1722  ;;  %v2171_v32 = vsel %vm10180_vm3, %v2166_v12, %v11221_v33  ;;  %v2223_v3 = vor.u32 %v2222_v54, %v11233_v9  ;;  %v2141_v2 = vor.u32 %v2140_v46, %v2137_v11  ;;  %v2023_v54 = vld [vmem:[#allocation2 + $0x90] sm:$0xf]  ;;  %v2026_v11 = vld [vmem:[#allocation2 + $0x9c] sm:$0xf] }
 0x1ac   : > { %1790 = vst.msk [vmem:[#allocation3 + $0xc8] sm:$0xf] %vm1764_vm15, %v1719_v26  ;;  %v2017_v26 = vld [vmem:[#allocation2 + $0x78] sm:$0xf] }
 0x1ad   : > { %2430 = vrot.lane.b32.xlu1 %v2099_v24, %s10010_s29  ;;  %1792 = vst.msk [vmem:[#allocation3 + $0xd8] sm:$0xf] %vm1764_vm15, %v1723_v60  ;;  %v2190_v24 = vrot.slane %v2189_v37, 4  ;;  %v2255_v42 = vshrl.u32 %v2017_v26, 16  ;;  %v2258_v14 = vshll.u32 %v2017_v26, 16  ;;  %v2236_v60 = vrot.slane %v2234_v47, 5 }
 0x1ae   : > { %v2224_v12 = vrot.slane %v2223_v3, 4  ;;  %v2228_v37 = vrot.slane %v2226_v59, 5  ;;  %v826_v26 = vld [vmem:[#allocation2 + $0xc8] sm:$0x1]  ;;  %v2011_v47 = vld [vmem:[#allocation2 + $0x60] sm:$0xf]  ;;  %v2175_v59 = vor.u32 %v2174_v49, %v11221_v33 }
 0x1af   : > { %v1721_v57 = vpop.permute.xlu1 %1720  ;;  %v2195_v1 = vsel %vm10180_vm3, %v2190_v24, %v2194_v38  ;;  %v2257_v28 = vrot.slane %v2255_v42, 4  ;;  %v2260_v53 = vrot.slane %v2258_v14, 5  ;;  %v827_v48 = vsel %vm10409_vm10, %v662_v50, %v826_v26  ;;  %v2022_v42 = vld [vmem:[#allocation2 + $0x8c] sm:$0x1]  ;;  %v11284_v33 = vld [vmem:[#allocation2 + $0x94] sm:$0xf] }
 0x1b0   : > { %1791 = vst.msk [vmem:[#allocation3 + $0xd0] sm:$0xf] %vm1764_vm15, %v1721_v57  ;;  %v2204_v57 = vrot.slane %v2202_v6, 5  ;;  %v2142_v6 = vrot.slane %v2141_v2, 4  ;;  %v2303_v14 = vshrl.u32 %v2023_v54, 16 }
 0x1b1   : > { %2434 = vrot.lane.b32.xlu0 %v2123_v40, %s10010_s29  ;;  %1923 = vrot.lane.b32.xlu2 %v1828_v0, %s10009_s23  ;;  %v2103_v40 = vor.u32 %v2102_v63, %v11194_v43  ;;  %v2233_v43 = vrot.slane %v2231_v36, 4  ;;  %v2270_v63 = vrot.slane %v2268_v19, 4  ;;  %828 = vst [vmem:[#allocation2 + $0xc8] sm:$0x1] %v827_v48  ;;  %v2030_v50 = vld [vmem:[#allocation2 + $0xac] sm:$0xf] }
 0x1b2   : > { %v2205_v0 = vsel %vm10180_vm3, %v2200_v39, %v2204_v57  ;;  %v2306_v39 = vshll.u32 %v2023_v54, 16  ;;  %v2147_v57 = vsel %vm10180_vm3, %v2142_v6, %v11203_v41  ;;  %v2027_v41 = vld [vmem:[#allocation2 + $0xa0] sm:$0xf]  ;;  %v2364_v54 = vshrl.u32 %v2030_v50, 16  ;;  %v2020_v48 = vld [vmem:[#allocation2 + $0x84] sm:$0xf] }
 0x1b3   : > { %v1725_v25 = vpop.permute.xlu0 %1724  ;;  %v1729_v56 = vpop.permute.xlu2 %1728  ;;  %v2104_v62 = vrot.slane %v2103_v40, 4  ;;  %v2237_v38 = vor.u32 %v2236_v60, %v2233_v43  ;;  %v2294_v40 = vrot.slane %v2292_v23, 4  ;;  %v2207_v43 = vshrl.u32 %v2011_v47, 16 }
 0x1b4   : > { %1793 = vst.msk [vmem:[#allocation3 + $0xe0] sm:$0xf] %vm1764_vm15, %v1725_v25  ;;  %v2264_v25 = vshll.u32 %v2018_v51, 16  ;;  %v2210_v60 = vshll.u32 %v2011_v47, 16  ;;  %v2340_v2 = vshrl.u32 %v2027_v41, 16  ;;  %v2244_v23 = vshrl.u32 %v11244_v15, 16 }
 0x1b5   : > { %2436 = vrot.lane.b32.xlu1 %v2133_v5, %s10010_s29  ;;  %1795 = vst.msk [vmem:[#allocation3 + $0xf0] sm:$0xf] %vm1764_vm15, %v1729_v56  ;;  %v2109_v8 = vsel %vm10180_vm3, %v2104_v62, %v2108_v35  ;;  %v2229_v56 = vsel %vm10180_vm3, %v2224_v12, %v2228_v37  ;;  %v2238_v24 = vrot.slane %v2237_v38, 4  ;;  %v2298_v35 = vshll.u32 %v2022_v42, 16  ;;  %v2032_v47 = vld [vmem:[#allocation2 + $0xb4] sm:$0xf] }
 0x1b6   : > { %v2266_v55 = vrot.slane %v2264_v25, 5  ;;  %v2209_v19 = vrot.slane %v2207_v43, 4  ;;  %v2212_v12 = vrot.slane %v2210_v60, 5  ;;  %v2336_v38 = vshll.u32 %v2027_v41, 16 }
 0x1b7   : > { %v1727_v20 = vpop.permute.xlu1 %1726  ;;  %v2378_v43 = vshll.u32 %v2032_v47, 16  ;;  %v2279_v60 = vshrl.u32 %v2020_v48, 16 }
 0x1b8   : > { %1794 = vst.msk [vmem:[#allocation3 + $0xe8] sm:$0xf] %vm1764_vm15, %v1727_v20  ;;  %v2261_v20 = vor.u32 %v2260_v53, %v2257_v28  ;;  %v2271_v7 = vor.u32 %v2270_v63, %v2266_v55  ;;  %v2327_v28 = vshrl.u32 %v2026_v11, 16  ;;  %v2330_v53 = vshll.u32 %v2026_v11, 16 }
 0x1b9   : > { %2440 = vrot.lane.b32.xlu0 %v2157_v52, %s10010_s29  ;;  %2426 = vrot.lane.b32.xlu2 %v2075_v4, %s10010_s29  ;;  %v11258_v52 = vrot.slane %v2240_v16, 5  ;;  %v2274_v4 = vshll.u32 %v2019_v31, 16  ;;  %v2308_v16 = vrot.slane %v2306_v39, 5  ;;  %v2213_v6 = vor.u32 %v2212_v12, %v2209_v19  ;;  %v2028_v31 = vld [vmem:[#allocation2 + $0xa4] sm:$0x1] }
 0x1ba   : > { %v2262_v36 = vrot.slane %v2261_v20, 4  ;;  %v2272_v51 = vrot.slane %v2271_v7, 4  ;;  %v2329_v63 = vrot.slane %v2327_v28, 4  ;;  %v2338_v49 = vrot.slane %v2336_v38, 5  ;;  %v2031_v39 = vld [vmem:[#allocation2 + $0xb0] sm:$0x1] }
 0x1bb   : > { %v1731_v18 = vpop.permute.xlu0 %1730  ;;  %v1864_v5 = vpop.permute.xlu2 %1863  ;;  %v2243_v13 = vsel %vm10180_vm3, %v2238_v24, %v11258_v52  ;;  %v2282_v11 = vshll.u32 %v2020_v48, 16  ;;  %v2281_v19 = vrot.slane %v2279_v60, 4 }
 0x1bc   : > { %1796 = vst.msk [vmem:[#allocation3 + $0xf8] sm:$0xf] %vm1764_vm15, %v1731_v18  ;;  %v11269_v18 = vrot.slane %v2288_v21, 5  ;;  %v2267_v46 = vsel %vm10180_vm3, %v2262_v36, %v2266_v55  ;;  %v2332_v21 = vrot.slane %v2330_v53, 5 }
 0x1bd   : > { %2442 = vrot.lane.b32.xlu1 %v2171_v32, %s10010_s29  ;;  %1959 = vst.msk [vmem:[#allocation3 + $0x8] sm:$0xf] %vm1957_vm1, %v1864_v5  ;;  %v2305_v5 = vrot.slane %v2303_v14, 4  ;;  %v2284_v12 = vrot.slane %v2282_v11, 5 }
 0x1be   : > { %v2295_v62 = vor.u32 %v2294_v40, %v11269_v18  ;;  %v2333_v36 = vor.u32 %v2332_v21, %v2329_v63  ;;  %v2346_v40 = vshll.u32 %v2028_v31, 16 }
 0x1bf   : > { %v1862_v44 = vpop.permute.xlu1 %1861  ;;  %v2309_v55 = vor.u32 %v2308_v16, %v2305_v5  ;;  %v2035_v5 = vld [vmem:[#allocation2 + $0xc0] sm:$0xf] }
 0x1c0   : > { %1958 = vst.msk [vmem:[#allocation3] sm:$0xf] %vm1957_vm1, %v1862_v44  ;;  %v2276_v44 = vrot.slane %v2274_v4, 5  ;;  %v2296_v20 = vrot.slane %v2295_v62, 4  ;;  %v2214_v4 = vrot.slane %v2213_v6, 4  ;;  %v2348_v28 = vrot.slane %v2346_v40, 5 }
 0x1c1   : > { %2446 = vrot.lane.b32.xlu0 %v2195_v1, %s10010_s29  ;;  %2432 = vrot.lane.b32.xlu2 %v2109_v8, %s10010_s29  ;;  %v2178_v1 = vshll.u32 %v2007_v34, 16  ;;  %v2300_v8 = vrot.slane %v2298_v35, 5  ;;  %v2360_v34 = vshll.u32 %v2030_v50, 16  ;;  %v2310_v15 = vrot.slane %v2309_v55, 4  ;;  %v2037_v40 = vld [vmem:[#allocation2 + $0xc8] sm:$0x1] }
 0x1c2   : > { %v2277_v30 = vsel %vm10180_vm3, %v2272_v51, %v2276_v44  ;;  %v2334_v51 = vrot.slane %v2333_v36, 4  ;;  %v2219_v44 = vsel %vm10180_vm3, %v2214_v4, %v11233_v9  ;;  %v2402_v38 = vshll.u32 %v2035_v5, 16 }
 0x1c3   : > { %v1866_v61 = vpop.permute.xlu0 %1865  ;;  %v1870_v58 = vpop.permute.xlu2 %1869  ;;  %v2180_v25 = vrot.slane %v2178_v1, 5  ;;  %v2301_v26 = vsel %vm10180_vm3, %v2296_v20, %v2300_v8  ;;  %v2246_v1 = vrot.slane %v2244_v23, 4  ;;  %v2418_v60 = vshll.u32 %v2037_v40, 16 }
 0x1c4   : > { %1960 = vst.msk [vmem:[#allocation3 + $0x10] sm:$0xf] %vm1957_vm1, %v1866_v61  ;;  %v2312_v61 = vshll.u32 %v11284_v33, 16  ;;  %v2339_v9 = vsel %vm10180_vm3, %v2334_v51, %v2338_v49  ;;  %v2404_v6 = vrot.slane %v2402_v38, 5 }
 0x1c5   : > { %2448 = vrot.lane.b32.xlu1 %v2205_v0, %s10010_s29  ;;  %1962 = vst.msk [vmem:[#allocation3 + $0x20] sm:$0xf] %vm1957_vm1, %v1870_v58  ;;  %v2176_v0 = vrot.slane %v2175_v59, 4  ;;  %v2375_v59 = vshrl.u32 %v2032_v47, 16  ;;  %v2247_v35 = vor.u32 %v2246_v1, %v11258_v52  ;;  %v11320_v52 = vld [vmem:[#allocation2 + $0xb8] sm:$0xf] }
 0x1c6   : > { %v11300_v58 = vrot.slane %v2312_v61, 5  ;;  %v2036_v61 = vld [vmem:[#allocation2 + $0xc4] sm:$0xf]  ;;  %v2384_v23 = vshll.u32 %v11320_v52, 16  ;;  %v2388_v38 = vshrl.u32 %v11320_v52, 16 }
 0x1c7   : > { %v1868_v32 = vpop.permute.xlu1 %1867  ;;  %v2408_v31 = vshll.u32 %v2036_v61, 16 }
 0x1c8   : > { %1961 = vst.msk [vmem:[#allocation3 + $0x18] sm:$0xf] %vm1957_vm1, %v1868_v32  ;;  %v2342_v32 = vrot.slane %v2340_v2, 4  ;;  %v11335_v36 = vrot.slane %v2384_v23, 5  ;;  %v2557_v23 = vld [vmem:[#allocation2 + $0x24] sm:$0xe] }
 0x1c9   : > { %2452 = vrot.lane.b32.xlu0 %v2229_v56, %s10010_s29  ;;  %2438 = vrot.lane.b32.xlu2 %v2147_v57, %s10010_s29  ;;  %v2181_v56 = vsel %vm10180_vm3, %v2176_v0, %v2180_v25  ;;  %v11303_v57 = vrot.slane %v2360_v34, 5  ;;  %v2377_v0 = vrot.slane %v2375_v59, 4  ;;  %v2380_v25 = vrot.slane %v2378_v43, 5 }
 0x1ca   : > { %v2343_v14 = vor.u32 %v2342_v32, %v2338_v49  ;;  %v2412_v49 = vshrl.u32 %v2036_v61, 16  ;;  %v2316_v32 = vshrl.u32 %v11284_v33, 16  ;;  %v11366_v61 = vld [vmem:[#allocation2 + $0x1c] sm:$0xf] }
 0x1cb   : > { %v1872_v3 = vpop.permute.xlu0 %1871  ;;  %v1876_v37 = vpop.permute.xlu2 %1875  ;;  %v2381_v21 = vor.u32 %v2380_v25, %v2377_v0  ;;  %v2656_v52 = vrot.slane %v11366_v61, 5 }
 0x1cc   : > { %1963 = vst.msk [vmem:[#allocation3 + $0x28] sm:$0xf] %vm1957_vm1, %v1872_v3  ;;  %v2366_v3 = vrot.slane %v2364_v54, 4  ;;  %v2344_v16 = vrot.slane %v2343_v14, 4  ;;  %v2414_v33 = vrot.slane %v2412_v49, 4 }
 0x1cd   : > { %2454 = vrot.lane.b32.xlu1 %v2243_v13, %s10010_s29  ;;  %1965 = vst.msk [vmem:[#allocation3 + $0x38] sm:$0xf] %vm1957_vm1, %v1876_v37  ;;  %v2016_v13 = vld [vmem:[#allocation2 + $0x74] sm:$0x1]  ;;  %v2399_v37 = vshrl.u32 %v2035_v5, 16  ;;  %v2420_v5 = vrot.slane %v2418_v60, 5 }
 0x1ce   : > { %v2250_v41 = vshll.u32 %v2016_v13, 16  ;;  %v2367_v53 = vor.u32 %v2366_v3, %v11303_v57  ;;  %v2349_v20 = vsel %vm10180_vm3, %v2344_v16, %v2348_v28  ;;  %v2318_v13 = vrot.slane %v2316_v32, 4  ;;  %v2029_v14 = vld [vmem:[#allocation2 + $0xa8] sm:$0xf] }
 0x1cf   : > { %v1874_v17 = vpop.permute.xlu1 %1873  ;;  %v9107_v32 = vrot.slane %v2557_v23, 9 }
 0x1d0   : > { %1964 = vst.msk [vmem:[#allocation3 + $0x30] sm:$0xf] %vm1957_vm1, %v1874_v17  ;;  %v2370_v17 = vshll.u32 %v2031_v39, 16  ;;  %v2252_v8 = vrot.slane %v2250_v41, 5  ;;  %v2368_v63 = vrot.slane %v2367_v53, 4 }
 0x1d1   : > { %2458 = vrot.lane.b32.xlu0 %v2267_v46, %s10010_s29  ;;  %2444 = vrot.lane.b32.xlu2 %v2181_v56, %s10010_s29  ;;  %v2315_v46 = vsel %vm10180_vm3, %v2310_v15, %v11300_v58  ;;  %v2285_v56 = vor.u32 %v2284_v12, %v2281_v19  ;;  %v2382_v15 = vrot.slane %v2381_v21, 4 }
 0x1d2   : > { %v2372_v55 = vrot.slane %v2370_v17, 5  ;;  %v2553_v17 = vld [vmem:[#allocation2 + $0x14] sm:$0x1] }
 0x1d3   : > { %v1878_v24 = vpop.permute.xlu0 %1877  ;;  %v1882_v42 = vpop.permute.xlu2 %1881  ;;  %v2286_v47 = vrot.slane %v2285_v56, 4  ;;  %v2387_v39 = vsel %vm10180_vm3, %v2382_v15, %v11335_v36  ;;  %v2558_v56 = vld [vmem:[#allocation2 + $0x28] sm:$0xf]  ;;  %v2559_v15 = vld [vmem:[#allocation2 + $0x2c] sm:$0x1] }
 0x1d4   : > { %1966 = vst.msk [vmem:[#allocation3 + $0x40] sm:$0xf] %vm1957_vm1, %v1878_v24  ;;  %v2401_v24 = vrot.slane %v2399_v37, 4  ;;  %v2652_v37 = vrot.slane %v2553_v17, 5  ;;  %v2666_v40 = vrot.slane %v2559_v15, 5 }
 0x1d5   : > { %2460 = vrot.lane.b32.xlu1 %v2277_v30, %s10010_s29  ;;  %1968 = vst.msk [vmem:[#allocation3 + $0x50] sm:$0xf] %vm1957_vm1, %v1882_v42  ;;  %v2248_v30 = vrot.slane %v2247_v35, 4  ;;  %v2025_v42 = vld [vmem:[#allocation2 + $0x98] sm:$0x1]  ;;  %v2291_v3 = vsel %vm10180_vm3, %v2286_v47, %v11269_v18  ;;  %v2354_v35 = vshll.u32 %v2029_v14, 16 }
 0x1d6   : > { %v2405_v48 = vor.u32 %v2404_v6, %v2401_v24  ;;  %v2322_v51 = vshll.u32 %v2025_v42, 16  ;;  %v2390_v24 = vrot.slane %v2388_v38, 4  ;;  %v2556_v38 = vld [vmem:[#allocation2 + $0x20] sm:$0x1]  ;;  %v2575_v15 = vld [vmem:[#allocation2 + $0x6c] sm:$0xe] }
 0x1d7   : > { %v1880_v7 = vpop.permute.xlu1 %1879  ;;  %v2253_v34 = vsel %vm10180_vm3, %v2248_v30, %v2252_v8  ;;  %v2356_v25 = vrot.slane %v2354_v35, 5  ;;  %v2554_v8 = vld [vmem:[#allocation2 + $0x18] sm:$0xe] }
 0x1d8   : > { %1967 = vst.msk [vmem:[#allocation3 + $0x48] sm:$0xf] %vm1957_vm1, %v1880_v7  ;;  %v2410_v7 = vrot.slane %v2408_v31, 5  ;;  %v2406_v59 = vrot.slane %v2405_v48, 4  ;;  %v2324_v53 = vrot.slane %v2322_v51, 5  ;;  %v2391_v47 = vor.u32 %v2390_v24, %v11335_v36 }
 0x1d9   : > { %2464 = vrot.lane.b32.xlu0 %v2301_v26, %s10010_s29  ;;  %2450 = vrot.lane.b32.xlu2 %v2219_v44, %s10010_s29  ;;  %v2373_v26 = vsel %vm10180_vm3, %v2368_v63, %v2372_v55  ;;  %v11348_v44 = vld [vmem:[#allocation2 + $0x10] sm:$0xf]  ;;  %v9106_v55 = vrot.slane %v2554_v8, 9  ;;  %v2034_v31 = vld [vmem:[#allocation2 + $0xbc] sm:$0x1] }
 0x1da   : > { %v2415_v43 = vor.u32 %v2414_v33, %v2410_v7  ;;  %v2411_v18 = vsel %vm10180_vm3, %v2406_v59, %v2410_v7  ;;  %v2649_v16 = vrot.slane %v11348_v44, 5  ;;  %v2394_v48 = vshll.u32 %v2034_v31, 16  ;;  %v11385_v7 = vld [vmem:[#allocation2 + $0x34] sm:$0xf]  ;;  %v2562_v36 = vld [vmem:[#allocation2 + $0x38] sm:$0x1] }
 0x1db   : > { %v1884_v62 = vpop.permute.xlu0 %1883  ;;  %v1888_v50 = vpop.permute.xlu2 %1887  ;;  %v2657_v49 = vsel %vm10873_vm13, %v9106_v55, %v2656_v52  ;;  %v2673_v59 = vrot.slane %v2562_v36, 5  ;;  %v2551_v51 = vld [vmem:[#allocation2 + $0xc] sm:$0xe]  ;;  %v2571_v55 = vld [vmem:[#allocation2 + $0x5c] sm:$0x1] }
 0x1dc   : > { %1969 = vst.msk [vmem:[#allocation3 + $0x58] sm:$0xf] %vm1957_vm1, %v1884_v62  ;;  %v2351_v62 = vshrl.u32 %v2029_v14, 16  ;;  %v2416_v41 = vrot.slane %v2415_v43, 4  ;;  %v2396_v42 = vrot.slane %v2394_v48, 5 }
 0x1dd   : > { %2466 = vrot.lane.b32.xlu1 %v2315_v46, %s10010_s29  ;;  %1971 = vst.msk [vmem:[#allocation3 + $0x68] sm:$0xf] %vm1957_vm1, %v1888_v50  ;;  %v2319_v46 = vor.u32 %v2318_v13, %v11300_v58  ;;  %v2572_v24 = vld [vmem:[#allocation2 + $0x60] sm:$0xe]  ;;  %v2560_v31 = vld [vmem:[#allocation2 + $0x30] sm:$0xe] }
 0x1de   : > { %v2353_v0 = vrot.slane %v2351_v62, 4  ;;  %v2421_v12 = vsel %vm10180_vm3, %v2416_v41, %v2420_v5  ;;  %v9105_v5 = vrot.slane %v2551_v51, 9  ;;  %v11459_v36 = vld [vmem:[#allocation2 + $0x7c] sm:$0xf] }
 0x1df   : > { %v1886_v2 = vpop.permute.xlu1 %1885  ;;  %v2320_v58 = vrot.slane %v2319_v46, 4  ;;  %v11402_v46 = vld [vmem:[#allocation2 + $0x40] sm:$0xf] }
 0x1e0   : > { %1970 = vst.msk [vmem:[#allocation3 + $0x60] sm:$0xf] %vm1957_vm1, %v1886_v2  ;;  %v2357_v50 = vor.u32 %v2356_v25, %v2353_v0 }
 0x1e1   : > { %2470 = vrot.lane.b32.xlu0 %v2339_v9, %s10010_s29  ;;  %2456 = vrot.lane.b32.xlu2 %v2253_v34, %s10010_s29  ;;  %v2651_v9 = vrot.slane %v2649_v16, 4  ;;  %v2325_v2 = vsel %vm10180_vm3, %v2320_v58, %v2324_v53  ;;  %v2663_v34 = vrot.slane %v2558_v56, 5  ;;  %v2567_v58 = vld [vmem:[#allocation2 + $0x4c] sm:$0xf]  ;;  %v2694_v56 = vrot.slane %v2571_v55, 5 }
 0x1e2   : > { %v2358_v21 = vrot.slane %v2357_v50, 4  ;;  %v2684_v25 = vrot.slane %v2567_v58, 5  ;;  %v2569_v58 = vld [vmem:[#allocation2 + $0x54] sm:$0xe]  ;;  %v11497_v55 = vld [vmem:[#allocation2 + $0xa0] sm:$0xf] }
 0x1e3   : > { %v1890_v54 = vpop.permute.xlu0 %1889  ;;  %v1894_v1 = vpop.permute.xlu2 %1893  ;;  %v2664_v33 = vsel %vm10873_vm13, %v9107_v32, %v2663_v34  ;;  %v9112_v32 = vrot.slane %v2572_v24, 9  ;;  %v2589_v24 = vld [vmem:[#allocation2 + $0xa4] sm:$0x1] }
 0x1e4   : > { %1972 = vst.msk [vmem:[#allocation3 + $0x70] sm:$0xf] %vm1957_vm1, %v1890_v54  ;;  %v2363_v54 = vsel %vm10180_vm3, %v2358_v21, %v11303_v57  ;;  %v2670_v57 = vrot.slane %v11385_v7, 5  ;;  %v2712_v7 = vrot.slane %v11459_v36, 5 }
 0x1e5   : > { %2472 = vrot.lane.b32.xlu1 %v2349_v20, %s10010_s29  ;;  %1974 = vst.msk [vmem:[#allocation3 + $0x80] sm:$0xf] %vm1957_vm1, %v1894_v1  ;;  %v2653_v20 = vsel %vm10873_vm13, %v2651_v9, %v2652_v37  ;;  %v2392_v1 = vrot.slane %v2391_v47, 4  ;;  %v2568_v9 = vld [vmem:[#allocation2 + $0x50] sm:$0x1] }
 0x1e6   : > { %v11421_v37 = vld [vmem:[#allocation2 + $0x58] sm:$0xf]  ;;  %v2687_v8 = vrot.slane %v2568_v9, 5  ;;  %v2576_v47 = vld [vmem:[#allocation2 + $0x70] sm:$0xf] }
 0x1e7   : > { %v1892_v4 = vpop.permute.xlu1 %1891  ;;  %v2397_v43 = vsel %vm10180_vm3, %v2392_v1, %v2396_v42  ;;  %v2691_v44 = vrot.slane %v11421_v37, 5  ;;  %v2577_v42 = vld [vmem:[#allocation2 + $0x74] sm:$0x1]  ;;  %v2733_v37 = vrot.slane %v11497_v55, 5  ;;  %v2892_v55 = vld [vmem:[#allocation2 + $0x28] sm:$0xf] }
 0x1e8   : > { %1973 = vst.msk [vmem:[#allocation3 + $0x78] sm:$0xf] %vm1957_vm1, %v1892_v4  ;;  %v2665_v4 = vrot.slane %v2663_v34, 4  ;;  %v2585_v9 = vld [vmem:[#allocation2 + $0x94] sm:$0xf] }
 0x1e9   : > { %2476 = vrot.lane.b32.xlu0 %v2373_v26, %s10010_s29  ;;  %2462 = vrot.lane.b32.xlu2 %v2291_v3, %s10010_s29  ;;  %v2672_v3 = vrot.slane %v2670_v57, 4  ;;  %v2693_v23 = vrot.slane %v2691_v44, 4 }
 0x1eb   : > { %v1896_v11 = vpop.permute.xlu0 %1895  ;;  %v1900_v19 = vpop.permute.xlu2 %1899  ;;  %v2674_v62 = vsel %vm10873_vm13, %v2672_v3, %v2673_v59  ;;  %v2708_v59 = vrot.slane %v2577_v42, 5  ;;  %v2594_v42 = vld [vmem:[#allocation2 + $0xb8] sm:$0xf] }
 0x1ec   : > { %1975 = vst.msk [vmem:[#allocation3 + $0x88] sm:$0xf] %vm1957_vm1, %v1896_v11  ;;  %v2563_v11 = vld [vmem:[#allocation2 + $0x3c] sm:$0xe] }
 0x1ed   : > { %2478 = vrot.lane.b32.xlu1 %v2387_v39, %s10010_s29  ;;  %1977 = vst.msk [vmem:[#allocation3 + $0x98] sm:$0xf] %vm1957_vm1, %v1900_v19  ;;  %v2667_v39 = vsel %vm10873_vm13, %v2665_v4, %v2666_v40  ;;  %v9109_v35 = vrot.slane %v2563_v11, 9  ;;  %v2650_v19 = vsel %vm10873_vm13, %v9105_v5, %v2649_v16  ;;  %v2658_v16 = vrot.slane %v2656_v52, 4  ;;  %v2580_v11 = vld [vmem:[#allocation2 + $0x80] sm:$0x1] }
 0x1ee   : > { %v9113_v4 = vrot.slane %v2575_v15, 9  ;;  %v2705_v40 = vrot.slane %v2576_v47, 5  ;;  %v2581_v5 = vld [vmem:[#allocation2 + $0x84] sm:$0xe]  ;;  %v11516_v15 = vld [vmem:[#allocation2 + $0xac] sm:$0xf] }
 0x1ef   : > { %v1898_v28 = vpop.permute.xlu1 %1897  ;;  %v2578_v47 = vld [vmem:[#allocation2 + $0x78] sm:$0xe] }
 0x1f0   : > { %1976 = vst.msk [vmem:[#allocation3 + $0x90] sm:$0xf] %vm1957_vm1, %v1898_v28  ;;  %v2566_v28 = vld [vmem:[#allocation2 + $0x48] sm:$0xe]  ;;  %v2707_v3 = vrot.slane %v2705_v40, 4 }
 0x1f1   : > { %2482 = vrot.lane.b32.xlu0 %v2411_v18, %s10010_s29  ;;  %2468 = vrot.lane.b32.xlu2 %v2325_v2, %s10010_s29  ;;  %v2677_v18 = vrot.slane %v11402_v46, 5  ;;  %v9110_v0 = vrot.slane %v2566_v28, 9  ;;  %v11478_v28 = vld [vmem:[#allocation2 + $0x88] sm:$0xf] }
 0x1f3   : > { %v1902_v30 = vpop.permute.xlu0 %1901  ;;  %v1906_v6 = vpop.permute.xlu2 %1905  ;;  %v2678_v17 = vsel %vm10873_vm13, %v9109_v35, %v2677_v18  ;;  %v2685_v2 = vsel %vm10873_vm13, %v9110_v0, %v2684_v25  ;;  %v2714_v35 = vrot.slane %v2712_v7, 4  ;;  %v2719_v0 = vrot.slane %v11478_v28, 5  ;;  %v2587_v28 = vld [vmem:[#allocation2 + $0x9c] sm:$0xe] }
 0x1f4   : > { %1978 = vst.msk [vmem:[#allocation3 + $0xa0] sm:$0xf] %vm1957_vm1, %v1902_v30  ;;  %v2686_v30 = vrot.slane %v2684_v25, 4 }
 0x1f5   : > { %2484 = vrot.lane.b32.xlu1 %v2421_v12, %s10010_s29  ;;  %1980 = vst.msk [vmem:[#allocation3 + $0xb0] sm:$0xf] %vm1957_vm1, %v1906_v6  ;;  %v11440_v6 = vld [vmem:[#allocation2 + $0x64] sm:$0xf] }
 0x1f6   : > { %v2688_v21 = vsel %vm10873_vm13, %v2686_v30, %v2687_v8  ;;  %v2698_v34 = vrot.slane %v11440_v6, 5  ;;  %v2726_v8 = vrot.slane %v2585_v9, 5 }
 0x1f7   : > { %v1904_v63 = vpop.permute.xlu1 %1903 }
 0x1f8   : > { %1979 = vst.msk [vmem:[#allocation3 + $0xa8] sm:$0xf] %vm1957_vm1, %v1904_v63 }
 0x1f9   : > { %2761 = vrot.lane.b32.xlu0 %v2653_v20, %s10011_s8  ;;  %2474 = vrot.lane.b32.xlu2 %v2363_v54, %s10010_s29  ;;  %v2659_v20 = vrot.slane %v2556_v38, 5 }
 0x1fb   : > { %v1908_v26 = vpop.permute.xlu0 %1907  ;;  %v1912_v14 = vpop.permute.xlu2 %1911  ;;  %v2660_v61 = vsel %vm10873_vm13, %v2658_v16, %v2659_v20  ;;  %v2586_v20 = vld [vmem:[#allocation2 + $0x98] sm:$0x1] }
 0x1fc   : > { %1981 = vst.msk [vmem:[#allocation3 + $0xb8] sm:$0xf] %vm1957_vm1, %v1908_v26  ;;  %v9108_v26 = vrot.slane %v2560_v31, 9 }
 0x1fd   : > { %2763 = vrot.lane.b32.xlu1 %v2657_v49, %s10011_s8  ;;  %1983 = vst.msk [vmem:[#allocation3 + $0xc8] sm:$0xf] %vm1957_vm1, %v1912_v14  ;;  %v2695_v49 = vsel %vm10873_vm13, %v2693_v23, %v2694_v56  ;;  %v2565_v14 = vld [vmem:[#allocation2 + $0x44] sm:$0x1]  ;;  %v2728_v23 = vrot.slane %v2726_v8, 4  ;;  %v2729_v56 = vrot.slane %v2586_v20, 5 }
 0x1fe   : > { %v2891_v20 = vld [vmem:[#allocation2 + $0x24] sm:$0xf] }
 0x1ff   : > { %v1910_v13 = vpop.permute.xlu1 %1909 }
 0x200   : > { %1982 = vst.msk [vmem:[#allocation3 + $0xc0] sm:$0xf] %vm1957_vm1, %v1910_v13  ;;  %v2671_v13 = vsel %vm10873_vm13, %v9108_v26, %v2670_v57  ;;  %v2679_v57 = vrot.slane %v2677_v18, 4  ;;  %v2590_v26 = vld [vmem:[#allocation2 + $0xa8] sm:$0xe] }
 0x201   : > { %2767 = vrot.lane.b32.xlu0 %v2664_v33, %s10011_s8  ;;  %2480 = vrot.lane.b32.xlu2 %v2397_v43, %s10010_s29  ;;  %v2699_v33 = vsel %vm10873_vm13, %v9112_v32, %v2698_v34  ;;  %v2735_v32 = vrot.slane %v2733_v37, 4 }
 0x203   : > { %v1914_v60 = vpop.permute.xlu0 %1913  ;;  %v1918_v53 = vpop.permute.xlu2 %1917 }
 0x204   : > { %1984 = vst.msk [vmem:[#allocation3 + $0xd0] sm:$0xf] %vm1957_vm1, %v1914_v60  ;;  %v2680_v60 = vrot.slane %v2565_v14, 5 }
 0x205   : > { %2769 = vrot.lane.b32.xlu1 %v2667_v39, %s10011_s8  ;;  %1986 = vst.msk [vmem:[#allocation3 + $0xe0] sm:$0xf] %vm1957_vm1, %v1918_v53  ;;  %v2706_v39 = vsel %vm10873_vm13, %v9113_v4, %v2705_v40  ;;  %v2740_v4 = vrot.slane %v11516_v15, 5 }
 0x206   : > { %v2681_v46 = vsel %vm10873_vm13, %v2679_v57, %v2680_v60  ;;  %v2595_v60 = vld [vmem:[#allocation2 + $0xbc] sm:$0x1] }
 0x207   : > { %v1916_v41 = vpop.permute.xlu1 %1915 }
 0x208   : > { %1985 = vst.msk [vmem:[#allocation3 + $0xd8] sm:$0xf] %vm1957_vm1, %v1916_v41  ;;  %v2715_v41 = vrot.slane %v2580_v11, 5  ;;  %v11533_v11 = vld [vmem:[#allocation2 + $0xc4] sm:$0xf] }
 0x209   : > { %2773 = vrot.lane.b32.xlu0 %v2674_v62, %s10011_s8  ;;  %2759 = vrot.lane.b32.xlu2 %v2650_v19, %s10011_s8  ;;  %v2709_v62 = vsel %vm10873_vm13, %v2707_v3, %v2708_v59  ;;  %v9111_v19 = vrot.slane %v2569_v58, 9  ;;  %v2747_v59 = vrot.slane %v2594_v42, 5  ;;  %v2754_v36 = vrot.slane %v11533_v11, 5  ;;  %v2893_v42 = vld [vmem:[#allocation2 + $0x30] sm:$0xf] }
 0x20a   : > { %v2716_v53 = vsel %vm10873_vm13, %v2714_v35, %v2715_v41  ;;  %v2750_v41 = vrot.slane %v2595_v60, 5  ;;  %v2906_v11 = vld [vmem:[#allocation2 + $0x7c] sm:$0xf] }
 0x20b   : > { %v1920_v12 = vpop.permute.xlu0 %1919  ;;  %v1924_v63 = vpop.permute.xlu2 %1923  ;;  %v2749_v35 = vrot.slane %v2747_v59, 4 }
 0x20c   : > { %1987 = vst.msk [vmem:[#allocation3 + $0xe8] sm:$0xf] %vm1957_vm1, %v1920_v12  ;;  %v2584_v12 = vld [vmem:[#allocation2 + $0x90] sm:$0xe] }
 0x20d   : > { %2775 = vrot.lane.b32.xlu1 %v2678_v17, %s10011_s8  ;;  %1989 = vst.msk [vmem:[#allocation3 + $0xf8] sm:$0xf] %vm1957_vm1, %v1924_v63  ;;  %v9115_v17 = vrot.slane %v2581_v5, 9  ;;  %v9116_v30 = vrot.slane %v2584_v12, 9  ;;  %v2574_v63 = vld [vmem:[#allocation2 + $0x68] sm:$0x1] }
 0x20e   : > { %v2598_v5 = vld [vmem:[#allocation2 + $0xc8] sm:$0x1] }
 0x20f   : > { %v1922_v50 = vpop.permute.xlu1 %1921 }
 0x210   : > { %1988 = vst.msk [vmem:[#allocation3 + $0xf0] sm:$0xf] %vm1957_vm1, %v1922_v50  ;;  %v2692_v50 = vsel %vm10873_vm13, %v9111_v19, %v2691_v44  ;;  %v2700_v44 = vrot.slane %v2698_v34, 4 }
 0x211   : > { %2779 = vrot.lane.b32.xlu0 %v2685_v2, %s10011_s8  ;;  %2765 = vrot.lane.b32.xlu2 %v2660_v61, %s10011_s8  ;;  %v2720_v2 = vsel %vm10873_vm13, %v9115_v17, %v2719_v0  ;;  %v2756_v17 = vrot.slane %v2754_v36, 4 }
 0x213   : > { %v2423_v52 = vpop.permute.xlu0 %2422  ;;  %v2427_v48 = vpop.permute.xlu2 %2426 }
 0x214   : > { %2519 = vst.msk [vmem:[#allocation3] sm:$0xf] %vm2518_vm2, %v2423_v52  ;;  %v2701_v52 = vrot.slane %v2574_v63, 5 }
 0x215   : > { %2781 = vrot.lane.b32.xlu1 %v2688_v21, %s10011_s8  ;;  %2521 = vst.msk [vmem:[#allocation3 + $0x10] sm:$0xf] %vm2518_vm2, %v2427_v48  ;;  %v2727_v21 = vsel %vm10873_vm13, %v9116_v30, %v2726_v8  ;;  %v2889_v30 = vld [vmem:[#allocation2 + $0x18] sm:$0xf] }
 0x216   : > { %v2702_v6 = vsel %vm10873_vm13, %v2700_v44, %v2701_v52  ;;  %v2596_v44 = vld [vmem:[#allocation2 + $0xc0] sm:$0xe]  ;;  %v2894_v52 = vld [vmem:[#allocation2 + $0x34] sm:$0xf] }
 0x217   : > { %v2425_v54 = vpop.permute.xlu1 %2424 }
 0x218   : > { %2520 = vst.msk [vmem:[#allocation3 + $0x8] sm:$0xf] %vm2518_vm2, %v2425_v54  ;;  %v2736_v54 = vrot.slane %v2589_v24, 5 }
 0x219   : > { %2785 = vrot.lane.b32.xlu0 %v2695_v49, %s10011_s8  ;;  %2771 = vrot.lane.b32.xlu2 %v2671_v13, %s10011_s8  ;;  %v2730_v49 = vsel %vm10873_vm13, %v2728_v23, %v2729_v56  ;;  %v9114_v13 = vrot.slane %v2578_v47, 9  ;;  %v2898_v47 = vld [vmem:[#allocation2 + $0x4c] sm:$0xf] }
 0x21a   : > { %v2737_v48 = vsel %vm10873_vm13, %v2735_v32, %v2736_v54  ;;  %v2895_v32 = vld [vmem:[#allocation2 + $0x3c] sm:$0xf] }
 0x21b   : > { %v2429_v1 = vpop.permute.xlu0 %2428  ;;  %v2433_v51 = vpop.permute.xlu2 %2432 }
 0x21c   : > { %2522 = vst.msk [vmem:[#allocation3 + $0x18] sm:$0xf] %vm2518_vm2, %v2429_v1  ;;  %v2593_v1 = vld [vmem:[#allocation2 + $0xb4] sm:$0xe] }
 0x21d   : > { %2787 = vrot.lane.b32.xlu1 %v2699_v33, %s10011_s8  ;;  %2524 = vst.msk [vmem:[#allocation3 + $0x28] sm:$0xf] %vm2518_vm2, %v2433_v51  ;;  %v9118_v33 = vrot.slane %v2590_v26, 9  ;;  %v9119_v3 = vrot.slane %v2593_v1, 9  ;;  %v2583_v51 = vld [vmem:[#allocation2 + $0x8c] sm:$0x1] }
 0x21e   : > { %v2901_v1 = vld [vmem:[#allocation2 + $0x60] sm:$0xf] }
 0x21f   : > { %v2431_v43 = vpop.permute.xlu1 %2430 }
 0x220   : > { %2523 = vst.msk [vmem:[#allocation3 + $0x20] sm:$0xf] %vm2518_vm2, %v2431_v43  ;;  %v2713_v43 = vsel %vm10873_vm13, %v9114_v13, %v2712_v7  ;;  %v2721_v7 = vrot.slane %v2719_v0, 4 }
 0x221   : > { %2791 = vrot.lane.b32.xlu0 %v2706_v39, %s10011_s8  ;;  %2777 = vrot.lane.b32.xlu2 %v2681_v46, %s10011_s8  ;;  %v2741_v39 = vsel %vm10873_vm13, %v9118_v33, %v2740_v4 }
 0x223   : > { %v2435_v18 = vpop.permute.xlu0 %2434  ;;  %v2439_v38 = vpop.permute.xlu2 %2438 }
 0x224   : > { %2525 = vst.msk [vmem:[#allocation3 + $0x30] sm:$0xf] %vm2518_vm2, %v2435_v18  ;;  %v2722_v18 = vrot.slane %v2583_v51, 5 }
 0x225   : > { %2793 = vrot.lane.b32.xlu1 %v2709_v62, %s10011_s8  ;;  %2527 = vst.msk [vmem:[#allocation3 + $0x40] sm:$0xf] %vm2518_vm2, %v2439_v38  ;;  %v2748_v62 = vsel %vm10873_vm13, %v9119_v3, %v2747_v59  ;;  %v9117_v38 = vrot.slane %v2587_v28, 9  ;;  %v3082_v28 = vld [vmem:[#allocation2 + $0x18] sm:$0xf] }
 0x226   : > { %v2723_v19 = vsel %vm10873_vm13, %v2721_v7, %v2722_v18 }
 0x227   : > { %v2437_v25 = vpop.permute.xlu1 %2436  ;;  %v2734_v8 = vsel %vm10873_vm13, %v9117_v38, %v2733_v37  ;;  %v3131_v38 = vshrl.u32 %v3082_v28, 16 }
 0x228   : > { %2526 = vst.msk [vmem:[#allocation3 + $0x38] sm:$0xf] %vm2518_vm2, %v2437_v25  ;;  %v2757_v25 = vrot.slane %v2598_v5, 5  ;;  %v2910_v5 = vld [vmem:[#allocation2 + $0x94] sm:$0xf] }
 0x229   : > { %2797 = vrot.lane.b32.xlu0 %v2716_v53, %s10011_s8  ;;  %2783 = vrot.lane.b32.xlu2 %v2692_v50, %s10011_s8  ;;  %v2751_v53 = vsel %vm10873_vm13, %v2749_v35, %v2750_v41  ;;  %v2907_v35 = vld [vmem:[#allocation2 + $0x84] sm:$0xf]  ;;  %v2899_v41 = vld [vmem:[#allocation2 + $0x54] sm:$0xf] }
 0x22a   : > { %v2758_v0 = vsel %vm10873_vm13, %v2756_v17, %v2757_v25  ;;  %v2912_v17 = vld [vmem:[#allocation2 + $0xa0] sm:$0xf] }
 0x22b   : > { %v2441_v16 = vpop.permute.xlu0 %2440  ;;  %v2445_v31 = vpop.permute.xlu2 %2444 }
 0x22c   : > { %2528 = vst.msk [vmem:[#allocation3 + $0x48] sm:$0xf] %vm2518_vm2, %v2441_v16  ;;  %v2592_v16 = vld [vmem:[#allocation2 + $0xb0] sm:$0x1] }
 0x22d   : > { %2799 = vrot.lane.b32.xlu1 %v2720_v2, %s10011_s8  ;;  %2530 = vst.msk [vmem:[#allocation3 + $0x58] sm:$0xf] %vm2518_vm2, %v2445_v31  ;;  %v2743_v23 = vrot.slane %v2592_v16, 5  ;;  %v9120_v31 = vrot.slane %v2596_v44, 9 }
 0x22f   : > { %v2443_v61 = vpop.permute.xlu1 %2442  ;;  %v2755_v54 = vsel %vm10873_vm13, %v9120_v31, %v2754_v36  ;;  %v2918_v31 = vld [vmem:[#allocation2 + $0xc4] sm:$0xf] }
 0x230   : > { %2529 = vst.msk [vmem:[#allocation3 + $0x50] sm:$0xf] %vm2518_vm2, %v2443_v61 }
 0x231   : > { %2803 = vrot.lane.b32.xlu0 %v2727_v21, %s10011_s8  ;;  %2789 = vrot.lane.b32.xlu2 %v2702_v6, %s10011_s8  ;;  %v2742_v21 = vrot.slane %v2740_v4, 4  ;;  %v2900_v4 = vld [vmem:[#allocation2 + $0x58] sm:$0xf] }
 0x233   : > { %v2447_v34 = vpop.permute.xlu0 %2446  ;;  %v2451_v14 = vpop.permute.xlu2 %2450  ;;  %v2744_v37 = vsel %vm10873_vm13, %v2742_v21, %v2743_v23 }
 0x234   : > { %2531 = vst.msk [vmem:[#allocation3 + $0x60] sm:$0xf] %vm2518_vm2, %v2447_v34  ;;  %v2897_v34 = vld [vmem:[#allocation2 + $0x48] sm:$0xf] }
 0x235   : > { %2805 = vrot.lane.b32.xlu1 %v2730_v49, %s10011_s8  ;;  %2533 = vst.msk [vmem:[#allocation3 + $0x70] sm:$0xf] %vm2518_vm2, %v2451_v14 }
 0x237   : > { %v2449_v40 = vpop.permute.xlu1 %2448 }
 0x238   : > { %2532 = vst.msk [vmem:[#allocation3 + $0x68] sm:$0xf] %vm2518_vm2, %v2449_v40 }
 0x239   : > { %2809 = vrot.lane.b32.xlu0 %v2737_v48, %s10011_s8  ;;  %2795 = vrot.lane.b32.xlu2 %v2713_v43, %s10011_s8  ;;  %v2890_v48 = vld [vmem:[#allocation2 + $0x1c] sm:$0xf]  ;;  %v2904_v43 = vld [vmem:[#allocation2 + $0x70] sm:$0xf] }
 0x23b   : > { %v2453_v57 = vpop.permute.xlu0 %2452  ;;  %v2457_v58 = vpop.permute.xlu2 %2456 }
 0x23c   : > { %2534 = vst.msk [vmem:[#allocation3 + $0x78] sm:$0xf] %vm2518_vm2, %v2453_v57  ;;  %v2896_v57 = vld [vmem:[#allocation2 + $0x40] sm:$0xf] }
 0x23d   : > { %2811 = vrot.lane.b32.xlu1 %v2741_v39, %s10011_s8  ;;  %2536 = vst.msk [vmem:[#allocation3 + $0x88] sm:$0xf] %vm2518_vm2, %v2457_v58  ;;  %v2903_v39 = vld [vmem:[#allocation2 + $0x6c] sm:$0xf]  ;;  %v2902_v58 = vld [vmem:[#allocation2 + $0x64] sm:$0xf] }
 0x23f   : > { %v2455_v46 = vpop.permute.xlu1 %2454 }
 0x240   : > { %2535 = vst.msk [vmem:[#allocation3 + $0x80] sm:$0xf] %vm2518_vm2, %v2455_v46  ;;  %v2909_v46 = vld [vmem:[#allocation2 + $0x90] sm:$0xf] }
 0x241   : > { %2815 = vrot.lane.b32.xlu0 %v2748_v62, %s10011_s8  ;;  %2801 = vrot.lane.b32.xlu2 %v2723_v19, %s10011_s8 }
 0x243   : > { %v2459_v12 = vpop.permute.xlu0 %2458  ;;  %v2463_v2 = vpop.permute.xlu2 %2462 }
 0x244   : > { %2537 = vst.msk [vmem:[#allocation3 + $0x90] sm:$0xf] %vm2518_vm2, %v2459_v12  ;;  %v2913_v12 = vld [vmem:[#allocation2 + $0xa8] sm:$0xf] }
 0x245   : > { %2817 = vrot.lane.b32.xlu1 %v2751_v53, %s10011_s8  ;;  %2539 = vst.msk [vmem:[#allocation3 + $0xa0] sm:$0xf] %vm2518_vm2, %v2463_v2  ;;  %v3134_v2 = vshll.u32 %v3082_v28, 16 }
 0x247   : > { %v2461_v9 = vpop.permute.xlu1 %2460 }
 0x248   : > { %2538 = vst.msk [vmem:[#allocation3 + $0x98] sm:$0xf] %vm2518_vm2, %v2461_v9 }
 0x249   : > { %2821 = vrot.lane.b32.xlu0 %v2758_v0, %s10011_s8  ;;  %2807 = vrot.lane.b32.xlu2 %v2734_v8, %s10011_s8  ;;  %v2905_v0 = vld [vmem:[#allocation2 + $0x78] sm:$0xf]  ;;  %v3083_v8 = vld [vmem:[#allocation2 + $0x1c] sm:$0xf] }
 0x24a   : > { %v3140_v21 = vshll.u32 %v3083_v8, 16  ;;  %v3144_v23 = vshrl.u32 %v3083_v8, 16 }
 0x24b   : > { %v2465_v50 = vpop.permute.xlu0 %2464  ;;  %v2469_v56 = vpop.permute.xlu2 %2468 }
 0x24c   : > { %2540 = vst.msk [vmem:[#allocation3 + $0xa8] sm:$0xf] %vm2518_vm2, %v2465_v50 }
 0x24d   : > { %2953 = vrot.lane.b32.xlu1 %v2889_v30, %s10012_s17  ;;  %2542 = vst.msk [vmem:[#allocation3 + $0xb8] sm:$0xf] %vm2518_vm2, %v2469_v56  ;;  %v2915_v30 = vld [vmem:[#allocation2 + $0xb4] sm:$0xf]  ;;  %v2916_v56 = vld [vmem:[#allocation2 + $0xb8] sm:$0xf] }
 0x24f   : > { %v2467_v63 = vpop.permute.xlu1 %2466 }
 0x250   : > { %2541 = vst.msk [vmem:[#allocation3 + $0xb0] sm:$0xf] %vm2518_vm2, %v2467_v63  ;;  %v3136_v63 = vrot.slane %v3134_v2, 5 }
 0x251   : > { %2957 = vrot.lane.b32.xlu0 %v2891_v20, %s10012_s17  ;;  %2813 = vrot.lane.b32.xlu2 %v2744_v37, %s10011_s8  ;;  %v3133_v20 = vrot.slane %v3131_v38, 4  ;;  %v2914_v38 = vld [vmem:[#allocation2 + $0xac] sm:$0xf] }
 0x253   : > { %v2471_v61 = vpop.permute.xlu0 %2470  ;;  %v2475_v49 = vpop.permute.xlu2 %2474  ;;  %v3137_v44 = vor.u32 %v3136_v63, %v3133_v20 }
 0x254   : > { %2543 = vst.msk [vmem:[#allocation3 + $0xc0] sm:$0xf] %vm2518_vm2, %v2471_v61  ;;  %v3086_v61 = vld [vmem:[#allocation2 + $0x28] sm:$0xf] }
 0x255   : > { %2959 = vrot.lane.b32.xlu1 %v2892_v55, %s10012_s17  ;;  %2545 = vst.msk [vmem:[#allocation3 + $0xd0] sm:$0xf] %vm2518_vm2, %v2475_v49  ;;  %v2908_v55 = vld [vmem:[#allocation2 + $0x88] sm:$0xf]  ;;  %v3084_v49 = vld [vmem:[#allocation2 + $0x20] sm:$0x1] }
 0x257   : > { %v2473_v24 = vpop.permute.xlu1 %2472 }
 0x258   : > { %2544 = vst.msk [vmem:[#allocation3 + $0xc8] sm:$0xf] %vm2518_vm2, %v2473_v24  ;;  %v3146_v24 = vrot.slane %v3144_v23, 4 }
 0x259   : > { %2963 = vrot.lane.b32.xlu0 %v2894_v52, %s10012_s17  ;;  %2819 = vrot.lane.b32.xlu2 %v2755_v54, %s10011_s8  ;;  %v3142_v52 = vrot.slane %v3140_v21, 5  ;;  %v3168_v54 = vshrl.u32 %v3086_v61, 16 }
 0x25b   : > { %v2477_v6 = vpop.permute.xlu0 %2476  ;;  %v2481_v15 = vpop.permute.xlu2 %2480 }
 0x25c   : > { %2546 = vst.msk [vmem:[#allocation3 + $0xd8] sm:$0xf] %vm2518_vm2, %v2477_v6 }
 0x25d   : > { %2965 = vrot.lane.b32.xlu1 %v2895_v32, %s10012_s17  ;;  %2548 = vst.msk [vmem:[#allocation3 + $0xe8] sm:$0xf] %vm2518_vm2, %v2481_v15  ;;  %v3164_v32 = vshll.u32 %v3086_v61, 16  ;;  %v3138_v15 = vrot.slane %v3137_v44, 4  ;;  %v3085_v61 = vld [vmem:[#allocation2 + $0x24] sm:$0xf] }
 0x25f   : > { %v2479_v26 = vpop.permute.xlu1 %2478 }
 0x260   : > { %2547 = vst.msk [vmem:[#allocation3 + $0xe0] sm:$0xf] %vm2518_vm2, %v2479_v26 }
 0x261   : > { %2969 = vrot.lane.b32.xlu0 %v2897_v34, %s10012_s17  ;;  %2955 = vrot.lane.b32.xlu2 %v2890_v48, %s10012_s17  ;;  %v3088_v34 = vld [vmem:[#allocation2 + $0x30] sm:$0xf]  ;;  %v3150_v48 = vshll.u32 %v3084_v49, 16 }
 0x263   : > { %v2483_v33 = vpop.permute.xlu0 %2482  ;;  %v2760_v13 = vpop.permute.xlu2 %2759 }
 0x264   : > { %2549 = vst.msk [vmem:[#allocation3 + $0xf0] sm:$0xf] %vm2518_vm2, %v2483_v33  ;;  %v3091_v33 = vld [vmem:[#allocation2 + $0x3c] sm:$0xf] }
 0x265   : > { %2971 = vrot.lane.b32.xlu1 %v2898_v47, %s10012_s17  ;;  %2856 = vst.msk [vmem:[#allocation3] sm:$0xf] %vm2855_vm4, %v2760_v13  ;;  %v3147_v47 = vor.u32 %v3146_v24, %v3142_v52  ;;  %v3170_v13 = vrot.slane %v3168_v54, 4 }
 0x267   : > { %v2485_v40 = vpop.permute.xlu1 %2484 }
 0x268   : > { %2550 = vst.msk [vmem:[#allocation3 + $0xf8] sm:$0xf] %vm2518_vm2, %v2485_v40  ;;  %v11626_v40 = vrot.slane %v3164_v32, 5 }
 0x269   : > { %2975 = vrot.lane.b32.xlu0 %v2900_v4, %s10012_s17  ;;  %2961 = vrot.lane.b32.xlu2 %v2893_v42, %s10012_s17  ;;  %v2919_v4 = vld [vmem:[#allocation2 + $0xcc] sm:$0xf]  ;;  %v3182_v42 = vshll.u32 %v3088_v34, 16 }
 0x26b   : > { %v2762_v14 = vpop.permute.xlu0 %2761  ;;  %v2766_v59 = vpop.permute.xlu2 %2765 }
 0x26c   : > { %2857 = vst.msk [vmem:[#allocation3 + $0x8] sm:$0xf] %vm2855_vm4, %v2762_v14  ;;  %v2911_v14 = vld [vmem:[#allocation2 + $0x9c] sm:$0xf] }
 0x26d   : > { %2977 = vrot.lane.b32.xlu1 %v2901_v1, %s10012_s17  ;;  %2859 = vst.msk [vmem:[#allocation3 + $0x18] sm:$0xf] %vm2855_vm4, %v2766_v59  ;;  %v3179_v1 = vshrl.u32 %v3088_v34, 16  ;;  %v3203_v59 = vshrl.u32 %v3091_v33, 16 }
 0x26f   : > { %v2764_v3 = vpop.permute.xlu1 %2763 }
 0x270   : > { %2858 = vst.msk [vmem:[#allocation3 + $0x10] sm:$0xf] %vm2855_vm4, %v2764_v3  ;;  %v3087_v3 = vld [vmem:[#allocation2 + $0x2c] sm:$0x1] }
 0x271   : > { %2981 = vrot.lane.b32.xlu0 %v2903_v39, %s10012_s17  ;;  %2967 = vrot.lane.b32.xlu2 %v2896_v57, %s10012_s17  ;;  %v3143_v57 = vsel %vm10180_vm3, %v3138_v15, %v3142_v52  ;;  %v3155_v15 = vshrl.u32 %v3085_v61, 16 }
 0x273   : > { %v2768_v60 = vpop.permute.xlu0 %2767  ;;  %v2772_v62 = vpop.permute.xlu2 %2771 }
 0x274   : > { %2860 = vst.msk [vmem:[#allocation3 + $0x20] sm:$0xf] %vm2855_vm4, %v2768_v60  ;;  %v3148_v60 = vrot.slane %v3147_v47, 4  ;;  %v3158_v47 = vshll.u32 %v3085_v61, 16  ;;  %v3090_v61 = vld [vmem:[#allocation2 + $0x38] sm:$0x1] }
 0x275   : > { %2983 = vrot.lane.b32.xlu1 %v2904_v43, %s10012_s17  ;;  %2862 = vst.msk [vmem:[#allocation3 + $0x30] sm:$0xf] %vm2855_vm4, %v2772_v62  ;;  %v3206_v43 = vshll.u32 %v3091_v33, 16  ;;  %v3171_v62 = vor.u32 %v3170_v13, %v11626_v40 }
 0x277   : > { %v2770_v51 = vpop.permute.xlu1 %2769 }
 0x278   : > { %2861 = vst.msk [vmem:[#allocation3 + $0x28] sm:$0xf] %vm2855_vm4, %v2770_v51  ;;  %v3092_v51 = vld [vmem:[#allocation2 + $0x40] sm:$0xf] }
 0x279   : > { %2987 = vrot.lane.b32.xlu0 %v2906_v11, %s10012_s17  ;;  %2973 = vrot.lane.b32.xlu2 %v2899_v41, %s10012_s17  ;;  %v3152_v11 = vrot.slane %v3150_v48, 5  ;;  %v3181_v41 = vrot.slane %v3179_v1, 4  ;;  %v2917_v48 = vld [vmem:[#allocation2 + $0xc0] sm:$0xf] }
 0x27b   : > { %v2774_v36 = vpop.permute.xlu0 %2773  ;;  %v2778_v18 = vpop.permute.xlu2 %2777 }
 0x27c   : > { %2863 = vst.msk [vmem:[#allocation3 + $0x38] sm:$0xf] %vm2855_vm4, %v2774_v36  ;;  %v3184_v36 = vrot.slane %v3182_v42, 5 }
 0x27d   : > { %2989 = vrot.lane.b32.xlu1 %v2907_v35, %s10012_s17  ;;  %2865 = vst.msk [vmem:[#allocation3 + $0x48] sm:$0xf] %vm2855_vm4, %v2778_v18  ;;  %v3174_v35 = vshll.u32 %v3087_v3, 16 }
 0x27e   : > { %v3185_v28 = vor.u32 %v3184_v36, %v3181_v41 }
 0x27f   : > { %v2776_v7 = vpop.permute.xlu1 %2775 }
 0x280   : > { %2864 = vst.msk [vmem:[#allocation3 + $0x40] sm:$0xf] %vm2855_vm4, %v2776_v7  ;;  %v11634_v7 = vld [vmem:[#allocation2 + $0x34] sm:$0xf]  ;;  %v3186_v23 = vrot.slane %v3185_v28, 4 }
 0x281   : > { %2993 = vrot.lane.b32.xlu0 %v2909_v46, %s10012_s17  ;;  %2979 = vrot.lane.b32.xlu2 %v2902_v58, %s10012_s17  ;;  %v3208_v58 = vrot.slane %v3206_v43, 5  ;;  %v3101_v43 = vld [vmem:[#allocation2 + $0x64] sm:$0xf]  ;;  %v3192_v28 = vshrl.u32 %v11634_v7, 16 }
 0x282   : > { %v3284_v36 = vshll.u32 %v3101_v43, 16 }
 0x283   : > { %v2780_v53 = vpop.permute.xlu0 %2779  ;;  %v2784_v19 = vpop.permute.xlu2 %2783 }
 0x284   : > { %2866 = vst.msk [vmem:[#allocation3 + $0x50] sm:$0xf] %vm2855_vm4, %v2780_v53  ;;  %v3212_v53 = vshll.u32 %v3092_v51, 16 }
 0x285   : > { %2995 = vrot.lane.b32.xlu1 %v2910_v5, %s10012_s17  ;;  %2868 = vst.msk [vmem:[#allocation3 + $0x60] sm:$0xf] %vm2855_vm4, %v2784_v19  ;;  %v3205_v5 = vrot.slane %v3203_v59, 4  ;;  %v3172_v19 = vrot.slane %v3171_v62, 4 }
 0x286   : > { %v3214_v8 = vrot.slane %v3212_v53, 5 }
 0x287   : > { %v2782_v25 = vpop.permute.xlu1 %2781 }
 0x288   : > { %2867 = vst.msk [vmem:[#allocation3 + $0x58] sm:$0xf] %vm2855_vm4, %v2782_v25  ;;  %v3153_v25 = vsel %vm10180_vm3, %v3148_v60, %v3152_v11  ;;  %v3157_v60 = vrot.slane %v3155_v15, 4  ;;  %v3160_v11 = vrot.slane %v3158_v47, 5  ;;  %v3105_v47 = vld [vmem:[#allocation2 + $0x74] sm:$0x1] }
 0x289   : > { %2999 = vrot.lane.b32.xlu0 %v2912_v17, %s10012_s17  ;;  %2985 = vrot.lane.b32.xlu2 %v2905_v0, %s10012_s17  ;;  %v3216_v17 = vshrl.u32 %v3092_v51, 16  ;;  %v3188_v0 = vshll.u32 %v11634_v7, 16 }
 0x28b   : > { %v2786_v9 = vpop.permute.xlu0 %2785  ;;  %v2790_v16 = vpop.permute.xlu2 %2789 }
 0x28c   : > { %2869 = vst.msk [vmem:[#allocation3 + $0x68] sm:$0xf] %vm2855_vm4, %v2786_v9  ;;  %v3095_v9 = vld [vmem:[#allocation2 + $0x4c] sm:$0xf] }
 0x28d   : > { %3001 = vrot.lane.b32.xlu1 %v2913_v12, %s10012_s17  ;;  %2871 = vst.msk [vmem:[#allocation3 + $0x78] sm:$0xf] %vm2855_vm4, %v2790_v16  ;;  %v3176_v12 = vrot.slane %v3174_v35, 5  ;;  %v3093_v16 = vld [vmem:[#allocation2 + $0x44] sm:$0x1]  ;;  %v3236_v20 = vshll.u32 %v3095_v9, 16 }
 0x28e   : > { %v3240_v63 = vshrl.u32 %v3095_v9, 16 }
 0x28f   : > { %v2788_v50 = vpop.permute.xlu1 %2787  ;;  %v3177_v21 = vsel %vm10180_vm3, %v3172_v19, %v3176_v12  ;;  %v11652_v49 = vrot.slane %v3236_v20, 5  ;;  %v3102_v20 = vld [vmem:[#allocation2 + $0x68] sm:$0x1] }
 0x290   : > { %2870 = vst.msk [vmem:[#allocation3 + $0x70] sm:$0xf] %vm2855_vm4, %v2788_v50  ;;  %v3218_v50 = vrot.slane %v3216_v17, 4  ;;  %v3242_v32 = vrot.slane %v3240_v63, 4 }
 0x291   : > { %3005 = vrot.lane.b32.xlu0 %v2915_v30, %s10012_s17  ;;  %2991 = vrot.lane.b32.xlu2 %v2908_v55, %s10012_s17  ;;  %v3209_v30 = vor.u32 %v3208_v58, %v3205_v5  ;;  %v3097_v55 = vld [vmem:[#allocation2 + $0x54] sm:$0xf] }
 0x292   : > { %v3219_v24 = vor.u32 %v3218_v50, %v3214_v8  ;;  %v3251_v54 = vshrl.u32 %v3097_v55, 16 }
 0x293   : > { %v2792_v37 = vpop.permute.xlu0 %2791  ;;  %v2796_v26 = vpop.permute.xlu2 %2795  ;;  %v3210_v52 = vrot.slane %v3209_v30, 4 }
 0x294   : > { %2872 = vst.msk [vmem:[#allocation3 + $0x80] sm:$0xf] %vm2855_vm4, %v2792_v37  ;;  %v3220_v1 = vrot.slane %v3219_v24, 4  ;;  %v3253_v3 = vrot.slane %v3251_v54, 4 }
 0x295   : > { %3007 = vrot.lane.b32.xlu1 %v2916_v56, %s10012_s17  ;;  %2874 = vst.msk [vmem:[#allocation3 + $0x90] sm:$0xf] %vm2855_vm4, %v2796_v26  ;;  %v11647_v56 = vrot.slane %v3188_v0, 5  ;;  %v3096_v26 = vld [vmem:[#allocation2 + $0x50] sm:$0x1]  ;;  %v3215_v13 = vsel %vm10180_vm3, %v3210_v52, %v3214_v8 }
 0x296   : > { %v2920_v0 = vld [vmem:[#allocation2 + $0xd0] sm:$0xf] }
 0x297   : > { %v2794_v6 = vpop.permute.xlu1 %2793  ;;  %v3191_v34 = vsel %vm10180_vm3, %v3186_v23, %v11647_v56 }
 0x298   : > { %2873 = vst.msk [vmem:[#allocation3 + $0x88] sm:$0xf] %vm2855_vm4, %v2794_v6  ;;  %v3254_v6 = vshll.u32 %v3097_v55, 16  ;;  %v3106_v55 = vld [vmem:[#allocation2 + $0x78] sm:$0xf] }
 0x299   : > { %3011 = vrot.lane.b32.xlu0 %v2918_v31, %s10012_s17  ;;  %2997 = vrot.lane.b32.xlu2 %v2911_v14, %s10012_s17  ;;  %v3222_v31 = vshll.u32 %v3093_v16, 16  ;;  %v3243_v14 = vor.u32 %v3242_v32, %v11652_v49  ;;  %v3094_v32 = vld [vmem:[#allocation2 + $0x48] sm:$0xf] }
 0x29a   : > { %v3256_v59 = vrot.slane %v3254_v6, 5  ;;  %v3323_v6 = vshrl.u32 %v3106_v55, 16 }
 0x29b   : > { %v2798_v39 = vpop.permute.xlu0 %2797  ;;  %v2802_v18 = vpop.permute.xlu2 %2801  ;;  %v3224_v42 = vrot.slane %v3222_v31, 5  ;;  %v3294_v31 = vshll.u32 %v3102_v20, 16 }
 0x29c   : > { %2875 = vst.msk [vmem:[#allocation3 + $0x98] sm:$0xf] %vm2855_vm4, %v2798_v39  ;;  %v3246_v39 = vshll.u32 %v3096_v26, 16  ;;  %v3257_v58 = vor.u32 %v3256_v59, %v3253_v3 }
 0x29d   : > { %3013 = vrot.lane.b32.xlu1 %v2919_v4, %s10012_s17  ;;  %2877 = vst.msk [vmem:[#allocation3 + $0xa8] sm:$0xf] %vm2855_vm4, %v2802_v18  ;;  %v3100_v4 = vld [vmem:[#allocation2 + $0x60] sm:$0xf]  ;;  %v3244_v18 = vrot.slane %v3243_v14, 4  ;;  %v3225_v17 = vsel %vm10180_vm3, %v3220_v1, %v3224_v42  ;;  %v3198_v1 = vshll.u32 %v3090_v61, 16 }
 0x29e   : > { %v3275_v51 = vshrl.u32 %v3100_v4, 16  ;;  %v3278_v62 = vshll.u32 %v3100_v4, 16  ;;  %v3248_v5 = vrot.slane %v3246_v39, 5  ;;  %v3258_v50 = vrot.slane %v3257_v58, 4  ;;  %v3109_v39 = vld [vmem:[#allocation2 + $0x84] sm:$0xf] }
 0x29f   : > { %v2800_v46 = vpop.permute.xlu1 %2799  ;;  %v3227_v42 = vshrl.u32 %v3094_v32, 16  ;;  %v3230_v14 = vshll.u32 %v3094_v32, 16  ;;  %v3296_v59 = vrot.slane %v3294_v31, 5 }
 0x2a0   : > { %2876 = vst.msk [vmem:[#allocation3 + $0xa0] sm:$0xf] %vm2855_vm4, %v2800_v46  ;;  %v3288_v46 = vshrl.u32 %v3101_v43, 16  ;;  %v3277_v19 = vrot.slane %v3275_v51, 4  ;;  %v3280_v12 = vrot.slane %v3278_v62, 5  ;;  %v3249_v8 = vsel %vm10180_vm3, %v3244_v18, %v3248_v5 }
 0x2a1   : > { %3514 = vrot.lane.b32.xlu0 %v3143_v57, %s10013_s11  ;;  %3003 = vrot.lane.b32.xlu2 %v2914_v38, %s10012_s17  ;;  %v11663_v57 = vld [vmem:[#allocation2 + $0x58] sm:$0xf]  ;;  %v3104_v38 = vld [vmem:[#allocation2 + $0x70] sm:$0xf]  ;;  %v3325_v43 = vrot.slane %v3323_v6, 4  ;;  %v3200_v18 = vrot.slane %v3198_v1, 5 }
 0x2a2   : > { %v3260_v53 = vshll.u32 %v11663_v57, 16  ;;  %v3290_v30 = vrot.slane %v3288_v46, 4  ;;  %v3281_v7 = vor.u32 %v3280_v12, %v3277_v19  ;;  %v3312_v23 = vshrl.u32 %v3104_v38, 16  ;;  %v11697_v51 = vld [vmem:[#allocation2 + $0x7c] sm:$0xf] }
 0x2a3   : > { %v2804_v2 = vpop.permute.xlu0 %2803  ;;  %v2808_v44 = vpop.permute.xlu2 %2807  ;;  %v3110_v62 = vld [vmem:[#allocation2 + $0x88] sm:$0xf]  ;;  %v3229_v5 = vrot.slane %v3227_v42, 4  ;;  %v3232_v58 = vrot.slane %v3230_v14, 5  ;;  %v3332_v19 = vshll.u32 %v11697_v51, 16 }
 0x2a4   : > { %2878 = vst.msk [vmem:[#allocation3 + $0xb0] sm:$0xf] %vm2855_vm4, %v2804_v2  ;;  %v3286_v2 = vrot.slane %v3284_v36, 5  ;;  %v11676_v16 = vrot.slane %v3260_v53, 5  ;;  %v3282_v15 = vrot.slane %v3281_v7, 4  ;;  %v3356_v12 = vshll.u32 %v3110_v62, 16 }
 0x2a5   : > { %3516 = vrot.lane.b32.xlu1 %v3153_v25, %s10013_s11  ;;  %2880 = vst.msk [vmem:[#allocation3 + $0xc0] sm:$0xf] %vm2855_vm4, %v2808_v44  ;;  %v3161_v25 = vor.u32 %v3160_v11, %v3157_v60  ;;  %v3194_v44 = vrot.slane %v3192_v28, 4  ;;  %v3360_v28 = vshrl.u32 %v3110_v62, 16  ;;  %v3233_v20 = vor.u32 %v3232_v58, %v3229_v5 }
 0x2a6   : > { %v3291_v24 = vor.u32 %v3290_v30, %v3286_v2  ;;  %v3263_v54 = vsel %vm10180_vm3, %v3258_v50, %v11676_v16  ;;  %v3287_v11 = vsel %vm10180_vm3, %v3282_v15, %v3286_v2  ;;  %v3264_v30 = vshrl.u32 %v11663_v57, 16 }
 0x2a7   : > { %v2806_v37 = vpop.permute.xlu1 %2805  ;;  %v3162_v63 = vrot.slane %v3161_v25, 4  ;;  %v3234_v31 = vrot.slane %v3233_v20, 4  ;;  %v3108_v20 = vld [vmem:[#allocation2 + $0x80] sm:$0x1] }
 0x2a8   : > { %2879 = vst.msk [vmem:[#allocation3 + $0xb8] sm:$0xf] %vm2855_vm4, %v2806_v37  ;;  %v3292_v3 = vrot.slane %v3291_v24, 4  ;;  %v3266_v32 = vrot.slane %v3264_v30, 4 }
 0x2a9   : > { %3520 = vrot.lane.b32.xlu0 %v3177_v21, %s10013_s11  ;;  %3009 = vrot.lane.b32.xlu2 %v2917_v48, %s10012_s17  ;;  %v3308_v21 = vshll.u32 %v3104_v38, 16  ;;  %v3167_v26 = vsel %vm10180_vm3, %v3162_v63, %v11626_v40  ;;  %v3318_v40 = vshll.u32 %v3105_v47, 16  ;;  %v3113_v63 = vld [vmem:[#allocation2 + $0x94] sm:$0xf]  ;;  %v3239_v14 = vsel %vm10180_vm3, %v3234_v31, %v11652_v49 }
 0x2ab   : > { %v2810_v33 = vpop.permute.xlu0 %2809  ;;  %v2814_v41 = vpop.permute.xlu2 %2813  ;;  %v11688_v48 = vrot.slane %v3308_v21, 5  ;;  %v11710_v21 = vrot.slane %v3332_v19, 5 }
 0x2ac   : > { %2881 = vst.msk [vmem:[#allocation3 + $0xc8] sm:$0xf] %vm2855_vm4, %v2810_v33  ;;  %v3314_v33 = vrot.slane %v3312_v23, 4  ;;  %v3358_v23 = vrot.slane %v3356_v12, 5  ;;  %v3115_v12 = vld [vmem:[#allocation2 + $0x9c] sm:$0xf] }
 0x2ad   : > { %3522 = vrot.lane.b32.xlu1 %v3191_v34, %s10013_s11  ;;  %2883 = vst.msk [vmem:[#allocation3 + $0xd8] sm:$0xf] %vm2855_vm4, %v2814_v41  ;;  %v3326_v34 = vshll.u32 %v3106_v55, 16  ;;  %v3350_v41 = vshll.u32 %v3109_v39, 16  ;;  %v3362_v55 = vrot.slane %v3360_v28, 4  ;;  %v3395_v28 = vshrl.u32 %v3115_v12, 16 }
 0x2af   : > { %v2812_v35 = vpop.permute.xlu1 %2811  ;;  %v3328_v60 = vrot.slane %v3326_v34, 5  ;;  %v3352_v2 = vrot.slane %v3350_v41, 5  ;;  %v3099_v34 = vld [vmem:[#allocation2 + $0x5c] sm:$0x1]  ;;  %v3363_v15 = vor.u32 %v3362_v55, %v3358_v23 }
 0x2b0   : > { %2882 = vst.msk [vmem:[#allocation3 + $0xd0] sm:$0xf] %vm2855_vm4, %v2812_v35  ;;  %v3347_v35 = vshrl.u32 %v3109_v39, 16 }
 0x2b1   : > { %3526 = vrot.lane.b32.xlu0 %v3215_v13, %s10013_s11  ;;  %3015 = vrot.lane.b32.xlu2 %v2920_v0, %s10012_s17  ;;  %v3195_v13 = vor.u32 %v3194_v44, %v11647_v56  ;;  %v3315_v56 = vor.u32 %v3314_v33, %v11688_v48  ;;  %v3329_v25 = vor.u32 %v3328_v60, %v3325_v43  ;;  %v3380_v44 = vshll.u32 %v3113_v63, 16 }
 0x2b2   : > { %v3349_v38 = vrot.slane %v3347_v35, 4  ;;  %v3364_v43 = vrot.slane %v3363_v15, 4 }
 0x2b3   : > { %v2816_v9 = vpop.permute.xlu0 %2815  ;;  %v2820_v52 = vpop.permute.xlu2 %2819  ;;  %v3196_v46 = vrot.slane %v3195_v13, 4  ;;  %v3316_v0 = vrot.slane %v3315_v56, 4  ;;  %v3330_v7 = vrot.slane %v3329_v25, 4  ;;  %v11721_v1 = vrot.slane %v3380_v44, 5 }
 0x2b4   : > { %2884 = vst.msk [vmem:[#allocation3 + $0xe0] sm:$0xf] %vm2855_vm4, %v2816_v9  ;;  %v3320_v9 = vrot.slane %v3318_v40, 5  ;;  %v3353_v61 = vor.u32 %v3352_v2, %v3349_v38  ;;  %v3114_v40 = vld [vmem:[#allocation2 + $0x98] sm:$0x1] }
 0x2b5   : > { %3528 = vrot.lane.b32.xlu1 %v3225_v17, %s10013_s11  ;;  %2886 = vst.msk [vmem:[#allocation3 + $0xf0] sm:$0xf] %vm2855_vm4, %v2820_v52  ;;  %v3297_v17 = vsel %vm10180_vm3, %v3292_v3, %v3296_v59  ;;  %v3384_v52 = vshrl.u32 %v3113_v63, 16  ;;  %v3267_v3 = vor.u32 %v3266_v32, %v11676_v16  ;;  %v3270_v59 = vshll.u32 %v3099_v34, 16  ;;  %v11747_v63 = vld [vmem:[#allocation2 + $0xa0] sm:$0xf] }
 0x2b6   : > { %v3321_v57 = vsel %vm10180_vm3, %v3316_v0, %v3320_v9  ;;  %v3354_v13 = vrot.slane %v3353_v61, 4  ;;  %v3390_v35 = vshll.u32 %v3114_v40, 16  ;;  %v3398_v0 = vshll.u32 %v3115_v12, 16  ;;  %v3644_v12 = vld [vmem:[#allocation2 + $0x1c] sm:$0xf] }
 0x2b7   : > { %v2818_v37 = vpop.permute.xlu1 %2817  ;;  %v3386_v42 = vrot.slane %v3384_v52, 4  ;;  %v3268_v16 = vrot.slane %v3267_v3, 4  ;;  %v3342_v61 = vshll.u32 %v3108_v20, 16 }
 0x2b8   : > { %2885 = vst.msk [vmem:[#allocation3 + $0xe8] sm:$0xf] %vm2855_vm4, %v2818_v37  ;;  %v3103_v37 = vld [vmem:[#allocation2 + $0x6c] sm:$0xf]  ;;  %v3359_v62 = vsel %vm10180_vm3, %v3354_v13, %v3358_v23  ;;  %v3404_v23 = vshll.u32 %v11747_v63, 16 }
 0x2b9   : > { %3532 = vrot.lane.b32.xlu0 %v3249_v8, %s10013_s11  ;;  %3518 = vrot.lane.b32.xlu2 %v3167_v26, %s10013_s11  ;;  %v3201_v8 = vsel %vm10180_vm3, %v3196_v46, %v3200_v18  ;;  %v3335_v26 = vsel %vm10180_vm3, %v3330_v7, %v11710_v21  ;;  %v3299_v47 = vshrl.u32 %v3103_v37, 16  ;;  %v3302_v33 = vshll.u32 %v3103_v37, 16 }
 0x2ba   : > { %v3387_v49 = vor.u32 %v3386_v42, %v11721_v1  ;;  %v11756_v52 = vrot.slane %v3404_v23, 5  ;;  %v9677_v42 = vld [vmem:[%s13673_s1 + $0x30] sm:$0xff]  ;;  %v3117_v23 = vld [vmem:[#allocation2 + $0xa4] sm:$0x1] }
 0x2bb   : > { %v2822_v4 = vpop.permute.xlu0 %2821  ;;  %v2956_v53 = vpop.permute.xlu2 %2955  ;;  %v3301_v60 = vrot.slane %v3299_v47, 4  ;;  %v9678_v47 = vld [vmem:[%s13673_s1 + $0x38] sm:$0xff] }
 0x2bc   : > { %2887 = vst.msk [vmem:[#allocation3 + $0xf8] sm:$0xf] %vm2855_vm4, %v2822_v4  ;;  %v3388_v58 = vrot.slane %v3387_v49, 4  ;;  %4154 = vmatpush.bf16.msra.mxu0 %v9678_v47 }
 0x2bd   : > { %3534 = vrot.lane.b32.xlu1 %v3263_v54, %s10013_s11  ;;  %3051 = vst.msk [vmem:[#allocation3 + $0x8] sm:$0xf] %vm3049_vm5, %v2956_v53  ;;  %v3111_v54 = vld [vmem:[#allocation2 + $0x8c] sm:$0x1]  ;;  %v3392_v53 = vrot.slane %v3390_v35, 5 }
 0x2be   : > { %v3366_v4 = vshll.u32 %v3111_v54, 16  ;;  %v3120_v35 = vld [vmem:[#allocation2 + $0xb0] sm:$0x1] }
 0x2bf   : > { %v2954_v36 = vpop.permute.xlu1 %2953  ;;  %v3393_v38 = vsel %vm10180_vm3, %v3388_v58, %v3392_v53  ;;  %v3408_v53 = vshrl.u32 %v11747_v63, 16 }
 0x2c0   : > { %3050 = vst.msk [vmem:[#allocation3] sm:$0xf] %vm3049_vm5, %v2954_v36  ;;  %v3368_v56 = vrot.slane %v3366_v4, 5  ;;  %v3272_v36 = vrot.slane %v3270_v59, 5  ;;  %v3118_v59 = vld [vmem:[#allocation2 + $0xa8] sm:$0xf]  ;;  %4155 = vmatpush.bf16.msra.mxu0 %v9677_v42 }
 0x2c1   : > { %3538 = vrot.lane.b32.xlu0 %v3287_v11, %s10013_s11  ;;  %3524 = vrot.lane.b32.xlu2 %v3201_v8, %s10013_s11  ;;  %v3304_v11 = vrot.slane %v3302_v33, 5  ;;  %v3400_v8 = vrot.slane %v3398_v0, 5  ;;  %v3419_v40 = vshrl.u32 %v3118_v59, 16  ;;  %v9675_v0 = vld [vmem:[%s13673_s1 + $0x20] sm:$0xff]  ;;  %v3410_v63 = vrot.slane %v3408_v53, 4  ;;  %v9672_v42 = vld [vmem:[%s13673_s1 + $0x8] sm:$0xff] }
 0x2c2   : > { %v3369_v18 = vsel %vm10180_vm3, %v3364_v43, %v3368_v56  ;;  %v3273_v25 = vsel %vm10180_vm3, %v3268_v16, %v3272_v36  ;;  %v3422_v43 = vshll.u32 %v3118_v59, 16  ;;  %v9676_v36 = vld [vmem:[%s13673_s1 + $0x28] sm:$0xff] }
 0x2c3   : > { %v2958_v50 = vpop.permute.xlu0 %2957  ;;  %v2962_v6 = vpop.permute.xlu2 %2961  ;;  %v3305_v5 = vor.u32 %v3304_v11, %v3301_v60 }
 0x2c4   : > { %3052 = vst.msk [vmem:[#allocation3 + $0x10] sm:$0xf] %vm3049_vm5, %v2958_v50  ;;  %v3424_v16 = vrot.slane %v3422_v43, 5  ;;  %4156 = vmatpush.bf16.msra.mxu0 %v9676_v36 }
 0x2c5   : > { %3540 = vrot.lane.b32.xlu1 %v3297_v17, %s10013_s11  ;;  %3054 = vst.msk [vmem:[#allocation3 + $0x20] sm:$0xf] %vm3049_vm5, %v2962_v6  ;;  %v3336_v17 = vshrl.u32 %v11697_v51, 16  ;;  %v3306_v9 = vrot.slane %v3305_v5, 4  ;;  %v3397_v51 = vrot.slane %v3395_v28, 4 }
 0x2c7   : > { %v2960_v24 = vpop.permute.xlu1 %2959  ;;  %v3338_v30 = vrot.slane %v3336_v17, 4  ;;  %v3401_v7 = vor.u32 %v3400_v8, %v3397_v51  ;;  %v3311_v55 = vsel %vm10180_vm3, %v3306_v9, %v11688_v48  ;;  %v3741_v9 = vrot.slane %v3644_v12, 5 }
 0x2c8   : > { %3053 = vst.msk [vmem:[#allocation3 + $0x18] sm:$0xf] %vm3049_vm5, %v2960_v24  ;;  %v3112_v24 = vld [vmem:[#allocation2 + $0x90] sm:$0xf]  ;;  %4157 = vmatpush.bf16.msra.mxu0 %v9675_v0 }
 0x2c9   : > { %3544 = vrot.lane.b32.xlu0 %v3321_v57, %s10013_s11  ;;  %3530 = vrot.lane.b32.xlu2 %v3239_v14, %s10013_s11  ;;  %v3339_v37 = vor.u32 %v3338_v30, %v11710_v21  ;;  %v3402_v44 = vrot.slane %v3401_v7, 4  ;;  %v3371_v32 = vshrl.u32 %v3112_v24, 16  ;;  %v3374_v54 = vshll.u32 %v3112_v24, 16  ;;  %v3119_v14 = vld [vmem:[#allocation2 + $0xac] sm:$0xf] }
 0x2ca   : > { %v3344_v21 = vrot.slane %v3342_v61, 5  ;;  %v3432_v3 = vshrl.u32 %v3119_v14, 16  ;;  %v3645_v30 = vld [vmem:[#allocation2 + $0x20] sm:$0x1]  ;;  %v3743_v8 = vrot.slane %v3741_v9, 4  ;;  %v3411_v61 = vor.u32 %v3410_v63, %v11756_v52 }
 0x2cb   : > { %v2964_v39 = vpop.permute.xlu0 %2963  ;;  %v2968_v46 = vpop.permute.xlu2 %2967  ;;  %v3407_v31 = vsel %vm10180_vm3, %v3402_v44, %v11756_v52  ;;  %v3340_v6 = vrot.slane %v3339_v37, 4  ;;  %v3373_v34 = vrot.slane %v3371_v32, 4  ;;  %v9674_v37 = vld [vmem:[%s13673_s1 + $0x18] sm:$0xff]  ;;  %v3414_v44 = vshll.u32 %v3117_v23, 16 }
 0x2cc   : > { %3055 = vst.msk [vmem:[#allocation3 + $0x28] sm:$0xf] %vm3049_vm5, %v2964_v39  ;;  %v3428_v39 = vshll.u32 %v3119_v14, 16  ;;  %4158 = vmatpush.bf16.msra.mxu0 %v9674_v37  ;;  %v3122_v52 = vld [vmem:[#allocation2 + $0xb8] sm:$0xf] }
 0x2cd   : > { %3546 = vrot.lane.b32.xlu1 %v3335_v26, %s10013_s11  ;;  %3057 = vst.msk [vmem:[#allocation3 + $0x38] sm:$0xf] %vm3049_vm5, %v2968_v46  ;;  %v3376_v26 = vrot.slane %v3374_v54, 5  ;;  %v3345_v33 = vsel %vm10180_vm3, %v3340_v6, %v3344_v21  ;;  %v3416_v32 = vrot.slane %v3414_v44, 5  ;;  %v9673_v54 = vld [vmem:[%s13673_s1 + $0x10] sm:$0xff]  ;;  %v3452_v21 = vshll.u32 %v3122_v52, 16 }
 0x2ce   : > { %v3430_v56 = vrot.slane %v3428_v39, 5  ;;  %v3121_v37 = vld [vmem:[#allocation2 + $0xb4] sm:$0xf] }
 0x2cf   : > { %v2966_v41 = vpop.permute.xlu1 %2965  ;;  %v3377_v13 = vor.u32 %v3376_v26, %v3373_v34  ;;  %v3456_v34 = vshrl.u32 %v3122_v52, 16 }
 0x2d0   : > { %3056 = vst.msk [vmem:[#allocation3 + $0x30] sm:$0xf] %vm3049_vm5, %v2966_v41  ;;  %v3421_v41 = vrot.slane %v3419_v40, 4  ;;  %4159 = vmatpush.bf16.msra.mxu0 %v9673_v54  ;;  %v3651_v54 = vld [vmem:[#allocation2 + $0x38] sm:$0x1] }
 0x2d1   : > { %3550 = vrot.lane.b32.xlu0 %v3359_v62, %s10013_s11  ;;  %3536 = vrot.lane.b32.xlu2 %v3273_v25, %s10013_s11  ;;  %v3378_v11 = vrot.slane %v3377_v13, 4  ;;  %v3434_v62 = vrot.slane %v3432_v3, 4  ;;  %v3458_v47 = vrot.slane %v3456_v34, 4 }
 0x2d2   : > { %v3425_v5 = vor.u32 %v3424_v16, %v3421_v41 }
 0x2d3   : > { %v2970_v19 = vpop.permute.xlu0 %2969  ;;  %v2974_v50 = vpop.permute.xlu2 %2973  ;;  %v3435_v46 = vor.u32 %v3434_v62, %v3430_v56  ;;  %v3383_v17 = vsel %vm10180_vm3, %v3378_v11, %v11721_v1 }
 0x2d4   : > { %3058 = vst.msk [vmem:[#allocation3 + $0x40] sm:$0xf] %vm3049_vm5, %v2970_v19  ;;  %v3426_v28 = vrot.slane %v3425_v5, 4  ;;  %4160 = vmatpush.bf16.msra.mxu0 %v9672_v42  ;;  %v9701_v42 = vld [vmem:[%s13673_s1 + $0x28] sm:$0xff] }
 0x2d5   : > { %3552 = vrot.lane.b32.xlu1 %v3369_v18, %s10013_s11  ;;  %3060 = vst.msk [vmem:[#allocation3 + $0x50] sm:$0xf] %vm3049_vm5, %v2974_v50  ;;  %v3438_v18 = vshll.u32 %v3120_v35, 16  ;;  %v3436_v25 = vrot.slane %v3435_v46, 4  ;;  %v3744_v50 = vrot.slane %v3645_v30, 5 }
 0x2d6   : > { %v3431_v1 = vsel %vm10180_vm3, %v3426_v28, %v3430_v56  ;;  %v9671_v56 = vld [vmem:[%s13673_s1] sm:$0xff]  ;;  %v3648_v35 = vld [vmem:[#allocation2 + $0x2c] sm:$0x1] }
 0x2d7   : > { %v2972_v2 = vpop.permute.xlu1 %2971  ;;  %v3440_v19 = vrot.slane %v3438_v18, 5  ;;  %v3751_v46 = vrot.slane %v3648_v35, 5 }
 0x2d8   : > { %3059 = vst.msk [vmem:[#allocation3 + $0x48] sm:$0xf] %vm3049_vm5, %v2972_v2  ;;  %v3643_v2 = vld [vmem:[#allocation2 + $0x18] sm:$0xe]  ;;  %4161 = vmatpush.bf16.msra.mxu0 %v9671_v56 }
 0x2d9   : > { %3556 = vrot.lane.b32.xlu0 %v3393_v38, %s10013_s11  ;;  %3542 = vrot.lane.b32.xlu2 %v3311_v55, %s10013_s11  ;;  %v3441_v38 = vsel %vm10180_vm3, %v3436_v25, %v3440_v19  ;;  %v9121_v51 = vrot.slane %v3643_v2, 9  ;;  %v3124_v25 = vld [vmem:[#allocation2 + $0xc0] sm:$0xf]  ;;  %v11844_v2 = vld [vmem:[#allocation2 + $0xc4] sm:$0xf] }
 0x2da   : > { %v3467_v19 = vshrl.u32 %v3124_v25, 16  ;;  %v3470_v12 = vshll.u32 %v3124_v25, 16  ;;  %v3480_v56 = vshrl.u32 %v11844_v2, 16  ;;  %v3654_v25 = vld [vmem:[#allocation2 + $0x44] sm:$0x1] }
 0x2db   : > { %v2976_v57 = vpop.permute.xlu0 %2975  ;;  %v2980_v15 = vpop.permute.xlu2 %2979  ;;  %v3742_v55 = vsel %vm10873_vm13, %v9121_v51, %v3741_v9 }
 0x2dc   : > { %3061 = vst.msk [vmem:[#allocation3 + $0x58] sm:$0xf] %vm3049_vm5, %v2976_v57  ;;  %v3745_v57 = vsel %vm10873_vm13, %v3743_v8, %v3744_v50  ;;  %v3469_v0 = vrot.slane %v3467_v19, 4  ;;  %v3472_v9 = vrot.slane %v3470_v12, 5  ;;  %v3476_v8 = vshll.u32 %v11844_v2, 16 }
 0x2dd   : > { %3558 = vrot.lane.b32.xlu1 %v3407_v31, %s10013_s11  ;;  %3063 = vst.msk [vmem:[#allocation3 + $0x68] sm:$0xf] %vm3049_vm5, %v2980_v15  ;;  %v3412_v31 = vrot.slane %v3411_v61, 4  ;;  %v11818_v15 = vrot.slane %v3452_v21, 5  ;;  %v3482_v2 = vrot.slane %v3480_v56, 4 }
 0x2de   : > { %3883 = vst.msk [vmem:[#allocation3 + $0x4] sm:$0xf] %vm300_vm0, %v3742_v55  ;;  %v3473_v51 = vor.u32 %v3472_v9, %v3469_v0  ;;  %v11851_v23 = vrot.slane %v3476_v8, 5  ;;  %v3650_v55 = vld [vmem:[#allocation2 + $0x34] sm:$0xf] }
 0x2df   : > { %v2978_v48 = vpop.permute.xlu1 %2977  ;;  %3884 = vst.msk [vmem:[#allocation3 + $0xc] sm:$0xf] %vm300_vm0, %v3745_v57  ;;  %v3417_v6 = vsel %vm10180_vm3, %v3412_v31, %v3416_v32  ;;  %v3459_v14 = vor.u32 %v3458_v47, %v11818_v15  ;;  %v9702_v57 = vld [vmem:[%s13673_s1 + $0x30] sm:$0xff]  ;;  %v3755_v61 = vrot.slane %v3650_v55, 5  ;;  %v3446_v31 = vshll.u32 %v3121_v37, 16 }
 0x2e0   : > { %3062 = vst.msk [vmem:[#allocation3 + $0x60] sm:$0xf] %vm3049_vm5, %v2978_v48  ;;  %v9679_v48 = vld [vmem:[%s13673_s1 + $0x40] sm:$0xff]  ;;  %v3649_v32 = vld [vmem:[#allocation2 + $0x30] sm:$0xe] }
 0x2e1   : > { %3548 = vrot.lane.b32.xlu2 %v3345_v33, %s10013_s11  ;;  %3562 = vrot.lane.b32.xlu0 %v3431_v1, %s10013_s11  ;;  %v3460_v43 = vrot.slane %v3459_v14, 4  ;;  %v9703_v1 = vld [vmem:[%s13673_s1 + $0x38] sm:$0xff]  ;;  %v3757_v52 = vrot.slane %v3755_v61, 4  ;;  %v3126_v8 = vld [vmem:[#allocation2 + $0xc8] sm:$0x1] }
 0x2e2   : > { %4210 = vmatpush.bf16.msra.mxu1 %v9679_v48  ;;  %4725 = vmatpush.bf16.msra.mxu2 %v9703_v1  ;;  %v9123_v48 = vrot.slane %v3649_v32, 9 }
 0x2e3   : > { %v2982_v4 = vpop.permute.xlu0 %2981  ;;  %v2986_v49 = vpop.permute.xlu2 %2985 }
 0x2e4   : > { %3064 = vst.msk [vmem:[#allocation3 + $0x70] sm:$0xf] %vm3049_vm5, %v2982_v4  ;;  %v3123_v4 = vld [vmem:[#allocation2 + $0xbc] sm:$0x1] }
 0x2e5   : > { %3066 = vst.msk [vmem:[#allocation3 + $0x80] sm:$0xf] %vm3049_vm5, %v2986_v49  ;;  %3564 = vrot.lane.b32.xlu1 %v3441_v38, %s10013_s11  ;;  %v9655_v13 = vld [vmem:[#allocation3 + $0x4] sm:$0xf]  ;;  %v3462_v3 = vshll.u32 %v3123_v4, 16 }
 0x2e6   : > { %v9141_v39 = vld [vmem:[#allocation3 + $0x8] sm:$0xf0]  ;;  %4726 = vmatpush.bf16.msra.mxu2 %v9702_v57  ;;  %v9697_v57 = vld [vmem:[%s13673_s1 + $0x8] sm:$0xff] }
 0x2e7   : > { %v2984_v60 = vpop.permute.xlu1 %2983  ;;  %v9144_v40 = vor.u32 %v9655_v13, %v9141_v39  ;;  %v3464_v11 = vrot.slane %v3462_v3, 5  ;;  %v3646_v49 = vld [vmem:[#allocation2 + $0x24] sm:$0xe] }
 0x2e8   : > { %3065 = vst.msk [vmem:[#allocation3 + $0x78] sm:$0xf] %vm3049_vm5, %v2984_v60  ;;  %v3647_v60 = vld [vmem:[#allocation2 + $0x28] sm:$0xf]  ;;  %v9122_v16 = vrot.slane %v3646_v49, 9  ;;  %v9700_v3 = vld [vmem:[%s13673_s1 + $0x20] sm:$0xff] }
 0x2e9   : > { %3554 = vrot.lane.b32.xlu2 %v3383_v17, %s10013_s11  ;;  %v3748_v62 = vrot.slane %v3647_v60, 5  ;;  %9237 = vmatmul.msk.bf16.vlgmr.msra.gmra.mxu1 %vm4129_vm6, %v9144_v40  ;;  %v3465_v41 = vsel %vm10180_vm3, %v3460_v43, %v3464_v11  ;;  %v9699_v11 = vld [vmem:[%s13673_s1 + $0x18] sm:$0xff] }
 0x2ea   : > { %3568 = vrot.lane.b32.xlu0 %v3465_v41, %s10013_s11  ;;  %4727 = vmatpush.bf16.msra.mxu2 %v9701_v42  ;;  %v3668_v49 = vld [vmem:[#allocation2 + $0x7c] sm:$0xf]  ;;  %v3670_v42 = vld [vmem:[#allocation2 + $0x84] sm:$0xe] }
 0x2eb   : > { %v2988_v58 = vpop.permute.xlu0 %2987  ;;  %v2992_v7 = vpop.permute.xlu2 %2991  ;;  %v3750_v36 = vrot.slane %v3748_v62, 4 }
 0x2ec   : > { %3067 = vst.msk [vmem:[#allocation3 + $0x88] sm:$0xf] %vm3049_vm5, %v2988_v58  ;;  %v3749_v58 = vsel %vm10873_vm13, %v9122_v16, %v3748_v62  ;;  %v3667_v16 = vld [vmem:[#allocation2 + $0x78] sm:$0xe] }
 0x2ed   : > { %3069 = vst.msk [vmem:[#allocation3 + $0x98] sm:$0xf] %vm3049_vm5, %v2992_v7  ;;  %v3752_v53 = vsel %vm10873_vm13, %v3750_v36, %v3751_v46  ;;  %v3474_v7 = vrot.slane %v3473_v51, 4  ;;  %v3669_v36 = vld [vmem:[#allocation2 + $0x80] sm:$0x1]  ;;  %v9698_v46 = vld [vmem:[%s13673_s1 + $0x10] sm:$0xff] }
 0x2ee   : > { %3885 = vst.msk [vmem:[#allocation3 + $0x14] sm:$0xf] %vm300_vm0, %v3749_v58  ;;  %4728 = vmatpush.bf16.msra.mxu2 %v9700_v3  ;;  %v3800_v58 = vrot.slane %v3669_v36, 5  ;;  %v9130_v3 = vrot.slane %v3670_v42, 9 }
 0x2ef   : > { %v2990_v20 = vpop.permute.xlu1 %2989  ;;  %3886 = vst.msk [vmem:[#allocation3 + $0x1c] sm:$0xf] %vm300_vm0, %v3752_v53  ;;  %v3479_v44 = vsel %vm10180_vm3, %v3474_v7, %v11851_v23  ;;  %v3652_v53 = vld [vmem:[#allocation2 + $0x3c] sm:$0xe]  ;;  %v3486_v7 = vshll.u32 %v3126_v8, 16 }
 0x2f0   : > { %3068 = vst.msk [vmem:[#allocation3 + $0x90] sm:$0xf] %vm3049_vm5, %v2990_v20  ;;  %3570 = vrot.lane.b32.xlu1 %v3479_v44, %s10013_s11  ;;  %v3675_v8 = vld [vmem:[#allocation2 + $0x98] sm:$0x1] }
 0x2f1   : > { %3560 = vrot.lane.b32.xlu2 %v3417_v6, %s10013_s11  ;;  %v3758_v6 = vrot.slane %v3651_v54, 5 }
 0x2f2   : > { %4729 = vmatpush.bf16.msra.mxu2 %v9699_v11  ;;  %v3656_v11 = vld [vmem:[#allocation2 + $0x4c] sm:$0xf] }
 0x2f3   : > { %v2994_v24 = vpop.permute.xlu0 %2993  ;;  %v2998_v33 = vpop.permute.xlu2 %2997  ;;  %v3759_v4 = vsel %vm10873_vm13, %v3757_v52, %v3758_v6 }
 0x2f4   : > { %3070 = vst.msk [vmem:[#allocation3 + $0xa0] sm:$0xf] %vm3049_vm5, %v2994_v24  ;;  %v3443_v24 = vshrl.u32 %v3121_v37, 16  ;;  %v9704_v37 = vld [vmem:[%s13673_s1 + $0x40] sm:$0xff] }
 0x2f5   : > { %3072 = vst.msk [vmem:[#allocation3 + $0xb0] sm:$0xf] %vm3049_vm5, %v2998_v33  ;;  %v9657_v30 = vld [vmem:[#allocation3 + $0x14] sm:$0xf]  ;;  %v3756_v33 = vsel %vm10873_vm13, %v9123_v48, %v3755_v61  ;;  %4781 = vmatpush.bf16.msra.mxu3 %v9704_v37  ;;  %v3658_v37 = vld [vmem:[#allocation2 + $0x54] sm:$0xe] }
 0x2f6   : > { %v9149_v50 = vld [vmem:[#allocation3 + $0x18] sm:$0xf0]  ;;  %v3445_v34 = vrot.slane %v3443_v24, 4  ;;  %3887 = vst.msk [vmem:[#allocation3 + $0x24] sm:$0xf] %vm300_vm0, %v3756_v33  ;;  %4730 = vmatpush.bf16.msra.mxu2 %v9698_v46  ;;  %v3488_v24 = vrot.slane %v3486_v7, 5 }
 0x2f7   : > { %v2996_v26 = vpop.permute.xlu1 %2995  ;;  %v9152_v63 = vor.u32 %v9657_v30, %v9149_v50  ;;  %3888 = vst.msk [vmem:[#allocation3 + $0x2c] sm:$0xf] %vm300_vm0, %v3759_v4  ;;  %v3765_v30 = vrot.slane %v3654_v25, 5 }
 0x2f8   : > { %3071 = vst.msk [vmem:[#allocation3 + $0xa8] sm:$0xf] %vm3049_vm5, %v2996_v26  ;;  %v3448_v26 = vrot.slane %v3446_v31, 5 }
 0x2f9   : > { %9238 = vmatmul.msk.bf16.gmra.mxu1 %vm4129_vm6, %v9152_v63  ;;  %v3483_v63 = vor.u32 %v3482_v2, %v11851_v23  ;;  %v9696_v23 = vld [vmem:[%s13673_s1] sm:$0xff] }
 0x2fa   : > { %v3449_v13 = vor.u32 %v3448_v26, %v3445_v34  ;;  %4731 = vmatpush.bf16.msra.mxu2 %v9697_v57  ;;  %v3814_v57 = vrot.slane %v3675_v8, 5 }
 0x2fb   : > { %v3000_v59 = vpop.permute.xlu0 %2999  ;;  %v3004_v5 = vpop.permute.xlu2 %3003  ;;  %v3484_v44 = vrot.slane %v3483_v63, 4 }
 0x2fc   : > { %3073 = vst.msk [vmem:[#allocation3 + $0xb8] sm:$0xf] %vm3049_vm5, %v3000_v59  ;;  %v3450_v39 = vrot.slane %v3449_v13, 4 }
 0x2fd   : > { %3075 = vst.msk [vmem:[#allocation3 + $0xc8] sm:$0xf] %vm3049_vm5, %v3004_v5  ;;  %v9659_v60 = vld [vmem:[#allocation3 + $0x24] sm:$0xf]  ;;  %v3797_v5 = vrot.slane %v3668_v49, 5  ;;  %v3489_v32 = vsel %vm10180_vm3, %v3484_v44, %v3488_v24 }
 0x2fe   : > { %v3455_v59 = vsel %vm10180_vm3, %v3450_v39, %v11818_v15  ;;  %v9157_v62 = vld [vmem:[#allocation3 + $0x28] sm:$0xf0]  ;;  %4732 = vmatpush.bf16.msra.mxu2 %v9696_v23 }
 0x2ff   : > { %v3002_v18 = vpop.permute.xlu1 %3001  ;;  %3566 = vrot.lane.b32.xlu2 %v3455_v59, %s10013_s11  ;;  %v9160_v41 = vor.u32 %v9659_v60, %v9157_v62  ;;  %v3799_v12 = vrot.slane %v3797_v5, 4  ;;  %v3655_v60 = vld [vmem:[#allocation2 + $0x48] sm:$0xe]  ;;  %v3657_v62 = vld [vmem:[#allocation2 + $0x50] sm:$0x1] }
 0x300   : > { %3074 = vst.msk [vmem:[#allocation3 + $0xc0] sm:$0xf] %vm3049_vm5, %v3002_v18  ;;  %v9129_v18 = vrot.slane %v3667_v16, 9  ;;  %v9125_v49 = vrot.slane %v3655_v60, 9  ;;  %v3772_v16 = vrot.slane %v3657_v62, 5 }
 0x301   : > { %v3801_v50 = vsel %vm10873_vm13, %v3799_v12, %v3800_v58  ;;  %v3676_v62 = vld [vmem:[#allocation2 + $0x9c] sm:$0xe] }
 0x302   : > { %v3798_v19 = vsel %vm10873_vm13, %v9129_v18, %v3797_v5  ;;  %3900 = vst.msk [vmem:[#allocation3 + $0x8c] sm:$0xf] %vm300_vm0, %v3801_v50  ;;  %v3659_v50 = vld [vmem:[#allocation2 + $0x58] sm:$0xf] }
 0x303   : > { %v3006_v17 = vpop.permute.xlu0 %3005  ;;  %v3010_v38 = vpop.permute.xlu2 %3009  ;;  %3899 = vst.msk [vmem:[#allocation3 + $0x84] sm:$0xf] %vm300_vm0, %v3798_v19  ;;  %v3776_v44 = vrot.slane %v3659_v50, 5 }
 0x304   : > { %3076 = vst.msk [vmem:[#allocation3 + $0xd0] sm:$0xf] %vm3049_vm5, %v3006_v17  ;;  %v3653_v17 = vld [vmem:[#allocation2 + $0x40] sm:$0xf] }
 0x305   : > { %3078 = vst.msk [vmem:[#allocation3 + $0xe0] sm:$0xf] %vm3049_vm5, %v3010_v38  ;;  %v3762_v0 = vrot.slane %v3653_v17, 5 }
 0x307   : > { %v3008_v28 = vpop.permute.xlu1 %3007  ;;  %v3764_v55 = vrot.slane %v3762_v0, 4  ;;  %3572 = vrot.lane.b32.xlu2 %v3489_v32, %s10013_s11 }
 0x308   : > { %3077 = vst.msk [vmem:[#allocation3 + $0xd8] sm:$0xf] %vm3049_vm5, %v3008_v28  ;;  %v9124_v28 = vrot.slane %v3652_v53, 9 }
 0x309   : > { %9239 = vmatmul.msk.bf16.gmra.mxu1 %vm4129_vm6, %v9160_v41  ;;  %v3766_v31 = vsel %vm10873_vm13, %v3764_v55, %v3765_v30  ;;  %v9249_v6 = vld [vmem:[#allocation3 + $0x88] sm:$0xf0] }
 0x30a   : > { %3890 = vst.msk [vmem:[#allocation3 + $0x3c] sm:$0xf] %vm300_vm0, %v3766_v31  ;;  %v9680_v48 = vld [vmem:[#allocation3 + $0x84] sm:$0xf]  ;;  %v9126_v31 = vrot.slane %v3658_v37, 9 }
 0x30b   : > { %v3012_v20 = vpop.permute.xlu0 %3011  ;;  %v3016_v47 = vpop.permute.xlu2 %3015  ;;  %v9252_v34 = vor.u32 %v9680_v48, %v9249_v6  ;;  %v3778_v48 = vrot.slane %v3776_v44, 4 }
 0x30c   : > { %3079 = vst.msk [vmem:[#allocation3 + $0xe8] sm:$0xf] %vm3049_vm5, %v3012_v20  ;;  %v3763_v20 = vsel %vm10873_vm13, %v9124_v28, %v3762_v0  ;;  %v3674_v28 = vld [vmem:[#allocation2 + $0x94] sm:$0xf] }
 0x30d   : > { %3081 = vst.msk [vmem:[#allocation3 + $0xf8] sm:$0xf] %vm3049_vm5, %v3016_v47  ;;  %9345 = vmatmul.msk.bf16.vlgmr.msra.gmra.mxu3 %vm4129_vm6, %v9252_v34 }
 0x30e   : > { %3889 = vst.msk [vmem:[#allocation3 + $0x34] sm:$0xf] %vm300_vm0, %v3763_v20 }
 0x30f   : > { %v3014_v21 = vpop.permute.xlu1 %3013 }
 0x310   : > { %3080 = vst.msk [vmem:[#allocation3 + $0xf0] sm:$0xf] %vm3049_vm5, %v3014_v21  ;;  %v3671_v21 = vld [vmem:[#allocation2 + $0x88] sm:$0xf] }
 0x311   : > { %v3804_v47 = vrot.slane %v3671_v21, 5  ;;  %v9165_v39 = vld [vmem:[#allocation3 + $0x38] sm:$0xf0]  ;;  %v3777_v21 = vsel %vm10873_vm13, %v9126_v31, %v3776_v44 }
 0x312   : > { %3893 = vst.msk [vmem:[#allocation3 + $0x54] sm:$0xf] %vm300_vm0, %v3777_v21 }
 0x313   : > { %v3515_v14 = vpop.permute.xlu0 %3514  ;;  %v3519_v43 = vpop.permute.xlu2 %3518  ;;  %v3806_v59 = vrot.slane %v3804_v47, 4  ;;  %v3805_v56 = vsel %vm10873_vm13, %v9130_v3, %v3804_v47  ;;  %v3677_v3 = vld [vmem:[#allocation2 + $0xa0] sm:$0xf] }
 0x314   : > { %3611 = vst.msk [vmem:[#allocation3] sm:$0xf] %vm3610_vm9, %v3515_v14  ;;  %v3672_v14 = vld [vmem:[#allocation2 + $0x8c] sm:$0x1] }
 0x315   : > { %3613 = vst.msk [vmem:[#allocation3 + $0x10] sm:$0xf] %vm3610_vm9, %v3519_v43  ;;  %v9661_v26 = vld [vmem:[#allocation3 + $0x34] sm:$0xf]  ;;  %v3807_v43 = vrot.slane %v3672_v14, 5 }
 0x316   : > { %3901 = vst.msk [vmem:[#allocation3 + $0x94] sm:$0xf] %vm300_vm0, %v3805_v56 }
 0x317   : > { %v3517_v40 = vpop.permute.xlu1 %3516  ;;  %v3808_v41 = vsel %vm10873_vm13, %v3806_v59, %v3807_v43  ;;  %v3818_v43 = vrot.slane %v3677_v3, 5 }
 0x318   : > { %3612 = vst.msk [vmem:[#allocation3 + $0x8] sm:$0xf] %vm3610_vm9, %v3517_v40  ;;  %v9168_v40 = vor.u32 %v9661_v26, %v9165_v39 }
 0x319   : > { %3902 = vst.msk [vmem:[#allocation3 + $0x9c] sm:$0xf] %vm300_vm0, %v3808_v41  ;;  %v3820_v41 = vrot.slane %v3818_v43, 4 }
 0x31a   : > { %9240 = vmatmul.msk.bf16.gmra.mxu1 %vm4129_vm6, %v9168_v40  ;;  %v9665_v40 = vld [vmem:[#allocation3 + $0x54] sm:$0xf] }
 0x31b   : > { %v3521_v35 = vpop.permute.xlu0 %3520  ;;  %v9139_v15 = vld [vmem:[#allocation3] sm:$0xf]  ;;  %v3525_v1 = vpop.permute.xlu2 %3524 }
 0x31c   : > { %3614 = vst.msk [vmem:[#allocation3 + $0x18] sm:$0xf] %vm3610_vm9, %v3521_v35  ;;  %v9147_v4 = vld [vmem:[#allocation3 + $0x10] sm:$0xf]  ;;  %v3769_v35 = vrot.slane %v3656_v11, 5 }
 0x31d   : > { %3616 = vst.msk [vmem:[#allocation3 + $0x28] sm:$0xf] %vm3610_vm9, %v3525_v1  ;;  %v9682_v25 = vld [vmem:[#allocation3 + $0x94] sm:$0xf] }
 0x31e   : > { %v3770_v18 = vsel %vm10873_vm13, %v9125_v49, %v3769_v35  ;;  %v3771_v5 = vrot.slane %v3769_v35, 4  ;;  %v3678_v49 = vld [vmem:[#allocation2 + $0xa4] sm:$0x1] }
 0x31f   : > { %v3523_v9 = vpop.permute.xlu1 %3522  ;;  %v9656_v38 = vld [vmem:[#allocation3 + $0x4] sm:$0xf0]  ;;  %3891 = vst.msk [vmem:[#allocation3 + $0x44] sm:$0xf] %vm300_vm0, %v3770_v18  ;;  %v3662_v18 = vld [vmem:[#allocation2 + $0x64] sm:$0xf] }
 0x320   : > { %3615 = vst.msk [vmem:[#allocation3 + $0x20] sm:$0xf] %vm3610_vm9, %v3523_v9  ;;  %v9140_v51 = vor.u32 %v9656_v38, %v9139_v15  ;;  %v3773_v58 = vsel %vm10873_vm13, %v3771_v5, %v3772_v16  ;;  %v9257_v12 = vld [vmem:[#allocation3 + $0x98] sm:$0xf0]  ;;  %v3811_v38 = vrot.slane %v3674_v28, 5 }
 0x321   : > { %3892 = vst.msk [vmem:[#allocation3 + $0x4c] sm:$0xf] %vm300_vm0, %v3773_v58  ;;  %v9260_v0 = vor.u32 %v9682_v25, %v9257_v12  ;;  %v3663_v58 = vld [vmem:[#allocation2 + $0x68] sm:$0x1] }
 0x322   : > { %4162 = vmatmul.bf16.vlgmr.msra.gmra.mxu0 %v9140_v51  ;;  %v3673_v51 = vld [vmem:[#allocation2 + $0x90] sm:$0xe]  ;;  %v3813_v7 = vrot.slane %v3811_v38, 4 }
 0x323   : > { %v3527_v61 = vpop.permute.xlu0 %3526  ;;  %v3531_v52 = vpop.permute.xlu2 %3530  ;;  %v9658_v13 = vld [vmem:[#allocation3 + $0x14] sm:$0xf0]  ;;  %9346 = vmatmul.msk.bf16.gmra.mxu3 %vm4129_vm6, %v9260_v0  ;;  %v9131_v63 = vrot.slane %v3673_v51, 9 }
 0x324   : > { %3617 = vst.msk [vmem:[#allocation3 + $0x30] sm:$0xf] %vm3610_vm9, %v3527_v61  ;;  %v9148_v46 = vor.u32 %v9658_v13, %v9147_v4  ;;  %v9660_v1 = vld [vmem:[#allocation3 + $0x24] sm:$0xf0]  ;;  %v3660_v61 = vld [vmem:[#allocation2 + $0x5c] sm:$0x1] }
 0x325   : > { %3619 = vst.msk [vmem:[#allocation3 + $0x40] sm:$0xf] %vm3610_vm9, %v3531_v52  ;;  %v3812_v24 = vsel %vm10873_vm13, %v9131_v63, %v3811_v38  ;;  %v3779_v23 = vrot.slane %v3660_v61, 5  ;;  %v3128_v63 = vld [vmem:[#allocation2 + $0xd0] sm:$0xf] }
 0x326   : > { %v9663_v9 = vld [vmem:[#allocation3 + $0x44] sm:$0xf]  ;;  %3903 = vst.msk [vmem:[#allocation3 + $0xa4] sm:$0xf] %vm300_vm0, %v3812_v24  ;;  %v3680_v24 = vld [vmem:[#allocation2 + $0xac] sm:$0xf] }
 0x327   : > { %v3529_v54 = vpop.permute.xlu1 %3528  ;;  %v9155_v30 = vld [vmem:[#allocation3 + $0x20] sm:$0xf]  ;;  %v3780_v34 = vsel %vm10873_vm13, %v3778_v48, %v3779_v23 }
 0x328   : > { %3618 = vst.msk [vmem:[#allocation3 + $0x38] sm:$0xf] %vm3610_vm9, %v3529_v54  ;;  %v9173_v20 = vld [vmem:[#allocation3 + $0x48] sm:$0xf0]  ;;  %v3815_v54 = vsel %vm10873_vm13, %v3813_v7, %v3814_v57  ;;  %v9156_v6 = vor.u32 %v9660_v1, %v9155_v30  ;;  %v3127_v7 = vld [vmem:[#allocation2 + $0xcc] sm:$0xf] }
 0x329   : > { %v9176_v55 = vor.u32 %v9663_v9, %v9173_v20  ;;  %3904 = vst.msk [vmem:[#allocation3 + $0xac] sm:$0xf] %vm300_vm0, %v3815_v54  ;;  %v3504_v57 = vshrl.u32 %v3128_v63, 16  ;;  %v3491_v37 = vshrl.u32 %v3127_v7, 16  ;;  %v3494_v61 = vshll.u32 %v3127_v7, 16 }
 0x32a   : > { %3894 = vst.msk [vmem:[#allocation3 + $0x5c] sm:$0xf] %vm300_vm0, %v3780_v34  ;;  %v3129_v54 = vld [vmem:[#allocation2 + $0xd4] sm:$0x1] }
 0x32b   : > { %v3533_v33 = vpop.permute.xlu0 %3532  ;;  %v3537_v36 = vpop.permute.xlu2 %3536  ;;  %9241 = vmatmul.msk.bf16.gmra.mxu1 %vm4129_vm6, %v9176_v55  ;;  %v9163_v60 = vld [vmem:[#allocation3 + $0x30] sm:$0xf]  ;;  %v3500_v55 = vshll.u32 %v3128_v63, 16  ;;  %v3510_v21 = vshll.u32 %v3129_v54, 16  ;;  %v3493_v34 = vrot.slane %v3491_v37, 4 }
 0x32c   : > { %3620 = vst.msk [vmem:[#allocation3 + $0x48] sm:$0xf] %vm3610_vm9, %v3533_v33  ;;  %v9171_v31 = vld [vmem:[#allocation3 + $0x40] sm:$0xf] }
 0x32d   : > { %3622 = vst.msk [vmem:[#allocation3 + $0x58] sm:$0xf] %vm3610_vm9, %v3537_v36  ;;  %v9684_v4 = vld [vmem:[#allocation3 + $0xa4] sm:$0xf]  ;;  %v3821_v36 = vrot.slane %v3678_v49, 5  ;;  %v3502_v48 = vrot.slane %v3500_v55, 5 }
 0x32f   : > { %v3535_v15 = vpop.permute.xlu1 %3534  ;;  %v9662_v11 = vld [vmem:[#allocation3 + $0x34] sm:$0xf0]  ;;  %v3822_v25 = vsel %vm10873_vm13, %v3820_v41, %v3821_v36 }
 0x330   : > { %3621 = vst.msk [vmem:[#allocation3 + $0x50] sm:$0xf] %vm3610_vm9, %v3535_v15  ;;  %v9265_v39 = vld [vmem:[#allocation3 + $0xa8] sm:$0xf0]  ;;  %v9132_v15 = vrot.slane %v3676_v62, 9  ;;  %v9164_v12 = vor.u32 %v9662_v11, %v9163_v60 }
 0x331   : > { %v9268_v59 = vor.u32 %v9684_v4, %v9265_v39  ;;  %v9181_v35 = vld [vmem:[#allocation3 + $0x58] sm:$0xf0]  ;;  %3906 = vst.msk [vmem:[#allocation3 + $0xbc] sm:$0xf] %vm300_vm0, %v3822_v25  ;;  %v3681_v4 = vld [vmem:[#allocation2 + $0xb0] sm:$0x1] }
 0x332   : > { %4167 = vmatmul.bf16.gmra.mxu0 %v9148_v46  ;;  %v9184_v16 = vor.u32 %v9665_v40, %v9181_v35  ;;  %v3661_v46 = vld [vmem:[#allocation2 + $0x60] sm:$0xe]  ;;  %v3819_v5 = vsel %vm10873_vm13, %v9132_v15, %v3818_v43  ;;  %v3512_v39 = vrot.slane %v3510_v21, 5  ;;  %v3665_v40 = vld [vmem:[#allocation2 + $0x70] sm:$0xf] }
 0x333   : > { %v3539_v53 = vpop.permute.xlu0 %3538  ;;  %v3543_v19 = vpop.permute.xlu2 %3542  ;;  %9347 = vmatmul.msk.bf16.gmra.mxu3 %vm4129_vm6, %v9268_v59  ;;  %3905 = vst.msk [vmem:[#allocation3 + $0xb4] sm:$0xf] %vm300_vm0, %v3819_v5  ;;  %v9664_v23 = vld [vmem:[#allocation3 + $0x44] sm:$0xf0]  ;;  %v3828_v59 = vrot.slane %v3681_v4, 5  ;;  %v3790_v41 = vrot.slane %v3665_v40, 5 }
 0x334   : > { %3623 = vst.msk [vmem:[#allocation3 + $0x60] sm:$0xf] %vm3610_vm9, %v3539_v53  ;;  %v9127_v53 = vrot.slane %v3661_v46, 9  ;;  %v3666_v43 = vld [vmem:[#allocation2 + $0x74] sm:$0x1]  ;;  %v9172_v49 = vor.u32 %v9664_v23, %v9171_v31 }
 0x335   : > { %3625 = vst.msk [vmem:[#allocation3 + $0x70] sm:$0xf] %vm3610_vm9, %v3543_v19  ;;  %v3786_v19 = vrot.slane %v3663_v58, 5  ;;  %v9666_v55 = vld [vmem:[#allocation3 + $0x54] sm:$0xf0] }
 0x336   : > { %v3686_v21 = vld [vmem:[#allocation2 + $0xc4] sm:$0xf] }
 0x337   : > { %v3541_v17 = vpop.permute.xlu1 %3540  ;;  %v9179_v7 = vld [vmem:[#allocation3 + $0x50] sm:$0xf] }
 0x338   : > { %3624 = vst.msk [vmem:[#allocation3 + $0x68] sm:$0xf] %vm3610_vm9, %v3541_v17  ;;  %v3783_v17 = vrot.slane %v3662_v18, 5  ;;  %v9273_v50 = vld [vmem:[#allocation3 + $0xb8] sm:$0xf0] }
 0x33a   : > { %v3784_v9 = vsel %vm10873_vm13, %v9127_v53, %v3783_v17  ;;  %v3785_v38 = vrot.slane %v3783_v17, 4  ;;  %v9686_v51 = vld [vmem:[#allocation3 + $0xb4] sm:$0xf]  ;;  %v3792_v53 = vrot.slane %v3790_v41, 4 }
 0x33b   : > { %v3545_v2 = vpop.permute.xlu0 %3544  ;;  %v3549_v52 = vpop.permute.xlu2 %3548  ;;  %9242 = vmatmul.msk.bf16.gmra.mxu1 %vm4129_vm6, %v9184_v16  ;;  %3895 = vst.msk [vmem:[#allocation3 + $0x64] sm:$0xf] %vm300_vm0, %v3784_v9  ;;  %v9276_v20 = vor.u32 %v9686_v51, %v9273_v50  ;;  %v3793_v16 = vrot.slane %v3666_v43, 5  ;;  %v3684_v51 = vld [vmem:[#allocation2 + $0xbc] sm:$0x1] }
 0x33c   : > { %3626 = vst.msk [vmem:[#allocation3 + $0x78] sm:$0xf] %vm3610_vm9, %v3545_v2  ;;  %v3787_v2 = vsel %vm10873_vm13, %v3785_v38, %v3786_v19  ;;  %v3835_v63 = vrot.slane %v3684_v51, 5  ;;  %v12029_v51 = vld [vmem:[%s13676_s4] ss:$0 sm:$0xff] }
 0x33d   : > { %3628 = vst.msk [vmem:[#allocation3 + $0x88] sm:$0xf] %vm3610_vm9, %v3549_v52  ;;  %v3506_v52 = vrot.slane %v3504_v57, 4  ;;  %v3794_v19 = vsel %vm10873_vm13, %v3792_v53, %v3793_v16 }
 0x33e   : > { %3896 = vst.msk [vmem:[#allocation3 + $0x6c] sm:$0xf] %vm300_vm0, %v3787_v2 }
 0x33f   : > { %v3547_v32 = vpop.permute.xlu1 %3546  ;;  %3898 = vst.msk [vmem:[#allocation3 + $0x7c] sm:$0xf] %vm300_vm0, %v3794_v19 }
 0x340   : > { %3627 = vst.msk [vmem:[#allocation3 + $0x80] sm:$0xf] %vm3610_vm9, %v3547_v32 }
 0x342   : > { %4172 = vmatmul.bf16.gmra.mxu0 %v9156_v6  ;;  %v9667_v44 = vld [vmem:[#allocation3 + $0x64] sm:$0xf] }
 0x343   : > { %v3551_v26 = vpop.permute.xlu0 %3550  ;;  %v3555_v42 = vpop.permute.xlu2 %3554  ;;  %9348 = vmatmul.msk.bf16.gmra.mxu3 %vm4129_vm6, %v9276_v20  ;;  %v9670_v16 = vld [vmem:[#allocation3 + $0x74] sm:$0xf0] }
 0x344   : > { %3629 = vst.msk [vmem:[#allocation3 + $0x90] sm:$0xf] %vm3610_vm9, %v3551_v26  ;;  %v9681_v13 = vld [vmem:[#allocation3 + $0x84] sm:$0xf0]  ;;  %v3496_v26 = vrot.slane %v3494_v61, 5 }
 0x345   : > { %3631 = vst.msk [vmem:[#allocation3 + $0xa0] sm:$0xf] %vm3610_vm9, %v3555_v42  ;;  %v9189_v32 = vld [vmem:[#allocation3 + $0x68] sm:$0xf0]  ;;  %v3825_v42 = vrot.slane %v3680_v24, 5 }
 0x346   : > { %v9192_v6 = vor.u32 %v9667_v44, %v9189_v32  ;;  %v3497_v3 = vor.u32 %v3496_v26, %v3493_v34  ;;  %v9180_v44 = vor.u32 %v9666_v55, %v9179_v7  ;;  %v3839_v34 = vrot.slane %v3686_v21, 5  ;;  %v3685_v26 = vld [vmem:[#allocation2 + $0xc0] sm:$0xe] }
 0x347   : > { %v9247_v47 = vld [vmem:[#allocation3 + $0x80] sm:$0xf]  ;;  %v3553_v33 = vpop.permute.xlu1 %3552 }
 0x348   : > { %3630 = vst.msk [vmem:[#allocation3 + $0x98] sm:$0xf] %vm3610_vm9, %v3553_v33  ;;  %v9248_v14 = vor.u32 %v9681_v13, %v9247_v47  ;;  %v3679_v47 = vld [vmem:[#allocation2 + $0xa8] sm:$0xe]  ;;  %v3507_v33 = vor.u32 %v3506_v52, %v3502_v48  ;;  %v3498_v15 = vrot.slane %v3497_v3, 4  ;;  %v3841_v4 = vrot.slane %v3839_v34, 4 }
 0x349   : > { %v9133_v13 = vrot.slane %v3679_v47, 9  ;;  %v3687_v47 = vld [vmem:[#allocation2 + $0xc8] sm:$0x1] }
 0x34a   : > { %4733 = vmatmul.bf16.vlgmr.msra.gmra.mxu2 %v9248_v14  ;;  %v3664_v14 = vld [vmem:[#allocation2 + $0x6c] sm:$0xe]  ;;  %v3508_v60 = vrot.slane %v3507_v33, 4  ;;  %v3503_v5 = vsel %vm10180_vm3, %v3498_v15, %v3502_v48  ;;  %v9135_v33 = vrot.slane %v3685_v26, 9 }
 0x34b   : > { %v3557_v56 = vpop.permute.xlu0 %3556  ;;  %v3561_v0 = vpop.permute.xlu2 %3560  ;;  %v9255_v30 = vld [vmem:[#allocation3 + $0x90] sm:$0xf]  ;;  %9243 = vmatmul.msk.bf16.gmra.mxu1 %vm4129_vm6, %v9192_v6  ;;  %v3826_v11 = vsel %vm10873_vm13, %v9133_v13, %v3825_v42  ;;  %v9128_v62 = vrot.slane %v3664_v14, 9  ;;  %3574 = vrot.lane.b32.xlu0 %v3503_v5, %s10013_s11  ;;  %v3842_v13 = vrot.slane %v3687_v47, 5  ;;  %v9668_v14 = vld [vmem:[#allocation3 + $0x64] sm:$0xf0] }
 0x34c   : > { %3632 = vst.msk [vmem:[#allocation3 + $0xa8] sm:$0xf] %vm3610_vm9, %v3557_v56  ;;  %v3827_v56 = vrot.slane %v3825_v42, 4  ;;  %v3513_v46 = vsel %vm10180_vm3, %v3508_v60, %v3512_v39  ;;  %v9263_v17 = vld [vmem:[#allocation3 + $0xa0] sm:$0xf]  ;;  %v3840_v39 = vsel %vm10873_vm13, %v9135_v33, %v3839_v34 }
 0x34d   : > { %3634 = vst.msk [vmem:[#allocation3 + $0xb8] sm:$0xf] %vm3610_vm9, %v3561_v0  ;;  %3576 = vrot.lane.b32.xlu1 %v3513_v46, %s10013_s11  ;;  %v3791_v58 = vsel %vm10873_vm13, %v9128_v62, %v3790_v41  ;;  %v3683_v0 = vld [vmem:[#allocation2 + $0xb8] sm:$0xf]  ;;  %v3843_v3 = vsel %vm10873_vm13, %v3841_v4, %v3842_v13  ;;  %v9195_v41 = vld [vmem:[#allocation3 + $0x70] sm:$0xf] }
 0x34e   : > { %3907 = vst.msk [vmem:[#allocation3 + $0xc4] sm:$0xf] %vm300_vm0, %v3826_v11  ;;  %v3829_v18 = vsel %vm10873_vm13, %v3827_v56, %v3828_v59  ;;  %v3832_v38 = vrot.slane %v3683_v0, 5  ;;  %v9187_v42 = vld [vmem:[#allocation3 + $0x60] sm:$0xf]  ;;  %v9196_v46 = vor.u32 %v9670_v16, %v9195_v41 }
 0x34f   : > { %v3559_v28 = vpop.permute.xlu1 %3558  ;;  %v9683_v1 = vld [vmem:[#allocation3 + $0x94] sm:$0xf0]  ;;  %3908 = vst.msk [vmem:[#allocation3 + $0xcc] sm:$0xf] %vm300_vm0, %v3829_v18  ;;  %v9188_v59 = vor.u32 %v9668_v14, %v9187_v42  ;;  %v5177_v0 = vld [vmem:[#allocation4 + $0x4] sm:$0xf] }
 0x350   : > { %3633 = vst.msk [vmem:[#allocation3 + $0xb0] sm:$0xf] %vm3610_vm9, %v3559_v28  ;;  %v9256_v8 = vor.u32 %v9683_v1, %v9255_v30  ;;  %v3682_v1 = vld [vmem:[#allocation2 + $0xb4] sm:$0xe]  ;;  %v3834_v20 = vrot.slane %v3832_v38, 4 }
 0x351   : > { %3897 = vst.msk [vmem:[#allocation3 + $0x74] sm:$0xf] %vm300_vm0, %v3791_v58  ;;  %v9134_v50 = vrot.slane %v3682_v1, 9  ;;  %v5178_v13 = vld [vmem:[#allocation4 + $0x8] sm:$0x1] }
 0x352   : > { %4177 = vmatmul.bf16.gmra.mxu0 %v9164_v12  ;;  %v3836_v61 = vsel %vm10873_vm13, %v3834_v20, %v3835_v63  ;;  %3911 = vst.msk [vmem:[#allocation3 + $0xe4] sm:$0xf] %vm300_vm0, %v3840_v39  ;;  %v3689_v20 = vld [vmem:[#allocation2 + $0xd0] sm:$0xf] }
 0x353   : > { %v3563_v36 = vpop.permute.xlu0 %3562  ;;  %v9685_v25 = vld [vmem:[#allocation3 + $0xa4] sm:$0xf0]  ;;  %v3833_v37 = vsel %vm10873_vm13, %v9134_v50, %v3832_v38  ;;  %3910 = vst.msk [vmem:[#allocation3 + $0xdc] sm:$0xf] %vm300_vm0, %v3836_v61  ;;  %v3688_v61 = vld [vmem:[#allocation2 + $0xcc] sm:$0xe] }
 0x354   : > { %3635 = vst.msk [vmem:[#allocation3 + $0xc0] sm:$0xf] %vm3610_vm9, %v3563_v36  ;;  %v9264_v12 = vor.u32 %v9685_v25, %v9263_v17  ;;  %v9687_v32 = vld [vmem:[#allocation3 + $0xb4] sm:$0xf0]  ;;  %v5176_v17 = vld [vmem:[#allocation4] sm:$0xf] }
 0x355   : > { %v9688_v28 = vld [vmem:[#allocation3 + $0xc4] sm:$0xf]  ;;  %3909 = vst.msk [vmem:[#allocation3 + $0xd4] sm:$0xf] %vm300_vm0, %v3833_v37  ;;  %v5225_v25 = vshrl.u32 %v5176_v17, 16  ;;  %v5228_v19 = vshll.u32 %v5176_v17, 16 }
 0x356   : > { %v9281_v9 = vld [vmem:[#allocation3 + $0xc8] sm:$0xf0]  ;;  %3912 = vst.msk [vmem:[#allocation3 + $0xec] sm:$0xf] %vm300_vm0, %v3843_v3  ;;  %v5244_v3 = vshll.u32 %v5178_v13, 16 }
 0x357   : > { %v3565_v35 = vpop.permute.xlu1 %3564  ;;  %v9284_v2 = vor.u32 %v9688_v28, %v9281_v9  ;;  %v9271_v23 = vld [vmem:[#allocation3 + $0xb0] sm:$0xf]  ;;  %v5230_v28 = vrot.slane %v5228_v19, 5  ;;  %v12024_v9 = vld [vmem:[%s13675_s3] ss:$0 sm:$0xff] }
 0x358   : > { %3636 = vst.msk [vmem:[#allocation3 + $0xc8] sm:$0xf] %vm3610_vm9, %v3565_v35  ;;  %v9669_v30 = vld [vmem:[#allocation3 + $0x74] sm:$0xf]  ;;  %v9272_v48 = vor.u32 %v9687_v32, %v9271_v23  ;;  %v9136_v23 = vrot.slane %v3688_v61, 9 }
 0x359   : > { %9349 = vmatmul.msk.bf16.gmra.mxu3 %vm4129_vm6, %v9284_v2  ;;  %v3567_v24 = vpop.permute.xlu2 %3566  ;;  %v9692_v62 = vld [vmem:[#allocation3 + $0xe4] sm:$0xf]  ;;  %v5234_v2 = vshll.u32 %v5177_v0, 16 }
 0x35a   : > { %4738 = vmatmul.bf16.gmra.mxu2 %v9256_v8  ;;  %v9197_v8 = vld [vmem:[#allocation3 + $0x78] sm:$0xf0]  ;;  %3637 = vst.msk [vmem:[#allocation3 + $0xd0] sm:$0xf] %vm3610_vm9, %v3567_v24 }
 0x35b   : > { %v9200_v57 = vor.u32 %v9669_v30, %v9197_v8  ;;  %v9289_v52 = vld [vmem:[#allocation3 + $0xd8] sm:$0xf0]  ;;  %v9279_v60 = vld [vmem:[#allocation3 + $0xc0] sm:$0xf]  ;;  %v5236_v50 = vrot.slane %v5234_v2, 5 }
 0x35c   : > { %v3569_v31 = vpop.permute.xlu0 %3568  ;;  %v9690_v54 = vld [vmem:[#allocation3 + $0xd4] sm:$0xf] }
 0x35d   : > { %9244 = vmatmul.msk.bf16.gmra.mxu1 %vm4129_vm6, %v9200_v57  ;;  %3638 = vst.msk [vmem:[#allocation3 + $0xd8] sm:$0xf] %vm3610_vm9, %v3569_v31  ;;  %v9292_v6 = vor.u32 %v9690_v54, %v9289_v52  ;;  %v9297_v35 = vld [vmem:[#allocation3 + $0xe8] sm:$0xf0]  ;;  %v3846_v57 = vrot.slane %v3689_v20, 5  ;;  %v5238_v52 = vshrl.u32 %v5177_v0, 16 }
 0x35e   : > { %v9300_v15 = vor.u32 %v9692_v62, %v9297_v35  ;;  %v5246_v62 = vrot.slane %v5244_v3, 5  ;;  %v4489_v0 = vld [vmem:[#allocation4 + $0x14] sm:$0x1] }
 0x35f   : > { %v9689_v11 = vld [vmem:[#allocation3 + $0xc4] sm:$0xf0]  ;;  %v3848_v32 = vrot.slane %v3846_v57, 4  ;;  %v5240_v4 = vrot.slane %v5238_v52, 4 }
 0x361   : > { %v3573_v43 = vpop.permute.xlu2 %3572  ;;  %v9287_v18 = vld [vmem:[#allocation3 + $0xd0] sm:$0xf]  ;;  %v5241_v39 = vor.u32 %v5240_v4, %v5236_v50 }
 0x362   : > { %4182 = vmatmul.bf16.gmra.mxu0 %v9172_v49  ;;  %v3571_v40 = vpop.permute.xlu1 %3570  ;;  %3640 = vst.msk [vmem:[#allocation3 + $0xe8] sm:$0xf] %vm3610_vm9, %v3573_v43  ;;  %v9280_v49 = vor.u32 %v9689_v11, %v9279_v60 }
 0x363   : > { %3639 = vst.msk [vmem:[#allocation3 + $0xe0] sm:$0xf] %vm3610_vm9, %v3571_v40  ;;  %v5242_v11 = vrot.slane %v5241_v39, 4 }
 0x364   : > { %v9691_v5 = vld [vmem:[#allocation3 + $0xd4] sm:$0xf0] }
 0x365   : > { %v9288_v58 = vor.u32 %v9691_v5, %v9287_v18  ;;  %v5247_v16 = vsel %vm10180_vm3, %v5242_v11, %v5246_v62 }
 0x366   : > { %v4212_v56 = vpop.f32.mrf.mxu1  ;;  %5610 = vrot.lane.b32.xlu0 %v5247_v16, %s10007_s12 }
 0x369   : > { %9350 = vmatmul.msk.bf16.gmra.mxu3 %vm4129_vm6, %v9292_v6  ;;  %v9693_v31 = vld [vmem:[#allocation3 + $0xe4] sm:$0xf0]  ;;  %v3847_v6 = vsel %vm10873_vm13, %v9136_v23, %v3846_v57 }
 0x36a   : > { %4743 = vmatmul.bf16.gmra.mxu2 %v9264_v12  ;;  %v5227_v12 = vrot.slane %v5225_v25, 4  ;;  %v9295_v37 = vld [vmem:[#allocation3 + $0xe0] sm:$0xf]  ;;  %3913 = vst.msk [vmem:[#allocation3 + $0xf4] sm:$0xf] %vm300_vm0, %v3847_v6 }
 0x36b   : > { %v9296_v26 = vor.u32 %v9693_v31, %v9295_v37  ;;  %v4492_v6 = vld [vmem:[#allocation4 + $0x18] sm:$0xf] }
 0x36c   : > { %v5231_v38 = vor.u32 %v5230_v28, %v5227_v12 }
 0x36e   : > { %v4214_v36 = vpop.f32.mrf.mxu1  ;;  %v5232_v8 = vrot.slane %v5231_v38, 4 }
 0x370   : > { %v5237_v55 = vsel %vm10180_vm3, %v5232_v8, %v5236_v50 }
 0x371   : > { %5608 = vrot.lane.b32.xlu2 %v5237_v55, %s10007_s12 }
 0x372   : > { %4187 = vmatmul.bf16.gmra.mxu0 %v9180_v44  ;;  %v3690_v44 = vld [vmem:[#allocation2 + $0xd4] sm:$0x1] }
 0x373   : > { %v3849_v54 = vrot.slane %v3690_v44, 5 }
 0x375   : > { %v3850_v21 = vsel %vm10873_vm13, %v3848_v32, %v3849_v54 }
 0x376   : > { %v4217_v53 = vpop.f32.mrf.mxu1  ;;  %3914 = vst.msk [vmem:[#allocation3 + $0xfc] sm:$0xf] %vm300_vm0, %v3850_v21 }
 0x379   : > { %9351 = vmatmul.msk.bf16.gmra.mxu3 %vm4129_vm6, %v9300_v15  ;;  %v9694_v15 = vld [vmem:[#allocation3 + $0xf4] sm:$0xf] }
 0x37a   : > { %4748 = vmatmul.bf16.gmra.mxu2 %v9272_v48 }
 0x37e   : > { %v12032_v7 = vpop.f32.mrf.mxu1 }
 0x382   : > { %4192 = vmatmul.bf16.gmra.mxu0 %v9188_v59 }
 0x386   : > { %v4222_v60 = vpop.f32.mrf.mxu1 }
 0x38a   : > { %4753 = vmatmul.bf16.gmra.mxu2 %v9280_v49 }
 0x38e   : > { %v4224_v8 = vpop.f32.mrf.mxu1 }
 0x390   : > { %v12054_v50 = vpop.f32.mrf.mxu3 }
 0x392   : > { %4197 = vmatmul.bf16.gmra.mxu0 %v9196_v46 }
 0x39a   : > { %4758 = vmatmul.bf16.gmra.mxu2 %v9288_v58 }
 0x39f   : > { %v4163_v30 = vpop.f32.mrf.mxu0 }
 0x3a0   : > { %v4213_v1 = vadd.f32 %v4212_v56, %v4163_v30  ;;  %v4485_v56 = vld [vmem:[#allocation4 + $0xc] sm:$0xf] }
 0x3a2   : > { %v4256_v63 = vmul.f32 %v12024_v9, %v4213_v1 }
 0x3a4   : > { %v4276_v24 = vadd.f32 %v12029_v51, %v4256_v63 }
 0x3a6   : > { %v4292_v48 = vmax.f32 %v4276_v24, 0.0 }
 0x3a7   : > { %v4165_v34 = vpop.f32.mrf.mxu0 }
 0x3a8   : > { %v4308_v47 = vpack.c.bf16 %v4292_v48, %v4292_v48  ;;  %v4215_v33 = vadd.f32 %v4214_v36, %v4165_v34  ;;  %v9305_v36 = vld [vmem:[#allocation3 + $0xf8] sm:$0xf0] }
 0x3a9   : > { %v9308_v58 = vor.u32 %v9694_v15, %v9305_v36  ;;  %v4496_v36 = vld [vmem:[#allocation4 + $0x20] sm:$0x1] }
 0x3aa   : > { %v4325_v42 = vshrl.u32 %v4308_v47, 16  ;;  %v4257_v14 = vmul.f32 %v12024_v9, %v4215_v33  ;;  %4763 = vmatmul.bf16.gmra.mxu2 %v9296_v26  ;;  %v4328_v40 = vshll.u32 %v4308_v47, 16 }
 0x3ab   : > { %9352 = vmatmul.msk.bf16.gmra.mxu3 %vm4129_vm6, %v9308_v58 }
 0x3ac   : > { %v4327_v59 = vrot.slane %v4325_v42, 7  ;;  %v4277_v43 = vadd.f32 %v12029_v51, %v4257_v14  ;;  %v4227_v14 = vpop.f32.mrf.mxu1 }
 0x3ae   : > { %v4330_v49 = vor.u32 %v4328_v40, %v4327_v59  ;;  %v4293_v35 = vmax.f32 %v4277_v43, 0.0  ;;  %v4331_v38 = vrot.slane %v4327_v59, 4  ;;  %v12069_v43 = vpop.f32.mrf.mxu3 }
 0x3af   : > { %v4168_v41 = vpop.f32.mrf.mxu0 }
 0x3b0   : > { %v4486_v46 = vsel %vm10303_vm7, %v4330_v49, %v4485_v56  ;;  %v4309_v18 = vpack.c.bf16 %v4293_v35, %v4293_v35  ;;  %v4218_v5 = vadd.f32 %v4217_v53, %v4168_v41 }
 0x3b1   : > { %4487 = vst [vmem:[#allocation4 + $0xc] sm:$0xf] %v4486_v46 }
 0x3b2   : > { %v4333_v17 = vshrl.u32 %v4309_v18, 16  ;;  %v4258_v25 = vmul.f32 %v12024_v9, %v4218_v5  ;;  %v4336_v12 = vshll.u32 %v4309_v18, 16 }
 0x3b4   : > { %v4335_v19 = vrot.slane %v4333_v17, 7  ;;  %v4278_v28 = vadd.f32 %v12029_v51, %v4258_v25 }
 0x3b6   : > { %v4338_v2 = vor.u32 %v4336_v12, %v4335_v19  ;;  %v4340_v30 = vrot.slane %v4335_v19, 4  ;;  %v4294_v1 = vmax.f32 %v4278_v28, 0.0 }
 0x3b7   : > { %v4170_v53 = vpop.f32.mrf.mxu0 }
 0x3b8   : > { %v4339_v20 = vsel %vm10310_vm8, %v4331_v38, %v4338_v2  ;;  %v4490_v63 = vsel %vm10409_vm10, %v4340_v30, %v4489_v0  ;;  %v4310_v55 = vpack.c.bf16 %v4294_v1, %v4294_v1  ;;  %v4220_v57 = vadd.f32 %v12032_v7, %v4170_v53  ;;  %v5179_v37 = vld [vmem:[#allocation4 + $0xc] sm:$0xf] }
 0x3b9   : > { %4488 = vst.msk [vmem:[#allocation4 + $0x10] sm:$0xf] %vm300_vm0, %v4339_v20  ;;  %v5249_v61 = vshrl.u32 %v5179_v37, 16  ;;  %v5252_v44 = vshll.u32 %v5179_v37, 16  ;;  %v9729_v7 = vld [vmem:[%s13674_s2 + $0x40] sm:$0xff]  ;;  %v12086_v37 = vpop.f32.mrf.mxu1 }
 0x3ba   : > { %4491 = vst [vmem:[#allocation4 + $0x14] sm:$0x1] %v4490_v63  ;;  %v4342_v24 = vshrl.u32 %v4310_v55, 16  ;;  %v4259_v31 = vmul.f32 %v12024_v9, %v4220_v57  ;;  %v4345_v48 = vshll.u32 %v4310_v55, 16  ;;  %8425 = vmatpush.bf16.msrb.mxu3 %v9729_v7 }
 0x3bb   : > { %v5251_v23 = vrot.slane %v5249_v61, 4  ;;  %v5254_v32 = vrot.slane %v5252_v44, 5 }
 0x3bc   : > { %v4344_v54 = vrot.slane %v4342_v24, 7  ;;  %v4279_v52 = vadd.f32 %v12029_v51, %v4259_v31  ;;  %v12088_v24 = vpop.f32.mrf.mxu3 }
 0x3bd   : > { %v5255_v47 = vor.u32 %v5254_v32, %v5251_v23 }
 0x3be   : > { %v4347_v21 = vor.u32 %v4345_v48, %v4344_v54  ;;  %v4295_v34 = vmax.f32 %v4279_v52, 0.0  ;;  %v4348_v5 = vrot.slane %v4344_v54, 4  ;;  %v4499_v54 = vld [vmem:[#allocation4 + $0x24] sm:$0xf]  ;;  %v12094_v48 = vld [vmem:[%s13675_s3] ss:$0 sm:$0xff] }
 0x3bf   : > { %v4173_v26 = vpop.f32.mrf.mxu0  ;;  %v5256_v62 = vrot.slane %v5255_v47, 4 }
 0x3c0   : > { %v4493_v33 = vsel %vm10303_vm7, %v4347_v21, %v4492_v6  ;;  %v4311_v4 = vpack.c.bf16 %v4295_v34, %v4295_v34  ;;  %v4223_v13 = vadd.f32 %v4222_v60, %v4173_v26  ;;  %v5180_v42 = vld [vmem:[#allocation4 + $0x10] sm:$0xf]  ;;  %v12100_v26 = vld [vmem:[%s13676_s4] ss:$0 sm:$0xff] }
 0x3c1   : > { %v5115_v39 = vld [vmem:[#allocation4 + $0x10] sm:$0xf]  ;;  %4494 = vst [vmem:[#allocation4 + $0x18] sm:$0xf] %v4493_v33  ;;  %v5258_v3 = vshll.u32 %v5180_v42, 16  ;;  %v5262_v59 = vshrl.u32 %v5180_v42, 16 }
 0x3c2   : > { %v5181_v40 = vld [vmem:[#allocation4 + $0x14] sm:$0x1]  ;;  %v4350_v11 = vshrl.u32 %v4311_v4, 16  ;;  %v4260_v56 = vmul.f32 %v12024_v9, %v4223_v13  ;;  %5147 = vst.msk [vmem:[#allocation5 + $0x18] sm:$0xf] %vm300_vm0, %v5115_v39  ;;  %v4353_v60 = vshll.u32 %v4311_v4, 16 }
 0x3c3   : > { %v5260_v49 = vrot.slane %v5258_v3, 5  ;;  %v5264_v35 = vrot.slane %v5262_v59, 4  ;;  %v5268_v15 = vshll.u32 %v5181_v40, 16 }
 0x3c4   : > { %v4352_v41 = vrot.slane %v4350_v11, 7  ;;  %v4280_v16 = vadd.f32 %v12029_v51, %v4260_v56 }
 0x3c5   : > { %v5261_v46 = vsel %vm10180_vm3, %v5256_v62, %v5260_v49  ;;  %v5265_v18 = vor.u32 %v5264_v35, %v5260_v49  ;;  %v5270_v28 = vrot.slane %v5268_v15, 5 }
 0x3c6   : > { %v4355_v58 = vor.u32 %v4353_v60, %v4352_v41  ;;  %v4357_v17 = vrot.slane %v4352_v41, 4  ;;  %v4296_v25 = vmax.f32 %v4280_v16, 0.0  ;;  %5612 = vrot.lane.b32.xlu1 %v5261_v46, %s10007_s12 }
 0x3c7   : > { %v4175_v19 = vpop.f32.mrf.mxu0  ;;  %v5266_v12 = vrot.slane %v5265_v18, 4 }
 0x3c8   : > { %v4356_v0 = vsel %vm10310_vm8, %v4348_v5, %v4355_v58  ;;  %v4497_v38 = vsel %vm10409_vm10, %v4357_v17, %v4496_v36  ;;  %v4312_v2 = vpack.c.bf16 %v4296_v25, %v4296_v25  ;;  %v4225_v30 = vadd.f32 %v4224_v8, %v4175_v19  ;;  %v5182_v1 = vld [vmem:[#allocation4 + $0x18] sm:$0xf]  ;;  %v12108_v5 = vpop.f32.mrf.mxu1  ;;  %v4503_v25 = vld [vmem:[#allocation4 + $0x2c] sm:$0x1] }
 0x3c9   : > { %4495 = vst.msk [vmem:[#allocation4 + $0x1c] sm:$0xf] %vm300_vm0, %v4356_v0  ;;  %v5271_v53 = vsel %vm10180_vm3, %v5266_v12, %v5270_v28  ;;  %v5273_v20 = vshrl.u32 %v5182_v1, 16  ;;  %v5276_v63 = vshll.u32 %v5182_v1, 16  ;;  %v7913_v32 = vld [vmem:[#allocation4 + $0x18] sm:$0xe] }
 0x3ca   : > { %4498 = vst [vmem:[#allocation4 + $0x20] sm:$0x1] %v4497_v38  ;;  %v4359_v55 = vshrl.u32 %v4312_v2, 16  ;;  %v4261_v57 = vmul.f32 %v12024_v9, %v4225_v30  ;;  %5614 = vrot.lane.b32.xlu2 %v5271_v53, %s10007_s12  ;;  %v4362_v31 = vshll.u32 %v4312_v2, 16  ;;  %v9385_v33 = vrot.slane %v7913_v32, 9  ;;  %v12114_v38 = vpop.f32.mrf.mxu3 }
 0x3cb   : > { %v5275_v61 = vrot.slane %v5273_v20, 4  ;;  %v5278_v44 = vrot.slane %v5276_v63, 5 }
 0x3cc   : > { %v4361_v8 = vrot.slane %v4359_v55, 7  ;;  %v4281_v23 = vadd.f32 %v12029_v51, %v4261_v57 }
 0x3cd   : > { %v4734_v7 = vpop.f32.mrf.mxu2  ;;  %v5279_v21 = vor.u32 %v5278_v44, %v5275_v61 }
 0x3ce   : > { %v4364_v52 = vor.u32 %v4362_v31, %v4361_v8  ;;  %v4297_v6 = vmax.f32 %v4281_v23, 0.0  ;;  %v4784_v34 = vadd.f32 %v12054_v50, %v4734_v7  ;;  %v4365_v4 = vrot.slane %v4361_v8, 4 }
 0x3cf   : > { %v4178_v47 = vpop.f32.mrf.mxu0  ;;  %v5280_v35 = vrot.slane %v5279_v21, 4 }
 0x3d0   : > { %v4500_v13 = vsel %vm10303_vm7, %v4364_v52, %v4499_v54  ;;  %v4313_v42 = vpack.c.bf16 %v4297_v6, %v4297_v6  ;;  %v4228_v39 = vadd.f32 %v4227_v14, %v4178_v47  ;;  %v5183_v3 = vld [vmem:[#allocation4 + $0x1c] sm:$0xf]  ;;  %v4827_v40 = vmul.f32 %v12094_v48, %v4784_v34 }
 0x3d1   : > { %v7914_v59 = vld [vmem:[#allocation4 + $0x1c] sm:$0xf]  ;;  %4501 = vst [vmem:[#allocation4 + $0x24] sm:$0xf] %v4500_v13  ;;  %v5282_v11 = vshll.u32 %v5183_v3, 16  ;;  %v5286_v50 = vshrl.u32 %v5183_v3, 16 }
 0x3d2   : > { %v5184_v56 = vld [vmem:[#allocation4 + $0x20] sm:$0x1]  ;;  %v4367_v62 = vshrl.u32 %v4313_v42, 16  ;;  %v4262_v49 = vmul.f32 %v12024_v9, %v4228_v39  ;;  %v4847_v41 = vadd.f32 %v12100_v26, %v4827_v40  ;;  %v8011_v36 = vrot.slane %v7914_v59, 5  ;;  %v5056_v39 = vld [vmem:[#allocation4 + $0x6c] sm:$0xf] }
 0x3d3   : > { %v5292_v15 = vshll.u32 %v5184_v56, 16  ;;  %v5284_v60 = vrot.slane %v5282_v11, 5  ;;  %v5288_v16 = vrot.slane %v5286_v50, 4  ;;  %v4370_v14 = vshll.u32 %v4313_v42, 16  ;;  %v7915_v17 = vld [vmem:[#allocation4 + $0x20] sm:$0x1] }
 0x3d4   : > { %v4369_v46 = vrot.slane %v4367_v62, 7  ;;  %v4282_v18 = vadd.f32 %v12029_v51, %v4262_v49  ;;  %v4863_v19 = vmax.f32 %v4847_v41, 0.0  ;;  %v8012_v0 = vsel %vm10873_vm13, %v9385_v33, %v8011_v36  ;;  %v4506_v50 = vld [vmem:[#allocation4 + $0x30] sm:$0xf] }
 0x3d5   : > { %v5294_v58 = vrot.slane %v5292_v15, 5  ;;  %v5285_v12 = vsel %vm10180_vm3, %v5280_v35, %v5284_v60  ;;  %v5289_v28 = vor.u32 %v5288_v16, %v5284_v60  ;;  %v4736_v53 = vpop.f32.mrf.mxu2  ;;  %v8013_v20 = vrot.slane %v8011_v36, 4  ;;  %8153 = vst.msk [vmem:[#allocation5 + $0x4] sm:$0xf] %vm300_vm0, %v8012_v0  ;;  %v4234_v16 = vpop.f32.mrf.mxu1 }
 0x3d6   : > { %v4372_v2 = vor.u32 %v4370_v14, %v4369_v46  ;;  %v4374_v30 = vrot.slane %v4369_v46, 4  ;;  %v4298_v1 = vmax.f32 %v4282_v18, 0.0  ;;  %5616 = vrot.lane.b32.xlu0 %v5285_v12, %s10007_s12  ;;  %v4879_v63 = vpack.c.bf16 %v4863_v19, %v4863_v19 }
 0x3d7   : > { %v4786_v55 = vadd.f32 %v12069_v43, %v4736_v53  ;;  %v4180_v57 = vpop.f32.mrf.mxu0  ;;  %v5290_v61 = vrot.slane %v5289_v28, 4  ;;  %v8014_v44 = vrot.slane %v7915_v17, 5 }
 0x3d8   : > { %v4373_v8 = vsel %vm10310_vm8, %v4365_v4, %v4372_v2  ;;  %v4504_v31 = vsel %vm10409_vm10, %v4374_v30, %v4503_v25  ;;  %v4314_v23 = vpack.c.bf16 %v4298_v1, %v4298_v1  ;;  %v4230_v32 = vadd.f32 %v12086_v37, %v4180_v57  ;;  %v5185_v54 = vld [vmem:[#allocation4 + $0x24] sm:$0xf]  ;;  %v12149_v25 = vpop.f32.mrf.mxu3 }
 0x3d9   : > { %4502 = vst.msk [vmem:[#allocation4 + $0x28] sm:$0xf] %vm300_vm0, %v4373_v8  ;;  %v4896_v52 = vshrl.u32 %v4879_v63, 16  ;;  %v4899_v6 = vshll.u32 %v4879_v63, 16  ;;  %v4828_v7 = vmul.f32 %v12094_v48, %v4786_v55  ;;  %v5295_v43 = vsel %vm10180_vm3, %v5290_v61, %v5294_v58  ;;  %v12132_v37 = vld [vmem:[#allocation4 + $0x24] sm:$0xe]  ;;  %v3577_v8 = vpop.permute.xlu1 %3576 }
 0x3da   : > { %4505 = vst [vmem:[#allocation4 + $0x2c] sm:$0x1] %v4504_v31  ;;  %v4376_v21 = vshrl.u32 %v4314_v23, 16  ;;  %v4263_v34 = vmul.f32 %v12024_v9, %v4230_v32  ;;  %5618 = vrot.lane.b32.xlu1 %v5295_v43, %s10007_s12  ;;  %v8015_v47 = vsel %vm10873_vm13, %v8013_v20, %v8014_v44  ;;  %v5297_v13 = vshrl.u32 %v5185_v54, 16 }
 0x3db   : > { %v12134_v33 = vrot.slane %v4896_v52, 7  ;;  %v4848_v4 = vadd.f32 %v12100_v26, %v4828_v7  ;;  %8154 = vst.msk [vmem:[#allocation5 + $0xc] sm:$0xf] %vm300_vm0, %v8015_v47  ;;  %v5300_v42 = vshll.u32 %v5185_v54, 16  ;;  %v4379_v59 = vshll.u32 %v4314_v23, 16  ;;  %v3575_v52 = vpop.permute.xlu0 %3574 }
 0x3dc   : > { %v12138_v3 = vrot.slane %v4376_v21, 7  ;;  %v4283_v40 = vadd.f32 %v12029_v51, %v4263_v34  ;;  %v5299_v62 = vrot.slane %v5297_v13, 4  ;;  %v9386_v49 = vrot.slane %v12132_v37, 9  ;;  %v9705_v0 = vld [vmem:[#allocation5 + $0x4] sm:$0xf] }
 0x3dd   : > { %v4901_v11 = vor.u32 %v4899_v6, %v12134_v33  ;;  %v4864_v56 = vmax.f32 %v4848_v4, 0.0  ;;  %v4902_v35 = vrot.slane %v12134_v33, 4  ;;  %v4739_v60 = vpop.f32.mrf.mxu2  ;;  %v5302_v36 = vrot.slane %v5300_v42, 5  ;;  %v5060_v6 = vld [vmem:[#allocation4 + $0x74] sm:$0x1] }
 0x3de   : > { %v4381_v15 = vor.u32 %v4379_v59, %v12138_v3  ;;  %v4299_v41 = vmax.f32 %v4283_v40, 0.0  ;;  %v4382_v14 = vrot.slane %v12138_v3, 4  ;;  %v4789_v58 = vadd.f32 %v12088_v24, %v4739_v60  ;;  %v4510_v4 = vld [vmem:[#allocation4 + $0x38] sm:$0x1]  ;;  %3642 = vst.msk [vmem:[#allocation3 + $0xf8] sm:$0xf] %vm3610_vm9, %v3577_v8 }
 0x3df   : > { %v5057_v46 = vsel %vm10303_vm7, %v4901_v11, %v5056_v39  ;;  %v4880_v18 = vpack.c.bf16 %v4864_v56, %v4864_v56  ;;  %v4183_v17 = vpop.f32.mrf.mxu0  ;;  %v5303_v30 = vor.u32 %v5302_v36, %v5299_v62  ;;  %3641 = vst.msk [vmem:[#allocation3 + $0xf0] sm:$0xf] %vm3610_vm9, %v3575_v52 }
 0x3e0   : > { %5058 = vst [vmem:[#allocation4 + $0x6c] sm:$0xf] %v5057_v46  ;;  %v4507_v19 = vsel %vm10303_vm7, %v4381_v15, %v4506_v50  ;;  %v4315_v12 = vpack.c.bf16 %v4299_v41, %v4299_v41  ;;  %v4233_v28 = vadd.f32 %v12108_v5, %v4183_v17  ;;  %v5186_v2 = vld [vmem:[#allocation4 + $0x28] sm:$0xf]  ;;  %v4829_v20 = vmul.f32 %v12094_v48, %v4789_v58  ;;  %v4237_v58 = vpop.f32.mrf.mxu1 }
 0x3e1   : > { %4508 = vst [vmem:[#allocation4 + $0x30] sm:$0xf] %v4507_v19  ;;  %v4904_v1 = vshrl.u32 %v4880_v18, 16  ;;  %v4907_v53 = vshll.u32 %v4880_v18, 16  ;;  %v5306_v63 = vshll.u32 %v5186_v2, 16  ;;  %v5304_v44 = vrot.slane %v5303_v30, 4 }
 0x3e2   : > { %v4384_v24 = vshrl.u32 %v4315_v12, 16  ;;  %v4387_v55 = vshll.u32 %v4315_v12, 16  ;;  %v4264_v57 = vmul.f32 %v12024_v9, %v4233_v28  ;;  %v9405_v61 = vld [vmem:[#allocation5 + $0x8] sm:$0xf0]  ;;  %v4849_v23 = vadd.f32 %v12100_v26, %v4829_v20  ;;  %v5187_v54 = vld [vmem:[#allocation4 + $0x2c] sm:$0x1] }
 0x3e3   : > { %v4906_v31 = vrot.slane %v4904_v1, 7  ;;  %v9408_v5 = vor.u32 %v9705_v0, %v9405_v61  ;;  %v5308_v32 = vrot.slane %v5306_v63, 5  ;;  %v5310_v21 = vshrl.u32 %v5186_v2, 16  ;;  %v7917_v17 = vld [vmem:[#allocation4 + $0x28] sm:$0xf]  ;;  %v12175_v0 = vpop.f32.mrf.mxu3 }
 0x3e4   : > { %v4386_v7 = vrot.slane %v4384_v24, 7  ;;  %v4284_v43 = vadd.f32 %v12029_v51, %v4264_v57  ;;  %v5316_v34 = vshll.u32 %v5187_v54, 16  ;;  %v4865_v13 = vmax.f32 %v4849_v23, 0.0 }
 0x3e5   : > { %v4909_v47 = vor.u32 %v4907_v53, %v4906_v31  ;;  %v4911_v33 = vrot.slane %v4906_v31, 4  ;;  %9501 = vmatmul.msk.bf16.vlgmr.msrb.gmra.mxu3 %vm4129_vm6, %v9408_v5  ;;  %v5309_v42 = vsel %vm10180_vm3, %v5304_v44, %v5308_v32  ;;  %v4741_v40 = vpop.f32.mrf.mxu2  ;;  %v5312_v11 = vrot.slane %v5310_v21, 4  ;;  %v4513_v5 = vld [vmem:[#allocation4 + $0x3c] sm:$0xf] }
 0x3e6   : > { %v4389_v39 = vor.u32 %v4387_v55, %v4386_v7  ;;  %v4391_v3 = vrot.slane %v4386_v7, 4  ;;  %v4300_v59 = vmax.f32 %v4284_v43, 0.0  ;;  %5620 = vrot.lane.b32.xlu2 %v5309_v42, %s10007_s12  ;;  %v4881_v62 = vpack.c.bf16 %v4865_v13, %v4865_v13  ;;  %v5063_v55 = vld [vmem:[#allocation4 + $0x78] sm:$0xf] }
 0x3e7   : > { %v4910_v50 = vsel %vm10310_vm8, %v4902_v35, %v4909_v47  ;;  %v5061_v56 = vsel %vm10409_vm10, %v4911_v33, %v5060_v6  ;;  %v4791_v15 = vadd.f32 %v12114_v38, %v4741_v40  ;;  %v4185_v41 = vpop.f32.mrf.mxu0  ;;  %v7918_v35 = vld [vmem:[#allocation4 + $0x2c] sm:$0x1]  ;;  %v5313_v38 = vor.u32 %v5312_v11, %v5308_v32 }
 0x3e8   : > { %5059 = vst.msk [vmem:[#allocation4 + $0x70] sm:$0xf] %vm300_vm0, %v4910_v50  ;;  %v4390_v60 = vsel %vm10310_vm8, %v4382_v14, %v4389_v39  ;;  %v4511_v36 = vsel %vm10409_vm10, %v4391_v3, %v4510_v4  ;;  %v4316_v46 = vpack.c.bf16 %v4300_v59, %v4300_v59  ;;  %v4235_v18 = vadd.f32 %v4234_v16, %v4185_v41  ;;  %v5188_v2 = vld [vmem:[#allocation4 + $0x30] sm:$0xf]  ;;  %v5067_v50 = vld [vmem:[#allocation4 + $0x80] sm:$0x1]  ;;  %v4239_v41 = vpop.f32.mrf.mxu1 }
 0x3e9   : > { %5062 = vst [vmem:[#allocation4 + $0x74] sm:$0x1] %v5061_v56  ;;  %v4913_v19 = vshrl.u32 %v4881_v62, 16  ;;  %v4916_v12 = vshll.u32 %v4881_v62, 16  ;;  %v4830_v28 = vmul.f32 %v12094_v48, %v4791_v15  ;;  %v5318_v53 = vrot.slane %v5316_v34, 5 }
 0x3ea   : > { %4509 = vst.msk [vmem:[#allocation4 + $0x34] sm:$0xf] %vm300_vm0, %v4390_v60  ;;  %v4393_v14 = vshrl.u32 %v4316_v46, 16  ;;  %v4396_v30 = vshll.u32 %v4316_v46, 16  ;;  %v4265_v1 = vmul.f32 %v12024_v9, %v4235_v18  ;;  %v5314_v63 = vrot.slane %v5313_v38, 4 }
 0x3eb   : > { %4512 = vst [vmem:[#allocation4 + $0x38] sm:$0x1] %v4511_v36  ;;  %v12179_v16 = vrot.slane %v4913_v19, 7  ;;  %v4850_v20 = vadd.f32 %v12100_v26, %v4830_v28  ;;  %v8018_v24 = vrot.slane %v7917_v17, 5  ;;  %v8021_v44 = vrot.slane %v7918_v35, 5  ;;  %v12208_v35 = vpop.f32.mrf.mxu3 }
 0x3ec   : > { %v12182_v57 = vrot.slane %v4393_v14, 7  ;;  %v4285_v61 = vadd.f32 %v12029_v51, %v4265_v1  ;;  %v5321_v8 = vshrl.u32 %v5188_v2, 16  ;;  %v5319_v54 = vsel %vm10180_vm3, %v5314_v63, %v5318_v53  ;;  %v5114_v14 = vld [vmem:[#allocation4 + $0xc] sm:$0xf]  ;;  %v4517_v53 = vld [vmem:[#allocation4 + $0x44] sm:$0x1] }
 0x3ed   : > { %v4918_v31 = vor.u32 %v4916_v12, %v12179_v16  ;;  %v4919_v23 = vrot.slane %v12179_v16, 4  ;;  %v4866_v32 = vmax.f32 %v4850_v20, 0.0  ;;  %5622 = vrot.lane.b32.xlu0 %v5319_v54, %s10007_s12  ;;  %v4744_v43 = vpop.f32.mrf.mxu2  ;;  %v8019_v21 = vsel %vm10873_vm13, %v9386_v49, %v8018_v24  ;;  %v9695_v54 = vld [vmem:[#allocation3 + $0xf4] sm:$0xf0]  ;;  %5146 = vst.msk [vmem:[#allocation5 + $0x10] sm:$0xf] %vm300_vm0, %v5114_v14 }
 0x3ee   : > { %v4398_v52 = vor.u32 %v4396_v30, %v12182_v57  ;;  %v4399_v6 = vrot.slane %v12182_v57, 4  ;;  %v4301_v7 = vmax.f32 %v4285_v61, 0.0  ;;  %v4794_v33 = vadd.f32 %v12149_v25, %v4744_v43  ;;  %8155 = vst.msk [vmem:[#allocation5 + $0x14] sm:$0xf] %vm300_vm0, %v8019_v21 }
 0x3ef   : > { %v5064_v34 = vsel %vm10303_vm7, %v4918_v31, %v5063_v55  ;;  %v4882_v47 = vpack.c.bf16 %v4866_v32, %v4866_v32  ;;  %v4188_v4 = vpop.f32.mrf.mxu0  ;;  %v8020_v13 = vrot.slane %v8018_v24, 4  ;;  %v5323_v37 = vrot.slane %v5321_v8, 4  ;;  %v9303_v32 = vld [vmem:[#allocation3 + $0xf0] sm:$0xf] }
 0x3f0   : > { %5065 = vst [vmem:[#allocation4 + $0x78] sm:$0xf] %v5064_v34  ;;  %v4514_v42 = vsel %vm10303_vm7, %v4398_v52, %v4513_v5  ;;  %v4317_v39 = vpack.c.bf16 %v4301_v7, %v4301_v7  ;;  %v4238_v3 = vadd.f32 %v4237_v58, %v4188_v4  ;;  %v4831_v40 = vmul.f32 %v12094_v48, %v4794_v33  ;;  %v7919_v52 = vld [vmem:[#allocation4 + $0x30] sm:$0xe] }
 0x3f1   : > { %4515 = vst [vmem:[#allocation4 + $0x3c] sm:$0xf] %v4514_v42  ;;  %v4921_v59 = vshrl.u32 %v4882_v47, 16  ;;  %v4924_v49 = vshll.u32 %v4882_v47, 16  ;;  %v8022_v11 = vsel %vm10873_vm13, %v8020_v13, %v8021_v44  ;;  %v5189_v25 = vld [vmem:[#allocation4 + $0x34] sm:$0xf] }
 0x3f2   : > { %v4401_v56 = vshrl.u32 %v4317_v39, 16  ;;  %v4404_v62 = vshll.u32 %v4317_v39, 16  ;;  %v4266_v15 = vmul.f32 %v12024_v9, %v4238_v3  ;;  %8156 = vst.msk [vmem:[#allocation5 + $0x1c] sm:$0xf] %vm300_vm0, %v8022_v11  ;;  %v5324_v60 = vshll.u32 %v5188_v2, 16 }
 0x3f3   : > { %v4923_v36 = vrot.slane %v4921_v59, 7  ;;  %v4851_v46 = vadd.f32 %v12100_v26, %v4831_v40  ;;  %v5330_v18 = vshll.u32 %v5189_v25, 16  ;;  %v5334_v58 = vshrl.u32 %v5189_v25, 16  ;;  %v5190_v17 = vld [vmem:[#allocation4 + $0x38] sm:$0x1] }
 0x3f4   : > { %v4403_v19 = vrot.slane %v4401_v56, 7  ;;  %v4286_v12 = vadd.f32 %v12029_v51, %v4266_v15  ;;  %v5326_v28 = vrot.slane %v5324_v60, 5  ;;  %v5340_v38 = vshll.u32 %v5190_v17, 16  ;;  %v7920_v11 = vld [vmem:[#allocation4 + $0x34] sm:$0xf]  ;;  %v4242_v56 = vpop.f32.mrf.mxu1  ;;  %v9754_v60 = vld [vmem:[%s13674_s2 + $0x40] sm:$0xff] }
 0x3f5   : > { %v4926_v30 = vor.u32 %v4924_v49, %v4923_v36  ;;  %v4928_v1 = vrot.slane %v4923_v36, 4  ;;  %v4867_v16 = vmax.f32 %v4851_v46, 0.0  ;;  %v12211_v20 = vrot.slane %v5330_v18, 5  ;;  %v4746_v55 = vpop.f32.mrf.mxu2  ;;  %v9707_v21 = vld [vmem:[#allocation5 + $0x14] sm:$0xf]  ;;  %8827 = vmatpush.bf16.msrb.mxu2 %v9754_v60 }
 0x3f6   : > { %v4406_v2 = vor.u32 %v4404_v62, %v4403_v19  ;;  %v4408_v63 = vrot.slane %v4403_v19, 4  ;;  %v4302_v24 = vmax.f32 %v4286_v12, 0.0  ;;  %v5327_v57 = vor.u32 %v5326_v28, %v5323_v37  ;;  %v5070_v25 = vld [vmem:[#allocation4 + $0x84] sm:$0xf]  ;;  %v4520_v18 = vld [vmem:[#allocation4 + $0x48] sm:$0xf]  ;;  %v12243_v19 = vpop.f32.mrf.mxu3 }
 0x3f7   : > { %v4927_v61 = vsel %vm10310_vm8, %v4919_v23, %v4926_v30  ;;  %v5068_v44 = vsel %vm10409_vm10, %v4928_v1, %v5067_v50  ;;  %v4883_v8 = vpack.c.bf16 %v4867_v16, %v4867_v16  ;;  %v4796_v31 = vadd.f32 %v12175_v0, %v4746_v55  ;;  %v4190_v5 = vpop.f32.mrf.mxu0 }
 0x3f8   : > { %5066 = vst.msk [vmem:[#allocation4 + $0x7c] sm:$0xf] %vm300_vm0, %v4927_v61  ;;  %v4407_v7 = vsel %vm10310_vm8, %v4399_v6, %v4406_v2  ;;  %v4518_v23 = vsel %vm10409_vm10, %v4408_v63, %v4517_v53  ;;  %v4318_v43 = vpack.c.bf16 %v4302_v24, %v4302_v24  ;;  %v5328_v34 = vrot.slane %v5327_v57, 4  ;;  %v7921_v24 = vld [vmem:[#allocation4 + $0x38] sm:$0x1] }
 0x3f9   : > { %5069 = vst [vmem:[#allocation4 + $0x80] sm:$0x1] %v5068_v44  ;;  %v4930_v47 = vshrl.u32 %v4883_v8, 16  ;;  %v4933_v0 = vshll.u32 %v4883_v8, 16  ;;  %v9413_v33 = vld [vmem:[#allocation5 + $0x18] sm:$0xf0]  ;;  %v4832_v4 = vmul.f32 %v12094_v48, %v4796_v31  ;;  %v4240_v13 = vadd.f32 %v4239_v41, %v4190_v5 }
 0x3fa   : > { %4516 = vst.msk [vmem:[#allocation4 + $0x40] sm:$0xf] %vm300_vm0, %v4407_v7  ;;  %v4410_v42 = vshrl.u32 %v4318_v43, 16  ;;  %v4413_v39 = vshll.u32 %v4318_v43, 16  ;;  %v9416_v3 = vor.u32 %v9707_v21, %v9413_v33  ;;  %v5333_v6 = vsel %vm10180_vm3, %v5328_v34, %v12211_v20  ;;  %v4524_v33 = vld [vmem:[#allocation4 + $0x50] sm:$0x1] }
 0x3fb   : > { %4519 = vst [vmem:[#allocation4 + $0x44] sm:$0x1] %v4518_v23  ;;  %v12229_v37 = vrot.slane %v4930_v47, 7  ;;  %v4852_v59 = vadd.f32 %v12100_v26, %v4832_v4  ;;  %5624 = vrot.lane.b32.xlu1 %v5333_v6, %s10007_s12  ;;  %v4267_v49 = vmul.f32 %v12024_v9, %v4240_v13  ;;  %v5336_v40 = vrot.slane %v5334_v58, 4 }
 0x3fc   : > { %v12234_v50 = vrot.slane %v4410_v42, 7  ;;  %9502 = vmatmul.msk.bf16.gmra.mxu3 %vm4129_vm6, %v9416_v3  ;;  %v5342_v62 = vrot.slane %v5340_v38, 5  ;;  %v9304_v15 = vor.u32 %v9695_v54, %v9303_v32  ;;  %v9387_v41 = vrot.slane %v7919_v52, 9  ;;  %v5191_v32 = vld [vmem:[#allocation4 + $0x3c] sm:$0xf] }
 0x3fd   : > { %v4935_v36 = vor.u32 %v4933_v0, %v12229_v37  ;;  %v4936_v46 = vrot.slane %v12229_v37, 4  ;;  %v4868_v58 = vmax.f32 %v4852_v59, 0.0  ;;  %v4287_v17 = vadd.f32 %v12029_v51, %v4267_v49  ;;  %v4749_v14 = vpop.f32.mrf.mxu2  ;;  %v5074_v0 = vld [vmem:[#allocation4 + $0x8c] sm:$0x1]  ;;  %v4244_v49 = vpop.f32.mrf.mxu1 }
 0x3fe   : > { %v4415_v12 = vor.u32 %v4413_v39, %v12234_v50  ;;  %v4416_v28 = vrot.slane %v12234_v50, 4  ;;  %v5337_v38 = vor.u32 %v5336_v40, %v12211_v20  ;;  %4768 = vmatmul.bf16.gmra.mxu2 %v9304_v15  ;;  %v8025_v30 = vrot.slane %v7920_v11, 5 }
 0x3ff   : > { %v5071_v1 = vsel %vm10303_vm7, %v4935_v36, %v5070_v25  ;;  %v4884_v53 = vpack.c.bf16 %v4868_v58, %v4868_v58  ;;  %v4303_v16 = vmax.f32 %v4287_v17, 0.0  ;;  %v4799_v2 = vadd.f32 %v12208_v35, %v4749_v14  ;;  %v4193_v63 = vpop.f32.mrf.mxu0  ;;  %v12273_v14 = vld [vmem:[#allocation4 + $0x78] sm:$0xe] }
 0x400   : > { %5072 = vst [vmem:[#allocation4 + $0x84] sm:$0xf] %v5071_v1  ;;  %v4521_v55 = vsel %vm10303_vm7, %v4415_v12, %v4520_v18  ;;  %v5338_v57 = vrot.slane %v5337_v38, 4  ;;  %v4243_v61 = vadd.f32 %v4242_v56, %v4193_v63  ;;  %v8026_v20 = vsel %vm10873_vm13, %v9387_v41, %v8025_v30  ;;  %v4803_v18 = vpop.f32.mrf.mxu3 }
 0x401   : > { %4522 = vst [vmem:[#allocation4 + $0x48] sm:$0xf] %v4521_v55  ;;  %v4938_v44 = vshrl.u32 %v4884_v53, 16  ;;  %v4941_v8 = vshll.u32 %v4884_v53, 16  ;;  %v4319_v31 = vpack.c.bf16 %v4303_v16, %v4303_v16  ;;  %v4833_v5 = vmul.f32 %v12094_v48, %v4799_v2  ;;  %v5192_v47 = vld [vmem:[#allocation4 + $0x40] sm:$0xf] }
 0x402   : > { %v5343_v35 = vsel %vm10180_vm3, %v5338_v57, %v5342_v62  ;;  %v4268_v54 = vmul.f32 %v12024_v9, %v4243_v61  ;;  %v8027_v52 = vrot.slane %v8025_v30, 4  ;;  %v8028_v7 = vrot.slane %v7921_v24, 5  ;;  %8157 = vst.msk [vmem:[#allocation5 + $0x24] sm:$0xf] %vm300_vm0, %v8026_v20  ;;  %v5116_v62 = vld [vmem:[#allocation4 + $0x18] sm:$0xf] }
 0x403   : > { %v4940_v23 = vrot.slane %v4938_v44, 7  ;;  %v4418_v43 = vshrl.u32 %v4319_v31, 16  ;;  %v4421_v21 = vshll.u32 %v4319_v31, 16  ;;  %5626 = vrot.lane.b32.xlu2 %v5343_v35, %s10007_s12  ;;  %v4853_v34 = vadd.f32 %v12100_v26, %v4833_v5  ;;  %5148 = vst.msk [vmem:[#allocation5 + $0x20] sm:$0xf] %vm300_vm0, %v5116_v62 }
 0x404   : > { %v4288_v4 = vadd.f32 %v12029_v51, %v4268_v54  ;;  %v8029_v13 = vsel %vm10873_vm13, %v8027_v52, %v8028_v7  ;;  %v5345_v9 = vshrl.u32 %v5191_v32, 16  ;;  %v5348_v42 = vshll.u32 %v5191_v32, 16  ;;  %v5193_v16 = vld [vmem:[#allocation4 + $0x44] sm:$0x1]  ;;  %v5077_v55 = vld [vmem:[#allocation4 + $0x90] sm:$0xf] }
 0x405   : > { %v4943_v39 = vor.u32 %v4941_v8, %v4940_v23  ;;  %v4945_v3 = vrot.slane %v4940_v23, 4  ;;  %v4420_v6 = vrot.slane %v4418_v43, 7  ;;  %v4869_v37 = vmax.f32 %v4853_v34, 0.0  ;;  %8158 = vst.msk [vmem:[#allocation5 + $0x2c] sm:$0xf] %vm300_vm0, %v8029_v13  ;;  %v4751_v40 = vpop.f32.mrf.mxu2 }
 0x406   : > { %v4304_v59 = vmax.f32 %v4288_v4, 0.0  ;;  %v5347_v11 = vrot.slane %v5345_v9, 4  ;;  %v5350_v25 = vrot.slane %v5348_v42, 5  ;;  %v5354_v56 = vshll.u32 %v5192_v47, 16  ;;  %v4527_v35 = vld [vmem:[#allocation4 + $0x54] sm:$0xf] }
 0x407   : > { %v4944_v51 = vsel %vm10310_vm8, %v4936_v46, %v4943_v39  ;;  %v5075_v15 = vsel %vm10409_vm10, %v4945_v3, %v5074_v0  ;;  %v4423_v41 = vor.u32 %v4421_v21, %v4420_v6  ;;  %v4425_v60 = vrot.slane %v4420_v6, 4  ;;  %v4195_v36 = vpop.f32.mrf.mxu0  ;;  %v12294_v23 = vld [vmem:[%s13675_s3] ss:$0 sm:$0xff]  ;;  %v7938_v21 = vld [vmem:[#allocation4 + $0x7c] sm:$0xf] }
 0x408   : > { %5073 = vst.msk [vmem:[#allocation4 + $0x88] sm:$0xf] %vm300_vm0, %v4944_v51  ;;  %v4885_v58 = vpack.c.bf16 %v4869_v37, %v4869_v37  ;;  %v4320_v17 = vpack.c.bf16 %v4304_v59, %v4304_v59  ;;  %v4801_v12 = vadd.f32 %v12243_v19, %v4751_v40  ;;  %v5351_v38 = vor.u32 %v5350_v25, %v5347_v11  ;;  %v5117_v34 = vld [vmem:[#allocation4 + $0x1c] sm:$0xf]  ;;  %v7939_v9 = vld [vmem:[#allocation4 + $0x80] sm:$0x1] }
 0x409   : > { %5076 = vst [vmem:[#allocation4 + $0x8c] sm:$0x1] %v5075_v15  ;;  %v4424_v46 = vsel %vm10310_vm8, %v4416_v28, %v4423_v41  ;;  %v4525_v30 = vsel %vm10409_vm10, %v4425_v60, %v4524_v33  ;;  %v5356_v1 = vrot.slane %v5354_v56, 5  ;;  %v5358_v53 = vshrl.u32 %v5192_v47, 16  ;;  %v9709_v57 = vld [vmem:[#allocation5 + $0x24] sm:$0xf]  ;;  %v4247_v60 = vpop.f32.mrf.mxu1 }
 0x40a   : > { %4523 = vst.msk [vmem:[#allocation4 + $0x4c] sm:$0xf] %vm300_vm0, %v4424_v46  ;;  %v4947_v2 = vshrl.u32 %v4885_v58, 16  ;;  %v4950_v63 = vshll.u32 %v4885_v58, 16  ;;  %v4427_v19 = vshrl.u32 %v4320_v17, 16  ;;  %v4430_v24 = vshll.u32 %v4320_v17, 16  ;;  %v4805_v17 = vpop.f32.mrf.mxu3 }
 0x40b   : > { %4526 = vst [vmem:[#allocation4 + $0x50] sm:$0x1] %v4525_v30  ;;  %v4834_v50 = vmul.f32 %v12094_v48, %v4801_v12  ;;  %v5352_v61 = vrot.slane %v5351_v38, 4  ;;  %v4245_v20 = vadd.f32 %v4244_v49, %v4195_v36  ;;  %v5360_v28 = vrot.slane %v5358_v53, 4  ;;  %v12307_v39 = vld [vmem:[%s13676_s4] ss:$0 sm:$0xff] }
 0x40c   : > { %v12283_v44 = vrot.slane %v4947_v2, 7  ;;  %v12285_v8 = vrot.slane %v4427_v19, 7  ;;  %v9421_v31 = vld [vmem:[#allocation5 + $0x28] sm:$0xf0]  ;;  %v5364_v5 = vshll.u32 %v5193_v16, 16  ;;  %v9393_v32 = vrot.slane %v12273_v14, 9 }
 0x40d   : > { %v9424_v54 = vor.u32 %v9709_v57, %v9421_v31  ;;  %v4854_v52 = vadd.f32 %v12100_v26, %v4834_v50  ;;  %v5357_v7 = vsel %vm10180_vm3, %v5352_v61, %v5356_v1  ;;  %v4269_v43 = vmul.f32 %v12294_v23, %v4245_v20  ;;  %v4754_v13 = vpop.f32.mrf.mxu2  ;;  %5149 = vst.msk [vmem:[#allocation5 + $0x28] sm:$0xf] %vm300_vm0, %v5117_v34  ;;  %v7922_v49 = vld [vmem:[#allocation4 + $0x3c] sm:$0xe]  ;;  %v5112_v40 = vld [vmem:[#allocation4] sm:$0xf] }
 0x40e   : > { %v4952_v47 = vor.u32 %v4950_v63, %v12283_v44  ;;  %v4953_v0 = vrot.slane %v12283_v44, 4  ;;  %v4432_v33 = vor.u32 %v4430_v24, %v12285_v8  ;;  %v4433_v4 = vrot.slane %v12285_v8, 4  ;;  %5628 = vrot.lane.b32.xlu0 %v5357_v7, %s10007_s12  ;;  %v7923_v51 = vld [vmem:[#allocation4 + $0x40] sm:$0xf]  ;;  %5144 = vst.msk [vmem:[#allocation5] sm:$0xf] %vm300_vm0, %v5112_v40  ;;  %v5609_v63 = vpop.permute.xlu2 %5608 }
 0x40f   : > { %9503 = vmatmul.msk.bf16.gmra.mxu3 %vm4129_vm6, %v9424_v54  ;;  %v4870_v42 = vmax.f32 %v4854_v52, 0.0  ;;  %v4289_v3 = vadd.f32 %v12307_v39, %v4269_v43  ;;  %v5361_v6 = vor.u32 %v5360_v28, %v5356_v1  ;;  %v5366_v37 = vrot.slane %v5364_v5, 5  ;;  %v4198_v59 = vpop.f32.mrf.mxu0  ;;  %v12321_v2 = vld [vmem:[#allocation4 + $0x48] sm:$0xf]  ;;  %5704 = vst.msk [vmem:[#allocation5] sm:$0xf] %vm1424_vm14, %v5609_v63 }
 0x410   : > { %v5078_v11 = vsel %vm10303_vm7, %v4952_v47, %v5077_v55  ;;  %v4528_v25 = vsel %vm10303_vm7, %v4432_v33, %v4527_v35  ;;  %v4804_v56 = vadd.f32 %v4803_v18, %v4754_v13  ;;  %v8067_v62 = vrot.slane %v7938_v21, 5  ;;  %v7924_v18 = vld [vmem:[#allocation4 + $0x44] sm:$0x1]  ;;  %v5081_v31 = vld [vmem:[#allocation4 + $0x98] sm:$0x1] }
 0x411   : > { %5079 = vst [vmem:[#allocation4 + $0x90] sm:$0xf] %v5078_v11  ;;  %v4886_v15 = vpack.c.bf16 %v4870_v42, %v4870_v42  ;;  %v4305_v41 = vmax.f32 %v4289_v3, 0.0  ;;  %v5362_v36 = vrot.slane %v5361_v6, 4  ;;  %v8070_v58 = vrot.slane %v7939_v9, 5 }
 0x412   : > { %4529 = vst [vmem:[#allocation4 + $0x54] sm:$0xf] %v4528_v25  ;;  %v4835_v12 = vmul.f32 %v12094_v48, %v4804_v56  ;;  %v8068_v38 = vsel %vm10873_vm13, %v9393_v32, %v8067_v62  ;;  %v8069_v14 = vrot.slane %v8067_v62, 4  ;;  %v4248_v46 = vadd.f32 %v4247_v60, %v4198_v59  ;;  %v4531_v47 = vld [vmem:[#allocation4 + $0x5c] sm:$0x1] }
 0x413   : > { %v4955_v30 = vshrl.u32 %v4886_v15, 16  ;;  %v4958_v1 = vshll.u32 %v4886_v15, 16  ;;  %v4321_v53 = vpack.c.bf16 %v4305_v41, %v4305_v41  ;;  %v5367_v16 = vsel %vm10180_vm3, %v5362_v36, %v5366_v37  ;;  %8169 = vst.msk [vmem:[#allocation5 + $0x84] sm:$0xf] %vm300_vm0, %v8068_v38  ;;  %v5195_v62 = vld [vmem:[#allocation4 + $0x4c] sm:$0xf]  ;;  %v4249_v41 = vpop.f32.mrf.mxu1 }
 0x414   : > { %5630 = vrot.lane.b32.xlu1 %v5367_v16, %s10007_s12  ;;  %v4855_v19 = vadd.f32 %v12100_v26, %v4835_v12  ;;  %v8071_v24 = vsel %vm10873_vm13, %v8069_v14, %v8070_v58  ;;  %v4270_v55 = vmul.f32 %v12294_v23, %v4248_v46  ;;  %v9388_v57 = vrot.slane %v7922_v49, 9  ;;  %v4808_v58 = vpop.f32.mrf.mxu3  ;;  %v4534_v46 = vld [vmem:[#allocation4 + $0x60] sm:$0xf] }
 0x415   : > { %v4957_v50 = vrot.slane %v4955_v30, 7  ;;  %v4435_v61 = vshrl.u32 %v4321_v53, 16  ;;  %v4438_v20 = vshll.u32 %v4321_v53, 16  ;;  %8170 = vst.msk [vmem:[#allocation5 + $0x8c] sm:$0xf] %vm300_vm0, %v8071_v24  ;;  %v8032_v28 = vrot.slane %v7923_v51, 5  ;;  %v4756_v54 = vpop.f32.mrf.mxu2 }
 0x416   : > { %v4871_v5 = vmax.f32 %v4855_v19, 0.0  ;;  %v4290_v32 = vadd.f32 %v12307_v39, %v4270_v55  ;;  %v8035_v35 = vrot.slane %v7924_v18, 5  ;;  %v5369_v52 = vshrl.u32 %v12321_v2, 16  ;;  %v5084_v51 = vld [vmem:[#allocation4 + $0x9c] sm:$0xf] }
 0x417   : > { %v4960_v7 = vor.u32 %v4958_v1, %v4957_v50  ;;  %v4962_v43 = vrot.slane %v4957_v50, 4  ;;  %v4437_v21 = vrot.slane %v4435_v61, 7  ;;  %v8033_v34 = vsel %vm10873_vm13, %v9388_v57, %v8032_v28  ;;  %v4200_v49 = vpop.f32.mrf.mxu0  ;;  %v5196_v1 = vld [vmem:[#allocation4 + $0x50] sm:$0x1]  ;;  %v7940_v53 = vld [vmem:[#allocation4 + $0x84] sm:$0xe] }
 0x418   : > { %v4887_v33 = vpack.c.bf16 %v4871_v5, %v4871_v5  ;;  %v4306_v13 = vmax.f32 %v4290_v32, 0.0  ;;  %v8034_v9 = vrot.slane %v8032_v28, 4  ;;  %8159 = vst.msk [vmem:[#allocation5 + $0x34] sm:$0xf] %vm300_vm0, %v8033_v34  ;;  %v4806_v42 = vadd.f32 %v4805_v17, %v4756_v54  ;;  %v7942_v34 = vld [vmem:[#allocation4 + $0x8c] sm:$0x1] }
 0x419   : > { %v4961_v3 = vsel %vm10310_vm8, %v4953_v0, %v4960_v7  ;;  %v5082_v6 = vsel %vm10409_vm10, %v4962_v43, %v5081_v31  ;;  %v4440_v37 = vor.u32 %v4438_v20, %v4437_v21  ;;  %v4442_v59 = vrot.slane %v4437_v21, 4  ;;  %v7941_v7 = vld [vmem:[#allocation4 + $0x88] sm:$0xf] }
 0x41a   : > { %5080 = vst.msk [vmem:[#allocation4 + $0x94] sm:$0xf] %vm300_vm0, %v4961_v3  ;;  %v4964_v40 = vshrl.u32 %v4887_v33, 16  ;;  %v4967_v11 = vshll.u32 %v4887_v33, 16  ;;  %v4322_v25 = vpack.c.bf16 %v4306_v13, %v4306_v13  ;;  %v8036_v56 = vsel %vm10873_vm13, %v8034_v9, %v8035_v35  ;;  %v9730_v15 = vld [vmem:[#allocation5 + $0x84] sm:$0xf] }
 0x41b   : > { %5083 = vst [vmem:[#allocation4 + $0x98] sm:$0x1] %v5082_v6  ;;  %v4441_v44 = vsel %vm10310_vm8, %v4433_v4, %v4440_v37  ;;  %v4532_v0 = vsel %vm10409_vm10, %v4442_v59, %v4531_v47  ;;  %v4836_v60 = vmul.f32 %v12094_v48, %v4806_v42  ;;  %v5371_v36 = vrot.slane %v5369_v52, 4  ;;  %v7925_v3 = vld [vmem:[#allocation4 + $0x48] sm:$0xe] }
 0x41c   : > { %4530 = vst.msk [vmem:[#allocation4 + $0x58] sm:$0xf] %vm300_vm0, %v4441_v44  ;;  %v12352_v17 = vrot.slane %v4964_v40, 7  ;;  %v9513_v12 = vld [vmem:[#allocation5 + $0x88] sm:$0xf0]  ;;  %v4444_v38 = vshrl.u32 %v4322_v25, 16  ;;  %v4250_v8 = vadd.f32 %v4249_v41, %v4200_v49 }
 0x41d   : > { %4533 = vst [vmem:[#allocation4 + $0x5c] sm:$0x1] %v4532_v0  ;;  %v9516_v14 = vor.u32 %v9730_v15, %v9513_v12  ;;  %v4447_v4 = vshll.u32 %v4322_v25, 16  ;;  %v4856_v18 = vadd.f32 %v12100_v26, %v4836_v60  ;;  %v5372_v30 = vshll.u32 %v12321_v2, 16  ;;  %v4759_v55 = vpop.f32.mrf.mxu2  ;;  %v5118_v2 = vld [vmem:[#allocation4 + $0x24] sm:$0xf] }
 0x41e   : > { %v4969_v16 = vor.u32 %v4967_v11, %v12352_v17  ;;  %v4970_v63 = vrot.slane %v12352_v17, 4  ;;  %v12358_v19 = vrot.slane %v4444_v38, 7  ;;  %8160 = vst.msk [vmem:[#allocation5 + $0x3c] sm:$0xf] %vm300_vm0, %v8036_v56  ;;  %v5378_v24 = vshll.u32 %v5195_v62, 16 }
 0x41f   : > { %9609 = vmatmul.msk.bf16.vlgmr.msrb.gmra.mxu2 %vm4129_vm6, %v9516_v14  ;;  %v4872_v57 = vmax.f32 %v4856_v18, 0.0  ;;  %v5374_v50 = vrot.slane %v5372_v30, 5  ;;  %v5382_v61 = vshrl.u32 %v5195_v62, 16  ;;  %v4271_v26 = vmul.f32 %v12294_v23, %v4250_v8  ;;  %5150 = vst.msk [vmem:[#allocation5 + $0x30] sm:$0xf] %vm300_vm0, %v5118_v2 }
 0x420   : > { %v5085_v20 = vsel %vm10303_vm7, %v4969_v16, %v5084_v51  ;;  %v4449_v28 = vor.u32 %v4447_v4, %v12358_v19  ;;  %v4450_v31 = vrot.slane %v12358_v19, 4  ;;  %v5380_v5 = vrot.slane %v5378_v24, 5  ;;  %v9711_v6 = vld [vmem:[#allocation5 + $0x34] sm:$0xf]  ;;  %v5088_v37 = vld [vmem:[#allocation4 + $0xa4] sm:$0x1]  ;;  %v4810_v51 = vpop.f32.mrf.mxu3 }
 0x421   : > { %5086 = vst [vmem:[#allocation4 + $0x9c] sm:$0xf] %v5085_v20  ;;  %v4888_v32 = vpack.c.bf16 %v4872_v57, %v4872_v57  ;;  %v5375_v35 = vor.u32 %v5374_v50, %v5371_v36  ;;  %v4291_v54 = vadd.f32 %v12307_v39, %v4271_v26  ;;  %v5384_v52 = vrot.slane %v5382_v61, 4  ;;  %v7927_v12 = vld [vmem:[#allocation4 + $0x50] sm:$0x1] }
 0x422   : > { %v4535_v43 = vsel %vm10303_vm7, %v4449_v28, %v4534_v46  ;;  %v5388_v23 = vshll.u32 %v5196_v1, 16  ;;  %v4809_v21 = vadd.f32 %v4808_v58, %v4759_v55  ;;  %v9394_v47 = vrot.slane %v7940_v53, 9  ;;  %v7926_v58 = vld [vmem:[#allocation4 + $0x4c] sm:$0xf]  ;;  %v5197_v50 = vld [vmem:[#allocation4 + $0x54] sm:$0xf] }
 0x423   : > { %4536 = vst [vmem:[#allocation4 + $0x60] sm:$0xf] %v4535_v43  ;;  %v4972_v33 = vshrl.u32 %v4888_v32, 16  ;;  %v4975_v13 = vshll.u32 %v4888_v32, 16  ;;  %v5376_v9 = vrot.slane %v5375_v35, 4  ;;  %v4307_v42 = vmax.f32 %v4291_v54, 0.0 }
 0x424   : > { %v5385_v39 = vor.u32 %v5384_v52, %v5380_v5  ;;  %v5390_v59 = vrot.slane %v5388_v23, 5  ;;  %v4837_v49 = vmul.f32 %v12094_v48, %v4809_v21  ;;  %v8074_v40 = vrot.slane %v7941_v7, 5  ;;  %v5615_v11 = vpop.permute.xlu2 %5614  ;;  %v12379_v48 = vld [vmem:[%s13676_s4] ss:$0 sm:$0xff]  ;;  %v5198_v35 = vld [vmem:[#allocation4 + $0x58] sm:$0xf] }
 0x425   : > { %v9429_v25 = vld [vmem:[#allocation5 + $0x38] sm:$0xf0]  ;;  %v4974_v56 = vrot.slane %v4972_v33, 7  ;;  %v5381_v62 = vsel %vm10180_vm3, %v5376_v9, %v5380_v5  ;;  %v4323_v44 = vpack.c.bf16 %v4307_v42, %v4307_v42  ;;  %v8077_v0 = vrot.slane %v7942_v34, 5  ;;  %5707 = vst.msk [vmem:[#allocation5 + $0x18] sm:$0xf] %vm1424_vm14, %v5615_v11  ;;  %v4761_v38 = vpop.f32.mrf.mxu2 }
 0x426   : > { %v9432_v15 = vor.u32 %v9711_v6, %v9429_v25  ;;  %5632 = vrot.lane.b32.xlu2 %v5381_v62, %s10007_s12  ;;  %v5386_v41 = vrot.slane %v5385_v39, 4  ;;  %v4857_v60 = vadd.f32 %v12379_v48, %v4837_v49  ;;  %v8075_v36 = vsel %vm10873_vm13, %v9394_v47, %v8074_v40  ;;  %v4538_v61 = vld [vmem:[#allocation4 + $0x68] sm:$0x1]  ;;  %v5199_v9 = vld [vmem:[#allocation4 + $0x5c] sm:$0x1] }
 0x427   : > { %v4977_v8 = vor.u32 %v4975_v13, %v4974_v56  ;;  %v4979_v14 = vrot.slane %v4974_v56, 4  ;;  %v4452_v4 = vshrl.u32 %v4323_v44, 16  ;;  %v4455_v46 = vshll.u32 %v4323_v44, 16  ;;  %8171 = vst.msk [vmem:[#allocation5 + $0x94] sm:$0xf] %vm300_vm0, %v8075_v36 }
 0x428   : > { %9504 = vmatmul.msk.bf16.gmra.mxu3 %vm4129_vm6, %v9432_v15  ;;  %v5391_v18 = vsel %vm10180_vm3, %v5386_v41, %v5390_v59  ;;  %v4873_v30 = vmax.f32 %v4857_v60, 0.0  ;;  %v8076_v1 = vrot.slane %v8074_v40, 4  ;;  %v9389_v53 = vrot.slane %v7925_v3, 9  ;;  %v12404_v7 = vld [vmem:[%s13675_s3] ss:$0 sm:$0xff]  ;;  %v4813_v59 = vpop.f32.mrf.mxu3 }
 0x429   : > { %v4978_v16 = vsel %vm10310_vm8, %v4970_v63, %v4977_v8  ;;  %v5089_v24 = vsel %vm10409_vm10, %v4979_v14, %v5088_v37  ;;  %v4454_v55 = vrot.slane %v4452_v4, 7  ;;  %5634 = vrot.lane.b32.xlu0 %v5391_v18, %s10007_s12  ;;  %v8039_v57 = vrot.slane %v7926_v58, 5  ;;  %v5091_v47 = vld [vmem:[#allocation4 + $0xa8] sm:$0xf]  ;;  %v7943_v6 = vld [vmem:[#allocation4 + $0x90] sm:$0xe] }
 0x42a   : > { %5087 = vst.msk [vmem:[#allocation4 + $0xa0] sm:$0xf] %vm300_vm0, %v4978_v16  ;;  %v4889_v26 = vpack.c.bf16 %v4873_v30, %v4873_v30  ;;  %v8078_v2 = vsel %vm10873_vm13, %v8076_v1, %v8077_v0  ;;  %v8042_v20 = vrot.slane %v7927_v12, 5  ;;  %v4811_v17 = vadd.f32 %v4810_v51, %v4761_v38  ;;  %v7944_v62 = vld [vmem:[#allocation4 + $0x94] sm:$0xf] }
 0x42b   : > { %5090 = vst [vmem:[#allocation4 + $0xa4] sm:$0x1] %v5089_v24  ;;  %v4457_v28 = vor.u32 %v4455_v46, %v4454_v55  ;;  %v4459_v63 = vrot.slane %v4454_v55, 4  ;;  %v8040_v5 = vsel %vm10873_vm13, %v9389_v53, %v8039_v57  ;;  %v8041_v32 = vrot.slane %v8039_v57, 4  ;;  %v7945_v12 = vld [vmem:[#allocation4 + $0x98] sm:$0x1] }
 0x42c   : > { %v4981_v54 = vshrl.u32 %v4889_v26, 16  ;;  %v4984_v52 = vshll.u32 %v4889_v26, 16  ;;  %8172 = vst.msk [vmem:[#allocation5 + $0x9c] sm:$0xf] %vm300_vm0, %v8078_v2  ;;  %v4838_v43 = vmul.f32 %v12404_v7, %v4811_v17  ;;  %v5393_v23 = vshrl.u32 %v5197_v50, 16 }
 0x42d   : > { %v4458_v21 = vsel %vm10310_vm8, %v4450_v31, %v4457_v28  ;;  %v4539_v34 = vsel %vm10409_vm10, %v4459_v63, %v4538_v61  ;;  %v8043_v33 = vsel %vm10873_vm13, %v8041_v32, %v8042_v20  ;;  %8161 = vst.msk [vmem:[#allocation5 + $0x44] sm:$0xf] %vm300_vm0, %v8040_v5  ;;  %v5396_v13 = vshll.u32 %v5197_v50, 16  ;;  %v4764_v49 = vpop.f32.mrf.mxu2  ;;  %v12426_v8 = vld [vmem:[#allocation4 + $0x6c] sm:$0xf] }
 0x42e   : > { %4537 = vst.msk [vmem:[#allocation4 + $0x64] sm:$0xf] %vm300_vm0, %v4458_v21  ;;  %v12417_v42 = vrot.slane %v4981_v54, 7  ;;  %v4858_v19 = vadd.f32 %v12379_v48, %v4838_v43  ;;  %v5395_v3 = vrot.slane %v5393_v23, 4  ;;  %v5402_v37 = vshll.u32 %v5198_v35, 16 }
 0x42f   : > { %4540 = vst [vmem:[#allocation4 + $0x68] sm:$0x1] %v4539_v34  ;;  %v5398_v31 = vrot.slane %v5396_v13, 5  ;;  %v5406_v39 = vshrl.u32 %v5198_v35, 16  ;;  %v5412_v25 = vshll.u32 %v5199_v9, 16  ;;  %v4814_v56 = vadd.f32 %v4813_v59, %v4764_v49 }
 0x430   : > { %v4986_v40 = vor.u32 %v4984_v52, %v12417_v42  ;;  %8162 = vst.msk [vmem:[#allocation5 + $0x4c] sm:$0xf] %vm300_vm0, %v8043_v33  ;;  %v4874_v11 = vmax.f32 %v4858_v19, 0.0  ;;  %v4987_v44 = vrot.slane %v12417_v42, 4  ;;  %v5404_v51 = vrot.slane %v5402_v37, 5 }
 0x431   : > { %v5399_v0 = vor.u32 %v5398_v31, %v5395_v3  ;;  %v5408_v15 = vrot.slane %v5406_v39, 4  ;;  %v9732_v60 = vld [vmem:[#allocation5 + $0x94] sm:$0xf]  ;;  %v4839_v58 = vmul.f32 %v12404_v7, %v4814_v56  ;;  %v9395_v38 = vrot.slane %v7943_v6, 9  ;;  %v7928_v24 = vld [vmem:[#allocation4 + $0x54] sm:$0xe] }
 0x432   : > { %v5092_v41 = vsel %vm10303_vm7, %v4986_v40, %v5091_v47  ;;  %v4890_v36 = vpack.c.bf16 %v4874_v11, %v4874_v11  ;;  %v8081_v18 = vrot.slane %v7944_v62, 5  ;;  %v5414_v53 = vrot.slane %v5412_v25, 5  ;;  %v7929_v55 = vld [vmem:[#allocation4 + $0x58] sm:$0xf]  ;;  %v5095_v50 = vld [vmem:[#allocation4 + $0xb0] sm:$0x1] }
 0x433   : > { %5093 = vst [vmem:[#allocation4 + $0xa8] sm:$0xf] %v5092_v41  ;;  %v9521_v14 = vld [vmem:[#allocation5 + $0x98] sm:$0xf0]  ;;  %v5400_v4 = vrot.slane %v5399_v0, 4  ;;  %v5409_v46 = vor.u32 %v5408_v15, %v5404_v51  ;;  %v4859_v16 = vadd.f32 %v12379_v48, %v4839_v58  ;;  %v8084_v32 = vrot.slane %v7945_v12, 5  ;;  %v4815_v15 = vpop.f32.mrf.mxu3 }
 0x434   : > { %v9524_v30 = vor.u32 %v9732_v60, %v9521_v14  ;;  %v4989_v1 = vshrl.u32 %v4890_v36, 16  ;;  %v9713_v57 = vld [vmem:[#allocation5 + $0x44] sm:$0xf]  ;;  %v8082_v2 = vsel %vm10873_vm13, %v9395_v38, %v8081_v18  ;;  %v8083_v20 = vrot.slane %v8081_v18, 4  ;;  %v12440_v13 = vld [vmem:[#allocation4 + $0x70] sm:$0xf] }
 0x435   : > { %v5405_v61 = vsel %vm10180_vm3, %v5400_v4, %v5404_v51  ;;  %v5410_v26 = vrot.slane %v5409_v46, 4  ;;  %v7930_v17 = vld [vmem:[#allocation4 + $0x5c] sm:$0x1]  ;;  %v4992_v63 = vshll.u32 %v4890_v36, 16  ;;  %v4875_v5 = vmax.f32 %v4859_v16, 0.0  ;;  %v4766_v31 = vpop.f32.mrf.mxu2 }
 0x436   : > { %9610 = vmatmul.msk.bf16.gmra.mxu2 %vm4129_vm6, %v9524_v30  ;;  %v4991_v28 = vrot.slane %v4989_v1, 7  ;;  %5636 = vrot.lane.b32.xlu1 %v5405_v61, %s10007_s12  ;;  %8173 = vst.msk [vmem:[#allocation5 + $0xa4] sm:$0xf] %vm300_vm0, %v8082_v2  ;;  %v9390_v52 = vrot.slane %v7928_v24, 9  ;;  %v8046_v43 = vrot.slane %v7929_v55, 5  ;;  %v5441_v23 = vshrl.u32 %v12426_v8, 16 }
 0x437   : > { %v9437_v35 = vld [vmem:[#allocation5 + $0x48] sm:$0xf0]  ;;  %v5415_v54 = vsel %vm10180_vm3, %v5410_v26, %v5414_v53  ;;  %v4891_v33 = vpack.c.bf16 %v4875_v5, %v4875_v5  ;;  %v8085_v42 = vsel %vm10873_vm13, %v8083_v20, %v8084_v32  ;;  %v8049_v6 = vrot.slane %v7930_v17, 5  ;;  %v5200_v37 = vld [vmem:[#allocation4 + $0x60] sm:$0xf]  ;;  %v5611_v53 = vpop.permute.xlu0 %5610 }
 0x438   : > { %v9440_v21 = vor.u32 %v9713_v57, %v9437_v35  ;;  %v4994_v34 = vor.u32 %v4992_v63, %v4991_v28  ;;  %v4996_v47 = vrot.slane %v4991_v28, 4  ;;  %5638 = vrot.lane.b32.xlu2 %v5415_v54, %s10007_s12  ;;  %v5613_v9 = vpop.permute.xlu1 %5612  ;;  %v8047_v19 = vsel %vm10873_vm13, %v9390_v52, %v8046_v43  ;;  %8174 = vst.msk [vmem:[#allocation5 + $0xac] sm:$0xf] %vm300_vm0, %v8085_v42  ;;  %v5201_v11 = vld [vmem:[#allocation4 + $0x64] sm:$0xf] }
 0x439   : > { %v8048_v3 = vrot.slane %v8046_v43, 4  ;;  %5706 = vst.msk [vmem:[#allocation5 + $0x10] sm:$0xf] %vm1424_vm14, %v5613_v9  ;;  %v4998_v49 = vshrl.u32 %v4891_v33, 16  ;;  %v5001_v40 = vshll.u32 %v4891_v33, 16  ;;  %v5443_v0 = vrot.slane %v5441_v23, 4 }
 0x43a   : > { %9505 = vmatmul.msk.bf16.gmra.mxu3 %vm4129_vm6, %v9440_v21  ;;  %v4995_v39 = vsel %vm10310_vm8, %v4987_v44, %v4994_v34  ;;  %v5096_v59 = vsel %vm10409_vm10, %v4996_v47, %v5095_v50  ;;  %v5113_v25 = vld [vmem:[#allocation4 + $0x4] sm:$0xf]  ;;  %v5098_v56 = vld [vmem:[#allocation4 + $0xb4] sm:$0xf]  ;;  %v5444_v51 = vshll.u32 %v12426_v8, 16  ;;  %v5450_v44 = vshll.u32 %v12440_v13, 16 }
 0x43b   : > { %5094 = vst.msk [vmem:[#allocation4 + $0xac] sm:$0xf] %vm300_vm0, %v4995_v39  ;;  %v8050_v62 = vsel %vm10873_vm13, %v8048_v3, %v8049_v6  ;;  %v5207_v41 = vld [vmem:[#allocation4 + $0x7c] sm:$0xf]  ;;  %v12458_v60 = vrot.slane %v4998_v49, 7  ;;  %v4816_v36 = vadd.f32 %v4815_v15, %v4766_v31  ;;  %v5417_v58 = vshrl.u32 %v5200_v37, 16 }
 0x43c   : > { %5097 = vst [vmem:[#allocation4 + $0xb0] sm:$0x1] %v5096_v59  ;;  %v5420_v12 = vshll.u32 %v5200_v37, 16  ;;  %v5446_v38 = vrot.slane %v5444_v51, 5  ;;  %v12461_v14 = vrot.slane %v5450_v44, 5  ;;  %v5454_v4 = vshrl.u32 %v12440_v13, 16 }
 0x43d   : > { %8163 = vst.msk [vmem:[#allocation5 + $0x54] sm:$0xf] %vm300_vm0, %v8047_v19  ;;  %v5003_v46 = vor.u32 %v5001_v40, %v12458_v60  ;;  %v5004_v8 = vrot.slane %v12458_v60, 4  ;;  %v4840_v18 = vmul.f32 %v12404_v7, %v4816_v36  ;;  %v5419_v30 = vrot.slane %v5417_v58, 4  ;;  %v5208_v1 = vld [vmem:[#allocation4 + $0x80] sm:$0x1] }
 0x43e   : > { %8164 = vst.msk [vmem:[#allocation5 + $0x5c] sm:$0xf] %vm300_vm0, %v8050_v62  ;;  %v5447_v16 = vor.u32 %v5446_v38, %v5443_v0  ;;  %v5422_v24 = vrot.slane %v5420_v12, 5  ;;  %v5426_v55 = vshll.u32 %v5201_v11, 16  ;;  %v5430_v57 = vshrl.u32 %v5201_v11, 16 }
 0x43f   : > { %v5202_v50 = vld [vmem:[#allocation4 + $0x68] sm:$0x1]  ;;  %v7946_v61 = vld [vmem:[#allocation4 + $0x9c] sm:$0xe]  ;;  %5145 = vst.msk [vmem:[#allocation5 + $0x8] sm:$0xf] %vm300_vm0, %v5113_v25  ;;  %v5099_v26 = vsel %vm10303_vm7, %v5003_v46, %v5098_v56  ;;  %v4860_v20 = vadd.f32 %v12379_v48, %v4840_v18 }
 0x440   : > { %v9734_v2 = vld [vmem:[#allocation5 + $0xa4] sm:$0xf]  ;;  %v5474_v17 = vshll.u32 %v5207_v41, 16  ;;  %v5478_v28 = vshrl.u32 %v5207_v41, 16  ;;  %v7947_v63 = vld [vmem:[#allocation4 + $0xa0] sm:$0xf]  ;;  %v5621_v5 = vpop.permute.xlu2 %5620  ;;  %v5423_v54 = vor.u32 %v5422_v24, %v5419_v30 }
 0x441   : > { %5705 = vst.msk [vmem:[#allocation5 + $0x8] sm:$0xf] %vm1424_vm14, %v5611_v53  ;;  %v9529_v32 = vld [vmem:[#allocation5 + $0xa8] sm:$0xf0]  ;;  %v5448_v35 = vrot.slane %v5447_v16, 4  ;;  %v5428_v52 = vrot.slane %v5426_v55, 5 }
 0x442   : > { %5100 = vst [vmem:[#allocation4 + $0xb4] sm:$0xf] %v5099_v26  ;;  %v9532_v43 = vor.u32 %v9734_v2, %v9529_v32  ;;  %v4876_v23 = vmax.f32 %v4860_v20, 0.0  ;;  %v12473_v21 = vrot.slane %v5474_v17, 5  ;;  %v5480_v34 = vrot.slane %v5478_v28, 4 }
 0x443   : > { %5710 = vst.msk [vmem:[#allocation5 + $0x30] sm:$0xf] %vm1424_vm14, %v5621_v5  ;;  %v5453_v47 = vsel %vm10180_vm3, %v5448_v35, %v12461_v14  ;;  %v5424_v33 = vrot.slane %v5423_v54, 4  ;;  %v5484_v9 = vshll.u32 %v5208_v1, 16  ;;  %v5432_v42 = vrot.slane %v5430_v57, 4 }
 0x444   : > { %v7948_v19 = vld [vmem:[#allocation4 + $0xa4] sm:$0x1]  ;;  %5644 = vrot.lane.b32.xlu2 %v5453_v47, %s10007_s12  ;;  %v4892_v3 = vpack.c.bf16 %v4876_v23, %v4876_v23  ;;  %v5481_v6 = vor.u32 %v5480_v34, %v12473_v21  ;;  %v5436_v31 = vshll.u32 %v5202_v50, 16  ;;  %v9396_v37 = vrot.slane %v7946_v61, 9  ;;  %v5205_v39 = vld [vmem:[#allocation4 + $0x74] sm:$0x1] }
 0x445   : > { %v7931_v59 = vld [vmem:[#allocation4 + $0x60] sm:$0xe]  ;;  %v7932_v49 = vld [vmem:[#allocation4 + $0x64] sm:$0xf]  ;;  %v9715_v40 = vld [vmem:[#allocation5 + $0x54] sm:$0xf]  ;;  %v5429_v25 = vsel %vm10180_vm3, %v5424_v33, %v5428_v52  ;;  %v5433_v62 = vor.u32 %v5432_v42, %v5428_v52 }
 0x446   : > { %v9445_v11 = vld [vmem:[#allocation5 + $0x58] sm:$0xf0]  ;;  %v5486_v56 = vrot.slane %v5484_v9, 5  ;;  %v8088_v0 = vrot.slane %v7947_v63, 5  ;;  %9611 = vmatmul.msk.bf16.gmra.mxu2 %vm4129_vm6, %v9532_v43  ;;  %v5006_v44 = vshrl.u32 %v4892_v3, 16  ;;  %v5009_v15 = vshll.u32 %v4892_v3, 16  ;;  %5640 = vrot.lane.b32.xlu0 %v5429_v25, %s10007_s12 }
 0x447   : > { %v9448_v51 = vor.u32 %v9715_v40, %v9445_v11  ;;  %v5482_v41 = vrot.slane %v5481_v6, 4  ;;  %v7933_v36 = vld [vmem:[#allocation4 + $0x68] sm:$0x1]  ;;  %v5102_v58 = vld [vmem:[#allocation4 + $0xbc] sm:$0x1]  ;;  %v5434_v12 = vrot.slane %v5433_v62, 4 }
 0x448   : > { %v5438_v38 = vrot.slane %v5436_v31, 5  ;;  %v8089_v46 = vsel %vm10873_vm13, %v9396_v37, %v8088_v0  ;;  %v8090_v18 = vrot.slane %v8088_v0, 4  ;;  %v5212_v30 = vld [vmem:[#allocation4 + $0x90] sm:$0xf]  ;;  %v5008_v1 = vrot.slane %v5006_v44, 7  ;;  %v5617_v55 = vpop.permute.xlu0 %5616 }
 0x449   : > { %v5487_v53 = vsel %vm10180_vm3, %v5482_v41, %v5486_v56  ;;  %v8091_v16 = vrot.slane %v7948_v19, 5  ;;  %8175 = vst.msk [vmem:[#allocation5 + $0xb4] sm:$0xf] %vm300_vm0, %v8089_v46  ;;  %v5456_v24 = vrot.slane %v5454_v4, 4  ;;  %v5460_v50 = vshll.u32 %v5205_v39, 16 }
 0x44a   : > { %v5439_v57 = vsel %vm10180_vm3, %v5434_v12, %v5438_v38  ;;  %v9391_v61 = vrot.slane %v7931_v59, 9  ;;  %v8053_v26 = vrot.slane %v7932_v49, 5  ;;  %5708 = vst.msk [vmem:[#allocation5 + $0x20] sm:$0xf] %vm1424_vm14, %v5617_v55  ;;  %9506 = vmatmul.msk.bf16.gmra.mxu3 %vm4129_vm6, %v9448_v51  ;;  %v5011_v2 = vor.u32 %v5009_v15, %v5008_v1  ;;  %v12500_v4 = vld [vmem:[#allocation4 + $0x94] sm:$0xf] }
 0x44b   : > { %v5013_v20 = vrot.slane %v5008_v1, 4  ;;  %5642 = vrot.lane.b32.xlu1 %v5439_v57, %s10007_s12  ;;  %v8092_v17 = vsel %vm10873_vm13, %v8090_v18, %v8091_v16  ;;  %v5457_v13 = vor.u32 %v5456_v24, %v12461_v14  ;;  %v5206_v28 = vld [vmem:[#allocation4 + $0x78] sm:$0xf]  ;;  %v5462_v63 = vrot.slane %v5460_v50, 5  ;;  %v5209_v54 = vld [vmem:[#allocation4 + $0x84] sm:$0xf] }
 0x44c   : > { %8176 = vst.msk [vmem:[#allocation5 + $0xbc] sm:$0xf] %vm300_vm0, %v8092_v17  ;;  %v8054_v5 = vsel %vm10873_vm13, %v9391_v61, %v8053_v26  ;;  %v8055_v32 = vrot.slane %v8053_v26, 4  ;;  %v8056_v35 = vrot.slane %v7933_v36, 5  ;;  %v5012_v52 = vsel %vm10310_vm8, %v5004_v8, %v5011_v2  ;;  %5650 = vrot.lane.b32.xlu2 %v5487_v53, %s10007_s12  ;;  %v5210_v34 = vld [vmem:[#allocation4 + $0x88] sm:$0xf]  ;;  %v5619_v8 = vpop.permute.xlu1 %5618 }
 0x44d   : > { %v5103_v14 = vsel %vm10409_vm10, %v5013_v20, %v5102_v58  ;;  %v5458_v43 = vrot.slane %v5457_v13, 4  ;;  %8165 = vst.msk [vmem:[#allocation5 + $0x64] sm:$0xf] %vm300_vm0, %v8054_v5  ;;  %v5513_v23 = vshrl.u32 %v5212_v30, 16  ;;  %v5516_v33 = vshll.u32 %v5212_v30, 16 }
 0x44e   : > { %5101 = vst.msk [vmem:[#allocation4 + $0xb8] sm:$0xf] %vm300_vm0, %v5012_v52  ;;  %v8057_v47 = vsel %vm10873_vm13, %v8055_v32, %v8056_v35  ;;  %v5522_v60 = vshll.u32 %v12500_v4, 16  ;;  %v5216_v9 = vld [vmem:[#allocation4 + $0xa0] sm:$0xf]  ;;  %v5465_v3 = vshrl.u32 %v5206_v28, 16 }
 0x44f   : > { %5104 = vst [vmem:[#allocation4 + $0xbc] sm:$0x1] %v5103_v14  ;;  %v5463_v42 = vsel %vm10180_vm3, %v5458_v43, %v5462_v63  ;;  %v5515_v19 = vrot.slane %v5513_v23, 4  ;;  %v5468_v6 = vshll.u32 %v5206_v28, 16  ;;  %v5518_v31 = vrot.slane %v5516_v33, 5 }
 0x450   : > { %5646 = vrot.lane.b32.xlu0 %v5463_v42, %s10007_s12  ;;  %8166 = vst.msk [vmem:[#allocation5 + $0x6c] sm:$0xf] %vm300_vm0, %v8057_v47  ;;  %v12521_v37 = vrot.slane %v5522_v60, 5  ;;  %v5526_v39 = vshrl.u32 %v12500_v4, 16  ;;  %v5217_v59 = vld [vmem:[#allocation4 + $0xa4] sm:$0x1] }
 0x451   : > { %v5467_v49 = vrot.slane %v5465_v3, 4  ;;  %v5470_v40 = vrot.slane %v5468_v6, 5  ;;  %v5489_v11 = vshrl.u32 %v5209_v54, 16  ;;  %v5492_v25 = vshll.u32 %v5209_v54, 16  ;;  %v5211_v56 = vld [vmem:[#allocation4 + $0x8c] sm:$0x1] }
 0x452   : > { %5709 = vst.msk [vmem:[#allocation5 + $0x28] sm:$0xf] %vm1424_vm14, %v5619_v8  ;;  %v7949_v62 = vld [vmem:[#allocation4 + $0xa8] sm:$0xe]  ;;  %v9736_v0 = vld [vmem:[#allocation5 + $0xb4] sm:$0xf]  ;;  %v5519_v51 = vor.u32 %v5518_v31, %v5515_v19 }
 0x453   : > { %v5498_v44 = vshll.u32 %v5210_v34, 16  ;;  %v5502_v15 = vshrl.u32 %v5210_v34, 16  ;;  %v5546_v41 = vshll.u32 %v5216_v9, 16  ;;  %v9537_v36 = vld [vmem:[#allocation5 + $0xb8] sm:$0xf0]  ;;  %v5471_v58 = vor.u32 %v5470_v40, %v5467_v49 }
 0x454   : > { %v5491_v12 = vrot.slane %v5489_v11, 4  ;;  %v5494_v38 = vrot.slane %v5492_v25, 5  ;;  %v5550_v46 = vshrl.u32 %v5216_v9, 16  ;;  %v9540_v18 = vor.u32 %v9736_v0, %v9537_v36  ;;  %v7950_v16 = vld [vmem:[#allocation4 + $0xac] sm:$0xf] }
 0x455   : > { %v5520_v30 = vrot.slane %v5519_v51, 4  ;;  %v5500_v1 = vrot.slane %v5498_v44, 5  ;;  %v12525_v53 = vrot.slane %v5546_v41, 5  ;;  %v9717_v24 = vld [vmem:[#allocation5 + $0x64] sm:$0xf]  ;;  %v5472_v55 = vrot.slane %v5471_v58, 4 }
 0x456   : > { %v5495_v57 = vor.u32 %v5494_v38, %v5491_v12  ;;  %v5552_v50 = vrot.slane %v5550_v46, 4  ;;  %v5556_v61 = vshll.u32 %v5217_v59, 16  ;;  %v5504_v2 = vrot.slane %v5502_v15, 4  ;;  %v7951_v17 = vld [vmem:[#allocation4 + $0xb0] sm:$0x1]  ;;  %9612 = vmatmul.msk.bf16.gmra.mxu2 %vm4129_vm6, %v9540_v18 }
 0x457   : > { %v5525_v26 = vsel %vm10180_vm3, %v5520_v30, %v12521_v37  ;;  %v5508_v20 = vshll.u32 %v5211_v56, 16  ;;  %v9397_v13 = vrot.slane %v7949_v62, 9  ;;  %v7934_v4 = vld [vmem:[#allocation4 + $0x6c] sm:$0xe]  ;;  %v7935_v28 = vld [vmem:[#allocation4 + $0x70] sm:$0xf]  ;;  %v5477_v5 = vsel %vm10180_vm3, %v5472_v55, %v12473_v21 }
 0x458   : > { %v9453_v63 = vld [vmem:[#allocation5 + $0x68] sm:$0xf0]  ;;  %5656 = vrot.lane.b32.xlu2 %v5525_v26, %s10007_s12  ;;  %v5496_v32 = vrot.slane %v5495_v57, 4  ;;  %v5553_v35 = vor.u32 %v5552_v50, %v12525_v53  ;;  %v5558_v54 = vrot.slane %v5556_v61, 5  ;;  %v5214_v52 = vld [vmem:[#allocation4 + $0x98] sm:$0x1]  ;;  %5648 = vrot.lane.b32.xlu1 %v5477_v5, %s10007_s12  ;;  %v5505_v23 = vor.u32 %v5504_v2, %v5500_v1 }
 0x459   : > { %v7936_v14 = vld [vmem:[#allocation4 + $0x74] sm:$0x1]  ;;  %v9456_v43 = vor.u32 %v9717_v24, %v9453_v63  ;;  %v5510_v34 = vrot.slane %v5508_v20, 5  ;;  %v8095_v47 = vrot.slane %v7950_v16, 5  ;;  %v5215_v33 = vld [vmem:[#allocation4 + $0x9c] sm:$0xf] }
 0x45a   : > { %v5121_v60 = vld [vmem:[#allocation4 + $0x34] sm:$0xf]  ;;  %v5501_v9 = vsel %vm10180_vm3, %v5496_v32, %v5500_v1  ;;  %v5554_v8 = vrot.slane %v5553_v35, 4  ;;  %v8098_v42 = vrot.slane %v7951_v17, 5  ;;  %v5528_v21 = vrot.slane %v5526_v39, 4 }
 0x45b   : > { %5153 = vst.msk [vmem:[#allocation5 + $0x48] sm:$0xf] %vm300_vm0, %v5121_v60  ;;  %5652 = vrot.lane.b32.xlu0 %v5501_v9, %s10007_s12  ;;  %v5506_v19 = vrot.slane %v5505_v23, 4  ;;  %v8096_v3 = vsel %vm10873_vm13, %v9397_v13, %v8095_v47  ;;  %v8097_v6 = vrot.slane %v8095_v47, 4  ;;  %v5532_v31 = vshll.u32 %v5214_v52, 16  ;;  %9507 = vmatmul.msk.bf16.gmra.mxu3 %vm4129_vm6, %v9456_v43 }
 0x45c   : > { %v5221_v59 = vld [vmem:[#allocation4 + $0xb4] sm:$0xf]  ;;  %8177 = vst.msk [vmem:[#allocation5 + $0xc4] sm:$0xf] %vm300_vm0, %v8096_v3  ;;  %v5529_v49 = vor.u32 %v5528_v21, %v12521_v37  ;;  %v9392_v40 = vrot.slane %v7934_v4, 9  ;;  %v8060_v11 = vrot.slane %v7935_v28, 5  ;;  %v5559_v25 = vsel %vm10180_vm3, %v5554_v8, %v5558_v54 }
 0x45d   : > { %v5222_v39 = vld [vmem:[#allocation4 + $0xb8] sm:$0xf]  ;;  %v8099_v56 = vsel %vm10873_vm13, %v8097_v6, %v8098_v42  ;;  %v5534_v62 = vrot.slane %v5532_v31, 5  ;;  %v8063_v0 = vrot.slane %v7936_v14, 5  ;;  %v5218_v51 = vld [vmem:[#allocation4 + $0xa8] sm:$0xf]  ;;  %v5627_v12 = vpop.permute.xlu2 %5626  ;;  %v5511_v30 = vsel %vm10180_vm3, %v5506_v19, %v5510_v34 }
 0x45e   : > { %v5219_v44 = vld [vmem:[#allocation4 + $0xac] sm:$0xf]  ;;  %8178 = vst.msk [vmem:[#allocation5 + $0xcc] sm:$0xf] %vm300_vm0, %v8099_v56  ;;  %v5530_v15 = vrot.slane %v5529_v49, 4  ;;  %v8061_v41 = vsel %vm10873_vm13, %v9392_v40, %v8060_v11  ;;  %v8062_v37 = vrot.slane %v8060_v11, 4 }
 0x45f   : > { %v5537_v36 = vshrl.u32 %v5215_v33, 16  ;;  %8167 = vst.msk [vmem:[#allocation5 + $0x74] sm:$0xf] %vm300_vm0, %v8061_v41  ;;  %v5540_v58 = vshll.u32 %v5215_v33, 16  ;;  %v5585_v38 = vshrl.u32 %v5221_v59, 16  ;;  %v5588_v46 = vshll.u32 %v5221_v59, 16  ;;  %v5623_v28 = vpop.permute.xlu0 %5622 }
 0x460   : > { %v5594_v18 = vshll.u32 %v5222_v39, 16  ;;  %5662 = vrot.lane.b32.xlu2 %v5559_v25, %s10007_s12  ;;  %v5535_v1 = vsel %vm10180_vm3, %v5530_v15, %v5534_v62  ;;  %v8064_v16 = vsel %vm10873_vm13, %v8062_v37, %v8063_v0  ;;  %5713 = vst.msk [vmem:[#allocation5 + $0x48] sm:$0xf] %vm1424_vm14, %v5627_v12  ;;  %v5119_v55 = vld [vmem:[#allocation4 + $0x28] sm:$0xf]  ;;  %5654 = vrot.lane.b32.xlu1 %v5511_v30, %s10007_s12  ;;  %v5598_v26 = vshrl.u32 %v5222_v39, 16 }
 0x461   : > { %v5539_v24 = vrot.slane %v5537_v36, 4  ;;  %8168 = vst.msk [vmem:[#allocation5 + $0x7c] sm:$0xf] %vm300_vm0, %v8064_v16  ;;  %v5542_v57 = vrot.slane %v5540_v58, 5  ;;  %v5587_v50 = vrot.slane %v5585_v38, 4  ;;  %v5590_v61 = vrot.slane %v5588_v46, 5 }
 0x462   : > { %v5220_v2 = vld [vmem:[#allocation4 + $0xb0] sm:$0x1]  ;;  %v5561_v20 = vshrl.u32 %v5218_v51, 16  ;;  %v5564_v17 = vshll.u32 %v5218_v51, 16  ;;  %v5570_v13 = vshll.u32 %v5219_v44, 16  ;;  %v5574_v4 = vshrl.u32 %v5219_v44, 16 }
 0x463   : > { %5151 = vst.msk [vmem:[#allocation5 + $0x38] sm:$0xf] %vm300_vm0, %v5119_v55  ;;  %v9738_v63 = vld [vmem:[#allocation5 + $0xc4] sm:$0xf]  ;;  %5658 = vrot.lane.b32.xlu0 %v5535_v1, %s10007_s12  ;;  %v5543_v5 = vor.u32 %v5542_v57, %v5539_v24  ;;  %v5591_v32 = vor.u32 %v5590_v61, %v5587_v50  ;;  %v5596_v35 = vrot.slane %v5594_v18, 5  ;;  %v5600_v9 = vrot.slane %v5598_v26, 4 }
 0x464   : > { %5711 = vst.msk [vmem:[#allocation5 + $0x38] sm:$0xf] %vm1424_vm14, %v5623_v28  ;;  %v5563_v54 = vrot.slane %v5561_v20, 4  ;;  %v5566_v52 = vrot.slane %v5564_v17, 5  ;;  %v5572_v14 = vrot.slane %v5570_v13, 5  ;;  %v5576_v43 = vrot.slane %v5574_v4, 4 }
 0x465   : > { %v12567_v23 = vld [vmem:[#allocation4 + $0x4] sm:$0xf]  ;;  %v5544_v47 = vrot.slane %v5543_v5, 4  ;;  %v5592_v33 = vrot.slane %v5591_v32, 4  ;;  %v5580_v21 = vshll.u32 %v5220_v2, 16  ;;  %v5601_v41 = vor.u32 %v5600_v9, %v5596_v35 }
 0x466   : > { %v9545_v34 = vld [vmem:[#allocation5 + $0xc8] sm:$0xf0]  ;;  %v5834_v60 = vrot.slane %v12567_v23, 5  ;;  %v5567_v42 = vor.u32 %v5566_v52, %v5563_v54  ;;  %v5738_v19 = vld [vmem:[#allocation4 + $0x8] sm:$0x1]  ;;  %v5577_v59 = vor.u32 %v5576_v43, %v5572_v14 }
 0x467   : > { %v9548_v8 = vor.u32 %v9738_v63, %v9545_v34  ;;  %v7952_v3 = vld [vmem:[#allocation4 + $0xb4] sm:$0xe]  ;;  %v9719_v6 = vld [vmem:[#allocation5 + $0x74] sm:$0xf]  ;;  %v5597_v31 = vsel %vm10180_vm3, %v5592_v33, %v5596_v35  ;;  %v7953_v49 = vld [vmem:[#allocation4 + $0xb8] sm:$0xf]  ;;  %v5549_v39 = vsel %vm10180_vm3, %v5544_v47, %v12525_v53 }
 0x468   : > { %v7954_v40 = vld [vmem:[#allocation4 + $0xbc] sm:$0x1]  ;;  %v9461_v11 = vld [vmem:[#allocation5 + $0x78] sm:$0xf0]  ;;  %5668 = vrot.lane.b32.xlu2 %v5597_v31, %s10007_s12  ;;  %v5568_v25 = vrot.slane %v5567_v42, 4  ;;  %v9398_v56 = vrot.slane %v7952_v3, 9  ;;  %5660 = vrot.lane.b32.xlu1 %v5549_v39, %s10007_s12 }
 0x469   : > { %9613 = vmatmul.msk.bf16.gmra.mxu2 %vm4129_vm6, %v9548_v8  ;;  %v8102_v62 = vrot.slane %v7953_v49, 5  ;;  %v9464_v0 = vor.u32 %v9719_v6, %v9461_v11  ;;  %v5836_v51 = vrot.slane %v5834_v60, 4  ;;  %v5837_v44 = vrot.slane %v5738_v19, 5  ;;  %v5223_v15 = vld [vmem:[#allocation4 + $0xbc] sm:$0x1] }
 0x46a   : > { %v5573_v37 = vsel %vm10180_vm3, %v5568_v25, %v5572_v14  ;;  %v8105_v58 = vrot.slane %v7954_v40, 5  ;;  %v5578_v12 = vrot.slane %v5577_v59, 4  ;;  %v5604_v46 = vshll.u32 %v5223_v15, 16  ;;  %v5120_v18 = vld [vmem:[#allocation4 + $0x30] sm:$0xf] }
 0x46b   : > { %v8103_v53 = vsel %vm10873_vm13, %v9398_v56, %v8102_v62  ;;  %v8104_v36 = vrot.slane %v8102_v62, 4  ;;  %5664 = vrot.lane.b32.xlu0 %v5573_v37, %s10007_s12  ;;  %9508 = vmatmul.msk.bf16.gmra.mxu3 %vm4129_vm6, %v9464_v0  ;;  %v5838_v30 = vsel %vm10873_vm13, %v5836_v51, %v5837_v44  ;;  %v5582_v1 = vrot.slane %v5580_v21, 5  ;;  %5152 = vst.msk [vmem:[#allocation5 + $0x40] sm:$0xf] %vm300_vm0, %v5120_v18  ;;  %v5736_v24 = vld [vmem:[#allocation4] sm:$0xe]  ;;  %v4818_v56 = vpop.f32.mrf.mxu3 }
 0x46c   : > { %8179 = vst.msk [vmem:[#allocation5 + $0xd4] sm:$0xf] %vm300_vm0, %v8103_v53  ;;  %v5602_v16 = vrot.slane %v5601_v41, 4  ;;  %v5743_v55 = vld [vmem:[#allocation4 + $0x1c] sm:$0xf]  ;;  %v5606_v61 = vrot.slane %v5604_v46, 5 }
 0x46d   : > { %v8106_v38 = vsel %vm10873_vm13, %v8104_v36, %v8105_v58  ;;  %v5625_v57 = vpop.permute.xlu1 %5624  ;;  %v5583_v50 = vsel %vm10180_vm3, %v5578_v12, %v5582_v1  ;;  %v5124_v26 = vld [vmem:[#allocation4 + $0x48] sm:$0xf]  ;;  %v9353_v20 = vrot.slane %v5736_v24, 9  ;;  %v5742_v17 = vld [vmem:[#allocation4 + $0x18] sm:$0xe]  ;;  %v5848_v13 = vrot.slane %v5743_v55, 5 }
 0x46e   : > { %8180 = vst.msk [vmem:[#allocation5 + $0xdc] sm:$0xf] %vm300_vm0, %v8106_v38  ;;  %v5607_v2 = vsel %vm10180_vm3, %v5602_v16, %v5606_v61  ;;  %v5740_v4 = vld [vmem:[#allocation4 + $0x10] sm:$0xf]  ;;  %v12602_v5 = vld [vmem:[#allocation4 + $0x28] sm:$0xf] }
 0x46f   : > { %5712 = vst.msk [vmem:[#allocation5 + $0x40] sm:$0xf] %vm1424_vm14, %v5625_v57  ;;  %v9355_v35 = vrot.slane %v5742_v17, 9  ;;  %v5739_v54 = vld [vmem:[#allocation4 + $0xc] sm:$0xe]  ;;  %v5835_v14 = vsel %vm10873_vm13, %v9353_v20, %v5834_v60  ;;  %v5841_v43 = vrot.slane %v5740_v4, 5 }
 0x470   : > { %5946 = vrot.lane.b32.xlu2 %v5838_v30, %s10008_s21  ;;  %5666 = vrot.lane.b32.xlu1 %v5583_v50, %s10007_s12  ;;  %5156 = vst.msk [vmem:[#allocation5 + $0x60] sm:$0xf] %vm300_vm0, %v5124_v26  ;;  %v5122_v52 = vld [vmem:[#allocation4 + $0x3c] sm:$0xf]  ;;  %v5123_v34 = vld [vmem:[#allocation4 + $0x40] sm:$0xf] }
 0x471   : > { %5154 = vst.msk [vmem:[#allocation5 + $0x50] sm:$0xf] %vm300_vm0, %v5122_v52  ;;  %v5849_v47 = vsel %vm10873_vm13, %v9355_v35, %v5848_v13  ;;  %v5855_v33 = vrot.slane %v12602_v5, 5  ;;  %v9354_v9 = vrot.slane %v5739_v54, 9  ;;  %v5747_v60 = vld [vmem:[#allocation4 + $0x2c] sm:$0x1] }
 0x472   : > { %5155 = vst.msk [vmem:[#allocation5 + $0x58] sm:$0xf] %vm300_vm0, %v5123_v34  ;;  %v5127_v8 = vld [vmem:[#allocation4 + $0x58] sm:$0xf]  ;;  %v5741_v42 = vld [vmem:[#allocation4 + $0x14] sm:$0x1] }
 0x473   : > { %5670 = vrot.lane.b32.xlu0 %v5607_v2, %s10007_s12  ;;  %v9740_v28 = vld [vmem:[#allocation5 + $0xd4] sm:$0xf]  ;;  %v5842_v23 = vsel %vm10873_vm13, %v9354_v9, %v5841_v43  ;;  %v5857_v21 = vrot.slane %v5855_v33, 4  ;;  %5159 = vst.msk [vmem:[#allocation5 + $0x78] sm:$0xf] %vm300_vm0, %v5127_v8  ;;  %v5843_v19 = vrot.slane %v5841_v43, 4  ;;  %v4820_v4 = vpop.f32.mrf.mxu3 }
 0x474   : > { %v5858_v3 = vrot.slane %v5747_v60, 5  ;;  %v5744_v6 = vld [vmem:[#allocation4 + $0x20] sm:$0x1]  ;;  %v5130_v31 = vld [vmem:[#allocation4 + $0x6c] sm:$0xf]  ;;  %v5844_v59 = vrot.slane %v5741_v42, 5 }
 0x475   : > { %v9553_v63 = vld [vmem:[#allocation5 + $0xd8] sm:$0xf0]  ;;  %v5850_v49 = vrot.slane %v5848_v13, 4  ;;  %5162 = vst.msk [vmem:[#allocation5 + $0x90] sm:$0xf] %vm300_vm0, %v5130_v31  ;;  %v5851_v25 = vrot.slane %v5744_v6, 5 }
 0x476   : > { %v9556_v32 = vor.u32 %v9740_v28, %v9553_v63  ;;  %v5859_v40 = vsel %vm10873_vm13, %v5857_v21, %v5858_v3  ;;  %v5752_v11 = vld [vmem:[#allocation4 + $0x40] sm:$0xf]  ;;  %v5845_v39 = vsel %vm10873_vm13, %v5843_v19, %v5844_v59  ;;  %v5745_v62 = vld [vmem:[#allocation4 + $0x24] sm:$0xe]  ;;  %v5125_v0 = vld [vmem:[#allocation4 + $0x4c] sm:$0xf] }
 0x477   : > { %v5852_v51 = vsel %vm10873_vm13, %v5850_v49, %v5851_v25  ;;  %v5751_v15 = vld [vmem:[#allocation4 + $0x3c] sm:$0xe]  ;;  %v5869_v41 = vrot.slane %v5752_v11, 5  ;;  %5157 = vst.msk [vmem:[#allocation5 + $0x68] sm:$0xf] %vm300_vm0, %v5125_v0  ;;  %v9356_v30 = vrot.slane %v5745_v62, 9 }
 0x478   : > { %5952 = vrot.lane.b32.xlu2 %v5849_v47, %s10008_s21  ;;  %5944 = vrot.lane.b32.xlu1 %v5835_v14, %s10008_s21  ;;  %v5749_v53 = vld [vmem:[#allocation4 + $0x34] sm:$0xf]  ;;  %v5131_v58 = vld [vmem:[#allocation4 + $0x70] sm:$0xf]  ;;  %v12633_v12 = vld [vmem:[#allocation4 + $0x4c] sm:$0xf] }
 0x479   : > { %9614 = vmatmul.msk.bf16.gmra.mxu2 %vm4129_vm6, %v9556_v32  ;;  %v9358_v46 = vrot.slane %v5751_v15, 9  ;;  %v5748_v18 = vld [vmem:[#allocation4 + $0x30] sm:$0xe]  ;;  %5163 = vst.msk [vmem:[#allocation5 + $0x98] sm:$0xf] %vm300_vm0, %v5131_v58  ;;  %v5862_v1 = vrot.slane %v5749_v53, 5  ;;  %v5856_v57 = vsel %vm10873_vm13, %v9356_v30, %v5855_v33 }
 0x47a   : > { %v5876_v55 = vrot.slane %v12633_v12, 5  ;;  %v9357_v50 = vrot.slane %v5748_v18, 9  ;;  %v5750_v20 = vld [vmem:[#allocation4 + $0x38] sm:$0x1]  ;;  %v5756_v17 = vld [vmem:[#allocation4 + $0x50] sm:$0x1] }
 0x47b   : > { %5948 = vrot.lane.b32.xlu0 %v5842_v23, %s10008_s21  ;;  %v5870_v24 = vsel %vm10873_vm13, %v9358_v46, %v5869_v41  ;;  %v5864_v5 = vrot.slane %v5862_v1, 4  ;;  %v5865_v35 = vrot.slane %v5750_v20, 5  ;;  %v5879_v54 = vrot.slane %v5756_v17, 5  ;;  %v5753_v52 = vld [vmem:[#allocation4 + $0x44] sm:$0x1] }
 0x47c   : > { %v5863_v2 = vsel %vm10873_vm13, %v9357_v50, %v5862_v1  ;;  %v5878_v28 = vrot.slane %v5876_v55, 4  ;;  %v5133_v14 = vld [vmem:[#allocation4 + $0x7c] sm:$0xf]  ;;  %v5871_v43 = vrot.slane %v5869_v41, 4  ;;  %v5105_v23 = vld [vmem:[#allocation4 + $0xc0] sm:$0xf] }
 0x47d   : > { %5165 = vst.msk [vmem:[#allocation5 + $0xa8] sm:$0xf] %vm300_vm0, %v5133_v14  ;;  %v5866_v60 = vsel %vm10873_vm13, %v5864_v5, %v5865_v35  ;;  %v5872_v8 = vrot.slane %v5753_v52, 5  ;;  %v5761_v21 = vld [vmem:[#allocation4 + $0x64] sm:$0xf] }
 0x47e   : > { %v5880_v9 = vsel %vm10873_vm13, %v5878_v28, %v5879_v54  ;;  %v9905_v19 = vld [vmem:[%s13676_s4] ss:$0 sm:$0xff]  ;;  %v5760_v6 = vld [vmem:[#allocation4 + $0x60] sm:$0xe]  ;;  %v5132_v31 = vld [vmem:[#allocation4 + $0x78] sm:$0xf] }
 0x47f   : > { %v5873_v59 = vsel %vm10873_vm13, %v5871_v43, %v5872_v8  ;;  %5164 = vst.msk [vmem:[#allocation5 + $0xa0] sm:$0xf] %vm300_vm0, %v5132_v31  ;;  %v5754_v11 = vld [vmem:[#allocation4 + $0x48] sm:$0xe]  ;;  %v5758_v25 = vld [vmem:[#allocation4 + $0x58] sm:$0xf] }
 0x480   : > { %5958 = vrot.lane.b32.xlu2 %v5859_v40, %s10008_s21  ;;  %5950 = vrot.lane.b32.xlu1 %v5845_v39, %s10008_s21  ;;  %v5633_v44 = vpop.permute.xlu2 %5632  ;;  %v5629_v37 = vpop.permute.xlu0 %5628  ;;  %v5890_v39 = vrot.slane %v5761_v21, 5  ;;  %v9361_v0 = vrot.slane %v5760_v6, 9  ;;  %v5757_v15 = vld [vmem:[#allocation4 + $0x54] sm:$0xe]  ;;  %v5136_v41 = vld [vmem:[#allocation4 + $0x90] sm:$0xf] }
 0x481   : > { %5716 = vst.msk [vmem:[#allocation5 + $0x60] sm:$0xf] %vm1424_vm14, %v5633_v44  ;;  %v4769_v36 = vpop.f32.mrf.mxu2  ;;  %v12669_v44 = vld [vmem:[#allocation4 + $0x70] sm:$0xf]  ;;  %v5883_v53 = vrot.slane %v5758_v25, 5  ;;  %v9360_v30 = vrot.slane %v5757_v15, 9 }
 0x482   : > { %5714 = vst.msk [vmem:[#allocation5 + $0x50] sm:$0xf] %vm1424_vm14, %v5629_v37  ;;  %v4819_v38 = vadd.f32 %v4818_v56, %v4769_v36  ;;  %v9359_v37 = vrot.slane %v5754_v11, 9  ;;  %v5897_v27 = vrot.slane %v12669_v44, 5  ;;  %v5770_v35 = vld [vmem:[#allocation4 + $0x88] sm:$0xf] }
 0x483   : > { %5954 = vrot.lane.b32.xlu0 %v5852_v51, %s10008_s21  ;;  %5168 = vst.msk [vmem:[#allocation5 + $0xc0] sm:$0xf] %vm300_vm0, %v5136_v41  ;;  %v5885_v20 = vrot.slane %v5883_v53, 4  ;;  %v5763_v52 = vld [vmem:[#allocation4 + $0x6c] sm:$0xe] }
 0x484   : > { %v4841_v16 = vmul.f32 %v12404_v7, %v4819_v38  ;;  %v5891_v38 = vsel %vm10873_vm13, %v9361_v0, %v5890_v39  ;;  %v5877_v18 = vsel %vm10873_vm13, %v9359_v37, %v5876_v55  ;;  %v5899_v12 = vrot.slane %v5897_v27, 4  ;;  %v5769_v14 = vld [vmem:[#allocation4 + $0x84] sm:$0xe]  ;;  %v5128_v43 = vld [vmem:[#allocation4 + $0x60] sm:$0xf] }
 0x485   : > { %5160 = vst.msk [vmem:[#allocation5 + $0x80] sm:$0xf] %vm300_vm0, %v5128_v43  ;;  %v5142_v31 = vld [vmem:[#allocation4 + $0xb4] sm:$0xf]  ;;  %v5768_v11 = vld [vmem:[#allocation4 + $0x80] sm:$0x1] }
 0x486   : > { %v5631_v61 = vpop.permute.xlu1 %5630  ;;  %v4861_v26 = vadd.f32 %v12379_v48, %v4841_v16  ;;  %v5109_v16 = vld [vmem:[#allocation4 + $0xc8] sm:$0x1]  ;;  %5174 = vst.msk [vmem:[#allocation5 + $0xf0] sm:$0xf] %vm300_vm0, %v5142_v31  ;;  %v5907_v0 = vrot.slane %v5768_v11, 5 }
 0x487   : > { %5715 = vst.msk [vmem:[#allocation5 + $0x58] sm:$0xf] %vm1424_vm14, %v5631_v61  ;;  %v5765_v61 = vld [vmem:[#allocation4 + $0x74] sm:$0x1]  ;;  %v5134_v15 = vld [vmem:[#allocation4 + $0x84] sm:$0xf] }
 0x488   : > { %5964 = vrot.lane.b32.xlu2 %v5870_v24, %s10008_s21  ;;  %5956 = vrot.lane.b32.xlu1 %v5856_v57, %s10008_s21  ;;  %v4877_v13 = vmax.f32 %v4861_v26, 0.0  ;;  %v5884_v24 = vsel %vm10873_vm13, %v9360_v30, %v5883_v53  ;;  %v5759_v26 = vld [vmem:[#allocation4 + $0x5c] sm:$0x1]  ;;  %v5779_v53 = vld [vmem:[#allocation4 + $0xac] sm:$0xf] }
 0x489   : > { %v4771_v63 = vpop.f32.mrf.mxu2  ;;  %v5886_v28 = vrot.slane %v5759_v26, 5  ;;  %5166 = vst.msk [vmem:[#allocation5 + $0xb0] sm:$0xf] %vm300_vm0, %v5134_v15  ;;  %v5782_v30 = vld [vmem:[#allocation4 + $0xb8] sm:$0xf] }
 0x48a   : > { %v4893_v32 = vpack.c.bf16 %v4877_v13, %v4877_v13  ;;  %v4821_v48 = vadd.f32 %v4820_v4, %v4771_v63  ;;  %v5900_v13 = vrot.slane %v5765_v61, 5  ;;  %v5762_v4 = vld [vmem:[#allocation4 + $0x68] sm:$0x1]  ;;  %v5892_v63 = vrot.slane %v5890_v39, 4  ;;  %v6075_v11 = vld [vmem:[#allocation4 + $0x1c] sm:$0xf] }
 0x48b   : > { %5960 = vrot.lane.b32.xlu0 %v5863_v2, %s10008_s21  ;;  %v5887_v29 = vsel %vm10873_vm13, %v5885_v20, %v5886_v28  ;;  %v5939_v26 = vrot.slane %v5782_v30, 5  ;;  %v5777_v28 = vld [vmem:[#allocation4 + $0xa4] sm:$0x1]  ;;  %v6084_v30 = vld [vmem:[#allocation4 + $0x54] sm:$0xf] }
 0x48c   : > { %v5015_v34 = vshrl.u32 %v4893_v32, 16  ;;  %v5018_v47 = vshll.u32 %v4893_v32, 16  ;;  %v4842_v33 = vmul.f32 %v12404_v7, %v4821_v48  ;;  %v5126_v7 = vld [vmem:[#allocation4 + $0x54] sm:$0xf]  ;;  %v5901_v5 = vsel %vm10873_vm13, %v5899_v12, %v5900_v13  ;;  %v5139_v32 = vld [vmem:[#allocation4 + $0xa0] sm:$0xf] }
 0x48d   : > { %5158 = vst.msk [vmem:[#allocation5 + $0x70] sm:$0xf] %vm300_vm0, %v5126_v7  ;;  %v5893_v48 = vrot.slane %v5762_v4, 5  ;;  %v5137_v12 = vld [vmem:[#allocation4 + $0x94] sm:$0xf] }
 0x48e   : > { %v5017_v42 = vrot.slane %v5015_v34, 7  ;;  %v4862_v3 = vadd.f32 %v9905_v19, %v4842_v33  ;;  %5171 = vst.msk [vmem:[#allocation5 + $0xd8] sm:$0xf] %vm300_vm0, %v5139_v32  ;;  %v5911_v34 = vrot.slane %v5770_v35, 5  ;;  %v5773_v33 = vld [vmem:[#allocation4 + $0x94] sm:$0xf] }
 0x48f   : > { %v5894_v54 = vsel %vm10873_vm13, %v5892_v63, %v5893_v48  ;;  %v5918_v21 = vrot.slane %v5773_v33, 5  ;;  %v5129_v19 = vld [vmem:[#allocation4 + $0x64] sm:$0xf]  ;;  %5169 = vst.msk [vmem:[#allocation5 + $0xc8] sm:$0xf] %vm300_vm0, %v5137_v12  ;;  %v5941_v63 = vrot.slane %v5939_v26, 4 }
 0x490   : > { %5970 = vrot.lane.b32.xlu2 %v5880_v9, %s10008_s21  ;;  %5962 = vrot.lane.b32.xlu1 %v5866_v60, %s10008_s21  ;;  %v5020_v49 = vor.u32 %v5018_v47, %v5017_v42  ;;  %v4878_v40 = vmax.f32 %v4862_v3, 0.0  ;;  %v5021_v46 = vrot.slane %v5017_v42, 4  ;;  %v5767_v47 = vld [vmem:[#allocation4 + $0x7c] sm:$0xf]  ;;  %v9364_v9 = vrot.slane %v5769_v14, 9 }
 0x491   : > { %v9362_v60 = vrot.slane %v5763_v52, 9  ;;  %v5904_v8 = vrot.slane %v5767_v47, 5  ;;  %5161 = vst.msk [vmem:[#allocation5 + $0x88] sm:$0xf] %vm300_vm0, %v5129_v19  ;;  %v5920_v39 = vrot.slane %v5918_v21, 4 }
 0x492   : > { %v5106_v56 = vsel %vm10303_vm7, %v5020_v49, %v5105_v23  ;;  %v5639_v62 = vpop.permute.xlu2 %5638  ;;  %v4894_v51 = vpack.c.bf16 %v4878_v40, %v4878_v40  ;;  %v5766_v23 = vld [vmem:[#allocation4 + $0x78] sm:$0xe]  ;;  %v5912_v42 = vsel %vm10873_vm13, %v9364_v9, %v5911_v34  ;;  %v5774_v40 = vld [vmem:[#allocation4 + $0x98] sm:$0x1]  ;;  %v5783_v4 = vld [vmem:[#allocation4 + $0xbc] sm:$0x1] }
 0x493   : > { %5966 = vrot.lane.b32.xlu0 %v5873_v59, %s10008_s21  ;;  %5107 = vst [vmem:[#allocation4 + $0xc0] sm:$0xf] %v5106_v56  ;;  %v5898_v3 = vsel %vm10873_vm13, %v9362_v60, %v5897_v27  ;;  %v9363_v6 = vrot.slane %v5766_v23, 9  ;;  %v5906_v25 = vrot.slane %v5904_v8, 4  ;;  %v5921_v56 = vrot.slane %v5774_v40, 5 }
 0x494   : > { %5719 = vst.msk [vmem:[#allocation5 + $0x78] sm:$0xf] %vm1424_vm14, %v5639_v62  ;;  %v5023_v36 = vshrl.u32 %v4894_v51, 16  ;;  %v5026_v58 = vshll.u32 %v4894_v51, 16  ;;  %v5771_v62 = vld [vmem:[#allocation4 + $0x8c] sm:$0x1] }
 0x495   : > { %v5905_v59 = vsel %vm10873_vm13, %v9363_v6, %v5904_v8  ;;  %v5913_v51 = vrot.slane %v5911_v34, 4  ;;  %v5922_v44 = vsel %vm10873_vm13, %v5920_v39, %v5921_v56  ;;  %v5908_v41 = vsel %vm10873_vm13, %v5906_v25, %v5907_v0  ;;  %v5778_v27 = vld [vmem:[#allocation4 + $0xa8] sm:$0xe]  ;;  %v5138_v52 = vld [vmem:[#allocation4 + $0x9c] sm:$0xf] }
 0x496   : > { %v5025_v1 = vrot.slane %v5023_v36, 7  ;;  %v5914_v37 = vrot.slane %v5771_v62, 5  ;;  %v5942_v32 = vrot.slane %v5783_v4, 5  ;;  %v5140_v14 = vld [vmem:[#allocation4 + $0xa8] sm:$0xf] }
 0x497   : > { %5170 = vst.msk [vmem:[#allocation5 + $0xd0] sm:$0xf] %vm300_vm0, %v5138_v52  ;;  %v5781_v23 = vld [vmem:[#allocation4 + $0xb4] sm:$0xe]  ;;  %v6074_v8 = vld [vmem:[#allocation4 + $0x18] sm:$0xf] }
 0x498   : > { %5976 = vrot.lane.b32.xlu2 %v5891_v38, %s10008_s21  ;;  %5968 = vrot.lane.b32.xlu1 %v5877_v18, %s10008_s21  ;;  %v5028_v57 = vor.u32 %v5026_v58, %v5025_v1  ;;  %v5030_v50 = vrot.slane %v5025_v1, 4  ;;  %v5915_v58 = vsel %vm10873_vm13, %v5913_v51, %v5914_v37  ;;  %v5772_v38 = vld [vmem:[#allocation4 + $0x90] sm:$0xe]  ;;  %v5776_v18 = vld [vmem:[#allocation4 + $0xa0] sm:$0xf]  ;;  %v9367_v1 = vrot.slane %v5778_v27, 9 }
 0x499   : > { %5172 = vst.msk [vmem:[#allocation5 + $0xe0] sm:$0xf] %vm300_vm0, %v5140_v14  ;;  %v9368_v60 = vrot.slane %v5781_v23, 9  ;;  %v6080_v56 = vld [vmem:[#allocation4 + $0x3c] sm:$0xf] }
 0x49a   : > { %v5029_v55 = vsel %vm10310_vm8, %v5021_v46, %v5028_v57  ;;  %v5110_v2 = vsel %vm10409_vm10, %v5030_v50, %v5109_v16  ;;  %v5932_v46 = vrot.slane %v5779_v53, 5  ;;  %v5775_v16 = vld [vmem:[#allocation4 + $0x9c] sm:$0xe]  ;;  %v5925_v57 = vrot.slane %v5776_v18, 5  ;;  %v5135_v50 = vld [vmem:[#allocation4 + $0x88] sm:$0xf] }
 0x49b   : > { %5972 = vrot.lane.b32.xlu0 %v5884_v24, %s10008_s21  ;;  %5108 = vst.msk [vmem:[#allocation4 + $0xc4] sm:$0xf] %vm300_vm0, %v5029_v55  ;;  %v5635_v17 = vpop.permute.xlu0 %5634  ;;  %v9365_v24 = vrot.slane %v5772_v38, 9  ;;  %v5940_v19 = vsel %vm10873_vm13, %v9368_v60, %v5939_v26  ;;  %v6076_v62 = vld [vmem:[#allocation4 + $0x24] sm:$0xf] }
 0x49c   : > { %5111 = vst [vmem:[#allocation4 + $0xc8] sm:$0x1] %v5110_v2  ;;  %v5933_v61 = vsel %vm10873_vm13, %v9367_v1, %v5932_v46  ;;  %v9366_v2 = vrot.slane %v5775_v16, 9  ;;  %v5934_v35 = vrot.slane %v5932_v46, 4  ;;  %v6078_v51 = vld [vmem:[#allocation4 + $0x30] sm:$0xf] }
 0x49d   : > { %5717 = vst.msk [vmem:[#allocation5 + $0x68] sm:$0xf] %vm1424_vm14, %v5635_v17  ;;  %v5919_v55 = vsel %vm10873_vm13, %v9365_v24, %v5918_v21  ;;  %v5143_v21 = vld [vmem:[#allocation4 + $0xb8] sm:$0xf]  ;;  %v6079_v37 = vld [vmem:[#allocation4 + $0x34] sm:$0xf] }
 0x49e   : > { %v5645_v22 = vpop.permute.xlu2 %5644  ;;  %5167 = vst.msk [vmem:[#allocation5 + $0xb8] sm:$0xf] %vm300_vm0, %v5135_v50  ;;  %v5926_v17 = vsel %vm10873_vm13, %v9366_v2, %v5925_v57  ;;  %v6086_v27 = vld [vmem:[#allocation4 + $0x60] sm:$0xf]  ;;  %v6082_v46 = vld [vmem:[#allocation4 + $0x48] sm:$0xf] }
 0x49f   : > { %5722 = vst.msk [vmem:[#allocation5 + $0x90] sm:$0xf] %vm1424_vm14, %v5645_v22  ;;  %v5928_v22 = vrot.slane %v5777_v28, 5  ;;  %v6089_v24 = vld [vmem:[#allocation4 + $0x70] sm:$0xf] }
 0x4a0   : > { %5982 = vrot.lane.b32.xlu2 %v5901_v5, %s10008_s21  ;;  %5974 = vrot.lane.b32.xlu1 %v5887_v29, %s10008_s21  ;;  %v5927_v5 = vrot.slane %v5925_v57, 4  ;;  %v5780_v29 = vld [vmem:[#allocation4 + $0xb0] sm:$0x1]  ;;  %5175 = vst.msk [vmem:[#allocation5 + $0xf8] sm:$0xf] %vm300_vm0, %v5143_v21 }
 0x4a1   : > { %v5935_v34 = vrot.slane %v5780_v29, 5  ;;  %v6085_v57 = vld [vmem:[#allocation4 + $0x58] sm:$0xf]  ;;  %v6088_v2 = vld [vmem:[#allocation4 + $0x6c] sm:$0xf] }
 0x4a2   : > { %v5929_v43 = vsel %vm10873_vm13, %v5927_v5, %v5928_v22  ;;  %v7955_v28 = vld [vmem:[#allocation4 + $0xc0] sm:$0xe]  ;;  %v6095_v5 = vld [vmem:[#allocation4 + $0x94] sm:$0xf]  ;;  %v6098_v23 = vld [vmem:[#allocation4 + $0xa8] sm:$0xf] }
 0x4a3   : > { %5978 = vrot.lane.b32.xlu0 %v5894_v54, %s10008_s21  ;;  %v5943_v54 = vsel %vm10873_vm13, %v5941_v63, %v5942_v32  ;;  %v5936_v33 = vsel %vm10873_vm13, %v5934_v35, %v5935_v34  ;;  %v7956_v63 = vld [vmem:[#allocation4 + $0xc4] sm:$0xf]  ;;  %v7957_v32 = vld [vmem:[#allocation4 + $0xc8] sm:$0x1]  ;;  %v9399_v29 = vrot.slane %v7955_v28, 9 }
 0x4a4   : > { %v8109_v22 = vrot.slane %v7956_v63, 5  ;;  %v8112_v35 = vrot.slane %v7957_v32, 5  ;;  %v6094_v60 = vld [vmem:[#allocation4 + $0x90] sm:$0xf]  ;;  %v6102_v63 = vld [vmem:[#allocation4 + $0xc0] sm:$0xf] }
 0x4a6   : > { %v5651_v7 = vpop.permute.xlu2 %5650  ;;  %v8111_v52 = vrot.slane %v8109_v22, 4 }
 0x4a7   : > { %5725 = vst.msk [vmem:[#allocation5 + $0xa8] sm:$0xf] %vm1424_vm14, %v5651_v7  ;;  %v6072_v7 = vld [vmem:[#allocation4 + $0xc] sm:$0xf] }
 0x4a8   : > { %5988 = vrot.lane.b32.xlu2 %v5912_v42, %s10008_s21  ;;  %5980 = vrot.lane.b32.xlu1 %v5898_v3, %s10008_s21  ;;  %v5637_v49 = vpop.permute.xlu1 %5636  ;;  %v5141_v42 = vld [vmem:[#allocation4 + $0xac] sm:$0xf] }
 0x4a9   : > { %5718 = vst.msk [vmem:[#allocation5 + $0x70] sm:$0xf] %vm1424_vm14, %v5637_v49  ;;  %v6073_v49 = vld [vmem:[#allocation4 + $0x10] sm:$0xf] }
 0x4aa   : > { %5173 = vst.msk [vmem:[#allocation5 + $0xe8] sm:$0xf] %vm300_vm0, %v5141_v42 }
 0x4ab   : > { %5984 = vrot.lane.b32.xlu0 %v5905_v59, %s10008_s21  ;;  %v6077_v59 = vld [vmem:[#allocation4 + $0x28] sm:$0xf] }
 0x4b0   : > { %5994 = vrot.lane.b32.xlu2 %v5922_v44, %s10008_s21  ;;  %5986 = vrot.lane.b32.xlu1 %v5908_v41, %s10008_s21  ;;  %v6083_v41 = vld [vmem:[#allocation4 + $0x4c] sm:$0xf] }
 0x4b2   : > { %v5657_v36 = vpop.permute.xlu2 %5656 }
 0x4b3   : > { %5728 = vst.msk [vmem:[#allocation5 + $0xc0] sm:$0xf] %vm1424_vm14, %v5657_v36  ;;  %5990 = vrot.lane.b32.xlu0 %v5915_v58, %s10008_s21  ;;  %v6081_v36 = vld [vmem:[#allocation4 + $0x40] sm:$0xf] }
 0x4b8   : > { %6000 = vrot.lane.b32.xlu2 %v5933_v61, %s10008_s21  ;;  %5992 = vrot.lane.b32.xlu1 %v5919_v55, %s10008_s21  ;;  %v5641_v13 = vpop.permute.xlu0 %5640  ;;  %v6087_v61 = vld [vmem:[#allocation4 + $0x64] sm:$0xf] }
 0x4b9   : > { %5720 = vst.msk [vmem:[#allocation5 + $0x80] sm:$0xf] %vm1424_vm14, %v5641_v13  ;;  %v6092_v55 = vld [vmem:[#allocation4 + $0x84] sm:$0xf] }
 0x4ba   : > { %v5663_v20 = vpop.permute.xlu2 %5662 }
 0x4bb   : > { %5731 = vst.msk [vmem:[#allocation5 + $0xd8] sm:$0xf] %vm1424_vm14, %v5663_v20  ;;  %5996 = vrot.lane.b32.xlu0 %v5926_v17, %s10008_s21  ;;  %v6090_v17 = vld [vmem:[#allocation4 + $0x78] sm:$0xf] }
 0x4bd   : > { %v5643_v48 = vpop.permute.xlu1 %5642 }
 0x4be   : > { %5721 = vst.msk [vmem:[#allocation5 + $0x88] sm:$0xf] %vm1424_vm14, %v5643_v48  ;;  %v6091_v48 = vld [vmem:[#allocation4 + $0x7c] sm:$0xf] }
 0x4c0   : > { %6006 = vrot.lane.b32.xlu2 %v5943_v54, %s10008_s21  ;;  %5998 = vrot.lane.b32.xlu1 %v5929_v43, %s10008_s21  ;;  %v8110_v54 = vsel %vm10873_vm13, %v9399_v29, %v8109_v22  ;;  %v6093_v43 = vld [vmem:[#allocation4 + $0x88] sm:$0xf] }
 0x4c1   : > { %8181 = vst.msk [vmem:[#allocation5 + $0xe4] sm:$0xf] %vm300_vm0, %v8110_v54 }
 0x4c2   : > { %v5669_v47 = vpop.permute.xlu2 %5668  ;;  %v5647_v9 = vpop.permute.xlu0 %5646 }
 0x4c3   : > { %5734 = vst.msk [vmem:[#allocation5 + $0xf0] sm:$0xf] %vm1424_vm14, %v5669_v47  ;;  %6002 = vrot.lane.b32.xlu0 %v5936_v33, %s10008_s21  ;;  %v8113_v47 = vsel %vm10873_vm13, %v8111_v52, %v8112_v35  ;;  %v6271_v52 = vld [vmem:[#allocation4 + $0x28] sm:$0xf] }
 0x4c4   : > { %5723 = vst.msk [vmem:[#allocation5 + $0x98] sm:$0xf] %vm1424_vm14, %v5647_v9  ;;  %v6264_v9 = vld [vmem:[#allocation4 + $0xc] sm:$0xf] }
 0x4c5   : > { %8182 = vst.msk [vmem:[#allocation5 + $0xec] sm:$0xf] %vm300_vm0, %v8113_v47  ;;  %v6316_v42 = vshll.u32 %v6264_v9, 16 }
 0x4c8   : > { %6140 = vrot.lane.b32.xlu2 %v6074_v8, %s10009_s23  ;;  %6004 = vrot.lane.b32.xlu1 %v5940_v19, %s10008_s21  ;;  %v6313_v8 = vshrl.u32 %v6264_v9, 16  ;;  %v6096_v19 = vld [vmem:[#allocation4 + $0x9c] sm:$0xf]  ;;  %s9088_s21 = sshll.u32 %s10142_s22, 8 }
 0x4ca   : > { %v5947_v3 = vpop.permute.xlu2 %5946  ;;  %v5649_v6 = vpop.permute.xlu1 %5648 }
 0x4cb   : > { %6041 = vst.msk [vmem:[#allocation5 + $0x8] sm:$0xf] %vm1764_vm15, %v5947_v3  ;;  %6136 = vrot.lane.b32.xlu0 %v6072_v7, %s10009_s23  ;;  %v9742_v3 = vld [vmem:[#allocation5 + $0xe4] sm:$0xf] }
 0x4cc   : > { %5724 = vst.msk [vmem:[#allocation5 + $0xa0] sm:$0xf] %vm1424_vm14, %v5649_v6  ;;  %v6268_v6 = vld [vmem:[#allocation4 + $0x1c] sm:$0xf] }
 0x4cd   : > { %v5653_v31 = vpop.permute.xlu0 %5652 }
 0x4ce   : > { %5726 = vst.msk [vmem:[#allocation5 + $0xb0] sm:$0xf] %vm1424_vm14, %v5653_v31  ;;  %v6265_v31 = vld [vmem:[#allocation4 + $0x10] sm:$0xf] }
 0x4d0   : > { %6146 = vrot.lane.b32.xlu2 %v6077_v59, %s10009_s23  ;;  %6138 = vrot.lane.b32.xlu1 %v6073_v49, %s10009_s23  ;;  %v9561_v59 = vld [vmem:[#allocation5 + $0xe8] sm:$0xf0] }
 0x4d2   : > { %v5953_v40 = vpop.permute.xlu2 %5952  ;;  %v5655_v39 = vpop.permute.xlu1 %5654 }
 0x4d3   : > { %6044 = vst.msk [vmem:[#allocation5 + $0x20] sm:$0xf] %vm1764_vm15, %v5953_v40  ;;  %6142 = vrot.lane.b32.xlu0 %v6075_v11, %s10009_s23  ;;  %v6315_v40 = vrot.slane %v6313_v8, 4  ;;  %v6318_v11 = vrot.slane %v6316_v42, 5  ;;  %v6370_v8 = vshll.u32 %v6271_v52, 16  ;;  %v6374_v42 = vshrl.u32 %v6271_v52, 16 }
 0x4d4   : > { %5727 = vst.msk [vmem:[#allocation5 + $0xb8] sm:$0xf] %vm1424_vm14, %v5655_v39  ;;  %v9564_v39 = vor.u32 %v9742_v3, %v9561_v59 }
 0x4d5   : > { %v5659_v25 = vpop.permute.xlu0 %5658 }
 0x4d6   : > { %5729 = vst.msk [vmem:[#allocation5 + $0xc8] sm:$0xf] %vm1424_vm14, %v5659_v25  ;;  %v6346_v25 = vshll.u32 %v6268_v6, 16  ;;  %9615 = vmatmul.msk.bf16.gmra.mxu2 %vm4129_vm6, %v9564_v39 }
 0x4d8   : > { %6152 = vrot.lane.b32.xlu2 %v6080_v56, %s10009_s23  ;;  %6144 = vrot.lane.b32.xlu1 %v6076_v62, %s10009_s23  ;;  %v6350_v56 = vshrl.u32 %v6268_v6, 16  ;;  %v6101_v62 = vld [vmem:[#allocation4 + $0xb8] sm:$0xf]  ;;  %v6103_v6 = vld [vmem:[#allocation4 + $0xc4] sm:$0xf] }
 0x4da   : > { %v5959_v0 = vpop.permute.xlu2 %5958  ;;  %v5661_v44 = vpop.permute.xlu1 %5660 }
 0x4db   : > { %6047 = vst.msk [vmem:[#allocation5 + $0x38] sm:$0xf] %vm1764_vm15, %v5959_v0  ;;  %6148 = vrot.lane.b32.xlu0 %v6078_v51, %s10009_s23  ;;  %v6322_v0 = vshll.u32 %v6265_v31, 16  ;;  %v6097_v51 = vld [vmem:[#allocation4 + $0xa0] sm:$0xf] }
 0x4dc   : > { %5730 = vst.msk [vmem:[#allocation5 + $0xd0] sm:$0xf] %vm1424_vm14, %v5661_v44  ;;  %v6319_v44 = vor.u32 %v6318_v11, %v6315_v40 }
 0x4dd   : > { %v5665_v15 = vpop.permute.xlu0 %5664 }
 0x4de   : > { %5732 = vst.msk [vmem:[#allocation5 + $0xe0] sm:$0xf] %vm1424_vm14, %v5665_v15  ;;  %v6326_v15 = vshrl.u32 %v6265_v31, 16 }
 0x4e0   : > { %6158 = vrot.lane.b32.xlu2 %v6083_v41, %s10009_s23  ;;  %6150 = vrot.lane.b32.xlu1 %v6079_v37, %s10009_s23  ;;  %v6099_v37 = vld [vmem:[#allocation4 + $0xac] sm:$0xf] }
 0x4e2   : > { %v5965_v53 = vpop.permute.xlu2 %5964  ;;  %v5667_v58 = vpop.permute.xlu1 %5666 }
 0x4e3   : > { %6050 = vst.msk [vmem:[#allocation5 + $0x50] sm:$0xf] %vm1764_vm15, %v5965_v53  ;;  %6154 = vrot.lane.b32.xlu0 %v6081_v36, %s10009_s23  ;;  %v6269_v53 = vld [vmem:[#allocation4 + $0x20] sm:$0x1]  ;;  %v12821_v36 = vrot.slane %v6346_v25, 5 }
 0x4e4   : > { %5733 = vst.msk [vmem:[#allocation5 + $0xe8] sm:$0xf] %vm1424_vm14, %v5667_v58  ;;  %v6352_v58 = vrot.slane %v6350_v56, 4  ;;  %v6372_v56 = vrot.slane %v6370_v8, 5 }
 0x4e5   : > { %v5671_v38 = vpop.permute.xlu0 %5670 }
 0x4e6   : > { %5735 = vst.msk [vmem:[#allocation5 + $0xf8] sm:$0xf] %vm1424_vm14, %v5671_v38 }
 0x4e8   : > { %6164 = vrot.lane.b32.xlu2 %v6086_v27, %s10009_s23  ;;  %6156 = vrot.lane.b32.xlu1 %v6082_v46, %s10009_s23  ;;  %v6324_v27 = vrot.slane %v6322_v0, 5  ;;  %v6267_v46 = vld [vmem:[#allocation4 + $0x18] sm:$0xf] }
 0x4ea   : > { %v5971_v18 = vpop.permute.xlu2 %5970  ;;  %v5945_v1 = vpop.permute.xlu1 %5944 }
 0x4eb   : > { %6053 = vst.msk [vmem:[#allocation5 + $0x68] sm:$0xf] %vm1764_vm15, %v5971_v18  ;;  %6160 = vrot.lane.b32.xlu0 %v6084_v30, %s10009_s23  ;;  %v6320_v30 = vrot.slane %v6319_v44, 4 }
 0x4ec   : > { %6040 = vst.msk [vmem:[#allocation5] sm:$0xf] %vm1764_vm15, %v5945_v1  ;;  %v6356_v1 = vshll.u32 %v6269_v53, 16 }
 0x4ed   : > { %v5949_v16 = vpop.permute.xlu0 %5948 }
 0x4ee   : > { %6042 = vst.msk [vmem:[#allocation5 + $0x10] sm:$0xf] %vm1764_vm15, %v5949_v16  ;;  %v6328_v16 = vrot.slane %v6326_v15, 4  ;;  %v6358_v32 = vrot.slane %v6356_v1, 5 }
 0x4f0   : > { %6170 = vrot.lane.b32.xlu2 %v6089_v24, %s10009_s23  ;;  %6162 = vrot.lane.b32.xlu1 %v6085_v57, %s10009_s23  ;;  %v6353_v24 = vor.u32 %v6352_v58, %v12821_v36  ;;  %v6273_v57 = vld [vmem:[#allocation4 + $0x30] sm:$0xf]  ;;  %v6329_v29 = vor.u32 %v6328_v16, %v6324_v27 }
 0x4f2   : > { %v5977_v50 = vpop.permute.xlu2 %5976  ;;  %v5951_v26 = vpop.permute.xlu1 %5950 }
 0x4f3   : > { %6056 = vst.msk [vmem:[#allocation5 + $0x80] sm:$0xf] %vm1764_vm15, %v5977_v50  ;;  %6166 = vrot.lane.b32.xlu0 %v6087_v61, %s10009_s23  ;;  %v6270_v50 = vld [vmem:[#allocation4 + $0x24] sm:$0xf]  ;;  %v6325_v61 = vsel %vm10180_vm3, %v6320_v30, %v6324_v27  ;;  %v6282_v30 = vld [vmem:[#allocation4 + $0x54] sm:$0xf] }
 0x4f4   : > { %6043 = vst.msk [vmem:[#allocation5 + $0x18] sm:$0xf] %vm1764_vm15, %v5951_v26  ;;  %v6266_v26 = vld [vmem:[#allocation4 + $0x14] sm:$0x1] }
 0x4f5   : > { %v5955_v12 = vpop.permute.xlu0 %5954  ;;  %v6332_v22 = vshll.u32 %v6266_v26, 16 }
 0x4f6   : > { %6045 = vst.msk [vmem:[#allocation5 + $0x28] sm:$0xf] %vm1764_vm15, %v5955_v12  ;;  %v6337_v12 = vshrl.u32 %v6267_v46, 16 }
 0x4f7   : > { %v6334_v31 = vrot.slane %v6332_v22, 5 }
 0x4f8   : > { %6176 = vrot.lane.b32.xlu2 %v6092_v55, %s10009_s23  ;;  %6168 = vrot.lane.b32.xlu1 %v6088_v2, %s10009_s23  ;;  %v6340_v55 = vshll.u32 %v6267_v46, 16  ;;  %v6100_v2 = vld [vmem:[#allocation4 + $0xb4] sm:$0xf]  ;;  %v6339_v35 = vrot.slane %v6337_v12, 4  ;;  %v6279_v12 = vld [vmem:[#allocation4 + $0x48] sm:$0xf] }
 0x4f9   : > { %v6433_v22 = vshrl.u32 %v6279_v12, 16 }
 0x4fa   : > { %v5983_v20 = vpop.permute.xlu2 %5982  ;;  %v5957_v13 = vpop.permute.xlu1 %5956  ;;  %v6342_v54 = vrot.slane %v6340_v55, 5 }
 0x4fb   : > { %6059 = vst.msk [vmem:[#allocation5 + $0x98] sm:$0xf] %vm1764_vm15, %v5983_v20  ;;  %6172 = vrot.lane.b32.xlu0 %v6090_v17, %s10009_s23  ;;  %v6385_v20 = vshrl.u32 %v6273_v57, 16  ;;  %v6388_v17 = vshll.u32 %v6273_v57, 16  ;;  %v6275_v57 = vld [vmem:[#allocation4 + $0x38] sm:$0x1] }
 0x4fc   : > { %6046 = vst.msk [vmem:[#allocation5 + $0x30] sm:$0xf] %vm1764_vm15, %v5957_v13  ;;  %v6361_v13 = vshrl.u32 %v6270_v50, 16  ;;  %v6343_v59 = vor.u32 %v6342_v54, %v6339_v35  ;;  %v6283_v35 = vld [vmem:[#allocation4 + $0x58] sm:$0xf] }
 0x4fd   : > { %v5961_v4 = vpop.permute.xlu0 %5960  ;;  %v6387_v47 = vrot.slane %v6385_v20, 4  ;;  %v6457_v20 = vshrl.u32 %v6282_v30, 16  ;;  %v6286_v54 = vld [vmem:[#allocation4 + $0x64] sm:$0xf] }
 0x4fe   : > { %6048 = vst.msk [vmem:[#allocation5 + $0x40] sm:$0xf] %vm1764_vm15, %v5961_v4  ;;  %v6364_v4 = vshll.u32 %v6270_v50, 16  ;;  %v6363_v9 = vrot.slane %v6361_v13, 4  ;;  %v6344_v53 = vrot.slane %v6343_v59, 4 }
 0x4ff   : > { %v6276_v50 = vld [vmem:[#allocation4 + $0x3c] sm:$0xf] }
 0x500   : > { %6182 = vrot.lane.b32.xlu2 %v6095_v5, %s10009_s23  ;;  %6174 = vrot.lane.b32.xlu1 %v6091_v48, %s10009_s23  ;;  %v6354_v5 = vrot.slane %v6353_v24, 4 }
 0x502   : > { %v5989_v14 = vpop.permute.xlu2 %5988  ;;  %v5963_v34 = vpop.permute.xlu1 %5962 }
 0x503   : > { %6062 = vst.msk [vmem:[#allocation5 + $0xb0] sm:$0xf] %vm1764_vm15, %v5989_v14  ;;  %6178 = vrot.lane.b32.xlu0 %v6093_v43, %s10009_s23  ;;  %v6274_v14 = vld [vmem:[#allocation4 + $0x34] sm:$0xf]  ;;  %v6277_v43 = vld [vmem:[#allocation4 + $0x40] sm:$0xf] }
 0x504   : > { %6049 = vst.msk [vmem:[#allocation5 + $0x48] sm:$0xf] %vm1764_vm15, %v5963_v34  ;;  %v6418_v3 = vshll.u32 %v6277_v43, 16  ;;  %v6398_v40 = vshrl.u32 %v6274_v14, 16 }
 0x505   : > { %v5967_v33 = vpop.permute.xlu0 %5966 }
 0x506   : > { %6051 = vst.msk [vmem:[#allocation5 + $0x58] sm:$0xf] %vm1764_vm15, %v5967_v33  ;;  %v6390_v33 = vrot.slane %v6388_v17, 5  ;;  %v12844_v44 = vrot.slane %v6418_v3, 5  ;;  %v6400_v27 = vrot.slane %v6398_v40, 4  ;;  %v6460_v17 = vshll.u32 %v6282_v30, 16 }
 0x507   : > { %v6494_v3 = vshrl.u32 %v6286_v54, 16  ;;  %v6288_v30 = vld [vmem:[#allocation4 + $0x6c] sm:$0xf] }
 0x508   : > { %6188 = vrot.lane.b32.xlu2 %v6098_v23, %s10009_s23  ;;  %6180 = vrot.lane.b32.xlu1 %v6094_v60, %s10009_s23  ;;  %v6366_v23 = vrot.slane %v6364_v4, 5  ;;  %v6330_v60 = vrot.slane %v6329_v29, 4 }
 0x50a   : > { %v5995_v21 = vpop.permute.xlu2 %5994  ;;  %v5969_v7 = vpop.permute.xlu1 %5968  ;;  %v6367_v11 = vor.u32 %v6366_v23, %v6363_v9  ;;  %v6335_v25 = vsel %vm10180_vm3, %v6330_v60, %v6334_v31 }
 0x50b   : > { %6065 = vst.msk [vmem:[#allocation5 + $0xc8] sm:$0xf] %vm1764_vm15, %v5995_v21  ;;  %6184 = vrot.lane.b32.xlu0 %v6096_v19, %s10009_s23  ;;  %v6359_v21 = vsel %vm10180_vm3, %v6354_v5, %v6358_v32  ;;  %v6394_v19 = vshll.u32 %v6274_v14, 16  ;;  %v6412_v5 = vshll.u32 %v6276_v50, 16 }
 0x50c   : > { %6052 = vst.msk [vmem:[#allocation5 + $0x60] sm:$0xf] %vm1764_vm15, %v5969_v7  ;;  %v6422_v7 = vshrl.u32 %v6277_v43, 16 }
 0x50d   : > { %v5973_v49 = vpop.permute.xlu0 %5972  ;;  %v6414_v8 = vrot.slane %v6412_v5, 5  ;;  %v6508_v5 = vshll.u32 %v6288_v30, 16 }
 0x50e   : > { %6054 = vst.msk [vmem:[#allocation5 + $0x70] sm:$0xf] %vm1764_vm15, %v5973_v49  ;;  %v6391_v49 = vor.u32 %v6390_v33, %v6387_v47  ;;  %v6424_v15 = vrot.slane %v6422_v7, 4  ;;  %v6462_v47 = vrot.slane %v6460_v17, 5  ;;  %v6280_v33 = vld [vmem:[#allocation4 + $0x4c] sm:$0xf] }
 0x50f   : > { %v6435_v7 = vrot.slane %v6433_v22, 4  ;;  %v6442_v31 = vshll.u32 %v6280_v33, 16  ;;  %v6446_v59 = vshrl.u32 %v6280_v33, 16 }
 0x510   : > { %6194 = vrot.lane.b32.xlu2 %v6101_v62, %s10009_s23  ;;  %6186 = vrot.lane.b32.xlu1 %v6097_v51, %s10009_s23  ;;  %v6376_v62 = vrot.slane %v6374_v42, 4  ;;  %v6396_v51 = vrot.slane %v6394_v19, 5  ;;  %v6392_v58 = vrot.slane %v6391_v49, 4  ;;  %v6425_v24 = vor.u32 %v6424_v15, %v12844_v44  ;;  %v6291_v49 = vld [vmem:[#allocation4 + $0x78] sm:$0xf] }
 0x511   : > { %v6490_v19 = vshll.u32 %v6286_v54, 16  ;;  %v6496_v15 = vrot.slane %v6494_v3, 4 }
 0x512   : > { %v6001_v41 = vpop.permute.xlu2 %6000  ;;  %v5975_v38 = vpop.permute.xlu1 %5974  ;;  %v6377_v46 = vor.u32 %v6376_v62, %v6372_v56  ;;  %v6397_v1 = vsel %vm10180_vm3, %v6392_v58, %v6396_v51  ;;  %v6426_v29 = vrot.slane %v6425_v24, 4  ;;  %v6448_v58 = vrot.slane %v6446_v59, 4 }
 0x513   : > { %6068 = vst.msk [vmem:[#allocation5 + $0xe0] sm:$0xf] %vm1764_vm15, %v6001_v41  ;;  %6190 = vrot.lane.b32.xlu0 %v6099_v37, %s10009_s23  ;;  %v6272_v41 = vld [vmem:[#allocation4 + $0x2c] sm:$0x1] }
 0x514   : > { %6055 = vst.msk [vmem:[#allocation5 + $0x78] sm:$0xf] %vm1764_vm15, %v5975_v38  ;;  %v6368_v38 = vrot.slane %v6367_v11, 4  ;;  %v6380_v16 = vshll.u32 %v6272_v41, 16  ;;  %v6378_v4 = vrot.slane %v6377_v46, 4  ;;  %v6529_v41 = vshrl.u32 %v6291_v49, 16 }
 0x515   : > { %v5979_v18 = vpop.permute.xlu0 %5978 }
 0x516   : > { %6057 = vst.msk [vmem:[#allocation5 + $0x88] sm:$0xf] %vm1764_vm15, %v5979_v18  ;;  %v6278_v18 = vld [vmem:[#allocation4 + $0x44] sm:$0x1]  ;;  %v6373_v26 = vsel %vm10180_vm3, %v6368_v38, %v6372_v56  ;;  %v6470_v56 = vshrl.u32 %v6283_v35, 16  ;;  %v6532_v38 = vshll.u32 %v6291_v49, 16 }
 0x517   : > { %v6428_v55 = vshll.u32 %v6278_v18, 16  ;;  %v6281_v18 = vld [vmem:[#allocation4 + $0x50] sm:$0x1] }
 0x518   : > { %6696 = vrot.lane.b32.xlu2 %v6325_v61, %s10010_s29  ;;  %6192 = vrot.lane.b32.xlu1 %v6100_v2, %s10009_s23  ;;  %v6349_v61 = vsel %vm10180_vm3, %v6344_v53, %v12821_v36  ;;  %v6401_v2 = vor.u32 %v6400_v27, %v6396_v51  ;;  %v6382_v36 = vrot.slane %v6380_v16, 5  ;;  %v12872_v51 = vrot.slane %v6490_v19, 5  ;;  %v6287_v16 = vld [vmem:[#allocation4 + $0x68] sm:$0x1] }
 0x519   : > { %v6430_v14 = vrot.slane %v6428_v55, 5  ;;  %v6444_v53 = vrot.slane %v6442_v31, 5  ;;  %v6472_v24 = vrot.slane %v6470_v56, 4  ;;  %v6534_v17 = vrot.slane %v6532_v38, 5 }
 0x51a   : > { %v6007_v28 = vpop.permute.xlu2 %6006  ;;  %v5981_v48 = vpop.permute.xlu1 %5980  ;;  %v6402_v43 = vrot.slane %v6401_v2, 4  ;;  %v6383_v9 = vsel %vm10180_vm3, %v6378_v4, %v6382_v36  ;;  %v6500_v4 = vshll.u32 %v6287_v16, 16  ;;  %v6294_v16 = vld [vmem:[#allocation4 + $0x84] sm:$0xf] }
 0x51b   : > { %6071 = vst.msk [vmem:[#allocation5 + $0xf8] sm:$0xf] %vm1764_vm15, %v6007_v28  ;;  %6196 = vrot.lane.b32.xlu0 %v6102_v63, %s10009_s23  ;;  %v6404_v28 = vshll.u32 %v6275_v57, 16  ;;  %v6409_v63 = vshrl.u32 %v6276_v50, 16  ;;  %v6431_v42 = vsel %vm10180_vm3, %v6426_v29, %v6430_v14  ;;  %v6497_v50 = vor.u32 %v6496_v15, %v12872_v51 }
 0x51c   : > { %6058 = vst.msk [vmem:[#allocation5 + $0x90] sm:$0xf] %vm1764_vm15, %v5981_v48  ;;  %v6436_v48 = vshll.u32 %v6279_v12, 16  ;;  %v6449_v2 = vor.u32 %v6448_v58, %v6444_v53 }
 0x51d   : > { %v5985_v34 = vpop.permute.xlu0 %5984  ;;  %v6406_v23 = vrot.slane %v6404_v28, 5  ;;  %v6411_v60 = vrot.slane %v6409_v63, 4  ;;  %v6284_v28 = vld [vmem:[#allocation4 + $0x5c] sm:$0x1]  ;;  %v6505_v63 = vshrl.u32 %v6288_v30, 16  ;;  %v6498_v54 = vrot.slane %v6497_v50, 4 }
 0x51e   : > { %6060 = vst.msk [vmem:[#allocation5 + $0xa0] sm:$0xf] %vm1764_vm15, %v5985_v34  ;;  %v6459_v34 = vrot.slane %v6457_v20, 4  ;;  %v12883_v20 = vld [vmem:[#allocation4 + $0x7c] sm:$0xf]  ;;  %v6450_v14 = vrot.slane %v6449_v2, 4 }
 0x51f   : > { %v6296_v50 = vld [vmem:[#allocation4 + $0x8c] sm:$0x1] }
 0x520   : > { %6702 = vrot.lane.b32.xlu2 %v6359_v21, %s10010_s29  ;;  %6198 = vrot.lane.b32.xlu1 %v6103_v6, %s10009_s23  ;;  %v6466_v21 = vshll.u32 %v6283_v35, 16  ;;  %v6438_v6 = vrot.slane %v6436_v48, 5  ;;  %v6463_v40 = vor.u32 %v6462_v47, %v6459_v34  ;;  %v6289_v48 = vld [vmem:[#allocation4 + $0x70] sm:$0xf]  ;;  %v6295_v47 = vld [vmem:[#allocation4 + $0x88] sm:$0xf] }
 0x521   : > { %v6562_v31 = vshll.u32 %v6295_v47, 16  ;;  %v6566_v59 = vshrl.u32 %v6295_v47, 16  ;;  %s13448_s23 = scalar_lea.vmem [#allocation9], %s9088_s21 }
 0x522   : > { %v6141_v39 = vpop.permute.xlu2 %6140  ;;  %v5987_v0 = vpop.permute.xlu1 %5986  ;;  %v6464_v46 = vrot.slane %v6463_v40, 4  ;;  %s9004_s28 = sshll.u32 %s13448_s23, 4  ;;  %s9005_s28 = int_to_ptr.vmem [resolvable:$true] %s9004_s28 }
 0x523   : > { %6234 = vst.msk [vmem:[#allocation5 + $0x10] sm:$0xf] %vm1957_vm1, %v6141_v39  ;;  %6698 = vrot.lane.b32.xlu0 %v6335_v25, %s10010_s29  ;;  %v6407_v39 = vsel %vm10180_vm3, %v6402_v43, %v6406_v23  ;;  %v6415_v25 = vor.u32 %v6414_v8, %v6411_v60  ;;  %v6476_v43 = vshll.u32 %v6284_v28, 16  ;;  %v6507_v23 = vrot.slane %v6505_v63, 4 }
 0x524   : > { %6061 = vst.msk [vmem:[#allocation5 + $0xa8] sm:$0xf] %vm1764_vm15, %v5987_v0  ;;  %v6468_v0 = vrot.slane %v6466_v21, 5  ;;  %v6510_v60 = vrot.slane %v6508_v5, 5  ;;  %v6514_v8 = vshll.u32 %v6289_v48, 16  ;;  %v12904_v58 = vrot.slane %v6562_v31, 5 }
 0x525   : > { %v5991_v37 = vpop.permute.xlu0 %5990  ;;  %v6478_v40 = vrot.slane %v6476_v43, 5  ;;  %v6568_v38 = vrot.slane %v6566_v59, 4  ;;  %v6572_v63 = vshll.u32 %v6296_v50, 16 }
 0x526   : > { %6063 = vst.msk [vmem:[#allocation5 + $0xb8] sm:$0xf] %vm1764_vm15, %v5991_v37  ;;  %v6439_v37 = vor.u32 %v6438_v6, %v6435_v7  ;;  %v6469_v57 = vsel %vm10180_vm3, %v6464_v46, %v6468_v0  ;;  %v6473_v29 = vor.u32 %v6472_v24, %v6468_v0  ;;  %v6518_v6 = vshrl.u32 %v6289_v48, 16  ;;  %v6300_v46 = vld [vmem:[#allocation4 + $0x9c] sm:$0xf] }
 0x527   : > { %v6604_v2 = vshll.u32 %v6300_v46, 16 }
 0x528   : > { %6708 = vrot.lane.b32.xlu2 %v6397_v1, %s10010_s29  ;;  %6700 = vrot.lane.b32.xlu1 %v6349_v61, %s10010_s29  ;;  %v6416_v1 = vrot.slane %v6415_v25, 4  ;;  %v6285_v61 = vld [vmem:[#allocation4 + $0x60] sm:$0xf]  ;;  %v6440_v55 = vrot.slane %v6439_v37, 4  ;;  %v6474_v21 = vrot.slane %v6473_v29, 4  ;;  %v6516_v37 = vrot.slane %v6514_v8, 5 }
 0x529   : > { %v6484_v22 = vshll.u32 %v6285_v61, 16 }
 0x52a   : > { %v6147_v13 = vpop.permute.xlu2 %6146  ;;  %v5993_v32 = vpop.permute.xlu1 %5992  ;;  %v6421_v12 = vsel %vm10180_vm3, %v6416_v1, %v12844_v44  ;;  %v6445_v36 = vsel %vm10180_vm3, %v6440_v55, %v6444_v53  ;;  %v6481_v44 = vshrl.u32 %v6285_v61, 16  ;;  %v6479_v56 = vsel %vm10180_vm3, %v6474_v21, %v6478_v40  ;;  %v6293_v1 = vld [vmem:[#allocation4 + $0x80] sm:$0x1] }
 0x52b   : > { %6237 = vst.msk [vmem:[#allocation5 + $0x28] sm:$0xf] %vm1957_vm1, %v6147_v13  ;;  %6704 = vrot.lane.b32.xlu0 %v6373_v26, %s10010_s29  ;;  %v6531_v26 = vrot.slane %v6529_v41, 4  ;;  %v6452_v13 = vshll.u32 %v6281_v18, 16  ;;  %v6486_v3 = vrot.slane %v6484_v22, 5  ;;  %v6520_v53 = vrot.slane %v6518_v6, 4 }
 0x52c   : > { %6064 = vst.msk [vmem:[#allocation5 + $0xc0] sm:$0xf] %vm1764_vm15, %v5993_v32  ;;  %v6483_v19 = vrot.slane %v6481_v44, 4  ;;  %v6601_v55 = vshrl.u32 %v6300_v46, 16  ;;  %v6548_v5 = vshll.u32 %v6293_v1, 16 }
 0x52d   : > { %v5997_v52 = vpop.permute.xlu0 %5996  ;;  %v6535_v34 = vor.u32 %v6534_v17, %v6531_v26  ;;  %v6521_v26 = vor.u32 %v6520_v53, %v6516_v37 }
 0x52e   : > { %6066 = vst.msk [vmem:[#allocation5 + $0xd0] sm:$0xf] %vm1764_vm15, %v5997_v52  ;;  %v6538_v52 = vshll.u32 %v12883_v20, 16  ;;  %v6550_v6 = vrot.slane %v6548_v5, 5 }
 0x52f   : > { %v6536_v0 = vrot.slane %v6535_v34, 4  ;;  %v6301_v34 = vld [vmem:[#allocation4 + $0xa0] sm:$0xf] }
 0x530   : > { %6714 = vrot.lane.b32.xlu2 %v6431_v42, %s10010_s29  ;;  %6706 = vrot.lane.b32.xlu1 %v6383_v9, %s10010_s29  ;;  %v6502_v9 = vrot.slane %v6500_v4, 5  ;;  %v6454_v42 = vrot.slane %v6452_v13, 5  ;;  %v6540_v15 = vrot.slane %v6538_v52, 5  ;;  %v6553_v13 = vshrl.u32 %v6294_v16, 16 }
 0x531   : > { %v6556_v4 = vshll.u32 %v6294_v16, 16  ;;  %v6606_v52 = vrot.slane %v6604_v2, 5 }
 0x532   : > { %v6153_v11 = vpop.permute.xlu2 %6152  ;;  %v5999_v62 = vpop.permute.xlu1 %5998  ;;  %v6503_v7 = vsel %vm10180_vm3, %v6498_v54, %v6502_v9  ;;  %v6455_v49 = vsel %vm10180_vm3, %v6450_v14, %v6454_v42  ;;  %v6603_v54 = vrot.slane %v6601_v55, 4  ;;  %v6555_v14 = vrot.slane %v6553_v13, 4 }
 0x533   : > { %6240 = vst.msk [vmem:[#allocation5 + $0x40] sm:$0xf] %vm1957_vm1, %v6153_v11  ;;  %6710 = vrot.lane.b32.xlu0 %v6407_v39, %s10010_s29  ;;  %v6542_v11 = vshrl.u32 %v12883_v20, 16  ;;  %v6511_v39 = vor.u32 %v6510_v60, %v6507_v23  ;;  %v6297_v20 = vld [vmem:[#allocation4 + $0x90] sm:$0xf]  ;;  %v6558_v43 = vrot.slane %v6556_v4, 5 }
 0x534   : > { %6067 = vst.msk [vmem:[#allocation5 + $0xd8] sm:$0xf] %vm1764_vm15, %v5999_v62  ;;  %v6487_v62 = vor.u32 %v6486_v3, %v6483_v19  ;;  %v6577_v44 = vshrl.u32 %v6297_v20, 16  ;;  %v6580_v22 = vshll.u32 %v6297_v20, 16  ;;  %v6574_v9 = vrot.slane %v6572_v63, 5 }
 0x535   : > { %v6003_v27 = vpop.permute.xlu0 %6002  ;;  %v6512_v30 = vrot.slane %v6511_v39, 4  ;;  %v6544_v61 = vrot.slane %v6542_v11, 4  ;;  %v6298_v23 = vld [vmem:[#allocation4 + $0x94] sm:$0xf]  ;;  %v6607_v3 = vor.u32 %v6606_v52, %v6603_v54  ;;  %v6559_v31 = vor.u32 %v6558_v43, %v6555_v14  ;;  %v6848_v52 = vld [vmem:[#allocation4 + $0x6c] sm:$0xe] }
 0x536   : > { %6069 = vst.msk [vmem:[#allocation5 + $0xe8] sm:$0xf] %vm1764_vm15, %v6003_v27  ;;  %v6290_v27 = vld [vmem:[#allocation4 + $0x74] sm:$0x1]  ;;  %v6488_v24 = vrot.slane %v6487_v62, 4  ;;  %v6579_v8 = vrot.slane %v6577_v44, 4 }
 0x537   : > { %v6524_v28 = vshll.u32 %v6290_v27, 16  ;;  %v6545_v29 = vor.u32 %v6544_v61, %v6540_v15  ;;  %v6582_v42 = vrot.slane %v6580_v22, 5  ;;  %v6586_v59 = vshll.u32 %v6298_v23, 16 }
 0x538   : > { %6720 = vrot.lane.b32.xlu2 %v6469_v57, %s10010_s29  ;;  %6712 = vrot.lane.b32.xlu1 %v6421_v12, %s10010_s29  ;;  %v6541_v57 = vsel %vm10180_vm3, %v6536_v0, %v6540_v15  ;;  %v6569_v12 = vor.u32 %v6568_v38, %v12904_v58  ;;  %v6493_v17 = vsel %vm10180_vm3, %v6488_v24, %v12872_v51  ;;  %v6522_v51 = vrot.slane %v6521_v26, 4  ;;  %v6825_v15 = vld [vmem:[#allocation4 + $0x10] sm:$0xf] }
 0x539   : > { %v6546_v60 = vrot.slane %v6545_v29, 4  ;;  %v6614_v39 = vshrl.u32 %v6301_v34, 16  ;;  %v6608_v62 = vrot.slane %v6607_v3, 4  ;;  %v6922_v1 = vrot.slane %v6825_v15, 5  ;;  %v6850_v3 = vld [vmem:[#allocation4 + $0x74] sm:$0x1] }
 0x53a   : > { %v6159_v32 = vpop.permute.xlu2 %6158  ;;  %v6005_v35 = vpop.permute.xlu1 %6004 }
 0x53b   : > { %6243 = vst.msk [vmem:[#allocation5 + $0x58] sm:$0xf] %vm1957_vm1, %v6159_v32  ;;  %6716 = vrot.lane.b32.xlu0 %v6445_v36, %s10010_s29  ;;  %v6517_v36 = vsel %vm10180_vm3, %v6512_v30, %v6516_v37  ;;  %v6551_v11 = vsel %vm10180_vm3, %v6546_v60, %v6550_v6  ;;  %v6588_v37 = vrot.slane %v6586_v59, 5  ;;  %v6616_v46 = vrot.slane %v6614_v39, 4  ;;  %v6299_v30 = vld [vmem:[#allocation4 + $0x98] sm:$0x1] }
 0x53c   : > { %6070 = vst.msk [vmem:[#allocation5 + $0xf0] sm:$0xf] %vm1764_vm15, %v6005_v35  ;;  %v6570_v35 = vrot.slane %v6569_v12, 4  ;;  %v6596_v26 = vshll.u32 %v6299_v30, 16  ;;  %v6826_v12 = vld [vmem:[#allocation4 + $0x14] sm:$0x1] }
 0x53d   : > { %v6137_v33 = vpop.permute.xlu0 %6136  ;;  %v6924_v20 = vrot.slane %v6922_v1, 4  ;;  %v6925_v4 = vrot.slane %v6826_v12, 5  ;;  %v9377_v60 = vrot.slane %v6848_v52, 9  ;;  %v7378_v59 = vld [vmem:[#allocation4 + $0x7c] sm:$0xf]  ;;  %v6981_v39 = vrot.slane %v6850_v3, 5 }
 0x53e   : > { %6232 = vst.msk [vmem:[#allocation5] sm:$0xf] %vm1957_vm1, %v6137_v33  ;;  %v6526_v33 = vrot.slane %v6524_v28, 5  ;;  %v6575_v19 = vsel %vm10180_vm3, %v6570_v35, %v6574_v9  ;;  %v6598_v28 = vrot.slane %v6596_v26, 5  ;;  %v7377_v35 = vld [vmem:[#allocation4 + $0x78] sm:$0xf] }
 0x53f   : > { %v6926_v5 = vsel %vm10873_vm13, %v6924_v20, %v6925_v4  ;;  %v7353_v9 = vld [vmem:[#allocation4 + $0x18] sm:$0xf]  ;;  %v7163_v3 = vld [vmem:[#allocation4 + $0x24] sm:$0xf] }
 0x540   : > { %6726 = vrot.lane.b32.xlu2 %v6503_v7, %s10010_s29  ;;  %6718 = vrot.lane.b32.xlu1 %v6455_v49, %s10010_s29  ;;  %v6527_v21 = vsel %vm10180_vm3, %v6522_v51, %v6526_v33  ;;  %v6610_v7 = vshll.u32 %v6301_v34, 16  ;;  %v6590_v49 = vshrl.u32 %v6298_v23, 16  ;;  %v6849_v51 = vld [vmem:[#allocation4 + $0x70] sm:$0xf]  ;;  %v7161_v34 = vld [vmem:[#allocation4 + $0x18] sm:$0xf] }
 0x541   : > { %v6978_v43 = vrot.slane %v6849_v51, 5  ;;  %v7597_v33 = vshll.u32 %v7377_v35, 16  ;;  %v7177_v20 = vld [vmem:[#allocation4 + $0x78] sm:$0xf] }
 0x542   : > { %v6165_v25 = vpop.permute.xlu2 %6164  ;;  %v6139_v41 = vpop.permute.xlu1 %6138  ;;  %v6612_v0 = vrot.slane %v6610_v7, 5  ;;  %v6592_v53 = vrot.slane %v6590_v49, 4  ;;  %v7405_v49 = vshll.u32 %v7353_v9, 16 }
 0x543   : > { %6246 = vst.msk [vmem:[#allocation5 + $0x70] sm:$0xf] %vm1957_vm1, %v6165_v25  ;;  %6722 = vrot.lane.b32.xlu0 %v6479_v56, %s10010_s29  ;;  %v6583_v25 = vor.u32 %v6582_v42, %v6579_v8  ;;  %v6979_v42 = vsel %vm10873_vm13, %v9377_v60, %v6978_v43  ;;  %v7599_v6 = vrot.slane %v7597_v33, 5  ;;  %v7380_v60 = vld [vmem:[#allocation4 + $0x84] sm:$0xf] }
 0x544   : > { %6233 = vst.msk [vmem:[#allocation5 + $0x8] sm:$0xf] %vm1957_vm1, %v6139_v41  ;;  %v6560_v41 = vrot.slane %v6559_v31, 4  ;;  %v6593_v24 = vor.u32 %v6592_v53, %v6588_v37  ;;  %v6617_v55 = vor.u32 %v6616_v46, %v6612_v0  ;;  %v6980_v31 = vrot.slane %v6978_v43, 4 }
 0x545   : > { %v6143_v18 = vpop.permute.xlu0 %6142  ;;  %v6584_v27 = vrot.slane %v6583_v25, 4  ;;  %v7178_v25 = vld [vmem:[#allocation4 + $0x7c] sm:$0xf]  ;;  %v7607_v46 = vshrl.u32 %v7378_v59, 16 }
 0x546   : > { %6235 = vst.msk [vmem:[#allocation5 + $0x18] sm:$0xf] %vm1957_vm1, %v6143_v18  ;;  %v6613_v18 = vsel %vm10180_vm3, %v6608_v62, %v6612_v0  ;;  %v6565_v16 = vsel %vm10180_vm3, %v6560_v41, %v12904_v58  ;;  %v6594_v58 = vrot.slane %v6593_v24, 4  ;;  %v6618_v63 = vrot.slane %v6617_v55, 4  ;;  %v7355_v55 = vld [vmem:[#allocation4 + $0x20] sm:$0x1] }
 0x547   : > { %v6589_v61 = vsel %vm10180_vm3, %v6584_v27, %v6588_v37  ;;  %v7603_v62 = vshll.u32 %v7378_v59, 16  ;;  %v6982_v15 = vsel %vm10873_vm13, %v6980_v31, %v6981_v39  ;;  %v7407_v41 = vrot.slane %v7405_v49, 5  ;;  %v7162_v27 = vld [vmem:[#allocation4 + $0x1c] sm:$0xf]  ;;  %v7356_v31 = vld [vmem:[#allocation4 + $0x24] sm:$0xf] }
 0x548   : > { %6732 = vrot.lane.b32.xlu2 %v6541_v57, %s10010_s29  ;;  %6724 = vrot.lane.b32.xlu1 %v6493_v17, %s10010_s29  ;;  %v6302_v57 = vld [vmem:[#allocation4 + $0xa4] sm:$0x1]  ;;  %v7609_v26 = vrot.slane %v7607_v46, 4  ;;  %v7426_v39 = vshrl.u32 %v7356_v31, 16  ;;  %v7180_v46 = vld [vmem:[#allocation4 + $0x88] sm:$0xf] }
 0x549   : > { %v6620_v17 = vshll.u32 %v6302_v57, 16 }
 0x54a   : > { %v6171_v32 = vpop.permute.xlu2 %6170  ;;  %v6145_v48 = vpop.permute.xlu1 %6144 }
 0x54b   : > { %6249 = vst.msk [vmem:[#allocation5 + $0x88] sm:$0xf] %vm1957_vm1, %v6171_v32  ;;  %6728 = vrot.lane.b32.xlu0 %v6517_v36, %s10010_s29  ;;  %v6599_v32 = vsel %vm10180_vm3, %v6594_v58, %v6598_v28  ;;  %v6622_v36 = vrot.slane %v6620_v17, 5 }
 0x54c   : > { %6236 = vst.msk [vmem:[#allocation5 + $0x20] sm:$0xf] %vm1957_vm1, %v6145_v48  ;;  %v6824_v48 = vld [vmem:[#allocation4 + $0xc] sm:$0xe] }
 0x54d   : > { %v6149_v47 = vpop.permute.xlu0 %6148  ;;  %v6623_v44 = vsel %vm10180_vm3, %v6618_v63, %v6622_v36  ;;  %v9369_v14 = vrot.slane %v6824_v48, 9  ;;  %v7421_v63 = vshll.u32 %v7355_v55, 16 }
 0x54e   : > { %6238 = vst.msk [vmem:[#allocation5 + $0x30] sm:$0xf] %vm1957_vm1, %v6149_v47  ;;  %v7594_v47 = vshrl.u32 %v7377_v35, 16 }
 0x54f   : > { %v6923_v23 = vsel %vm10873_vm13, %v9369_v14, %v6922_v1  ;;  %v7605_v1 = vrot.slane %v7603_v62, 5  ;;  %v7423_v35 = vrot.slane %v7421_v63, 5 }
 0x550   : > { %6738 = vrot.lane.b32.xlu2 %v6575_v19, %s10010_s29  ;;  %6730 = vrot.lane.b32.xlu1 %v6527_v21, %s10010_s29  ;;  %v7402_v21 = vshrl.u32 %v7353_v9, 16  ;;  %v7596_v7 = vrot.slane %v7594_v47, 4  ;;  %v6827_v9 = vld [vmem:[#allocation4 + $0x18] sm:$0xe] }
 0x552   : > { %v6177_v40 = vpop.permute.xlu2 %6176  ;;  %v6151_v56 = vpop.permute.xlu1 %6150  ;;  %v7404_v0 = vrot.slane %v7402_v21, 4  ;;  %v9370_v21 = vrot.slane %v6827_v9, 9 }
 0x553   : > { %6252 = vst.msk [vmem:[#allocation5 + $0xa0] sm:$0xf] %vm1957_vm1, %v6177_v40  ;;  %6734 = vrot.lane.b32.xlu0 %v6551_v11, %s10010_s29  ;;  %v7354_v11 = vld [vmem:[#allocation4 + $0x1c] sm:$0xf] }
 0x554   : > { %6239 = vst.msk [vmem:[#allocation5 + $0x38] sm:$0xf] %vm1957_vm1, %v6151_v56  ;;  %v7600_v56 = vor.u32 %v7599_v6, %v7596_v7  ;;  %v7411_v37 = vshll.u32 %v7354_v11, 16  ;;  %v7415_v53 = vshrl.u32 %v7354_v11, 16  ;;  %v7618_v7 = vshrl.u32 %v7380_v60, 16 }
 0x555   : > { %v6155_v38 = vpop.permute.xlu0 %6154  ;;  %v7621_v6 = vshll.u32 %v7380_v60, 16 }
 0x556   : > { %6241 = vst.msk [vmem:[#allocation5 + $0x48] sm:$0xf] %vm1957_vm1, %v6155_v38  ;;  %v7601_v30 = vrot.slane %v7600_v56, 4  ;;  %v7413_v24 = vrot.slane %v7411_v37, 5  ;;  %v7417_v57 = vrot.slane %v7415_v53, 4  ;;  %v7620_v62 = vrot.slane %v7618_v7, 4 }
 0x557   : > { %v6853_v56 = vld [vmem:[#allocation4 + $0x80] sm:$0x1]  ;;  %v7429_v37 = vshll.u32 %v7356_v31, 16  ;;  %v6830_v31 = vld [vmem:[#allocation4 + $0x24] sm:$0xe] }
 0x558   : > { %6744 = vrot.lane.b32.xlu2 %v6613_v18, %s10010_s29  ;;  %6736 = vrot.lane.b32.xlu1 %v6565_v16, %s10010_s29  ;;  %v7408_v16 = vor.u32 %v7407_v41, %v7404_v0  ;;  %v7606_v12 = vsel %vm10180_vm3, %v7601_v30, %v7605_v1  ;;  %v7418_v17 = vor.u32 %v7417_v57, %v7413_v24  ;;  %v7623_v0 = vrot.slane %v7621_v6, 5  ;;  %v7381_v41 = vld [vmem:[#allocation4 + $0x88] sm:$0xf] }
 0x559   : > { %v7627_v30 = vshll.u32 %v7381_v41, 16 }
 0x55a   : > { %v6183_v50 = vpop.permute.xlu2 %6182  ;;  %v6157_v2 = vpop.permute.xlu1 %6156  ;;  %v7409_v58 = vrot.slane %v7408_v16, 4 }
 0x55b   : > { %6255 = vst.msk [vmem:[#allocation5 + $0xb8] sm:$0xf] %vm1957_vm1, %v6183_v50  ;;  %6740 = vrot.lane.b32.xlu0 %v6589_v61, %s10010_s29  ;;  %v6828_v50 = vld [vmem:[#allocation4 + $0x1c] sm:$0xf] }
 0x55c   : > { %6242 = vst.msk [vmem:[#allocation5 + $0x50] sm:$0xf] %vm1957_vm1, %v6157_v2  ;;  %v6929_v2 = vrot.slane %v6828_v50, 5  ;;  %v7414_v28 = vsel %vm10180_vm3, %v7409_v58, %v7413_v24  ;;  %v7431_v24 = vrot.slane %v7429_v37, 5 }
 0x55d   : > { %v6161_v13 = vpop.permute.xlu0 %6160 }
 0x55e   : > { %6244 = vst.msk [vmem:[#allocation5 + $0x60] sm:$0xf] %vm1957_vm1, %v6161_v13  ;;  %v7379_v13 = vld [vmem:[#allocation4 + $0x80] sm:$0x1]  ;;  %v6930_v59 = vsel %vm10873_vm13, %v9370_v21, %v6929_v2 }
 0x560   : > { %7034 = vrot.lane.b32.xlu2 %v6926_v5, %s10011_s8  ;;  %6742 = vrot.lane.b32.xlu1 %v6599_v32, %s10010_s29  ;;  %v6829_v5 = vld [vmem:[#allocation4 + $0x20] sm:$0x1]  ;;  %v7610_v32 = vor.u32 %v7609_v26, %v7605_v1  ;;  %v7428_v1 = vrot.slane %v7426_v39, 4  ;;  %v7164_v26 = vld [vmem:[#allocation4 + $0x28] sm:$0xf]  ;;  %v9371_v39 = vrot.slane %v6830_v31, 9 }
 0x561   : > { %v6932_v51 = vrot.slane %v6829_v5, 5 }
 0x562   : > { %v6189_v29 = vpop.permute.xlu2 %6188  ;;  %v6163_v22 = vpop.permute.xlu1 %6162  ;;  %v7432_v58 = vor.u32 %v7431_v24, %v7428_v1  ;;  %v7384_v24 = vld [vmem:[#allocation4 + $0x94] sm:$0xf] }
 0x563   : > { %6258 = vst.msk [vmem:[#allocation5 + $0xd0] sm:$0xf] %vm1957_vm1, %v6189_v29  ;;  %6746 = vrot.lane.b32.xlu0 %v6623_v44, %s10010_s29  ;;  %v6931_v29 = vrot.slane %v6929_v2, 4  ;;  %v7419_v44 = vrot.slane %v7418_v17, 4 }
 0x564   : > { %6245 = vst.msk [vmem:[#allocation5 + $0x68] sm:$0xf] %vm1957_vm1, %v6163_v22  ;;  %v7613_v22 = vshll.u32 %v7379_v13, 16 }
 0x565   : > { %v6167_v54 = vpop.permute.xlu0 %6166  ;;  %v6933_v52 = vsel %vm10873_vm13, %v6931_v29, %v6932_v51  ;;  %v7424_v14 = vsel %vm10180_vm3, %v7419_v44, %v7423_v35  ;;  %v7179_v29 = vld [vmem:[#allocation4 + $0x84] sm:$0xf]  ;;  %v7433_v44 = vrot.slane %v7432_v58, 4 }
 0x566   : > { %6247 = vst.msk [vmem:[#allocation5 + $0x78] sm:$0xf] %vm1957_vm1, %v6167_v54  ;;  %v7611_v54 = vrot.slane %v7610_v32, 4  ;;  %v7615_v43 = vrot.slane %v7613_v22, 5  ;;  %v7358_v32 = vld [vmem:[#allocation4 + $0x2c] sm:$0x1] }
 0x568   : > { %7225 = vrot.lane.b32.xlu2 %v7161_v34, %s10012_s17  ;;  %7032 = vrot.lane.b32.xlu1 %v6923_v23, %s10011_s8  ;;  %v7616_v47 = vsel %vm10180_vm3, %v7611_v54, %v7615_v43  ;;  %v6852_v23 = vld [vmem:[#allocation4 + $0x7c] sm:$0xf]  ;;  %v7445_v54 = vshll.u32 %v7358_v32, 16 }
 0x56a   : > { %v6195_v8 = vpop.permute.xlu2 %6194  ;;  %v6169_v19 = vpop.permute.xlu1 %6168  ;;  %v7447_v60 = vrot.slane %v7445_v54, 5 }
 0x56b   : > { %6261 = vst.msk [vmem:[#allocation5 + $0xe8] sm:$0xf] %vm1957_vm1, %v6195_v8  ;;  %7064 = vrot.lane.b32.xlu0 %v6979_v42, %s10011_s8  ;;  %v6851_v42 = vld [vmem:[#allocation4 + $0x78] sm:$0xe] }
 0x56c   : > { %6248 = vst.msk [vmem:[#allocation5 + $0x80] sm:$0xf] %vm1957_vm1, %v6169_v19  ;;  %v6985_v19 = vrot.slane %v6852_v23, 5  ;;  %v9378_v49 = vrot.slane %v6851_v42, 9 }
 0x56d   : > { %v6173_v40 = vpop.permute.xlu0 %6172 }
 0x56e   : > { %6250 = vst.msk [vmem:[#allocation5 + $0x90] sm:$0xf] %vm1957_vm1, %v6173_v40  ;;  %v6986_v11 = vsel %vm10873_vm13, %v9378_v49, %v6985_v19  ;;  %v7383_v49 = vld [vmem:[#allocation4 + $0x90] sm:$0xf] }
 0x570   : > { %7259 = vrot.lane.b32.xlu2 %v7178_v25, %s10012_s17  ;;  %7066 = vrot.lane.b32.xlu1 %v6982_v15, %s10011_s8  ;;  %v6987_v15 = vrot.slane %v6985_v19, 4 }
 0x572   : > { %v6697_v38 = vpop.permute.xlu2 %6696  ;;  %v6175_v18 = vpop.permute.xlu1 %6174 }
 0x573   : > { %6792 = vst.msk [vmem:[#allocation5] sm:$0xf] %vm2518_vm2, %v6697_v38  ;;  %7227 = vrot.lane.b32.xlu0 %v7162_v27, %s10012_s17  ;;  %v7357_v38 = vld [vmem:[#allocation4 + $0x28] sm:$0xf]  ;;  %v6988_v27 = vrot.slane %v6853_v56, 5 }
 0x574   : > { %6251 = vst.msk [vmem:[#allocation5 + $0x98] sm:$0xf] %vm1957_vm1, %v6175_v18  ;;  %v7624_v18 = vor.u32 %v7623_v0, %v7620_v62  ;;  %v7435_v57 = vshll.u32 %v7357_v38, 16  ;;  %v7439_v50 = vshrl.u32 %v7357_v38, 16  ;;  %v7165_v56 = vld [vmem:[#allocation4 + $0x30] sm:$0xf] }
 0x575   : > { %v6179_v61 = vpop.permute.xlu0 %6178  ;;  %v6989_v16 = vsel %vm10873_vm13, %v6987_v15, %v6988_v27  ;;  %v7642_v62 = vshrl.u32 %v7383_v49, 16  ;;  %v7645_v0 = vshll.u32 %v7383_v49, 16  ;;  %v7359_v15 = vld [vmem:[#allocation4 + $0x30] sm:$0xf]  ;;  %v9728_v49 = vld [vmem:[%s13674_s2 + $0x38] sm:$0xff] }
 0x576   : > { %6253 = vst.msk [vmem:[#allocation5 + $0xa8] sm:$0xf] %vm1957_vm1, %v6179_v61  ;;  %v7625_v2 = vrot.slane %v7624_v18, 4  ;;  %v7437_v17 = vrot.slane %v7435_v57, 5  ;;  %v7441_v13 = vrot.slane %v7439_v50, 4  ;;  %v7450_v27 = vshrl.u32 %v7359_v15, 16  ;;  %8369 = vmatpush.bf16.msrb.mxu1 %v9728_v49 }
 0x577   : > { %v6856_v18 = vld [vmem:[#allocation4 + $0x8c] sm:$0x1]  ;;  %v7647_v1 = vrot.slane %v7645_v0, 5  ;;  %v7453_v57 = vshll.u32 %v7359_v15, 16  ;;  %v9753_v0 = vld [vmem:[%s13674_s2 + $0x38] sm:$0xff] }
 0x578   : > { %7817 = vrot.lane.b32.xlu2 %v7606_v12, %s10013_s11  ;;  %7257 = vrot.lane.b32.xlu1 %v7177_v20, %s10012_s17  ;;  %v7631_v12 = vshrl.u32 %v7381_v41, 16  ;;  %v7629_v20 = vrot.slane %v7627_v30, 5  ;;  %v7442_v22 = vor.u32 %v7441_v13, %v7437_v17  ;;  %v7438_v35 = vsel %vm10180_vm3, %v7433_v44, %v7437_v17 }
 0x579   : > { %v7644_v30 = vrot.slane %v7642_v62, 4  ;;  %v7455_v17 = vrot.slane %v7453_v57, 5  ;;  %v9727_v62 = vld [vmem:[%s13674_s2 + $0x30] sm:$0xff]  ;;  %8771 = vmatpush.bf16.msrb.mxu0 %v9753_v0 }
 0x57a   : > { %v6703_v4 = vpop.permute.xlu2 %6702  ;;  %v6181_v36 = vpop.permute.xlu1 %6180  ;;  %v7633_v63 = vrot.slane %v7631_v12, 4  ;;  %v7630_v5 = vsel %vm10180_vm3, %v7625_v2, %v7629_v20  ;;  %v7182_v12 = vld [vmem:[#allocation4 + $0x94] sm:$0xf]  ;;  %v7651_v2 = vshll.u32 %v7384_v24, 16  ;;  %8370 = vmatpush.bf16.msrb.mxu1 %v9727_v62  ;;  %v7167_v57 = vld [vmem:[#allocation4 + $0x3c] sm:$0xf] }
 0x57b   : > { %6795 = vst.msk [vmem:[#allocation5 + $0x18] sm:$0xf] %vm2518_vm2, %v6703_v4  ;;  %7785 = vrot.lane.b32.xlu0 %v7414_v28, %s10013_s11  ;;  %v6831_v4 = vld [vmem:[#allocation4 + $0x28] sm:$0xf]  ;;  %v7364_v62 = vld [vmem:[#allocation4 + $0x44] sm:$0x1] }
 0x57c   : > { %6254 = vst.msk [vmem:[#allocation5 + $0xb0] sm:$0xf] %vm1957_vm1, %v6181_v36  ;;  %v6936_v36 = vrot.slane %v6831_v4, 5 }
 0x57d   : > { %v6185_v48 = vpop.permute.xlu0 %6184 }
 0x57e   : > { %6256 = vst.msk [vmem:[#allocation5 + $0xc0] sm:$0xf] %vm1957_vm1, %v6185_v48  ;;  %v7382_v48 = vld [vmem:[#allocation4 + $0x8c] sm:$0x1]  ;;  %v6937_v41 = vsel %vm10873_vm13, %v9371_v39, %v6936_v36 }
 0x580   : > { %7038 = vrot.lane.b32.xlu2 %v6933_v52, %s10011_s8  ;;  %7787 = vrot.lane.b32.xlu1 %v7424_v14, %s10013_s11  ;;  %v6832_v52 = vld [vmem:[#allocation4 + $0x2c] sm:$0x1]  ;;  %v7634_v14 = vor.u32 %v7633_v63, %v7629_v20  ;;  %v7452_v20 = vrot.slane %v7450_v27, 4  ;;  %v7166_v63 = vld [vmem:[#allocation4 + $0x34] sm:$0xf] }
 0x581   : > { %v6939_v23 = vrot.slane %v6832_v52, 5  ;;  %v7386_v27 = vld [vmem:[#allocation4 + $0x9c] sm:$0xf] }
 0x582   : > { %v6709_v34 = vpop.permute.xlu2 %6708  ;;  %v6187_v33 = vpop.permute.xlu1 %6186  ;;  %v7456_v44 = vor.u32 %v7455_v17, %v7452_v20  ;;  %v9751_v20 = vld [vmem:[%s13674_s2 + $0x28] sm:$0xff] }
 0x583   : > { %6798 = vst.msk [vmem:[#allocation5 + $0x30] sm:$0xf] %vm2518_vm2, %v6709_v34  ;;  %7819 = vrot.lane.b32.xlu0 %v7616_v47, %s10013_s11  ;;  %v6938_v34 = vrot.slane %v6936_v36, 4  ;;  %v7443_v47 = vrot.slane %v7442_v22, 4 }
 0x584   : > { %6257 = vst.msk [vmem:[#allocation5 + $0xc8] sm:$0xf] %vm1957_vm1, %v6187_v33  ;;  %v7637_v33 = vshll.u32 %v7382_v48, 16 }
 0x585   : > { %v6191_v8 = vpop.permute.xlu0 %6190  ;;  %v6940_v42 = vsel %vm10873_vm13, %v6938_v34, %v6939_v23  ;;  %v7448_v21 = vsel %vm10180_vm3, %v7443_v47, %v7447_v60  ;;  %v7181_v34 = vld [vmem:[#allocation4 + $0x90] sm:$0xf]  ;;  %v7457_v47 = vrot.slane %v7456_v44, 4 }
 0x586   : > { %6259 = vst.msk [vmem:[#allocation5 + $0xd8] sm:$0xf] %vm1957_vm1, %v6191_v8  ;;  %v7635_v8 = vrot.slane %v7634_v14, 4  ;;  %v7639_v19 = vrot.slane %v7637_v33, 5  ;;  %v7361_v14 = vld [vmem:[#allocation4 + $0x38] sm:$0x1] }
 0x588   : > { %7229 = vrot.lane.b32.xlu2 %v7163_v3, %s10012_s17  ;;  %7036 = vrot.lane.b32.xlu1 %v6930_v59, %s10011_s8  ;;  %v7640_v7 = vsel %vm10180_vm3, %v7635_v8, %v7639_v19  ;;  %v6855_v59 = vld [vmem:[#allocation4 + $0x88] sm:$0xf]  ;;  %v7469_v8 = vshll.u32 %v7361_v14, 16 }
 0x58a   : > { %v6715_v40 = vpop.permute.xlu2 %6714  ;;  %v6193_v25 = vpop.permute.xlu1 %6192 }
 0x58b   : > { %6801 = vst.msk [vmem:[#allocation5 + $0x48] sm:$0xf] %vm2518_vm2, %v6715_v40  ;;  %7068 = vrot.lane.b32.xlu0 %v6986_v11, %s10011_s8  ;;  %v6854_v11 = vld [vmem:[#allocation4 + $0x84] sm:$0xe] }
 0x58c   : > { %6260 = vst.msk [vmem:[#allocation5 + $0xe0] sm:$0xf] %vm1957_vm1, %v6193_v25  ;;  %v6992_v25 = vrot.slane %v6855_v59, 5  ;;  %v9379_v37 = vrot.slane %v6854_v11, 9 }
 0x58d   : > { %v6197_v53 = vpop.permute.xlu0 %6196 }
 0x58e   : > { %6262 = vst.msk [vmem:[#allocation5 + $0xf0] sm:$0xf] %vm1957_vm1, %v6197_v53  ;;  %v6993_v38 = vsel %vm10873_vm13, %v9379_v37, %v6992_v25 }
 0x590   : > { %7263 = vrot.lane.b32.xlu2 %v7180_v46, %s10012_s17  ;;  %7070 = vrot.lane.b32.xlu1 %v6989_v16, %s10011_s8  ;;  %v6994_v16 = vrot.slane %v6992_v25, 4 }
 0x592   : > { %v6721_v61 = vpop.permute.xlu2 %6720  ;;  %v6199_v55 = vpop.permute.xlu1 %6198 }
 0x593   : > { %6804 = vst.msk [vmem:[#allocation5 + $0x60] sm:$0xf] %vm2518_vm2, %v6721_v61  ;;  %7231 = vrot.lane.b32.xlu0 %v7164_v26, %s10012_s17  ;;  %v7360_v61 = vld [vmem:[#allocation4 + $0x34] sm:$0xf]  ;;  %v6995_v26 = vrot.slane %v6856_v18, 5 }
 0x594   : > { %6263 = vst.msk [vmem:[#allocation5 + $0xf8] sm:$0xf] %vm1957_vm1, %v6199_v55  ;;  %v7648_v55 = vor.u32 %v7647_v1, %v7644_v30  ;;  %v7459_v13 = vshll.u32 %v7360_v61, 16  ;;  %v7463_v4 = vshrl.u32 %v7360_v61, 16  ;;  %v6857_v18 = vld [vmem:[#allocation4 + $0x90] sm:$0xe] }
 0x595   : > { %v6699_v28 = vpop.permute.xlu0 %6698  ;;  %v6996_v58 = vsel %vm10873_vm13, %v6994_v16, %v6995_v26  ;;  %v9726_v30 = vld [vmem:[%s13674_s2 + $0x28] sm:$0xff]  ;;  %v9752_v1 = vld [vmem:[%s13674_s2 + $0x30] sm:$0xff]  ;;  %v7669_v61 = vshll.u32 %v7386_v27, 16 }
 0x596   : > { %6793 = vst.msk [vmem:[#allocation5 + $0x8] sm:$0xf] %vm2518_vm2, %v6699_v28  ;;  %v7649_v36 = vrot.slane %v7648_v55, 4  ;;  %v7461_v22 = vrot.slane %v7459_v13, 5  ;;  %v7465_v48 = vrot.slane %v7463_v4, 4  ;;  %8371 = vmatpush.bf16.msrb.mxu1 %v9726_v30  ;;  %8772 = vmatpush.bf16.msrb.mxu0 %v9752_v1  ;;  %v7493_v1 = vshll.u32 %v7364_v62, 16 }
 0x597   : > { %v7362_v55 = vld [vmem:[#allocation4 + $0x3c] sm:$0xf]  ;;  %v7363_v13 = vld [vmem:[#allocation4 + $0x40] sm:$0xf] }
 0x598   : > { %7821 = vrot.lane.b32.xlu2 %v7630_v5, %s10013_s11  ;;  %7261 = vrot.lane.b32.xlu1 %v7179_v29, %s10012_s17  ;;  %v7655_v5 = vshrl.u32 %v7384_v24, 16  ;;  %v7653_v29 = vrot.slane %v7651_v2, 5  ;;  %v7466_v33 = vor.u32 %v7465_v48, %v7461_v22  ;;  %v7462_v60 = vsel %vm10180_vm3, %v7457_v47, %v7461_v22  ;;  %v9725_v2 = vld [vmem:[%s13674_s2 + $0x20] sm:$0xff]  ;;  %v9724_v48 = vld [vmem:[%s13674_s2 + $0x18] sm:$0xff] }
 0x599   : > { %v7477_v44 = vshll.u32 %v7362_v55, 16 }
 0x59a   : > { %v6727_v51 = vpop.permute.xlu2 %6726  ;;  %v6701_v43 = vpop.permute.xlu1 %6700  ;;  %v7657_v54 = vrot.slane %v7655_v5, 4  ;;  %v7654_v52 = vsel %vm10180_vm3, %v7649_v36, %v7653_v29  ;;  %v7671_v5 = vrot.slane %v7669_v61, 5  ;;  %8372 = vmatpush.bf16.msrb.mxu1 %v9725_v2  ;;  %8773 = vmatpush.bf16.msrb.mxu0 %v9751_v20  ;;  %v7495_v2 = vrot.slane %v7493_v1, 5 }
 0x59b   : > { %6807 = vst.msk [vmem:[#allocation5 + $0x78] sm:$0xf] %vm2518_vm2, %v6727_v51  ;;  %7789 = vrot.lane.b32.xlu0 %v7438_v35, %s10013_s11  ;;  %v6834_v51 = vld [vmem:[#allocation4 + $0x34] sm:$0xf] }
 0x59c   : > { %6794 = vst.msk [vmem:[#allocation5 + $0x10] sm:$0xf] %vm2518_vm2, %v6701_v43  ;;  %v6943_v43 = vrot.slane %v6834_v51, 5  ;;  %v9750_v51 = vld [vmem:[%s13674_s2 + $0x20] sm:$0xff] }
 0x59d   : > { %v6705_v9 = vpop.permute.xlu0 %6704 }
 0x59e   : > { %6796 = vst.msk [vmem:[#allocation5 + $0x20] sm:$0xf] %vm2518_vm2, %v6705_v9  ;;  %v7385_v9 = vld [vmem:[#allocation4 + $0x98] sm:$0x1]  ;;  %8373 = vmatpush.bf16.msrb.mxu1 %v9724_v48  ;;  %8774 = vmatpush.bf16.msrb.mxu0 %v9750_v51 }
 0x5a0   : > { %7042 = vrot.lane.b32.xlu2 %v6940_v42, %s10011_s8  ;;  %7791 = vrot.lane.b32.xlu1 %v7448_v21, %s10013_s11  ;;  %v6835_v42 = vld [vmem:[#allocation4 + $0x38] sm:$0x1]  ;;  %v7658_v21 = vor.u32 %v7657_v54, %v7653_v29  ;;  %v7387_v29 = vld [vmem:[#allocation4 + $0xa0] sm:$0xf] }
 0x5a1   : > { %v6946_v59 = vrot.slane %v6835_v42, 5  ;;  %v7184_v54 = vld [vmem:[#allocation4 + $0xa0] sm:$0xf]  ;;  %v7675_v14 = vshll.u32 %v7387_v29, 16 }
 0x5a2   : > { %v6733_v3 = vpop.permute.xlu2 %6732  ;;  %v6707_v6 = vpop.permute.xlu1 %6706  ;;  %v7659_v11 = vrot.slane %v7658_v21, 4  ;;  %v7168_v42 = vld [vmem:[#allocation4 + $0x40] sm:$0xf]  ;;  %v7679_v21 = vshrl.u32 %v7387_v29, 16  ;;  %v7389_v29 = vld [vmem:[#allocation4 + $0xa8] sm:$0xf] }
 0x5a3   : > { %6810 = vst.msk [vmem:[#allocation5 + $0x90] sm:$0xf] %vm2518_vm2, %v6733_v3  ;;  %7823 = vrot.lane.b32.xlu0 %v7640_v7, %s10013_s11  ;;  %v6945_v3 = vrot.slane %v6943_v43, 4  ;;  %v7467_v7 = vrot.slane %v7466_v33, 4  ;;  %v7479_v33 = vrot.slane %v7477_v44, 5 }
 0x5a4   : > { %6797 = vst.msk [vmem:[#allocation5 + $0x28] sm:$0xf] %vm2518_vm2, %v6707_v6  ;;  %v7661_v6 = vshll.u32 %v7385_v9, 16  ;;  %v7487_v9 = vshrl.u32 %v7363_v13, 16 }
 0x5a5   : > { %v6711_v40 = vpop.permute.xlu0 %6710  ;;  %v6947_v39 = vsel %vm10873_vm13, %v6945_v3, %v6946_v59 }
 0x5a6   : > { %6799 = vst.msk [vmem:[#allocation5 + $0x38] sm:$0xf] %vm2518_vm2, %v6711_v40  ;;  %v7471_v40 = vrot.slane %v7469_v8, 5  ;;  %v7489_v49 = vrot.slane %v7487_v9, 4 }
 0x5a8   : > { %7233 = vrot.lane.b32.xlu2 %v7165_v56, %s10012_s17  ;;  %7040 = vrot.lane.b32.xlu1 %v6937_v41, %s10011_s8  ;;  %v7472_v25 = vsel %vm10180_vm3, %v7467_v7, %v7471_v40  ;;  %v7663_v56 = vrot.slane %v7661_v6, 5  ;;  %v7677_v7 = vrot.slane %v7675_v14, 5  ;;  %v13131_v6 = vld [vmem:[#allocation4 + $0x40] sm:$0xf]  ;;  %v9722_v40 = vld [vmem:[%s13674_s2 + $0x8] sm:$0xff] }
 0x5a9   : > { %v6950_v0 = vrot.slane %v13131_v6, 5  ;;  %v7365_v14 = vld [vmem:[#allocation4 + $0x48] sm:$0xf] }
 0x5aa   : > { %v6739_v53 = vpop.permute.xlu2 %6738  ;;  %v6713_v46 = vpop.permute.xlu1 %6712  ;;  %v7664_v41 = vsel %vm10180_vm3, %v7659_v11, %v7663_v56  ;;  %v9748_v11 = vld [vmem:[%s13674_s2 + $0x10] sm:$0xff]  ;;  %v7498_v9 = vshrl.u32 %v7365_v14, 16  ;;  %v7501_v6 = vshll.u32 %v7365_v14, 16 }
 0x5ab   : > { %6813 = vst.msk [vmem:[#allocation5 + $0xa8] sm:$0xf] %vm2518_vm2, %v6739_v53  ;;  %7072 = vrot.lane.b32.xlu0 %v6993_v38, %s10011_s8  ;;  %v6833_v53 = vld [vmem:[#allocation4 + $0x30] sm:$0xe]  ;;  %v6858_v38 = vld [vmem:[#allocation4 + $0x94] sm:$0xf] }
 0x5ac   : > { %6800 = vst.msk [vmem:[#allocation5 + $0x40] sm:$0xf] %vm2518_vm2, %v6713_v46  ;;  %v9372_v16 = vrot.slane %v6833_v53, 9  ;;  %v6999_v24 = vrot.slane %v6858_v38, 5  ;;  %v7388_v38 = vld [vmem:[#allocation4 + $0xa4] sm:$0x1] }
 0x5ad   : > { %v6717_v50 = vpop.permute.xlu0 %6716 }
 0x5ae   : > { %6802 = vst.msk [vmem:[#allocation5 + $0x50] sm:$0xf] %vm2518_vm2, %v6717_v50  ;;  %v7666_v50 = vshrl.u32 %v7386_v27, 16  ;;  %v6944_v26 = vsel %vm10873_vm13, %v9372_v16, %v6943_v43  ;;  %v7001_v36 = vrot.slane %v6999_v24, 4  ;;  %v7483_v43 = vshll.u32 %v7363_v13, 16  ;;  %v9721_v27 = vld [vmem:[%s13674_s2] sm:$0xff] }
 0x5af   : > { %v6838_v16 = vld [vmem:[#allocation4 + $0x44] sm:$0x1] }
 0x5b0   : > { %7267 = vrot.lane.b32.xlu2 %v7182_v12, %s10012_s17  ;;  %7074 = vrot.lane.b32.xlu1 %v6996_v58, %s10011_s8  ;;  %v9380_v12 = vrot.slane %v6857_v18, 9  ;;  %v7485_v59 = vrot.slane %v7483_v43, 5 }
 0x5b2   : > { %v6745_v28 = vpop.permute.xlu2 %6744  ;;  %v6719_v32 = vpop.permute.xlu1 %6718  ;;  %v7000_v17 = vsel %vm10873_vm13, %v9380_v12, %v6999_v24  ;;  %v7490_v53 = vor.u32 %v7489_v49, %v7485_v59 }
 0x5b3   : > { %6816 = vst.msk [vmem:[#allocation5 + $0xc0] sm:$0xf] %vm2518_vm2, %v6745_v28  ;;  %7235 = vrot.lane.b32.xlu0 %v7166_v63, %s10012_s17  ;;  %v6859_v28 = vld [vmem:[#allocation4 + $0x98] sm:$0x1]  ;;  %v7668_v63 = vrot.slane %v7666_v50, 4  ;;  %v6952_v50 = vrot.slane %v6950_v0, 4 }
 0x5b4   : > { %6803 = vst.msk [vmem:[#allocation5 + $0x58] sm:$0xf] %vm2518_vm2, %v6719_v32  ;;  %v7474_v32 = vshrl.u32 %v7362_v55, 16  ;;  %v7491_v61 = vrot.slane %v7490_v53, 4  ;;  %v6953_v55 = vrot.slane %v6838_v16, 5 }
 0x5b5   : > { %v6723_v35 = vpop.permute.xlu0 %6722 }
 0x5b6   : > { %6805 = vst.msk [vmem:[#allocation5 + $0x68] sm:$0xf] %vm2518_vm2, %v6723_v35  ;;  %v7002_v35 = vrot.slane %v6859_v28, 5  ;;  %v7476_v47 = vrot.slane %v7474_v32, 4  ;;  %v6954_v13 = vsel %vm10873_vm13, %v6952_v50, %v6953_v55  ;;  %v6836_v32 = vld [vmem:[#allocation4 + $0x3c] sm:$0xe] }
 0x5b7   : > { %v9373_v48 = vrot.slane %v6836_v32, 9  ;;  %v7367_v55 = vld [vmem:[#allocation4 + $0x50] sm:$0x1] }
 0x5b8   : > { %7825 = vrot.lane.b32.xlu2 %v7654_v52, %s10013_s11  ;;  %7265 = vrot.lane.b32.xlu1 %v7181_v34, %s10012_s17  ;;  %v7672_v52 = vor.u32 %v7671_v5, %v7668_v63  ;;  %v7003_v34 = vsel %vm10873_vm13, %v7001_v36, %v7002_v35  ;;  %v6861_v36 = vld [vmem:[#allocation4 + $0xa0] sm:$0xf]  ;;  %v7169_v35 = vld [vmem:[#allocation4 + $0x48] sm:$0xf] }
 0x5b9   : > { %v7006_v51 = vrot.slane %v6861_v36, 5  ;;  %v6951_v43 = vsel %vm10873_vm13, %v9373_v48, %v6950_v0  ;;  %v7517_v36 = vshll.u32 %v7367_v55, 16 }
 0x5ba   : > { %v7035_v23 = vpop.permute.xlu2 %7034  ;;  %v6725_v19 = vpop.permute.xlu1 %6724  ;;  %v7673_v3 = vrot.slane %v7672_v52, 4  ;;  %v7693_v52 = vshll.u32 %v7389_v29, 16 }
 0x5bb   : > { %7129 = vst.msk [vmem:[#allocation5 + $0x8] sm:$0xf] %vm2855_vm4, %v7035_v23  ;;  %7793 = vrot.lane.b32.xlu0 %v7462_v60, %s10013_s11  ;;  %v9723_v23 = vld [vmem:[%s13674_s2 + $0x10] sm:$0xff]  ;;  %v9749_v60 = vld [vmem:[%s13674_s2 + $0x18] sm:$0xff] }
 0x5bc   : > { %6806 = vst.msk [vmem:[#allocation5 + $0x70] sm:$0xf] %vm2518_vm2, %v6725_v19  ;;  %8374 = vmatpush.bf16.msrb.mxu1 %v9723_v23  ;;  %8775 = vmatpush.bf16.msrb.mxu0 %v9749_v60  ;;  %v7678_v56 = vsel %vm10180_vm3, %v7673_v3, %v7677_v7  ;;  %v6862_v60 = vld [vmem:[#allocation4 + $0xa4] sm:$0x1]  ;;  %v7008_v3 = vrot.slane %v7006_v51, 4 }
 0x5bd   : > { %v6729_v31 = vpop.permute.xlu0 %6728 }
 0x5be   : > { %6808 = vst.msk [vmem:[#allocation5 + $0x80] sm:$0xf] %vm2518_vm2, %v6729_v31  ;;  %v7480_v31 = vor.u32 %v7479_v33, %v7476_v47  ;;  %v7366_v33 = vld [vmem:[#allocation4 + $0x4c] sm:$0xf] }
 0x5bf   : > { %v7511_v49 = vshrl.u32 %v7366_v33, 16 }
 0x5c0   : > { %7046 = vrot.lane.b32.xlu2 %v6947_v39, %s10011_s8  ;;  %7795 = vrot.lane.b32.xlu1 %v7472_v25, %s10013_s11  ;;  %v7681_v25 = vrot.slane %v7679_v21, 4  ;;  %v7695_v21 = vrot.slane %v7693_v52, 5 }
 0x5c1   : > { %8375 = vmatpush.bf16.msrb.mxu1 %v9722_v40  ;;  %8776 = vmatpush.bf16.msrb.mxu0 %v9748_v11  ;;  %v7009_v40 = vrot.slane %v6862_v60, 5  ;;  %v7513_v53 = vrot.slane %v7511_v49, 4 }
 0x5c2   : > { %v13082_v15 = vpop.permute.xlu2 %7225  ;;  %v6731_v37 = vpop.permute.xlu1 %6730  ;;  %v7682_v24 = vor.u32 %v7681_v25, %v7677_v7  ;;  %v7390_v7 = vld [vmem:[#allocation4 + $0xac] sm:$0xf] }
 0x5c3   : > { %7827 = vrot.lane.b32.xlu0 %v7664_v41, %s10013_s11  ;;  %6809 = vst.msk [vmem:[#allocation5 + $0x88] sm:$0xf] %vm2518_vm2, %v6731_v37  ;;  %v7183_v41 = vld [vmem:[#allocation4 + $0x9c] sm:$0xf]  ;;  %v7481_v37 = vrot.slane %v7480_v31, 4  ;;  %v7699_v62 = vshll.u32 %v7390_v7, 16  ;;  %v7010_v0 = vsel %vm10873_vm13, %v7008_v3, %v7009_v40 }
 0x5c4   : > { %v7683_v20 = vrot.slane %v7682_v24, 4  ;;  %v7186_v25 = vld [vmem:[#allocation4 + $0xac] sm:$0xf]  ;;  %v6863_v40 = vld [vmem:[#allocation4 + $0xa8] sm:$0xe] }
 0x5c5   : > { %v6735_v46 = vpop.permute.xlu0 %6734  ;;  %v7486_v30 = vsel %vm10180_vm3, %v7481_v37, %v7485_v59  ;;  %8376 = vmatpush.bf16.msrb.mxu1 %v9721_v27  ;;  %v7507_v59 = vshll.u32 %v7366_v33, 16  ;;  %v7503_v37 = vrot.slane %v7501_v6, 5  ;;  %v7170_v27 = vld [vmem:[#allocation4 + $0x4c] sm:$0xf]  ;;  %v7701_v24 = vrot.slane %v7699_v62, 5 }
 0x5c6   : > { %6811 = vst.msk [vmem:[#allocation5 + $0x98] sm:$0xf] %vm2518_vm2, %v6735_v46  ;;  %v9747_v46 = vld [vmem:[%s13674_s2 + $0x8] sm:$0xff] }
 0x5c7   : > { %8777 = vmatpush.bf16.msrb.mxu0 %v9747_v46  ;;  %v7703_v46 = vshrl.u32 %v7390_v7, 16 }
 0x5c8   : > { %7237 = vrot.lane.b32.xlu2 %v7167_v57, %s10012_s17  ;;  %7044 = vrot.lane.b32.xlu1 %v6944_v26, %s10011_s8  ;;  %v7685_v26 = vshll.u32 %v7388_v38, 16 }
 0x5ca   : > { %v13105_v58 = vpop.permute.xlu2 %7259  ;;  %v6737_v4 = vpop.permute.xlu1 %6736  ;;  %v7687_v28 = vrot.slane %v7685_v26, 5 }
 0x5cb   : > { %7076 = vrot.lane.b32.xlu0 %v7000_v17, %s10011_s8  ;;  %6812 = vst.msk [vmem:[#allocation5 + $0xa0] sm:$0xf] %vm2518_vm2, %v6737_v4  ;;  %v9746_v17 = vld [vmem:[%s13674_s2] sm:$0xff]  ;;  %v7496_v4 = vsel %vm10180_vm3, %v7491_v61, %v7495_v2 }
 0x5cc   : > { %8778 = vmatpush.bf16.msrb.mxu0 %v9746_v17  ;;  %v7688_v63 = vsel %vm10180_vm3, %v7683_v20, %v7687_v28  ;;  %v7705_v20 = vrot.slane %v7703_v46, 4 }
 0x5cd   : > { %v6741_v22 = vpop.permute.xlu0 %6740 }
 0x5ce   : > { %6814 = vst.msk [vmem:[#allocation5 + $0xb0] sm:$0xf] %vm2518_vm2, %v6741_v22  ;;  %v6860_v22 = vld [vmem:[#allocation4 + $0x9c] sm:$0xe] }
 0x5d0   : > { %7271 = vrot.lane.b32.xlu2 %v7184_v54, %s10012_s17  ;;  %7078 = vrot.lane.b32.xlu1 %v7003_v34, %s10011_s8  ;;  %v7690_v54 = vshrl.u32 %v7389_v29, 16  ;;  %v9381_v34 = vrot.slane %v6860_v22, 9  ;;  %v7391_v29 = vld [vmem:[#allocation4 + $0xb0] sm:$0x1] }
 0x5d2   : > { %v13128_v8 = vpop.permute.xlu2 %7817  ;;  %v6743_v19 = vpop.permute.xlu1 %6742 }
 0x5d3   : > { %7239 = vrot.lane.b32.xlu0 %v7168_v42, %s10012_s17  ;;  %6815 = vst.msk [vmem:[#allocation5 + $0xb8] sm:$0xf] %vm2518_vm2, %v6743_v19  ;;  %v7692_v42 = vrot.slane %v7690_v54, 4  ;;  %v6304_v19 = vld [vmem:[#allocation4 + $0xac] sm:$0xf] }
 0x5d4   : > { %v6634_v11 = vshll.u32 %v6304_v19, 16 }
 0x5d5   : > { %v6747_v39 = vpop.permute.xlu0 %6746 }
 0x5d6   : > { %6817 = vst.msk [vmem:[#allocation5 + $0xc8] sm:$0xf] %vm2518_vm2, %v6747_v39  ;;  %v6638_v39 = vshrl.u32 %v6304_v19, 16 }
 0x5d8   : > { %7829 = vrot.lane.b32.xlu2 %v7678_v56, %s10013_s11  ;;  %7269 = vrot.lane.b32.xlu1 %v7183_v41, %s10012_s17  ;;  %v7696_v56 = vor.u32 %v7695_v21, %v7692_v42  ;;  %v7500_v41 = vrot.slane %v7498_v9, 4  ;;  %v7519_v42 = vrot.slane %v7517_v36, 5 }
 0x5da   : > { %v7039_v18 = vpop.permute.xlu2 %7038  ;;  %v7033_v57 = vpop.permute.xlu1 %7032  ;;  %v7697_v16 = vrot.slane %v7696_v56, 4  ;;  %v7504_v50 = vor.u32 %v7503_v37, %v7500_v41  ;;  %v6839_v41 = vld [vmem:[#allocation4 + $0x48] sm:$0xe] }
 0x5db   : > { %7131 = vst.msk [vmem:[#allocation5 + $0x18] sm:$0xf] %vm2855_vm4, %v7039_v18  ;;  %7797 = vrot.lane.b32.xlu0 %v7486_v30, %s10013_s11  ;;  %v13197_v18 = vrot.slane %v6634_v11, 5  ;;  %v6640_v30 = vrot.slane %v6638_v39, 4  ;;  %v9374_v46 = vrot.slane %v6839_v41, 9 }
 0x5dc   : > { %7128 = vst.msk [vmem:[#allocation5] sm:$0xf] %vm2855_vm4, %v7033_v57  ;;  %v6303_v57 = vld [vmem:[#allocation4 + $0xa8] sm:$0xf]  ;;  %v7505_v28 = vrot.slane %v7504_v50, 4 }
 0x5dd   : > { %7321 = vst.msk [vmem:[#allocation5] sm:$0xf] %vm3049_vm5, %v13082_v15  ;;  %v7065_v12 = vpop.permute.xlu0 %7064  ;;  %v6641_v2 = vor.u32 %v6640_v30, %v13197_v18  ;;  %v6625_v17 = vshrl.u32 %v6303_v57, 16  ;;  %v7393_v50 = vld [vmem:[#allocation4 + $0xb8] sm:$0xf] }
 0x5de   : > { %7144 = vst.msk [vmem:[#allocation5 + $0x80] sm:$0xf] %vm2855_vm4, %v7065_v12  ;;  %v6305_v12 = vld [vmem:[#allocation4 + $0xb0] sm:$0x1] }
 0x5df   : > { %v6642_v48 = vrot.slane %v6641_v2, 4 }
 0x5e0   : > { %7050 = vrot.lane.b32.xlu2 %v6954_v13, %s10011_s8  ;;  %7799 = vrot.lane.b32.xlu1 %v7496_v4, %s10013_s11  ;;  %v7702_v13 = vsel %vm10180_vm3, %v7697_v16, %v7701_v24  ;;  %v7185_v4 = vld [vmem:[#allocation4 + $0xa8] sm:$0xf] }
 0x5e2   : > { %v13169_v15 = vpop.permute.xlu2 %7229  ;;  %v7067_v5 = vpop.permute.xlu1 %7066 }
 0x5e3   : > { %7831 = vrot.lane.b32.xlu0 %v7688_v63, %s10013_s11  ;;  %7145 = vst.msk [vmem:[#allocation5 + $0x88] sm:$0xf] %vm2855_vm4, %v7067_v5  ;;  %v6644_v63 = vshll.u32 %v6305_v12, 16  ;;  %v6628_v5 = vshll.u32 %v6303_v57, 16  ;;  %v6841_v57 = vld [vmem:[#allocation4 + $0x50] sm:$0x1] }
 0x5e4   : > { %7338 = vst.msk [vmem:[#allocation5 + $0x88] sm:$0xf] %vm3049_vm5, %v13105_v58  ;;  %v7007_v58 = vsel %vm10873_vm13, %v9381_v34, %v7006_v51  ;;  %v7706_v51 = vor.u32 %v7705_v20, %v7701_v24  ;;  %v6865_v12 = vld [vmem:[#allocation4 + $0xb0] sm:$0x1]  ;;  %v6960_v20 = vrot.slane %v6841_v57, 5 }
 0x5e5   : > { %v7228_v44 = vpop.permute.xlu0 %7227  ;;  %v6646_v34 = vrot.slane %v6644_v63, 5  ;;  %v6630_v33 = vrot.slane %v6628_v5, 5 }
 0x5e6   : > { %7322 = vst.msk [vmem:[#allocation5 + $0x8] sm:$0xf] %vm3049_vm5, %v7228_v44  ;;  %v7707_v19 = vrot.slane %v7706_v51, 4 }
 0x5e7   : > { %v6647_v3 = vsel %vm10180_vm3, %v6642_v48, %v6646_v34 }
 0x5e8   : > { %7241 = vrot.lane.b32.xlu2 %v7169_v35, %s10012_s17  ;;  %7048 = vrot.lane.b32.xlu1 %v6951_v43, %s10011_s8  ;;  %v6627_v35 = vrot.slane %v6625_v17, 4 }
 0x5ea   : > { %v13182_v47 = vpop.permute.xlu2 %7263  ;;  %v7258_v23 = vpop.permute.xlu1 %7257 }
 0x5eb   : > { %7080 = vrot.lane.b32.xlu0 %v7007_v58, %s10011_s8  ;;  %7337 = vst.msk [vmem:[#allocation5 + $0x80] sm:$0xf] %vm3049_vm5, %v7258_v23  ;;  %v7709_v58 = vshll.u32 %v7391_v29, 16 }
 0x5ec   : > { %7897 = vst.msk [vmem:[#allocation5 + $0x80] sm:$0xf] %vm3610_vm9, %v13128_v8  ;;  %v7509_v8 = vrot.slane %v7507_v59, 5 }
 0x5ed   : > { %v7786_v31 = vpop.permute.xlu0 %7785  ;;  %v7711_v6 = vrot.slane %v7709_v58, 5 }
 0x5ee   : > { %7881 = vst.msk [vmem:[#allocation5] sm:$0xf] %vm3610_vm9, %v7786_v31  ;;  %v7514_v26 = vor.u32 %v7513_v53, %v7509_v8  ;;  %v7510_v22 = vsel %vm10180_vm3, %v7505_v28, %v7509_v8  ;;  %v6864_v31 = vld [vmem:[#allocation4 + $0xac] sm:$0xf]  ;;  %v7368_v8 = vld [vmem:[#allocation4 + $0x54] sm:$0xf] }
 0x5ef   : > { %v7712_v49 = vsel %vm10180_vm3, %v7707_v19, %v7711_v6  ;;  %v7013_v39 = vrot.slane %v6864_v31, 5  ;;  %v7525_v30 = vshll.u32 %v7368_v8, 16  ;;  %v7172_v28 = vld [vmem:[#allocation4 + $0x58] sm:$0xf]  ;;  %v7370_v19 = vld [vmem:[#allocation4 + $0x5c] sm:$0x1] }
 0x5f0   : > { %7275 = vrot.lane.b32.xlu2 %v7186_v25, %s10012_s17  ;;  %7082 = vrot.lane.b32.xlu1 %v7010_v0, %s10011_s8  ;;  %v7515_v32 = vrot.slane %v7514_v26, 4  ;;  %v6840_v25 = vld [vmem:[#allocation4 + $0x4c] sm:$0xf]  ;;  %v9382_v0 = vrot.slane %v6863_v40, 9  ;;  %v7541_v41 = vshll.u32 %v7370_v19, 16 }
 0x5f1   : > { %v6957_v37 = vrot.slane %v6840_v25, 5  ;;  %v7527_v2 = vrot.slane %v7525_v30, 5  ;;  %v7015_v17 = vrot.slane %v7013_v39, 4 }
 0x5f2   : > { %v13195_v38 = vpop.permute.xlu2 %7821  ;;  %v7788_v1 = vpop.permute.xlu1 %7787  ;;  %v7520_v7 = vsel %vm10180_vm3, %v7515_v32, %v7519_v42  ;;  %v7014_v53 = vsel %vm10873_vm13, %v9382_v0, %v7013_v39  ;;  %v7016_v32 = vrot.slane %v6865_v12, 5  ;;  %v7171_v42 = vld [vmem:[#allocation4 + $0x54] sm:$0xf] }
 0x5f3   : > { %7243 = vrot.lane.b32.xlu0 %v7170_v27, %s10012_s17  ;;  %7882 = vst.msk [vmem:[#allocation5 + $0x8] sm:$0xf] %vm3610_vm9, %v7788_v1  ;;  %v9511_v23 = vld [vmem:[#allocation5 + $0x80] sm:$0xf]  ;;  %v6958_v16 = vsel %vm10873_vm13, %v9374_v46, %v6957_v37 }
 0x5f5   : > { %v7820_v61 = vpop.permute.xlu0 %7819  ;;  %v9403_v52 = vld [vmem:[#allocation5] sm:$0xf] }
 0x5f6   : > { %7898 = vst.msk [vmem:[#allocation5 + $0x88] sm:$0xf] %vm3610_vm9, %v7820_v61  ;;  %v7369_v61 = vld [vmem:[#allocation4 + $0x58] sm:$0xf] }
 0x5f7   : > { %v7531_v63 = vshll.u32 %v7369_v61, 16  ;;  %v7535_v36 = vshrl.u32 %v7369_v61, 16 }
 0x5f8   : > { %7833 = vrot.lane.b32.xlu2 %v7702_v13, %s10013_s11  ;;  %7273 = vrot.lane.b32.xlu1 %v7185_v4, %s10012_s17  ;;  %v7723_v13 = vshll.u32 %v7393_v50, 16  ;;  %v7727_v4 = vshrl.u32 %v7393_v50, 16  ;;  %v6843_v50 = vld [vmem:[#allocation4 + $0x58] sm:$0xf] }
 0x5f9   : > { %v7537_v34 = vrot.slane %v7535_v36, 4 }
 0x5fa   : > { %v7043_v44 = vpop.permute.xlu2 %7042  ;;  %v7037_v54 = vpop.permute.xlu1 %7036  ;;  %v9706_v14 = vld [vmem:[#allocation5 + $0x4] sm:$0xf0]  ;;  %v7729_v48 = vrot.slane %v7727_v4, 4  ;;  %v6964_v4 = vrot.slane %v6843_v50, 5 }
 0x5fb   : > { %7133 = vst.msk [vmem:[#allocation5 + $0x28] sm:$0xf] %vm2855_vm4, %v7043_v44  ;;  %7801 = vrot.lane.b32.xlu0 %v7510_v22, %s10013_s11  ;;  %v9404_v43 = vor.u32 %v9706_v14, %v9403_v52  ;;  %v7017_v44 = vsel %vm10873_vm13, %v7015_v17, %v7016_v32  ;;  %v13254_v22 = vrot.slane %v7723_v13, 5 }
 0x5fc   : > { %7130 = vst.msk [vmem:[#allocation5 + $0x10] sm:$0xf] %vm2855_vm4, %v7037_v54  ;;  %v7392_v54 = vld [vmem:[#allocation4 + $0xb4] sm:$0xf] }
 0x5fd   : > { %7323 = vst.msk [vmem:[#allocation5 + $0x10] sm:$0xf] %vm3049_vm5, %v13169_v15  ;;  %v7069_v9 = vpop.permute.xlu0 %7068  ;;  %v9731_v60 = vld [vmem:[#allocation5 + $0x84] sm:$0xf0]  ;;  %8377 = vmatmul.bf16.vlgmr.msrb.gmra.mxu1 %v9404_v43  ;;  %v6631_v15 = vor.u32 %v6630_v33, %v6627_v35  ;;  %v7533_v35 = vrot.slane %v7531_v63, 5  ;;  %v7730_v58 = vor.u32 %v7729_v48, %v13254_v22  ;;  %v7714_v33 = vshrl.u32 %v7392_v54, 16 }
 0x5fe   : > { %7146 = vst.msk [vmem:[#allocation5 + $0x90] sm:$0xf] %vm2855_vm4, %v7069_v9  ;;  %v9512_v21 = vor.u32 %v9731_v60, %v9511_v23  ;;  %v7394_v43 = vld [vmem:[#allocation4 + $0xbc] sm:$0x1]  ;;  %v7717_v9 = vshll.u32 %v7392_v54, 16 }
 0x5ff   : > { %v6632_v56 = vrot.slane %v6631_v15, 4  ;;  %v6306_v23 = vld [vmem:[#allocation4 + $0xb4] sm:$0xf]  ;;  %v7731_v31 = vrot.slane %v7730_v58, 4  ;;  %v6308_v48 = vld [vmem:[#allocation4 + $0xbc] sm:$0x1] }
 0x600   : > { %8779 = vmatmul.bf16.vlgmr.msrb.gmra.mxu0 %v9512_v21  ;;  %6750 = vrot.lane.b32.xlu2 %v6647_v3, %s10010_s29  ;;  %v7733_v21 = vshll.u32 %v7394_v43, 16  ;;  %v7538_v3 = vor.u32 %v7537_v34, %v7533_v35  ;;  %v7187_v15 = vld [vmem:[#allocation4 + $0xb4] sm:$0xf]  ;;  %v7719_v40 = vrot.slane %v7717_v9, 5  ;;  %v6868_v43 = vld [vmem:[#allocation4 + $0xbc] sm:$0x1] }
 0x601   : > { %7803 = vrot.lane.b32.xlu1 %v7520_v7, %s10013_s11  ;;  %v6637_v27 = vsel %vm10180_vm3, %v6632_v56, %v13197_v18  ;;  %v6959_v18 = vrot.slane %v6957_v37, 4  ;;  %v6649_v7 = vshrl.u32 %v6306_v23, 16  ;;  %v6307_v37 = vld [vmem:[#allocation4 + $0xb8] sm:$0xf]  ;;  %v7372_v34 = vld [vmem:[#allocation4 + $0x64] sm:$0xf] }
 0x602   : > { %v13221_v59 = vpop.permute.xlu2 %7233  ;;  %v7071_v11 = vpop.permute.xlu1 %7070  ;;  %v7735_v0 = vrot.slane %v7733_v21, 5  ;;  %v6658_v61 = vshll.u32 %v6307_v37, 16  ;;  %v6844_v9 = vld [vmem:[#allocation4 + $0x5c] sm:$0x1]  ;;  %v7559_v21 = vshrl.u32 %v7372_v34, 16 }
 0x603   : > { %7835 = vrot.lane.b32.xlu0 %v7712_v49, %s10013_s11  ;;  %7147 = vst.msk [vmem:[#allocation5 + $0x98] sm:$0xf] %vm2855_vm4, %v7071_v11  ;;  %v6961_v5 = vsel %vm10873_vm13, %v6959_v18, %v6960_v20  ;;  %v7716_v49 = vrot.slane %v7714_v33, 4  ;;  %v6652_v11 = vshll.u32 %v6306_v23, 16  ;;  %v6651_v30 = vrot.slane %v6649_v7, 4 }
 0x604   : > { %7340 = vst.msk [vmem:[#allocation5 + $0x98] sm:$0xf] %vm3049_vm5, %v13182_v47  ;;  %v7522_v47 = vshrl.u32 %v7368_v8, 16  ;;  %v7188_v18 = vld [vmem:[#allocation4 + $0xb8] sm:$0xf] }
 0x605   : > { %v7232_v62 = vpop.permute.xlu0 %7231  ;;  %v7720_v57 = vor.u32 %v7719_v40, %v7716_v49 }
 0x606   : > { %7324 = vst.msk [vmem:[#allocation5 + $0x18] sm:$0xf] %vm3049_vm5, %v7232_v62  ;;  %v7524_v55 = vrot.slane %v7522_v47, 4  ;;  %v7539_v47 = vrot.slane %v7538_v3, 4  ;;  %v6966_v3 = vrot.slane %v6964_v4, 4 }
 0x607   : > { %v7721_v13 = vrot.slane %v7720_v57, 4 }
 0x608   : > { %7084 = vrot.lane.b32.xlu2 %v7014_v53, %s10011_s8 }
 0x609   : > { %6748 = vrot.lane.b32.xlu1 %v6637_v27, %s10010_s29 }
 0x60a   : > { %v13237_v1 = vpop.permute.xlu2 %7267  ;;  %v7262_v24 = vpop.permute.xlu1 %7261 }
 0x60b   : > { %7052 = vrot.lane.b32.xlu0 %v6958_v16, %s10011_s8  ;;  %7339 = vst.msk [vmem:[#allocation5 + $0x90] sm:$0xf] %vm3049_vm5, %v7262_v24  ;;  %v6654_v16 = vrot.slane %v6652_v11, 5  ;;  %v7736_v24 = vsel %vm10180_vm3, %v7731_v31, %v7735_v0  ;;  %v7561_v31 = vrot.slane %v7559_v21, 4  ;;  %v7373_v11 = vld [vmem:[#allocation4 + $0x68] sm:$0x1] }
 0x60c   : > { %7899 = vst.msk [vmem:[#allocation5 + $0x90] sm:$0xf] %vm3610_vm9, %v13195_v38  ;;  %v7528_v38 = vor.u32 %v7527_v2, %v7524_v55  ;;  %v6842_v2 = vld [vmem:[#allocation4 + $0x54] sm:$0xe] }
 0x60d   : > { %v7790_v26 = vpop.permute.xlu0 %7789  ;;  %v6655_v20 = vor.u32 %v6654_v16, %v6651_v30 }
 0x60e   : > { %7883 = vst.msk [vmem:[#allocation5 + $0x10] sm:$0xf] %vm3610_vm9, %v7790_v26  ;;  %v7529_v14 = vrot.slane %v7528_v38, 4  ;;  %v6662_v26 = vshrl.u32 %v6307_v37, 16  ;;  %v9375_v38 = vrot.slane %v6842_v2, 9 }
 0x60f   : > { %v6656_v36 = vrot.slane %v6655_v20, 4  ;;  %v7371_v37 = vld [vmem:[#allocation4 + $0x60] sm:$0xf] }
 0x610   : > { %7247 = vrot.lane.b32.xlu2 %v7172_v28, %s10012_s17  ;;  %v7534_v60 = vsel %vm10180_vm3, %v7529_v14, %v7533_v35  ;;  %v6660_v28 = vrot.slane %v6658_v61, 5  ;;  %v6664_v63 = vrot.slane %v6662_v26, 4  ;;  %v7726_v35 = vsel %vm10180_vm3, %v7721_v13, %v13254_v22 }
 0x611   : > { %7054 = vrot.lane.b32.xlu1 %v6961_v5, %s10011_s8  ;;  %v6867_v5 = vld [vmem:[#allocation4 + $0xb8] sm:$0xf]  ;;  %v6668_v14 = vshll.u32 %v6308_v48, 16  ;;  %v7546_v16 = vshrl.u32 %v7371_v37, 16  ;;  %v6310_v48 = vld [vmem:[#allocation4 + $0xc4] sm:$0xf] }
 0x612   : > { %v13250_v29 = vpop.permute.xlu2 %7825  ;;  %v7792_v51 = vpop.permute.xlu1 %7791  ;;  %v6665_v54 = vor.u32 %v6664_v63, %v6660_v28 }
 0x613   : > { %7086 = vrot.lane.b32.xlu0 %v7017_v44, %s10011_s8  ;;  %7884 = vst.msk [vmem:[#allocation5 + $0x18] sm:$0xf] %vm3610_vm9, %v7792_v51  ;;  %v9519_v53 = vld [vmem:[#allocation5 + $0x90] sm:$0xf]  ;;  %v6965_v44 = vsel %vm10873_vm13, %v9375_v38, %v6964_v4  ;;  %v7020_v51 = vrot.slane %v6867_v5, 5  ;;  %v6670_v19 = vrot.slane %v6668_v14, 5 }
 0x614   : > { %v6666_v22 = vrot.slane %v6665_v54, 4  ;;  %v7396_v5 = vld [vmem:[#allocation4 + $0xc4] sm:$0xf] }
 0x615   : > { %v7824_v52 = vpop.permute.xlu0 %7823  ;;  %v9411_v25 = vld [vmem:[#allocation5 + $0x10] sm:$0xf]  ;;  %v7022_v33 = vrot.slane %v7020_v51, 4  ;;  %v7174_v14 = vld [vmem:[#allocation4 + $0x64] sm:$0xf] }
 0x616   : > { %7900 = vst.msk [vmem:[#allocation5 + $0x98] sm:$0xf] %vm3610_vm9, %v7824_v52  ;;  %v6661_v52 = vsel %vm10180_vm3, %v6656_v36, %v6660_v28  ;;  %v7548_v28 = vrot.slane %v7546_v16, 4 }
 0x618   : > { %7805 = vrot.lane.b32.xlu2 %v7534_v60, %s10013_s11  ;;  %v7023_v60 = vrot.slane %v6868_v43, 5  ;;  %v7747_v43 = vshll.u32 %v7396_v5, 16 }
 0x619   : > { %7245 = vrot.lane.b32.xlu1 %v7171_v42, %s10012_s17  ;;  %v7555_v42 = vshll.u32 %v7372_v34, 16  ;;  %v6682_v34 = vshll.u32 %v6310_v48, 16 }
 0x61a   : > { %v7047_v6 = vpop.permute.xlu2 %7046  ;;  %v7041_v39 = vpop.permute.xlu1 %7040  ;;  %v9708_v56 = vld [vmem:[#allocation5 + $0x14] sm:$0xf0]  ;;  %v7024_v7 = vsel %vm10873_vm13, %v7022_v33, %v7023_v60  ;;  %v7190_v33 = vld [vmem:[#allocation4 + $0xc4] sm:$0xf]  ;;  %v7749_v21 = vrot.slane %v7747_v43, 5 }
 0x61b   : > { %7135 = vst.msk [vmem:[#allocation5 + $0x38] sm:$0xf] %vm2855_vm4, %v7047_v6  ;;  %7277 = vrot.lane.b32.xlu0 %v7187_v15, %s10012_s17  ;;  %v9412_v62 = vor.u32 %v9708_v56, %v9411_v25  ;;  %v6671_v6 = vsel %vm10180_vm3, %v6666_v22, %v6670_v19  ;;  %v6967_v15 = vrot.slane %v6844_v9, 5  ;;  %v6866_v25 = vld [vmem:[#allocation4 + $0xb4] sm:$0xe]  ;;  %v6686_v9 = vshrl.u32 %v6310_v48, 16 }
 0x61c   : > { %7132 = vst.msk [vmem:[#allocation5 + $0x20] sm:$0xf] %vm2855_vm4, %v7041_v39  ;;  %v6309_v56 = vld [vmem:[#allocation4 + $0xc0] sm:$0xf]  ;;  %v7375_v48 = vld [vmem:[#allocation4 + $0x70] sm:$0xf] }
 0x61d   : > { %7325 = vst.msk [vmem:[#allocation5 + $0x20] sm:$0xf] %vm3049_vm5, %v13221_v59  ;;  %v7073_v8 = vpop.permute.xlu0 %7072  ;;  %v9733_v27 = vld [vmem:[#allocation5 + $0x94] sm:$0xf0]  ;;  %8382 = vmatmul.bf16.gmra.mxu1 %v9412_v62  ;;  %v7543_v59 = vrot.slane %v7541_v41, 5  ;;  %v6968_v40 = vsel %vm10873_vm13, %v6966_v3, %v6967_v15  ;;  %v7565_v41 = vshll.u32 %v7373_v11, 16 }
 0x61e   : > { %7148 = vst.msk [vmem:[#allocation5 + $0xa0] sm:$0xf] %vm2855_vm4, %v7073_v8  ;;  %v9520_v46 = vor.u32 %v9733_v27, %v9519_v53  ;;  %v9383_v8 = vrot.slane %v6866_v25, 9  ;;  %v6673_v53 = vshrl.u32 %v6309_v56, 16  ;;  %v6676_v27 = vshll.u32 %v6309_v56, 16 }
 0x61f   : > { %v7544_v55 = vsel %vm10180_vm3, %v7539_v47, %v7543_v59  ;;  %v7395_v47 = vld [vmem:[#allocation4 + $0xc0] sm:$0xf]  ;;  %v7567_v50 = vrot.slane %v7565_v41, 5  ;;  %v6846_v3 = vld [vmem:[#allocation4 + $0x64] sm:$0xf]  ;;  %v6688_v11 = vrot.slane %v6686_v9, 4 }
 0x620   : > { %8784 = vmatmul.bf16.gmra.mxu0 %v9520_v46  ;;  %7839 = vrot.lane.b32.xlu2 %v7736_v24, %s10013_s11  ;;  %v7189_v46 = vld [vmem:[#allocation4 + $0xc0] sm:$0xf]  ;;  %v7021_v30 = vsel %vm10873_vm13, %v9383_v8, %v7020_v51  ;;  %v7549_v24 = vshll.u32 %v7371_v37, 16  ;;  %v6675_v61 = vrot.slane %v6673_v53, 4  ;;  %v6678_v26 = vrot.slane %v6676_v27, 5 }
 0x621   : > { %7279 = vrot.lane.b32.xlu1 %v7188_v18, %s10012_s17  ;;  %v7173_v59 = vld [vmem:[#allocation4 + $0x60] sm:$0xf]  ;;  %v7741_v2 = vshll.u32 %v7395_v47, 16  ;;  %v7397_v15 = vld [vmem:[#allocation4 + $0xc8] sm:$0x1]  ;;  %v6971_v25 = vrot.slane %v6846_v3, 5 }
 0x622   : > { %v13274_v12 = vpop.permute.xlu2 %7237  ;;  %v7075_v17 = vpop.permute.xlu1 %7074  ;;  %v7551_v63 = vrot.slane %v7549_v24, 5  ;;  %v6311_v56 = vld [vmem:[#allocation4 + $0xc8] sm:$0x1] }
 0x623   : > { %7807 = vrot.lane.b32.xlu0 %v7544_v55, %s10013_s11  ;;  %7149 = vst.msk [vmem:[#allocation5 + $0xa8] sm:$0xf] %vm2855_vm4, %v7075_v17  ;;  %v7738_v55 = vshrl.u32 %v7395_v47, 16  ;;  %v6847_v8 = vld [vmem:[#allocation4 + $0x68] sm:$0x1]  ;;  %v6692_v27 = vshll.u32 %v6311_v56, 16 }
 0x624   : > { %7342 = vst.msk [vmem:[#allocation5 + $0xa8] sm:$0xf] %vm3049_vm5, %v13237_v1  ;;  %v7552_v22 = vor.u32 %v7551_v63, %v7548_v28  ;;  %v6973_v47 = vrot.slane %v6971_v25, 4  ;;  %v6974_v24 = vrot.slane %v6847_v8, 5  ;;  %v7175_v63 = vld [vmem:[#allocation4 + $0x6c] sm:$0xf] }
 0x625   : > { %v7236_v32 = vpop.permute.xlu0 %7235  ;;  %v7740_v51 = vrot.slane %v7738_v55, 4  ;;  %v6845_v55 = vld [vmem:[#allocation4 + $0x60] sm:$0xe] }
 0x626   : > { %7326 = vst.msk [vmem:[#allocation5 + $0x28] sm:$0xf] %vm3049_vm5, %v7236_v32 }
 0x628   : > { %7056 = vrot.lane.b32.xlu2 %v6965_v44, %s10011_s8 }
 0x629   : > { %7837 = vrot.lane.b32.xlu1 %v7726_v35, %s10013_s11  ;;  %v7743_v35 = vrot.slane %v7741_v2, 5  ;;  %v6869_v2 = vld [vmem:[#allocation4 + $0xc0] sm:$0xe] }
 0x62a   : > { %v13290_v1 = vpop.permute.xlu2 %7271  ;;  %v7266_v58 = vpop.permute.xlu1 %7265 }
 0x62b   : > { %6752 = vrot.lane.b32.xlu0 %v6661_v52, %s10010_s29  ;;  %7341 = vst.msk [vmem:[#allocation5 + $0xa0] sm:$0xf] %vm3049_vm5, %v7266_v58  ;;  %v6679_v52 = vor.u32 %v6678_v26, %v6675_v61 }
 0x62c   : > { %7901 = vst.msk [vmem:[#allocation5 + $0xa0] sm:$0xf] %vm3610_vm9, %v13250_v29  ;;  %v13305_v29 = vrot.slane %v7555_v42, 5 }
 0x62d   : > { %v7794_v23 = vpop.permute.xlu0 %7793  ;;  %v6680_v42 = vrot.slane %v6679_v52, 4 }
 0x62e   : > { %7885 = vst.msk [vmem:[#allocation5 + $0x20] sm:$0xf] %vm3610_vm9, %v7794_v23  ;;  %v7562_v0 = vor.u32 %v7561_v31, %v13305_v29  ;;  %v7744_v23 = vor.u32 %v7743_v35, %v7740_v51  ;;  %v7553_v31 = vrot.slane %v7552_v22, 4 }
 0x630   : > { %7090 = vrot.lane.b32.xlu2 %v7024_v7, %s10011_s8  ;;  %v7563_v57 = vrot.slane %v7562_v0, 4  ;;  %v7757_v0 = vshll.u32 %v7397_v15, 16 }
 0x631   : > { %6754 = vrot.lane.b32.xlu1 %v6671_v6, %s10010_s29  ;;  %v6684_v6 = vrot.slane %v6682_v34, 5 }
 0x632   : > { %v13307_v49 = vpop.permute.xlu2 %7829  ;;  %v7796_v39 = vpop.permute.xlu1 %7795  ;;  %v7568_v54 = vsel %vm10180_vm3, %v7563_v57, %v7567_v50  ;;  %v6694_v50 = vrot.slane %v6692_v27, 5 }
 0x633   : > { %7058 = vrot.lane.b32.xlu0 %v6968_v40, %s10011_s8  ;;  %7886 = vst.msk [vmem:[#allocation5 + $0x28] sm:$0xf] %vm3610_vm9, %v7796_v39  ;;  %v9527_v38 = vld [vmem:[#allocation5 + $0xa0] sm:$0xf]  ;;  %v7745_v40 = vrot.slane %v7744_v23, 4  ;;  %v6685_v39 = vsel %vm10180_vm3, %v6680_v42, %v6684_v6  ;;  %v6689_v53 = vor.u32 %v6688_v11, %v6684_v6 }
 0x634   : > { %v7399_v23 = vld [vmem:[#allocation4 + $0xd0] sm:$0xf] }
 0x635   : > { %v7828_v62 = vpop.permute.xlu0 %7827  ;;  %v9419_v17 = vld [vmem:[#allocation5 + $0x20] sm:$0xf]  ;;  %v7750_v37 = vsel %vm10180_vm3, %v7745_v40, %v7749_v21  ;;  %v6690_v57 = vrot.slane %v6689_v53, 4  ;;  %v7771_v6 = vshll.u32 %v7399_v23, 16  ;;  %v7775_v15 = vshrl.u32 %v7399_v23, 16 }
 0x636   : > { %7902 = vst.msk [vmem:[#allocation5 + $0xa8] sm:$0xf] %vm3610_vm9, %v7828_v62  ;;  %v7558_v62 = vsel %vm10180_vm3, %v7553_v31, %v13305_v29  ;;  %v7176_v31 = vld [vmem:[#allocation4 + $0x70] sm:$0xf]  ;;  %v7376_v53 = vld [vmem:[#allocation4 + $0x74] sm:$0x1] }
 0x637   : > { %v7773_v56 = vrot.slane %v7771_v6, 5 }
 0x638   : > { %7281 = vrot.lane.b32.xlu2 %v7189_v46, %s10012_s17 }
 0x639   : > { %7088 = vrot.lane.b32.xlu1 %v7021_v30, %s10011_s8  ;;  %v7759_v30 = vrot.slane %v7757_v0, 5  ;;  %v7400_v0 = vld [vmem:[#allocation4 + $0xd4] sm:$0x1] }
 0x63a   : > { %v7051_v18 = vpop.permute.xlu2 %7050  ;;  %v7045_v20 = vpop.permute.xlu1 %7044  ;;  %v9710_v13 = vld [vmem:[#allocation5 + $0x24] sm:$0xf0] }
 0x63b   : > { %7137 = vst.msk [vmem:[#allocation5 + $0x48] sm:$0xf] %vm2855_vm4, %v7051_v18  ;;  %7249 = vrot.lane.b32.xlu0 %v7173_v59, %s10012_s17  ;;  %v9420_v4 = vor.u32 %v9710_v13, %v9419_v17  ;;  %v6975_v18 = vsel %vm10873_vm13, %v6973_v47, %v6974_v24  ;;  %v9376_v13 = vrot.slane %v6845_v55, 9  ;;  %v7781_v47 = vshll.u32 %v7400_v0, 16 }
 0x63c   : > { %7134 = vst.msk [vmem:[#allocation5 + $0x30] sm:$0xf] %vm2855_vm4, %v7045_v20  ;;  %v6870_v20 = vld [vmem:[#allocation4 + $0xc4] sm:$0xf] }
 0x63d   : > { %7327 = vst.msk [vmem:[#allocation5 + $0x30] sm:$0xf] %vm3049_vm5, %v13274_v12  ;;  %v7077_v32 = vpop.permute.xlu0 %7076  ;;  %v9735_v36 = vld [vmem:[#allocation5 + $0xa4] sm:$0xf0]  ;;  %8387 = vmatmul.bf16.gmra.mxu1 %v9420_v4  ;;  %v7751_v12 = vshrl.u32 %v7396_v5, 16  ;;  %v9384_v4 = vrot.slane %v6869_v2, 9 }
 0x63e   : > { %7150 = vst.msk [vmem:[#allocation5 + $0xb0] sm:$0xf] %vm2855_vm4, %v7077_v32  ;;  %v9528_v44 = vor.u32 %v9735_v36, %v9527_v38  ;;  %v7027_v28 = vrot.slane %v6870_v20, 5  ;;  %v7374_v5 = vld [vmem:[#allocation4 + $0x6c] sm:$0xf]  ;;  %v6972_v32 = vsel %vm10873_vm13, %v9376_v13, %v6971_v25 }
 0x63f   : > { %v7753_v19 = vrot.slane %v7751_v12, 4  ;;  %v6871_v38 = vld [vmem:[#allocation4 + $0xc8] sm:$0x1]  ;;  %v7570_v51 = vshrl.u32 %v7374_v5, 16  ;;  %v7573_v35 = vshll.u32 %v7374_v5, 16 }
 0x640   : > { %8789 = vmatmul.bf16.gmra.mxu0 %v9528_v44  ;;  %7811 = vrot.lane.b32.xlu2 %v7568_v54, %s10013_s11  ;;  %v7028_v44 = vsel %vm10873_vm13, %v9384_v4, %v7027_v28  ;;  %v7029_v12 = vrot.slane %v7027_v28, 4  ;;  %v7030_v34 = vrot.slane %v6871_v38, 5  ;;  %v7398_v2 = vld [vmem:[#allocation4 + $0xcc] sm:$0xf]  ;;  %v8427_v38 = vpop.f32.mrf.mxu3 }
 0x641   : > { %7251 = vrot.lane.b32.xlu1 %v7174_v14, %s10012_s17  ;;  %v7572_v42 = vrot.slane %v7570_v51, 4  ;;  %v7762_v20 = vshrl.u32 %v7398_v2, 16  ;;  %v13418_v51 = vld [vmem:[%s13678_s6] ss:$0 sm:$0xff] }
 0x642   : > { %v13329_v58 = vpop.permute.xlu2 %7241  ;;  %v7079_v60 = vpop.permute.xlu1 %7078  ;;  %v7031_v3 = vsel %vm10873_vm13, %v7029_v12, %v7030_v34 }
 0x643   : > { %7283 = vrot.lane.b32.xlu0 %v7190_v33, %s10012_s17  ;;  %7151 = vst.msk [vmem:[#allocation5 + $0xb8] sm:$0xf] %vm2855_vm4, %v7079_v60  ;;  %v7764_v4 = vrot.slane %v7762_v20, 4 }
 0x644   : > { %7344 = vst.msk [vmem:[#allocation5 + $0xb8] sm:$0xf] %vm3049_vm5, %v13290_v1  ;;  %v7754_v1 = vor.u32 %v7753_v19, %v7749_v21  ;;  %v7575_v21 = vrot.slane %v7573_v35, 5  ;;  %v7579_v19 = vshll.u32 %v7375_v48, 16 }
 0x645   : > { %v7240_v7 = vpop.permute.xlu0 %7239 }
 0x646   : > { %7328 = vst.msk [vmem:[#allocation5 + $0x38] sm:$0xf] %vm3049_vm5, %v7240_v7  ;;  %v7755_v29 = vrot.slane %v7754_v1, 4  ;;  %v7583_v7 = vshrl.u32 %v7375_v48, 16  ;;  %v7576_v40 = vor.u32 %v7575_v21, %v7572_v42  ;;  %v13413_v48 = vld [vmem:[%s13677_s5] ss:$0 sm:$0xff] }
 0x648   : > { %6756 = vrot.lane.b32.xlu2 %v6685_v39, %s10010_s29  ;;  %v7760_v59 = vsel %vm10180_vm3, %v7755_v29, %v7759_v30  ;;  %v7581_v39 = vrot.slane %v7579_v19, 5  ;;  %v7585_v25 = vrot.slane %v7583_v7, 4  ;;  %v7577_v8 = vrot.slane %v7576_v40, 4  ;;  %v13438_v7 = vld [vmem:[%s13678_s6] ss:$0 sm:$0xff]  ;;  %v8429_v40 = vpop.f32.mrf.mxu3 }
 0x649   : > { %7809 = vrot.lane.b32.xlu1 %v7558_v62, %s10013_s11  ;;  %v7777_v62 = vrot.slane %v7775_v15, 4  ;;  %v9758_v19 = vunpack.c.l.bf16 %v9757_v10 }
 0x64a   : > { %v13343_v41 = vpop.permute.xlu2 %7275  ;;  %v7270_v46 = vpop.permute.xlu1 %7269  ;;  %v7586_v27 = vor.u32 %v7585_v25, %v7581_v39  ;;  %v7582_v30 = vsel %vm10180_vm3, %v7577_v8, %v7581_v39 }
 0x64b   : > { %7841 = vrot.lane.b32.xlu0 %v7750_v37, %s10013_s11  ;;  %7343 = vst.msk [vmem:[#allocation5 + $0xb0] sm:$0xf] %vm3049_vm5, %v7270_v46  ;;  %v7191_v37 = vld [vmem:[#allocation4 + $0xcc] sm:$0xf]  ;;  %v7778_v46 = vor.u32 %v7777_v62, %v7773_v56 }
 0x64c   : > { %7903 = vst.msk [vmem:[#allocation5 + $0xb0] sm:$0xf] %vm3610_vm9, %v13307_v49  ;;  %v6695_v49 = vsel %vm10180_vm3, %v6690_v57, %v6694_v50  ;;  %v7783_v50 = vrot.slane %v7781_v47, 5 }
 0x64d   : > { %v7798_v16 = vpop.permute.xlu0 %7797  ;;  %v7779_v57 = vrot.slane %v7778_v46, 4 }
 0x64e   : > { %7887 = vst.msk [vmem:[#allocation5 + $0x30] sm:$0xf] %vm3610_vm9, %v7798_v16  ;;  %v7589_v16 = vshll.u32 %v7376_v53, 16 }
 0x64f   : > { %v7784_v55 = vsel %vm10180_vm3, %v7779_v57, %v7783_v50 }
 0x650   : > { %7062 = vrot.lane.b32.xlu2 %v6975_v18, %s10011_s8 }
 0x651   : > { %7843 = vrot.lane.b32.xlu1 %v7760_v59, %s10013_s11  ;;  %v7591_v59 = vrot.slane %v7589_v16, 5 }
 0x652   : > { %v13358_v61 = vpop.permute.xlu2 %7833  ;;  %v7800_v26 = vpop.permute.xlu1 %7799 }
 0x653   : > { %6758 = vrot.lane.b32.xlu0 %v6695_v49, %s10010_s29  ;;  %7888 = vst.msk [vmem:[#allocation5 + $0x38] sm:$0xf] %vm3610_vm9, %v7800_v26  ;;  %v9535_v33 = vld [vmem:[#allocation5 + $0xb0] sm:$0xf]  ;;  %v7192_v49 = vld [vmem:[#allocation4 + $0xd0] sm:$0xf] }
 0x654   : > { %s9006_s29 = sshll.u32 %s9003_s9, 4  ;;  %s9007_s29 = int_to_ptr.hbm [resolvable:$true] %s9006_s29 }
 0x655   : > { %v7832_v17 = vpop.permute.xlu0 %7831  ;;  %v9427_v52 = vld [vmem:[#allocation5 + $0x30] sm:$0xf] }
 0x656   : > { %7904 = vst.msk [vmem:[#allocation5 + $0xb8] sm:$0xf] %vm3610_vm9, %v7832_v17  ;;  %v7765_v17 = vshll.u32 %v7398_v2, 16 }
 0x658   : > { %7253 = vrot.lane.b32.xlu2 %v7175_v63, %s10012_s17  ;;  %v7767_v28 = vrot.slane %v7765_v17, 5 }
 0x659   : > { %7060 = vrot.lane.b32.xlu1 %v6972_v32, %s10011_s8 }
 0x65a   : > { %v6751_v36 = vpop.permute.xlu2 %6750  ;;  %v7049_v54 = vpop.permute.xlu1 %7048  ;;  %v9712_v14 = vld [vmem:[#allocation5 + $0x34] sm:$0xf0]  ;;  %v7768_v5 = vor.u32 %v7767_v28, %v7764_v4 }
 0x65b   : > { %6819 = vst.msk [vmem:[#allocation5 + $0xd8] sm:$0xf] %vm2518_vm2, %v6751_v36  ;;  %7092 = vrot.lane.b32.xlu0 %v7028_v44, %s10011_s8  ;;  %v9428_v43 = vor.u32 %v9712_v14, %v9427_v52  ;;  %v8829_v44 = vpop.f32.mrf.mxu2 }
 0x65c   : > { %7136 = vst.msk [vmem:[#allocation5 + $0x40] sm:$0xf] %vm2855_vm4, %v7049_v54  ;;  %v7769_v32 = vrot.slane %v7768_v5, 4 }
 0x65d   : > { %7329 = vst.msk [vmem:[#allocation5 + $0x40] sm:$0xf] %vm3049_vm5, %v13329_v58  ;;  %v7081_v22 = vpop.permute.xlu0 %7080  ;;  %v9737_v9 = vld [vmem:[#allocation5 + $0xb4] sm:$0xf0]  ;;  %8392 = vmatmul.bf16.gmra.mxu1 %v9428_v43 }
 0x65e   : > { %7152 = vst.msk [vmem:[#allocation5 + $0xc0] sm:$0xf] %vm2855_vm4, %v7081_v22  ;;  %v9536_v60 = vor.u32 %v9737_v9, %v9535_v33  ;;  %v7774_v36 = vsel %vm10180_vm3, %v7769_v32, %v7773_v56  ;;  %v13428_v33 = vld [vmem:[%s13677_s5] ss:$0 sm:$0xff]  ;;  %v9827_v22 = vld [vmem:[%s10146_s16 + $0x40] sm:$0xff]   ;;  %v9820_v32 = vld [vmem:[%s10146_s16 + $0x8] sm:$0xff]  }
 0x660   : > { %8794 = vmatmul.bf16.gmra.mxu0 %v9536_v60  ;;  %7287 = vrot.lane.b32.xlu2 %v7192_v49, %s10012_s17 }
 0x661   : > { %7094 = vrot.lane.b32.xlu1 %v7031_v3, %s10011_s8  ;;  %s8992_s8 = scalar_lea.sflag [#allocation8], %s10142_s22 }
 0x662   : > { %v13380_v58 = vpop.permute.xlu2 %7084  ;;  %v7083_v11 = vpop.permute.xlu1 %7082 }
 0x663   : > { %7255 = vrot.lane.b32.xlu0 %v7176_v31, %s10012_s17  ;;  %7153 = vst.msk [vmem:[#allocation5 + $0xc8] sm:$0xf] %vm2855_vm4, %v7083_v11  ;;  %v9790_v31 = vunpack.c.l.bf16 %v9827_v22 }
 0x664   : > { %7346 = vst.msk [vmem:[#allocation5 + $0xc8] sm:$0xf] %vm3049_vm5, %v13343_v41  ;;  %v7587_v41 = vrot.slane %v7586_v27, 4 }
 0x665   : > { %v7244_v1 = vpop.permute.xlu0 %7243 }
 0x666   : > { %7330 = vst.msk [vmem:[#allocation5 + $0x48] sm:$0xf] %vm3049_vm5, %v7244_v1  ;;  %v7592_v26 = vsel %vm10180_vm3, %v7587_v41, %v7591_v59  ;;  %v8831_v1 = vpop.f32.mrf.mxu2  ;;  %v9791_v41 = vunpack.c.h.bf16 %v9827_v22 }
 0x668   : > { %7845 = vrot.lane.b32.xlu2 %v7774_v36, %s10013_s11 }
 0x669   : > { %7285 = vrot.lane.b32.xlu1 %v7191_v37, %s10012_s17  ;;  %s9950_s17 = sshra.s32 %s9007_s29, 4  ;;  %s9951_s17 = int_to_ptr.hbm [resolvable:$true] %s9950_s17 }
 0x66a   : > { %v13388_v29 = vpop.permute.xlu2 %7247  ;;  %v7274_v24 = vpop.permute.xlu1 %7273  ;;  %s9952_s18 = scalar_lea.hbm %s9951_s17, 256  ;;  %p9957_p0 = scmp.lt.s32.totalorder %s9951_s17, %s13679_s7 }
 0x66b   : > { %7813 = vrot.lane.b32.xlu0 %v7582_v30, %s10013_s11  ;;  %7345 = vst.msk [vmem:[#allocation5 + $0xc0] sm:$0xf] %vm3049_vm5, %v7274_v24  ;;  %v9759_v30 = vunpack.c.h.bf16 %v9757_v10  ;;  %p9953_p6 = scmp.ne.s32.totalorder %s9951_s17, %s9952_s18 }
 0x66c   : > { %7905 = vst.msk [vmem:[#allocation5 + $0xc0] sm:$0xf] %vm3610_vm9, %v13358_v61 }
 0x66d   : > { %v7802_v18 = vpop.permute.xlu0 %7801  ;;  %p9954_p9 = pnand %p9953_p6, %p10106_p11 }
 0x66e   : > { %7889 = vst.msk [vmem:[#allocation5 + $0x40] sm:$0xf] %vm3610_vm9, %v7802_v18  ;;  %v8834_v4 = vpop.f32.mrf.mxu2 }
 0x66f   : > { %p9955_p13 = pneg %p9954_p9 }
 0x671   : > { %7815 = vrot.lane.b32.xlu1 %v7592_v26, %s10013_s11 }
 0x672   : > { %v13403_v13 = vpop.permute.xlu2 %7805 }
 0x673   : > { %v7804_v61 = vpop.permute.xlu1 %7803  ;;  %7847 = vrot.lane.b32.xlu0 %v7784_v55, %s10013_s11  ;;  %v9543_v60 = vld [vmem:[#allocation5 + $0xc0] sm:$0xf]  ;;  %s9956_s11 = scalar_lea.hbm %s13679_s7, 512 }
 0x674   : > { %7890 = vst.msk [vmem:[#allocation5 + $0x48] sm:$0xf] %vm3610_vm9, %v7804_v61  ;;  %p9958_p1 = scmp.lt.s32.totalorder %s9956_s11, %s9952_s18 }
 0x675   : > { %v7836_v63 = vpop.permute.xlu0 %7835  ;;  %v9435_v14 = vld [vmem:[#allocation5 + $0x40] sm:$0xf] }
 0x676   : > { %7906 = vst.msk [vmem:[#allocation5 + $0xc8] sm:$0xf] %vm3610_vm9, %v7836_v63  ;;  %p9959_p3 = por %p9958_p1, %p9957_p0 }
 0x678   : > { %p9960_p4 = pnand %p9959_p3, %p9955_p13 }
 0x67a   : > { %v13420_v35 = vpop.permute.xlu2 %7839  ;;  %v8378_v52 = vpop.f32.mrf.mxu1 }
 0x67b   : > { %v6749_v54 = vpop.permute.xlu1 %6748  ;;  %v9714_v43 = vld [vmem:[#allocation5 + $0x44] sm:$0xf0]  ;;  %v8428_v12 = vadd.f32 %v8427_v38, %v8378_v52 }
 0x67c   : > { %6818 = vst.msk [vmem:[#allocation5 + $0xd0] sm:$0xf] %vm2518_vm2, %v6749_v54  ;;  %v9436_v34 = vor.u32 %v9714_v43, %v9435_v14  ;;  %v9828_v54 = vld [vmem:[%s10146_s16 + $0x48] sm:$0xff]   ;;  %v9762_v14 = vunpack.c.l.bf16 %v9820_v32 }
 0x67d   : > { %7154 = vst.msk [vmem:[#allocation5 + $0xd0] sm:$0xf] %vm2855_vm4, %v13380_v58  ;;  %v7053_v9 = vpop.permute.xlu0 %7052  ;;  %v8780_v23 = vpop.f32.mrf.mxu0  ;;  %v9739_v42 = vld [vmem:[#allocation5 + $0xc4] sm:$0xf0]  ;;  %v8471_v21 = vmul.f32 %v13413_v48, %v8428_v12 }
 0x67e   : > { %8397 = vmatmul.bf16.gmra.mxu1 %v9436_v34  ;;  %7138 = vst.msk [vmem:[#allocation5 + $0x50] sm:$0xf] %vm2855_vm4, %v7053_v9  ;;  %v8830_v3 = vadd.f32 %v8829_v44, %v8780_v23  ;;  %v9544_v6 = vor.u32 %v9739_v42, %v9543_v60  ;;  %v9794_v9 = vunpack.c.l.bf16 %v9828_v54 }
 0x67f   : > { %v8491_v15 = vadd.f32 %v13418_v51, %v8471_v21 }
 0x680   : > { %v8873_v58 = vmul.f32 %v13428_v33, %v8830_v3  ;;  %8799 = vmatmul.bf16.gmra.mxu0 %v9544_v6 }
 0x681   : > { %v8539_v11 = vadd.f32 %v9758_v19, %v8491_v15 }
 0x682   : > { %v8893_v39 = vadd.f32 %v13438_v7, %v8873_v58  ;;  %v7057_v25 = vpop.permute.xlu2 %7056  ;;  %v8380_v62 = vpop.f32.mrf.mxu1 }
 0x683   : > { %v7055_v56 = vpop.permute.xlu1 %7054  ;;  %7140 = vst.msk [vmem:[#allocation5 + $0x60] sm:$0xf] %vm2855_vm4, %v7057_v25  ;;  %v8555_v0 = vmax.f32 %v8539_v11, 0.0  ;;  %v8430_v8 = vadd.f32 %v8429_v40, %v8380_v62  ;;  %v8836_v58 = vpop.f32.mrf.mxu2 }
 0x684   : > { %v8942_v37 = vadd.f32 %v9790_v31, %v8893_v39  ;;  %7139 = vst.msk [vmem:[#allocation5 + $0x58] sm:$0xf] %vm2855_vm4, %v7055_v56 }
 0x685   : > { %7332 = vst.msk [vmem:[#allocation5 + $0x58] sm:$0xf] %vm3049_vm5, %v13388_v29  ;;  %v7087_v53 = vpop.permute.xlu0 %7086  ;;  %v8782_v27 = vpop.f32.mrf.mxu0  ;;  %v8472_v47 = vmul.f32 %v13413_v48, %v8430_v8 }
 0x686   : > { %8571 = vst.msk [vmem:[%s13448_s23] sm:$0xff] %vm4129_vm6, %v8555_v0  ;;  %v8958_v46 = vmax.f32 %v8942_v37, 0.0  ;;  %v8832_v16 = vadd.f32 %v8831_v1, %v8782_v27  ;;  %v9763_v0 = vunpack.c.h.bf16 %v9820_v32  ;;  %v9795_v27 = vunpack.c.h.bf16 %v9828_v54 }
 0x687   : > { %7155 = vst.msk [vmem:[#allocation5 + $0xd8] sm:$0xf] %vm2855_vm4, %v7087_v53  ;;  %v8492_v29 = vadd.f32 %v13418_v51, %v8472_v47 }
 0x688   : > { %9633 = vst.msk [vmem:[%s13448_s23 + $0x80] sm:$0xff] %vm4129_vm6, %v8958_v46  ;;  %v8874_v24 = vmul.f32 %v13428_v33, %v8832_v16 }
 0x689   : > { %v8540_v57 = vadd.f32 %v9759_v30, %v8492_v29 }
 0x68a   : > { %v8894_v50 = vadd.f32 %v13438_v7, %v8874_v24  ;;  %v7091_v18 = vpop.permute.xlu2 %7090 }
 0x68b   : > { %v7246_v59 = vpop.permute.xlu1 %7245  ;;  %v8556_v49 = vmax.f32 %v8540_v57, 0.0 }
 0x68c   : > { %v8943_v26 = vadd.f32 %v9791_v41, %v8894_v50  ;;  %7331 = vst.msk [vmem:[#allocation5 + $0x50] sm:$0xf] %vm3049_vm5, %v7246_v59 }
 0x68d   : > { %7891 = vst.msk [vmem:[#allocation5 + $0x50] sm:$0xf] %vm3610_vm9, %v13403_v13  ;;  %v7278_v55 = vpop.permute.xlu0 %7277  ;;  %v8432_v13 = vpop.f32.mrf.mxu3 }
 0x68e   : > { %8572 = vst.msk [vmem:[%s13448_s23 + $0x8] sm:$0xff] %vm4129_vm6, %v8556_v49  ;;  %v8959_v2 = vmax.f32 %v8943_v26, 0.0  ;;  %v8839_v49 = vpop.f32.mrf.mxu2 }
 0x68f   : > { %7347 = vst.msk [vmem:[#allocation5 + $0xd0] sm:$0xf] %vm3049_vm5, %v7278_v55 }
 0x690   : > { %9634 = vst.msk [vmem:[%s13448_s23 + $0x88] sm:$0xff] %vm4129_vm6, %v8959_v2  ;;  %v9821_v2 = vld [vmem:[%s10146_s16 + $0x10] sm:$0xff]  }
 0x692   : > { %v13467_v20 = vpop.permute.xlu2 %7281 }
 0x693   : > { %v7280_v17 = vpop.permute.xlu1 %7279 }
 0x694   : > { %7348 = vst.msk [vmem:[#allocation5 + $0xd8] sm:$0xf] %vm3049_vm5, %v7280_v17  ;;  %v9443_v52 = vld [vmem:[#allocation5 + $0x50] sm:$0xf] }
 0x695   : > { %7908 = vst.msk [vmem:[#allocation5 + $0xd8] sm:$0xf] %vm3610_vm9, %v13420_v35  ;;  %v7808_v61 = vpop.permute.xlu0 %7807  ;;  %v8434_v23 = vpop.f32.mrf.mxu3 }
 0x696   : > { %7892 = vst.msk [vmem:[#allocation5 + $0x58] sm:$0xf] %vm3610_vm9, %v7808_v61 }
 0x69a   : > { %v13473_v28 = vpop.permute.xlu2 %7811  ;;  %v8383_v5 = vpop.f32.mrf.mxu1 }
 0x69b   : > { %v7838_v63 = vpop.permute.xlu1 %7837  ;;  %v8433_v38 = vadd.f32 %v8432_v13, %v8383_v5  ;;  %v9829_v13 = vld [vmem:[%s10146_s16 + $0x50] sm:$0xff]  }
 0x69c   : > { %7907 = vst.msk [vmem:[#allocation5 + $0xd0] sm:$0xf] %vm3610_vm9, %v7838_v63  ;;  %v9741_v15 = vld [vmem:[#allocation5 + $0xd4] sm:$0xf0]  ;;  %v9766_v63 = vunpack.c.l.bf16 %v9821_v2 }
 0x69d   : > { %v6753_v36 = vpop.permute.xlu0 %6752  ;;  %v8785_v44 = vpop.f32.mrf.mxu0  ;;  %v9716_v10 = vld [vmem:[#allocation5 + $0x54] sm:$0xf0]  ;;  %v8473_v35 = vmul.f32 %v13413_v48, %v8433_v38  ;;  %v9798_v38 = vunpack.c.l.bf16 %v9829_v13 }
 0x69e   : > { %6820 = vst.msk [vmem:[#allocation5 + $0xe0] sm:$0xf] %vm2518_vm2, %v6753_v36  ;;  %v8835_v43 = vadd.f32 %v8834_v4, %v8785_v44  ;;  %v9444_v12 = vor.u32 %v9716_v10, %v9443_v52  ;;  %v8437_v59 = vpop.f32.mrf.mxu3 }
 0x69f   : > { %v8493_v34 = vadd.f32 %v13418_v51, %v8473_v35 }
 0x6a0   : > { %v8875_v22 = vmul.f32 %v13428_v33, %v8835_v43  ;;  %8402 = vmatmul.bf16.gmra.mxu1 %v9444_v12  ;;  %v8841_v43 = vpop.f32.mrf.mxu2 }
 0x6a1   : > { %v8541_v60 = vadd.f32 %v9762_v14, %v8493_v34 }
 0x6a2   : > { %v8895_v42 = vadd.f32 %v13438_v7, %v8875_v22  ;;  %v6757_v21 = vpop.permute.xlu2 %6756  ;;  %v8385_v3 = vpop.f32.mrf.mxu1 }
 0x6a3   : > { %v6755_v19 = vpop.permute.xlu1 %6754  ;;  %6822 = vst.msk [vmem:[#allocation5 + $0xf0] sm:$0xf] %vm2518_vm2, %v6757_v21  ;;  %v9551_v6 = vld [vmem:[#allocation5 + $0xd0] sm:$0xf]  ;;  %v8557_v31 = vmax.f32 %v8541_v60, 0.0  ;;  %v8435_v11 = vadd.f32 %v8434_v23, %v8385_v3 }
 0x6a4   : > { %v8944_v40 = vadd.f32 %v9794_v9, %v8895_v42  ;;  %6821 = vst.msk [vmem:[#allocation5 + $0xe8] sm:$0xf] %vm2518_vm2, %v6755_v19  ;;  %v9552_v39 = vor.u32 %v9741_v15, %v9551_v6  ;;  %v9767_v19 = vunpack.c.h.bf16 %v9821_v2 }
 0x6a5   : > { %7157 = vst.msk [vmem:[#allocation5 + $0xe8] sm:$0xf] %vm2855_vm4, %v7091_v18  ;;  %v7059_v25 = vpop.permute.xlu0 %7058  ;;  %v8787_v56 = vpop.f32.mrf.mxu0  ;;  %v8474_v1 = vmul.f32 %v13413_v48, %v8435_v11 }
 0x6a6   : > { %8573 = vst.msk [vmem:[%s13448_s23 + $0x10] sm:$0xff] %vm4129_vm6, %v8557_v31  ;;  %v8960_v62 = vmax.f32 %v8944_v40, 0.0  ;;  %8804 = vmatmul.bf16.gmra.mxu0 %v9552_v39  ;;  %v8837_v37 = vadd.f32 %v8836_v58, %v8787_v56  ;;  %v8439_v36 = vpop.f32.mrf.mxu3  ;;  %v9799_v31 = vunpack.c.h.bf16 %v9829_v13 }
 0x6a7   : > { %7141 = vst.msk [vmem:[#allocation5 + $0x68] sm:$0xf] %vm2855_vm4, %v7059_v25  ;;  %v8494_v8 = vadd.f32 %v13418_v51, %v8474_v1 }
 0x6a8   : > { %9635 = vst.msk [vmem:[%s13448_s23 + $0x90] sm:$0xff] %vm4129_vm6, %v8960_v62  ;;  %v8876_v53 = vmul.f32 %v13428_v33, %v8837_v37 }
 0x6a9   : > { %v8542_v46 = vadd.f32 %v9763_v0, %v8494_v8 }
 0x6aa   : > { %v8896_v47 = vadd.f32 %v13438_v7, %v8876_v53  ;;  %v7063_v30 = vpop.permute.xlu2 %7062  ;;  %v7958_v53 = vld [vmem:[#allocation4 + $0xcc] sm:$0xe] }
 0x6ab   : > { %v7089_v16 = vpop.permute.xlu1 %7088  ;;  %7143 = vst.msk [vmem:[#allocation5 + $0x78] sm:$0xf] %vm2855_vm4, %v7063_v30  ;;  %v8558_v29 = vmax.f32 %v8542_v46, 0.0  ;;  %v7960_v46 = vld [vmem:[#allocation4 + $0xd4] sm:$0x1] }
 0x6ac   : > { %v8945_v24 = vadd.f32 %v9795_v27, %v8896_v47  ;;  %7156 = vst.msk [vmem:[#allocation5 + $0xe0] sm:$0xf] %vm2855_vm4, %v7089_v16  ;;  %v7959_v27 = vld [vmem:[#allocation4 + $0xd0] sm:$0xf]  ;;  %v9400_v47 = vrot.slane %v7958_v53, 9 }
 0x6ad   : > { %7349 = vst.msk [vmem:[#allocation5 + $0xe0] sm:$0xf] %vm3049_vm5, %v13467_v20  ;;  %v7250_v41 = vpop.permute.xlu0 %7249  ;;  %v8116_v30 = vrot.slane %v7959_v27, 5 }
 0x6ae   : > { %8574 = vst.msk [vmem:[%s13448_s23 + $0x18] sm:$0xff] %vm4129_vm6, %v8558_v29  ;;  %v8961_v57 = vmax.f32 %v8945_v24, 0.0  ;;  %v8119_v29 = vrot.slane %v7960_v46, 5 }
 0x6af   : > { %7333 = vst.msk [vmem:[#allocation5 + $0x60] sm:$0xf] %vm3049_vm5, %v7250_v41  ;;  %v8117_v24 = vsel %vm10873_vm13, %v9400_v47, %v8116_v30  ;;  %v8118_v41 = vrot.slane %v8116_v30, 4  ;;  %v9823_v47 = vld [vmem:[%s10146_s16 + $0x20] sm:$0xff]  }
 0x6b0   : > { %9636 = vst.msk [vmem:[%s13448_s23 + $0x98] sm:$0xff] %vm4129_vm6, %v8961_v57 }
 0x6b1   : > { %8183 = vst.msk [vmem:[#allocation5 + $0xf4] sm:$0xf] %vm300_vm0, %v8117_v24 }
 0x6b2   : > { %v7254_v6 = vpop.permute.xlu2 %7253 }
 0x6b3   : > { %v7252_v50 = vpop.permute.xlu1 %7251 }
 0x6b4   : > { %7334 = vst.msk [vmem:[#allocation5 + $0x68] sm:$0xf] %vm3049_vm5, %v7252_v50  ;;  %v8120_v50 = vsel %vm10873_vm13, %v8118_v41, %v8119_v29  ;;  %v9831_v29 = vld [vmem:[%s10146_s16 + $0x60] sm:$0xff]   ;;  %v9774_v41 = vunpack.c.l.bf16 %v9823_v47 }
 0x6b5   : > { %7894 = vst.msk [vmem:[#allocation5 + $0x68] sm:$0xf] %vm3610_vm9, %v13473_v28  ;;  %v7284_v18 = vpop.permute.xlu0 %7283 }
 0x6b6   : > { %7350 = vst.msk [vmem:[#allocation5 + $0xe8] sm:$0xf] %vm3049_vm5, %v7284_v18 }
 0x6b7   : > { %8184 = vst.msk [vmem:[#allocation5 + $0xfc] sm:$0xf] %vm300_vm0, %v8120_v50 }
 0x6ba   : > { %v8388_v55 = vpop.f32.mrf.mxu1  ;;  %v7288_v16 = vpop.permute.xlu2 %7287 }
 0x6bb   : > { %v7810_v26 = vpop.permute.xlu1 %7809  ;;  %v8438_v20 = vadd.f32 %v8437_v59, %v8388_v55  ;;  %v8442_v59 = vpop.f32.mrf.mxu3 }
 0x6bc   : > { %7893 = vst.msk [vmem:[#allocation5 + $0x60] sm:$0xf] %vm3610_vm9, %v7810_v26  ;;  %v9718_v14 = vld [vmem:[#allocation5 + $0x64] sm:$0xf0] }
 0x6bd   : > { %v7842_v17 = vpop.permute.xlu0 %7841  ;;  %v8790_v61 = vpop.f32.mrf.mxu0  ;;  %v8475_v4 = vmul.f32 %v13413_v48, %v8438_v20  ;;  %v9822_v20 = vld [vmem:[%s10146_s16 + $0x18] sm:$0xff]  }
 0x6be   : > { %7909 = vst.msk [vmem:[#allocation5 + $0xe0] sm:$0xf] %vm3610_vm9, %v7842_v17  ;;  %v8840_v28 = vadd.f32 %v8839_v49, %v8790_v61  ;;  %v8844_v49 = vpop.f32.mrf.mxu2  ;;  %v9744_v61 = vld [vmem:[#allocation5 + $0xf4] sm:$0xf] }
 0x6bf   : > { %v8495_v5 = vadd.f32 %v13418_v51, %v8475_v4  ;;  %v9830_v4 = vld [vmem:[%s10146_s16 + $0x58] sm:$0xff]  }
 0x6c0   : > { %v8877_v32 = vmul.f32 %v13428_v33, %v8840_v28  ;;  %v9770_v28 = vunpack.c.l.bf16 %v9822_v20 }
 0x6c1   : > { %v8543_v44 = vadd.f32 %v9766_v63, %v8495_v5 }
 0x6c2   : > { %v8897_v54 = vadd.f32 %v13438_v7, %v8877_v32  ;;  %v8390_v10 = vpop.f32.mrf.mxu1  ;;  %v7846_v26 = vpop.permute.xlu2 %7845  ;;  %v9569_v32 = vld [vmem:[#allocation5 + $0xf8] sm:$0xf0] }
 0x6c3   : > { %v7844_v52 = vpop.permute.xlu1 %7843  ;;  %v9451_v35 = vld [vmem:[#allocation5 + $0x60] sm:$0xf]  ;;  %v8559_v12 = vmax.f32 %v8543_v44, 0.0  ;;  %v8440_v22 = vadd.f32 %v8439_v36, %v8390_v10 }
 0x6c4   : > { %v8946_v34 = vadd.f32 %v9798_v38, %v8897_v54  ;;  %7910 = vst.msk [vmem:[#allocation5 + $0xe8] sm:$0xf] %vm3610_vm9, %v7844_v52  ;;  %v9452_v9 = vor.u32 %v9718_v14, %v9451_v35  ;;  %v9572_v38 = vor.u32 %v9744_v61, %v9569_v32  ;;  %v9802_v54 = vunpack.c.l.bf16 %v9830_v4  ;;  %v8444_v52 = vpop.f32.mrf.mxu3 }
 0x6c5   : > { %v6759_v23 = vpop.permute.xlu0 %6758  ;;  %v8792_v60 = vpop.f32.mrf.mxu0  ;;  %8575 = vst.msk [vmem:[%s13448_s23 + $0x20] sm:$0xff] %vm4129_vm6, %v8559_v12  ;;  %v8476_v21 = vmul.f32 %v13413_v48, %v8440_v22  ;;  %v9559_v25 = vld [vmem:[#allocation5 + $0xe0] sm:$0xf] }
 0x6c6   : > { %v8962_v42 = vmax.f32 %v8946_v34, 0.0  ;;  %8407 = vmatmul.bf16.gmra.mxu1 %v9452_v9  ;;  %v8842_v3 = vadd.f32 %v8841_v43, %v8792_v60  ;;  %6823 = vst.msk [vmem:[#allocation5 + $0xf8] sm:$0xf] %vm2518_vm2, %v6759_v23  ;;  %9616 = vmatmul.msk.bf16.gmra.mxu2 %vm4129_vm6, %v9572_v38  ;;  %v8846_v12 = vpop.f32.mrf.mxu2 }
 0x6c7   : > { %v8496_v15 = vadd.f32 %v13418_v51, %v8476_v21 }
 0x6c8   : > { %9637 = vst.msk [vmem:[%s13448_s23 + $0xa0] sm:$0xff] %vm4129_vm6, %v8962_v42  ;;  %v8878_v58 = vmul.f32 %v13428_v33, %v8842_v3 }
 0x6c9   : > { %v8544_v40 = vadd.f32 %v9767_v19, %v8496_v15  ;;  %v9771_v19 = vunpack.c.h.bf16 %v9822_v20 }
 0x6ca   : > { %v8898_v11 = vadd.f32 %v13438_v7, %v8878_v58  ;;  %v9803_v58 = vunpack.c.h.bf16 %v9830_v4 }
 0x6cb   : > { %v7061_v39 = vpop.permute.xlu1 %7060  ;;  %v9743_v56 = vld [vmem:[#allocation5 + $0xe4] sm:$0xf0]  ;;  %v8560_v62 = vmax.f32 %v8544_v40, 0.0 }
 0x6cc   : > { %v8947_v1 = vadd.f32 %v9799_v31, %v8898_v11  ;;  %7142 = vst.msk [vmem:[#allocation5 + $0x70] sm:$0xf] %vm2855_vm4, %v7061_v39  ;;  %v9560_v0 = vor.u32 %v9743_v56, %v9559_v25  ;;  %v8447_v53 = vpop.f32.mrf.mxu3 }
 0x6cd   : > { %7335 = vst.msk [vmem:[#allocation5 + $0x70] sm:$0xf] %vm3049_vm5, %v7254_v6  ;;  %v7093_v37 = vpop.permute.xlu0 %7092 }
 0x6ce   : > { %8576 = vst.msk [vmem:[%s13448_s23 + $0x28] sm:$0xff] %vm4129_vm6, %v8560_v62  ;;  %v8963_v8 = vmax.f32 %v8947_v1, 0.0  ;;  %8809 = vmatmul.bf16.gmra.mxu0 %v9560_v0  ;;  %v8849_v27 = vpop.f32.mrf.mxu2 }
 0x6cf   : > { %7158 = vst.msk [vmem:[#allocation5 + $0xf0] sm:$0xf] %vm2855_vm4, %v7093_v37 }
 0x6d0   : > { %9638 = vst.msk [vmem:[%s13448_s23 + $0xa8] sm:$0xff] %vm4129_vm6, %v8963_v8 }
 0x6d3   : > { %v7095_v57 = vpop.permute.xlu1 %7094 }
 0x6d4   : > { %7159 = vst.msk [vmem:[#allocation5 + $0xf8] sm:$0xf] %vm2855_vm4, %v7095_v57 }
 0x6d5   : > { %v7256_v18 = vpop.permute.xlu0 %7255  ;;  %7352 = vst.msk [vmem:[#allocation5 + $0xf8] sm:$0xf] %vm3049_vm5, %v7288_v16 }
 0x6d6   : > { %7336 = vst.msk [vmem:[#allocation5 + $0x78] sm:$0xf] %vm3049_vm5, %v7256_v18 }
 0x6da   : > { %v8393_v2 = vpop.f32.mrf.mxu1 }
 0x6db   : > { %v7286_v55 = vpop.permute.xlu1 %7285  ;;  %v8443_v17 = vadd.f32 %v8442_v59, %v8393_v2  ;;  %v9806_v59 = vunpack.c.l.bf16 %v9831_v29 }
 0x6dc   : > { %7351 = vst.msk [vmem:[#allocation5 + $0xf0] sm:$0xf] %vm3049_vm5, %v7286_v55  ;;  %v8449_v55 = vpop.f32.mrf.mxu3 }
 0x6dd   : > { %v7814_v45 = vpop.permute.xlu0 %7813  ;;  %v8795_v13 = vpop.f32.mrf.mxu0  ;;  %7911 = vst.msk [vmem:[#allocation5 + $0xf0] sm:$0xf] %vm3610_vm9, %v7846_v26  ;;  %v8477_v63 = vmul.f32 %v13413_v48, %v8443_v17 }
 0x6de   : > { %7895 = vst.msk [vmem:[#allocation5 + $0x70] sm:$0xf] %vm3610_vm9, %v7814_v45  ;;  %v8845_v5 = vadd.f32 %v8844_v49, %v8795_v13  ;;  %v8851_v45 = vpop.f32.mrf.mxu2 }
 0x6df   : > { %v8497_v36 = vadd.f32 %v13418_v51, %v8477_v63 }
 0x6e0   : > { %v8879_v44 = vmul.f32 %v13428_v33, %v8845_v5 }
 0x6e1   : > { %v8545_v10 = vadd.f32 %v9770_v28, %v8497_v36  ;;  %v9775_v28 = vunpack.c.h.bf16 %v9823_v47  ;;  %v9807_v36 = vunpack.c.h.bf16 %v9831_v29 }
 0x6e2   : > { %v8899_v35 = vadd.f32 %v13438_v7, %v8879_v44  ;;  %v8395_v43 = vpop.f32.mrf.mxu1 }
 0x6e3   : > { %v7816_v14 = vpop.permute.xlu1 %7815  ;;  %v8561_v34 = vmax.f32 %v8545_v10, 0.0  ;;  %v8445_v9 = vadd.f32 %v8444_v52, %v8395_v43 }
 0x6e4   : > { %v8948_v22 = vadd.f32 %v9802_v54, %v8899_v35  ;;  %7896 = vst.msk [vmem:[#allocation5 + $0x78] sm:$0xf] %vm3610_vm9, %v7816_v14  ;;  %v9567_v1 = vld [vmem:[#allocation5 + $0xf0] sm:$0xf]  ;;  %v8452_v14 = vpop.f32.mrf.mxu3 }
 0x6e5   : > { %v7848_v23 = vpop.permute.xlu0 %7847  ;;  %v8797_v60 = vpop.f32.mrf.mxu0  ;;  %8577 = vst.msk [vmem:[%s13448_s23 + $0x30] sm:$0xff] %vm4129_vm6, %v8561_v34  ;;  %v8478_v21 = vmul.f32 %v13413_v48, %v8445_v9  ;;  %v9459_v11 = vld [vmem:[#allocation5 + $0x70] sm:$0xf] }
 0x6e6   : > { %v8964_v42 = vmax.f32 %v8948_v22, 0.0  ;;  %v8847_v3 = vadd.f32 %v8846_v12, %v8797_v60  ;;  %7912 = vst.msk [vmem:[#allocation5 + $0xf8] sm:$0xf] %vm3610_vm9, %v7848_v23  ;;  %v9824_v12 = vld [vmem:[%s10146_s16 + $0x28] sm:$0xff]   ;;  %v8854_v23 = vpop.f32.mrf.mxu2 }
 0x6e7   : > { %v8498_v6 = vadd.f32 %v13418_v51, %v8478_v21  ;;  %v9778_v9 = vunpack.c.l.bf16 %v9824_v12  ;;  %v9832_v21 = vld [vmem:[%s10146_s16 + $0x68] sm:$0xff]  }
 0x6e8   : > { %9639 = vst.msk [vmem:[%s13448_s23 + $0xb0] sm:$0xff] %vm4129_vm6, %v8964_v42  ;;  %v8880_v15 = vmul.f32 %v13428_v33, %v8847_v3 }
 0x6e9   : > { %v8546_v31 = vadd.f32 %v9771_v19, %v8498_v6 }
 0x6ea   : > { %v8900_v40 = vadd.f32 %v13438_v7, %v8880_v15 }
 0x6eb   : > { %v9720_v39 = vld [vmem:[#allocation5 + $0x74] sm:$0xf0]  ;;  %v8562_v25 = vmax.f32 %v8546_v31, 0.0 }
 0x6ec   : > { %v8949_v56 = vadd.f32 %v9803_v58, %v8900_v40  ;;  %v9460_v62 = vor.u32 %v9720_v39, %v9459_v11  ;;  %v8454_v6 = vpop.f32.mrf.mxu3  ;;  %v9810_v40 = vunpack.c.l.bf16 %v9832_v21 }
 0x6ed   : > { %8578 = vst.msk [vmem:[%s13448_s23 + $0x38] sm:$0xff] %vm4129_vm6, %v8562_v25  ;;  %v9745_v37 = vld [vmem:[#allocation5 + $0xf4] sm:$0xf0] }
 0x6ee   : > { %v8965_v0 = vmax.f32 %v8949_v56, 0.0  ;;  %8412 = vmatmul.bf16.gmra.mxu1 %v9460_v62  ;;  %v9568_v8 = vor.u32 %v9745_v37, %v9567_v1  ;;  %v9779_v56 = vunpack.c.h.bf16 %v9824_v12 }
 0x6f0   : > { %9640 = vst.msk [vmem:[%s13448_s23 + $0xb8] sm:$0xff] %vm4129_vm6, %v8965_v0  ;;  %8814 = vmatmul.bf16.gmra.mxu0 %v9568_v8  ;;  %v8856_v0 = vpop.f32.mrf.mxu2 }
 0x6fb   : > { %v8398_v46 = vpop.f32.mrf.mxu1 }
 0x6fc   : > { %v8448_v30 = vadd.f32 %v8447_v53, %v8398_v46 }
 0x6fd   : > { %v8800_v16 = vpop.f32.mrf.mxu0 }
 0x6fe   : > { %v8479_v24 = vmul.f32 %v13413_v48, %v8448_v30  ;;  %v8850_v57 = vadd.f32 %v8849_v27, %v8800_v16  ;;  %v9811_v30 = vunpack.c.h.bf16 %v9832_v21 }
 0x700   : > { %v8499_v50 = vadd.f32 %v13418_v51, %v8479_v24  ;;  %v8881_v18 = vmul.f32 %v13428_v33, %v8850_v57 }
 0x702   : > { %v8547_v49 = vadd.f32 %v9774_v41, %v8499_v50  ;;  %v8901_v26 = vadd.f32 %v13438_v7, %v8881_v18  ;;  %v8457_v41 = vpop.f32.mrf.mxu3  ;;  %v9825_v50 = vld [vmem:[%s10146_s16 + $0x30] sm:$0xff]  }
 0x703   : > { %v8400_v2 = vpop.f32.mrf.mxu1 }
 0x704   : > { %v8563_v20 = vmax.f32 %v8547_v49, 0.0  ;;  %v8950_v17 = vadd.f32 %v9806_v59, %v8901_v26  ;;  %v8450_v61 = vadd.f32 %v8449_v55, %v8400_v2  ;;  %v9782_v49 = vunpack.c.l.bf16 %v9825_v50  ;;  %v8859_v55 = vpop.f32.mrf.mxu2 }
 0x705   : > { %v8802_v13 = vpop.f32.mrf.mxu0 }
 0x706   : > { %8579 = vst.msk [vmem:[%s13448_s23 + $0x40] sm:$0xff] %vm4129_vm6, %v8563_v20  ;;  %v8966_v4 = vmax.f32 %v8950_v17, 0.0  ;;  %v8480_v63 = vmul.f32 %v13413_v48, %v8450_v61  ;;  %v8852_v5 = vadd.f32 %v8851_v45, %v8802_v13  ;;  %v9833_v45 = vld [vmem:[%s10146_s16 + $0x70] sm:$0xff]  }
 0x708   : > { %9641 = vst.msk [vmem:[%s13448_s23 + $0xc0] sm:$0xff] %vm4129_vm6, %v8966_v4  ;;  %v8500_v32 = vadd.f32 %v13418_v51, %v8480_v63  ;;  %v8882_v38 = vmul.f32 %v13428_v33, %v8852_v5  ;;  %v9783_v5 = vunpack.c.h.bf16 %v9825_v50 }
 0x70a   : > { %v8548_v44 = vadd.f32 %v9775_v28, %v8500_v32  ;;  %v8902_v54 = vadd.f32 %v13438_v7, %v8882_v38  ;;  %v8459_v2 = vpop.f32.mrf.mxu3  ;;  %v9814_v38 = vunpack.c.l.bf16 %v9833_v45 }
 0x70c   : > { %v8564_v52 = vmax.f32 %v8548_v44, 0.0  ;;  %v8951_v10 = vadd.f32 %v9807_v36, %v8902_v54 }
 0x70e   : > { %8580 = vst.msk [vmem:[%s13448_s23 + $0x48] sm:$0xff] %vm4129_vm6, %v8564_v52  ;;  %v8967_v35 = vmax.f32 %v8951_v10, 0.0  ;;  %v8861_v10 = vpop.f32.mrf.mxu2 }
 0x710   : > { %9642 = vst.msk [vmem:[%s13448_s23 + $0xc8] sm:$0xff] %vm4129_vm6, %v8967_v35 }
 0x71d   : > { %v8403_v43 = vpop.f32.mrf.mxu1 }
 0x71e   : > { %v8453_v34 = vadd.f32 %v8452_v14, %v8403_v43 }
 0x720   : > { %v8481_v22 = vmul.f32 %v13413_v48, %v8453_v34 }
 0x722   : > { %v8501_v60 = vadd.f32 %v13418_v51, %v8481_v22  ;;  %v9815_v22 = vunpack.c.h.bf16 %v9833_v45 }
 0x723   : > { %v8805_v42 = vpop.f32.mrf.mxu0 }
 0x724   : > { %v8549_v19 = vadd.f32 %v9778_v9, %v8501_v60  ;;  %v8855_v3 = vadd.f32 %v8854_v23, %v8805_v42  ;;  %v8462_v42 = vpop.f32.mrf.mxu3 }
 0x725   : > { %v8405_v15 = vpop.f32.mrf.mxu1 }
 0x726   : > { %v8565_v58 = vmax.f32 %v8549_v19, 0.0  ;;  %v8883_v31 = vmul.f32 %v13428_v33, %v8855_v3  ;;  %v8455_v11 = vadd.f32 %v8454_v6, %v8405_v15  ;;  %v9826_v19 = vld [vmem:[%s10146_s16 + $0x38] sm:$0xff]  }
 0x728   : > { %8581 = vst.msk [vmem:[%s13448_s23 + $0x50] sm:$0xff] %vm4129_vm6, %v8565_v58  ;;  %v8903_v39 = vadd.f32 %v13438_v7, %v8883_v31  ;;  %v8482_v25 = vmul.f32 %v13413_v48, %v8455_v11  ;;  %v9786_v58 = vunpack.c.l.bf16 %v9826_v19 }
 0x72a   : > { %v8952_v62 = vadd.f32 %v9810_v40, %v8903_v39  ;;  %v8502_v1 = vadd.f32 %v13418_v51, %v8482_v25  ;;  %v9834_v40 = vld [vmem:[%s10146_s16 + $0x78] sm:$0xff]  }
 0x72b   : > { %v8807_v37 = vpop.f32.mrf.mxu0  ;;  %v9819_v50 = vunpack.c.h.bf16 %v9834_v40 }
 0x72c   : > { %v8968_v8 = vmax.f32 %v8952_v62, 0.0  ;;  %v8550_v53 = vadd.f32 %v9779_v56, %v8502_v1  ;;  %v8857_v27 = vadd.f32 %v8856_v0, %v8807_v37  ;;  %v9818_v56 = vunpack.c.l.bf16 %v9834_v40  ;;  %v8464_v1 = vpop.f32.mrf.mxu3 }
 0x72e   : > { %9643 = vst.msk [vmem:[%s13448_s23 + $0xd0] sm:$0xff] %vm4129_vm6, %v8968_v8  ;;  %v8566_v46 = vmax.f32 %v8550_v53, 0.0  ;;  %v8884_v47 = vmul.f32 %v13428_v33, %v8857_v27 }
 0x730   : > { %8582 = vst.msk [vmem:[%s13448_s23 + $0x58] sm:$0xff] %vm4129_vm6, %v8566_v46  ;;  %v8904_v16 = vadd.f32 %v13438_v7, %v8884_v47 }
 0x732   : > { %v8953_v29 = vadd.f32 %v9811_v30, %v8904_v16  ;;  %v9787_v30 = vunpack.c.h.bf16 %v9826_v19 }
 0x734   : > { %v8969_v24 = vmax.f32 %v8953_v29, 0.0 }
 0x736   : > { %9644 = vst.msk [vmem:[%s13448_s23 + $0xd8] sm:$0xff] %vm4129_vm6, %v8969_v24 }
 0x743   : > { %v8408_v57 = vpop.f32.mrf.mxu1 }
 0x744   : > { %v8458_v18 = vadd.f32 %v8457_v41, %v8408_v57 }
 0x746   : > { %v8483_v59 = vmul.f32 %v13413_v48, %v8458_v18 }
 0x748   : > { %v8503_v26 = vadd.f32 %v13418_v51, %v8483_v59 }
 0x749   : > { %v8864_v3 = vpop.f32.mrf.mxu2 }
 0x74a   : > { %v8551_v20 = vadd.f32 %v9782_v49, %v8503_v26 }
 0x74b   : > { %v8410_v17 = vpop.f32.mrf.mxu1  ;;  %v8810_v61 = vpop.f32.mrf.mxu0 }
 0x74c   : > { %v8567_v13 = vmax.f32 %v8551_v20, 0.0  ;;  %v8460_v4 = vadd.f32 %v8459_v2, %v8410_v17  ;;  %v8860_v63 = vadd.f32 %v8859_v55, %v8810_v61 }
 0x74e   : > { %8583 = vst.msk [vmem:[%s13448_s23 + $0x60] sm:$0xff] %vm4129_vm6, %v8567_v13  ;;  %v8484_v28 = vmul.f32 %v13413_v48, %v8460_v4  ;;  %v8885_v32 = vmul.f32 %v13428_v33, %v8860_v63 }
 0x750   : > { %v8504_v36 = vadd.f32 %v13418_v51, %v8484_v28  ;;  %v8905_v44 = vadd.f32 %v13438_v7, %v8885_v32 }
 0x751   : > { %v8866_v46 = vpop.f32.mrf.mxu2 }
 0x752   : > { %v8552_v54 = vadd.f32 %v9783_v5, %v8504_v36  ;;  %v8954_v52 = vadd.f32 %v9814_v38, %v8905_v44 }
 0x753   : > { %v8812_v35 = vpop.f32.mrf.mxu0 }
 0x754   : > { %v8568_v14 = vmax.f32 %v8552_v54, 0.0  ;;  %v8970_v43 = vmax.f32 %v8954_v52, 0.0  ;;  %v8862_v12 = vadd.f32 %v8861_v10, %v8812_v35 }
 0x756   : > { %8584 = vst.msk [vmem:[%s13448_s23 + $0x68] sm:$0xff] %vm4129_vm6, %v8568_v14  ;;  %v8886_v34 = vmul.f32 %v13428_v33, %v8862_v12 }
 0x757   : > { %9645 = vst.msk [vmem:[%s13448_s23 + $0xe0] sm:$0xff] %vm4129_vm6, %v8970_v43 }
 0x758   : > { %v8906_v9 = vadd.f32 %v13438_v7, %v8886_v34 }
 0x75a   : > { %v8955_v23 = vadd.f32 %v9815_v22, %v8906_v9 }
 0x75c   : > { %v8971_v60 = vmax.f32 %v8955_v23, 0.0 }
 0x75e   : > { %9646 = vst.msk [vmem:[%s13448_s23 + $0xe8] sm:$0xff] %vm4129_vm6, %v8971_v60 }
 0x76b   : > { %v8413_v21 = vpop.f32.mrf.mxu1 }
 0x76c   : > { %v8463_v6 = vadd.f32 %v8462_v42, %v8413_v21 }
 0x76d   : > { %v8815_v31 = vpop.f32.mrf.mxu0 }
 0x76e   : > { %v8485_v15 = vmul.f32 %v13413_v48, %v8463_v6  ;;  %v8865_v11 = vadd.f32 %v8864_v3, %v8815_v31 }
 0x770   : > { %v8505_v39 = vadd.f32 %v13418_v51, %v8485_v15  ;;  %v8887_v25 = vmul.f32 %v13428_v33, %v8865_v11 }
 0x772   : > { %v8553_v62 = vadd.f32 %v9786_v58, %v8505_v39  ;;  %v8907_v0 = vadd.f32 %v13438_v7, %v8887_v25 }
 0x773   : > { %v8415_v37 = vpop.f32.mrf.mxu1 }
 0x774   : > { %v8569_v8 = vmax.f32 %v8553_v62, 0.0  ;;  %v8465_v53 = vadd.f32 %v8464_v1, %v8415_v37  ;;  %v8956_v27 = vadd.f32 %v9818_v56, %v8907_v0 }
 0x775   : > { %v8817_v16 = vpop.f32.mrf.mxu0 }
 0x776   : > { %8585 = vst.msk [vmem:[%s13448_s23 + $0x70] sm:$0xff] %vm4129_vm6, %v8569_v8  ;;  %v8486_v47 = vmul.f32 %v13413_v48, %v8465_v53  ;;  %v8972_v29 = vmax.f32 %v8956_v27, 0.0  ;;  %v8867_v24 = vadd.f32 %v8866_v46, %v8817_v16 }
 0x778   : > { %v8506_v41 = vadd.f32 %v13418_v51, %v8486_v47  ;;  %9647 = vst.msk [vmem:[%s13448_s23 + $0xf0] sm:$0xff] %vm4129_vm6, %v8972_v29  ;;  %v8888_v57 = vmul.f32 %v13428_v33, %v8867_v24 }
 0x77a   : > { %v8554_v18 = vadd.f32 %v9787_v30, %v8506_v41  ;;  %v8908_v48 = vadd.f32 %v13438_v7, %v8888_v57 }
 0x77c   : > { %v8570_v59 = vmax.f32 %v8554_v18, 0.0  ;;  %v8957_v49 = vadd.f32 %v9819_v50, %v8908_v48 }
 0x77e   : > { %8586 = vst.msk [vmem:[%s13448_s23 + $0x78] sm:$0xff] %vm4129_vm6, %v8570_v59  ;;  %v8973_v51 = vmax.f32 %v8957_v49, 0.0 }
 0x780   : > { %9648 = vst.msk [vmem:[%s13448_s23 + $0xf8] sm:$0xff] %vm4129_vm6, %v8973_v51 }
 0x781   : > { %9963 = shalt.err (!%p9960_p4)
}
 0x782   : > { %s10014_s22 = smov 128   ;;  %s10015_s23 = smov 8  }
 0x783   : > { %9837 = dma.vmem_to_hbm [thread:$0]  (%p10106_p11), %s9005_s28, 4096, %s9007_s29, %s8992_s8, %s10014_s22, %s10014_s22, %s10015_s23  }
 0x784 PF: > { %s9021_s20 = sand.u32 1, %s9990_s24   ;;  %p13696_p7 = scmp.ge.s32.totalorder %s10002_s27, 2 }
 0x785   : > { %s9022_s16 = scalar_lea.sflag [#allocation8], %s9021_s20 }
 0x786   : > { %p9844_p5 = pnand %p13696_p7, %p10110_p12 }
 0x788   : > { %p9845_p8 = pneg %p9844_p5 }
 0x78a   : > { %9985 = dma.done.wait (%p9845_p8), %s9022_s16, 4096  }
 0x78b   : > { %9987 = vsyncadd (%p9845_p8), %s9022_s16, 4294963200  ;;  %s13697_s10 = sld [smem:[#allocation12_spill]]  ;;  %p20_p10 = scmp.ge.s32.totalorder %s10081_s30, 4  }
 0x78c   : > { %s13698_s24 = smov %s9994_s25  ;;  %s13699_s25 = smov %s9998_s26 }
 0x78d   : > { %s13701_s27 = smov %s10081_s30  ;;  %22 = sbr.rel (!%p20_p10) target bundleno = 5 (0x5), region = 100 }
 0x791   : > { %s13700_s26 = smov %s13697_s10 }
 0x792   :  { %9028 = vsyncpa [#allocation7], 1 }
 0x793   :  { %9030 = vsyncpa [#allocation7 + $0x1], 1 }
 0x794   :  { %9031 = vsyncpa [#allocation8], 1 }
 0x795   :  { %9033 = vsyncpa [#allocation8 + $0x1], 1 }

</bundles_post_ra>
